<compile_context>
chip_gen: v5e
topology: v5e:2x2
jax: 0.10.0
libtpu: 0.0.40
codegen_flags: <defaults>
</compile_context>

<pallas_src>
import numpy as np

import jax
import jax.numpy as jnp
from jax import lax
from jax.experimental import pallas as pl
from jax.experimental.pallas import tpu as pltpu


def _round_up(x, m):
    return ((x + m - 1) // m) * m


# ----------------------------------------------------------------------------
# Fused LeNet forward kernel: one grid step processes a block of BB images.
#
# Inputs (host-prepared layouts, all MXU weights in bf16):
#   x    : (30, BB, 30)  zero-padded input rows, batch on sublanes, width on lanes
#   w1t  : (3, 30, 256)  conv1 block-Toeplitz weight per kh; cols [0:84] = even
#                        output columns (lane wp*6+c), cols [128:212] = odd
#   b1   : (1, 128) f32  conv1 bias tiled over wp (lanes 84..127 zero)
#   w2t  : (640, 256)    conv2 block-Toeplitz weight; row kh*128 + (jw*6+ci)
#                        matches the a1 lane layout; cols [0:80] even w2
#                        (lane wp2*16+co), cols [128:208] odd w2
#   b2   : (1, 128) f32  conv2 bias tiled over wp2 (lanes 80..127 zero)
#   w345 : (5, 128, 10)  folded fc3·fc4·fc5 weight per pooled conv2 row
#   bf   : (1, 10)  f32  folded fc bias
# Scratch:
#   a1   : (BB, 14*128) bf16   pooled conv1 activations, lane = hp*128 + wp*6 + c
# ----------------------------------------------------------------------------
def lenet_kernel(x_ref, w1_ref, b1_ref, w2_ref, b2_ref, w345_ref, bf_ref,
                 o_ref, a1_ref):
    f32 = jnp.float32
    bf16 = jnp.bfloat16
    BB = o_ref.shape[0]

    # --- stage 1: conv1 (3x3, padding folded) + 2x2 max pool -----------------
    b1v = b1_ref[...]                                        # (1, 128)

    def conv1_row_pooled(h):
        # conv row h; even/odd output columns live in lane halves [0:128]/[128:256]
        acc = jnp.dot(x_ref[h], w1_ref[0], preferred_element_type=f32)
        acc = acc + jnp.dot(x_ref[h + 1], w1_ref[1], preferred_element_type=f32)
        acc = acc + jnp.dot(x_ref[h + 2], w1_ref[2], preferred_element_type=f32)
        return jnp.maximum(acc[:, 0:128], acc[:, 128:256])   # W-direction pool

    for hp in range(14):
        pooled = jnp.maximum(conv1_row_pooled(2 * hp),
                             conv1_row_pooled(2 * hp + 1)) + b1v   # H pool + bias
        a1_ref[:, hp * 128:(hp + 1) * 128] = pooled.astype(bf16)

    # --- stage 2: conv2 (5x5) + 2x2 max pool + folded fc3·fc4·fc5 ------------
    b2v = b2_ref[...]                                        # (1, 128)
    o_ref[...] = jnp.zeros((BB, 10), f32) + bf_ref[...]      # folded fc bias

    def conv2_row_pooled(h2):
        # 5 consecutive a1 rows form one 128-aligned lane slice -> one big-K matmul
        lhs = a1_ref[:, h2 * 128:h2 * 128 + 640]             # (BB, 640) bf16
        z = jnp.dot(lhs, w2_ref[...], preferred_element_type=f32)   # (BB, 256)
        return jnp.maximum(z[:, 0:128], z[:, 128:256])       # W-direction pool

    for hp2 in range(5):
        p2 = jnp.maximum(conv2_row_pooled(2 * hp2),
                         conv2_row_pooled(2 * hp2 + 1)) + b2v       # (BB, 128)
        o_ref[...] += jnp.dot(p2.astype(bf16), w345_ref[hp2],
                              preferred_element_type=f32)


# ----------------------------------------------------------------------------
# One-time host-side parameter re-layout (kept out of the per-call path).
# ----------------------------------------------------------------------------
def prepare_params(params):
    w1, b1, w2, b2, w3, b3, w4, b4, w5, b5 = [
        np.asarray(p, np.float32) for p in params]

    # conv1 block-Toeplitz per kh: row = padded input column, even output col
    # w=2wp at lane wp*6+c, odd output col w=2wp+1 at lane 128 + wp*6+c.
    w1t = np.zeros((3, 30, 256), np.float32)
    for kh in range(3):
        for wp in range(14):
            for c in range(6):
                for kw in range(3):
                    w1t[kh, 2 * wp + kw, wp * 6 + c] = w1[c, 0, kh, kw]
                    w1t[kh, 2 * wp + 1 + kw, 128 + wp * 6 + c] = w1[c, 0, kh, kw]
    b1big = np.zeros((1, 128), np.float32)
    for wp in range(14):
        b1big[0, wp * 6:wp * 6 + 6] = b1

    # conv2 as ONE (640, 256) block-Toeplitz weight: row kh*128 + jw*6 + ci
    # (matching a1's lane layout); even output col w2=2wp2 at lane wp2*16+co,
    # odd output col w2=2wp2+1 at lane 128 + wp2*16+co.
    w2t = np.zeros((640, 256), np.float32)
    for kh in range(5):
        for jw in range(14):
            for ci in range(6):
                r = kh * 128 + jw * 6 + ci
                for wp2 in range(5):
                    kwe = jw - 2 * wp2
                    if 0 <= kwe <= 4:
                        w2t[r, wp2 * 16:wp2 * 16 + 16] = w2[:, ci, kh, kwe]
                    kwo = jw - 2 * wp2 - 1
                    if 0 <= kwo <= 4:
                        w2t[r, 128 + wp2 * 16:128 + wp2 * 16 + 16] = w2[:, ci, kh, kwo]
    b2big = np.zeros((1, 128), np.float32)
    for wp2 in range(5):
        b2big[0, wp2 * 16:wp2 * 16 + 16] = b2

    # Fold fc3·fc4·fc5 (the reference module has NO nonlinearities between them,
    # so this is mathematically exact): (400, 10) weight + (10,) bias, then
    # re-indexed per pooled conv2 row hp2 with rows matching the p2 lane layout.
    wfold = w3.T @ w4.T @ w5.T                               # (400, 10)
    bfold = (b3 @ w4.T @ w5.T + b4 @ w5.T + b5).reshape(1, 10)
    w345 = np.zeros((5, 128, 10), np.float32)
    for hp2 in range(5):
        for wp2 in range(5):
            for co in range(16):
                # PyTorch NCHW flatten index: co*25 + hp2*5 + wp2
                w345[hp2, wp2 * 16 + co, :] = wfold[co * 25 + hp2 * 5 + wp2, :]

    bf16 = jnp.bfloat16
    return (jnp.asarray(w1t, bf16), jnp.asarray(b1big),
            jnp.asarray(w2t, bf16), jnp.asarray(b2big),
            jnp.asarray(w345, bf16), jnp.asarray(bfold))


# ----------------------------------------------------------------------------
# Full forward pass: one fused pallas_call, grid over batch blocks.
# ----------------------------------------------------------------------------
def lenet_forward(x_nchw, prepared, block_batch=128):
    w1t, b1big, w2t, b2big, w345, bfold = prepared
    n = x_nchw.shape[0]
    # Batch block: up to 128 rows per MXU matmul (sweet spot per review);
    # small batches are rounded up to a multiple of 16 (bf16 sublane packing).
    bb = min(block_batch, _round_up(n, 16))
    npad = _round_up(n, bb)
    # NOTE: for best v7x utilization feed batches with npad//bb >= 2 (even).

    # Minimal host prep: zero-pad (batch + spatial halo), transpose so rows lead
    # (batch on sublanes, width on lanes), cast to bf16 (halves HBM traffic).
    xp = jnp.pad(x_nchw[:, 0].astype(jnp.float32),
                 ((0, npad - n), (1, 1), (1, 1)))            # (npad, 30, 30)
    xr = jnp.transpose(xp, (1, 0, 2)).astype(jnp.bfloat16)   # (30, npad, 30)

    def const_spec(shape):
        return pl.BlockSpec(shape, lambda i: (0,) * len(shape))

    out = pl.pallas_call(
        lenet_kernel,
        out_shape=jax.ShapeDtypeStruct((npad, 10), jnp.float32),
        grid=(npad // bb,),
        in_specs=[pl.BlockSpec((30, bb, 30), lambda i: (0, i, 0)),
                  const_spec((3, 30, 256)), const_spec((1, 128)),
                  const_spec((640, 256)), const_spec((1, 128)),
                  const_spec((5, 128, 10)), const_spec((1, 10))],
        out_specs=pl.BlockSpec((bb, 10), lambda i: (i, 0)),
        scratch_shapes=[pltpu.VMEM((bb, 14 * 128), jnp.bfloat16)],
        compiler_params=pltpu.CompilerParams(
            dimension_semantics=("parallel",),
            vmem_limit_bytes=32 * 1024 * 1024),
    )(xr, w1t, b1big, w2t, b2big, w345, bfold)
    return out[:n]


# Pure-JAX reference for verification (matches the PyTorch module).
def ref_forward(x, params):
    w1, b1, w2, b2, w3, b3, w4, b4, w5, b5 = params
    dn = ("NCHW", "OIHW", "NCHW")
    hp = lax.Precision.HIGHEST
    y = lax.conv_general_dilated(x, w1, (1, 1), ((1, 1), (1, 1)),
                                 dimension_numbers=dn, precision=hp)
    y = y + b1[None, :, None, None]
    y = lax.reduce_window(y, -jnp.inf, lax.max, (1, 1, 2, 2), (1, 1, 2, 2),
                          "VALID")
    y = lax.conv_general_dilated(y, w2, (1, 1), "VALID",
                                 dimension_numbers=dn, precision=hp)
    y = y + b2[None, :, None, None]
    y = lax.reduce_window(y, -jnp.inf, lax.max, (1, 1, 2, 2), (1, 1, 2, 2),
                          "VALID")
    f = y.reshape(y.shape[0], -1)
    f = jnp.dot(f, w3.T, precision=hp) + b3
    f = jnp.dot(f, w4.T, precision=hp) + b4
    f = jnp.dot(f, w5.T, precision=hp) + b5
    return f


if __name__ == "__main__":
    key = jax.random.PRNGKey(0)
    ks = jax.random.split(key, 11)

    N = 2
    x = jax.random.normal(ks[0], (N, 1, 28, 28), jnp.float32)

    def uinit(k, shape, fan_in):
        bound = 1.0 / (fan_in ** 0.5)
        return jax.random.uniform(k, shape, jnp.float32, -bound, bound)

    # Same shapes as the PyTorch module's parameters (deterministic init).
    w1 = uinit(ks[1], (6, 1, 3, 3), 9);      b1 = uinit(ks[2], (6,), 9)
    w2 = uinit(ks[3], (16, 6, 5, 5), 150);   b2 = uinit(ks[4], (16,), 150)
    w3 = uinit(ks[5], (120, 400), 400);      b3 = uinit(ks[6], (120,), 400)
    w4 = uinit(ks[7], (84, 120), 120);       b4 = uinit(ks[8], (84,), 120)
    w5 = uinit(ks[9], (10, 84), 84);         b5 = uinit(ks[10], (10,), 84)
    params = (w1, b1, w2, b2, w3, b3, w4, b4, w5, b5)

    prepared = prepare_params(params)        # one-time host-side re-layout
    fwd = jax.jit(lambda xb: lenet_forward(xb, prepared))
    out = jax.block_until_ready(fwd(x))
    assert out.shape == (N, 10), out.shape

    ref = jax.block_until_ready(ref_forward(x, params))
    err = float(jnp.max(jnp.abs(out - ref)))
    assert jnp.allclose(out, ref, atol=5e-2, rtol=5e-2), err

    print("KERNEL_OK")
</pallas_src>

<mosaic_0001>
module attributes {stable_mosaic.version = 11 : i64} {
  func.func @lenet_kernel(%arg0: i32, %arg1: memref<30x16x30xbf16, #tpu.memory_space<vmem>>, %arg2: memref<3x30x256xbf16, #tpu.memory_space<vmem>>, %arg3: memref<1x128xf32, #tpu.memory_space<vmem>>, %arg4: memref<640x256xbf16, #tpu.memory_space<vmem>>, %arg5: memref<1x128xf32, #tpu.memory_space<vmem>>, %arg6: memref<5x128x10xbf16, #tpu.memory_space<vmem>>, %arg7: memref<1x10xf32, #tpu.memory_space<vmem>>, %arg8: memref<16x10xf32, #tpu.memory_space<vmem>>, %arg9: memref<16x1792xbf16, #tpu.memory_space<vmem>>) attributes {dimension_semantics = [#tpu.dimension_semantics<parallel>], iteration_bounds = array<i64: 1>, scalar_prefetch = 0 : i64, scratch_operands = 1 : i64, tpu.core_type = #tpu.core_type<tc>, window_params = [{transform_indices = @transform_0, window_bounds = array<i64: 30, 16, 30>}, {pipeline_mode = #tpu.pipeline_mode<synchronous>, transform_indices = @transform_1, window_bounds = array<i64: 3, 30, 256>}, {pipeline_mode = #tpu.pipeline_mode<synchronous>, transform_indices = @transform_2, window_bounds = array<i64: 1, 128>}, {pipeline_mode = #tpu.pipeline_mode<synchronous>, transform_indices = @transform_3, window_bounds = array<i64: 640, 256>}, {pipeline_mode = #tpu.pipeline_mode<synchronous>, transform_indices = @transform_4, window_bounds = array<i64: 1, 128>}, {pipeline_mode = #tpu.pipeline_mode<synchronous>, transform_indices = @transform_5, window_bounds = array<i64: 5, 128, 10>}, {pipeline_mode = #tpu.pipeline_mode<synchronous>, transform_indices = @transform_6, window_bounds = array<i64: 1, 10>}, {transform_indices = @transform_7, window_bounds = array<i64: 16, 10>}]} {
    %c0 = arith.constant 0 : index
    %c0_0 = arith.constant 0 : index
    %0 = vector.load %arg3[%c0, %c0_0] : memref<1x128xf32, #tpu.memory_space<vmem>>, vector<1x128xf32>
    %c0_1 = arith.constant 0 : index
    %c0_2 = arith.constant 0 : index
    %c0_3 = arith.constant 0 : index
    %1 = vector.load %arg1[%c0_1, %c0_2, %c0_3] : memref<30x16x30xbf16, #tpu.memory_space<vmem>>, vector<1x16x30xbf16>
    %2 = vector.shape_cast %1 : vector<1x16x30xbf16> to vector<16x30xbf16>
    %c0_4 = arith.constant 0 : index
    %c0_5 = arith.constant 0 : index
    %c0_6 = arith.constant 0 : index
    %3 = vector.load %arg2[%c0_4, %c0_5, %c0_6] : memref<3x30x256xbf16, #tpu.memory_space<vmem>>, vector<1x30x256xbf16>
    %4 = vector.shape_cast %3 : vector<1x30x256xbf16> to vector<30x256xbf16>
    %cst = arith.constant dense<0.000000e+00> : vector<16x256xf32>
    %5 = tpu.matmul %2, %4, %cst {dimension_numbers = #tpu.dot_dimension_numbers<[1], [0], [0], [1], [0, 0, 1, 1], [], []>} : vector<16x30xbf16>, vector<30x256xbf16>, vector<16x256xf32> -> vector<16x256xf32>
    %c1 = arith.constant 1 : index
    %c0_7 = arith.constant 0 : index
    %c0_8 = arith.constant 0 : index
    %6 = vector.load %arg1[%c1, %c0_7, %c0_8] : memref<30x16x30xbf16, #tpu.memory_space<vmem>>, vector<1x16x30xbf16>
    %7 = vector.shape_cast %6 : vector<1x16x30xbf16> to vector<16x30xbf16>
    %c1_9 = arith.constant 1 : index
    %c0_10 = arith.constant 0 : index
    %c0_11 = arith.constant 0 : index
    %8 = vector.load %arg2[%c1_9, %c0_10, %c0_11] : memref<3x30x256xbf16, #tpu.memory_space<vmem>>, vector<1x30x256xbf16>
    %9 = vector.shape_cast %8 : vector<1x30x256xbf16> to vector<30x256xbf16>
    %cst_12 = arith.constant dense<0.000000e+00> : vector<16x256xf32>
    %10 = tpu.matmul %7, %9, %cst_12 {dimension_numbers = #tpu.dot_dimension_numbers<[1], [0], [0], [1], [0, 0, 1, 1], [], []>} : vector<16x30xbf16>, vector<30x256xbf16>, vector<16x256xf32> -> vector<16x256xf32>
    %11 = arith.addf %5, %10 : vector<16x256xf32>
    %c2 = arith.constant 2 : index
    %c0_13 = arith.constant 0 : index
    %c0_14 = arith.constant 0 : index
    %12 = vector.load %arg1[%c2, %c0_13, %c0_14] : memref<30x16x30xbf16, #tpu.memory_space<vmem>>, vector<1x16x30xbf16>
    %13 = vector.shape_cast %12 : vector<1x16x30xbf16> to vector<16x30xbf16>
    %c2_15 = arith.constant 2 : index
    %c0_16 = arith.constant 0 : index
    %c0_17 = arith.constant 0 : index
    %14 = vector.load %arg2[%c2_15, %c0_16, %c0_17] : memref<3x30x256xbf16, #tpu.memory_space<vmem>>, vector<1x30x256xbf16>
    %15 = vector.shape_cast %14 : vector<1x30x256xbf16> to vector<30x256xbf16>
    %cst_18 = arith.constant dense<0.000000e+00> : vector<16x256xf32>
    %16 = tpu.matmul %13, %15, %cst_18 {dimension_numbers = #tpu.dot_dimension_numbers<[1], [0], [0], [1], [0, 0, 1, 1], [], []>} : vector<16x30xbf16>, vector<30x256xbf16>, vector<16x256xf32> -> vector<16x256xf32>
    %17 = arith.addf %11, %16 : vector<16x256xf32>
    %18 = vector.extract_strided_slice %17 {offsets = [0, 0], sizes = [16, 128], strides = [1, 1]} : vector<16x256xf32> to vector<16x128xf32>
    %19 = vector.extract_strided_slice %17 {offsets = [0, 128], sizes = [16, 128], strides = [1, 1]} : vector<16x256xf32> to vector<16x128xf32>
    %20 = arith.maximumf %18, %19 : vector<16x128xf32>
    %c1_19 = arith.constant 1 : index
    %c0_20 = arith.constant 0 : index
    %c0_21 = arith.constant 0 : index
    %21 = vector.load %arg1[%c1_19, %c0_20, %c0_21] : memref<30x16x30xbf16, #tpu.memory_space<vmem>>, vector<1x16x30xbf16>
    %22 = vector.shape_cast %21 : vector<1x16x30xbf16> to vector<16x30xbf16>
    %c0_22 = arith.constant 0 : index
    %c0_23 = arith.constant 0 : index
    %c0_24 = arith.constant 0 : index
    %23 = vector.load %arg2[%c0_22, %c0_23, %c0_24] : memref<3x30x256xbf16, #tpu.memory_space<vmem>>, vector<1x30x256xbf16>
    %24 = vector.shape_cast %23 : vector<1x30x256xbf16> to vector<30x256xbf16>
    %cst_25 = arith.constant dense<0.000000e+00> : vector<16x256xf32>
    %25 = tpu.matmul %22, %24, %cst_25 {dimension_numbers = #tpu.dot_dimension_numbers<[1], [0], [0], [1], [0, 0, 1, 1], [], []>} : vector<16x30xbf16>, vector<30x256xbf16>, vector<16x256xf32> -> vector<16x256xf32>
    %c2_26 = arith.constant 2 : index
    %c0_27 = arith.constant 0 : index
    %c0_28 = arith.constant 0 : index
    %26 = vector.load %arg1[%c2_26, %c0_27, %c0_28] : memref<30x16x30xbf16, #tpu.memory_space<vmem>>, vector<1x16x30xbf16>
    %27 = vector.shape_cast %26 : vector<1x16x30xbf16> to vector<16x30xbf16>
    %c1_29 = arith.constant 1 : index
    %c0_30 = arith.constant 0 : index
    %c0_31 = arith.constant 0 : index
    %28 = vector.load %arg2[%c1_29, %c0_30, %c0_31] : memref<3x30x256xbf16, #tpu.memory_space<vmem>>, vector<1x30x256xbf16>
    %29 = vector.shape_cast %28 : vector<1x30x256xbf16> to vector<30x256xbf16>
    %cst_32 = arith.constant dense<0.000000e+00> : vector<16x256xf32>
    %30 = tpu.matmul %27, %29, %cst_32 {dimension_numbers = #tpu.dot_dimension_numbers<[1], [0], [0], [1], [0, 0, 1, 1], [], []>} : vector<16x30xbf16>, vector<30x256xbf16>, vector<16x256xf32> -> vector<16x256xf32>
    %31 = arith.addf %25, %30 : vector<16x256xf32>
    %c3 = arith.constant 3 : index
    %c0_33 = arith.constant 0 : index
    %c0_34 = arith.constant 0 : index
    %32 = vector.load %arg1[%c3, %c0_33, %c0_34] : memref<30x16x30xbf16, #tpu.memory_space<vmem>>, vector<1x16x30xbf16>
    %33 = vector.shape_cast %32 : vector<1x16x30xbf16> to vector<16x30xbf16>
    %c2_35 = arith.constant 2 : index
    %c0_36 = arith.constant 0 : index
    %c0_37 = arith.constant 0 : index
    %34 = vector.load %arg2[%c2_35, %c0_36, %c0_37] : memref<3x30x256xbf16, #tpu.memory_space<vmem>>, vector<1x30x256xbf16>
    %35 = vector.shape_cast %34 : vector<1x30x256xbf16> to vector<30x256xbf16>
    %cst_38 = arith.constant dense<0.000000e+00> : vector<16x256xf32>
    %36 = tpu.matmul %33, %35, %cst_38 {dimension_numbers = #tpu.dot_dimension_numbers<[1], [0], [0], [1], [0, 0, 1, 1], [], []>} : vector<16x30xbf16>, vector<30x256xbf16>, vector<16x256xf32> -> vector<16x256xf32>
    %37 = arith.addf %31, %36 : vector<16x256xf32>
    %38 = vector.extract_strided_slice %37 {offsets = [0, 0], sizes = [16, 128], strides = [1, 1]} : vector<16x256xf32> to vector<16x128xf32>
    %39 = vector.extract_strided_slice %37 {offsets = [0, 128], sizes = [16, 128], strides = [1, 1]} : vector<16x256xf32> to vector<16x128xf32>
    %40 = arith.maximumf %38, %39 : vector<16x128xf32>
    %41 = arith.maximumf %20, %40 : vector<16x128xf32>
    %42 = vector.broadcast %0 : vector<1x128xf32> to vector<16x128xf32>
    %43 = arith.addf %41, %42 : vector<16x128xf32>
    %44 = arith.truncf %43 : vector<16x128xf32> to vector<16x128xbf16>
    %c0_39 = arith.constant 0 : index
    %c0_40 = arith.constant 0 : index
    %45 = vector.load %arg9[%c0_39, %c0_40] : memref<16x1792xbf16, #tpu.memory_space<vmem>>, vector<16x128xbf16>
    tpu.vector_store %arg9[%c0_39, %c0_40], %44 {strides = array<i32>} : memref<16x1792xbf16, #tpu.memory_space<vmem>>, vector<16x128xbf16>,
    %c2_41 = arith.constant 2 : index
    %c0_42 = arith.constant 0 : index
    %c0_43 = arith.constant 0 : index
    %46 = vector.load %arg1[%c2_41, %c0_42, %c0_43] : memref<30x16x30xbf16, #tpu.memory_space<vmem>>, vector<1x16x30xbf16>
    %47 = vector.shape_cast %46 : vector<1x16x30xbf16> to vector<16x30xbf16>
    %c0_44 = arith.constant 0 : index
    %c0_45 = arith.constant 0 : index
    %c0_46 = arith.constant 0 : index
    %48 = vector.load %arg2[%c0_44, %c0_45, %c0_46] : memref<3x30x256xbf16, #tpu.memory_space<vmem>>, vector<1x30x256xbf16>
    %49 = vector.shape_cast %48 : vector<1x30x256xbf16> to vector<30x256xbf16>
    %cst_47 = arith.constant dense<0.000000e+00> : vector<16x256xf32>
    %50 = tpu.matmul %47, %49, %cst_47 {dimension_numbers = #tpu.dot_dimension_numbers<[1], [0], [0], [1], [0, 0, 1, 1], [], []>} : vector<16x30xbf16>, vector<30x256xbf16>, vector<16x256xf32> -> vector<16x256xf32>
    %c3_48 = arith.constant 3 : index
    %c0_49 = arith.constant 0 : index
    %c0_50 = arith.constant 0 : index
    %51 = vector.load %arg1[%c3_48, %c0_49, %c0_50] : memref<30x16x30xbf16, #tpu.memory_space<vmem>>, vector<1x16x30xbf16>
    %52 = vector.shape_cast %51 : vector<1x16x30xbf16> to vector<16x30xbf16>
    %c1_51 = arith.constant 1 : index
    %c0_52 = arith.constant 0 : index
    %c0_53 = arith.constant 0 : index
    %53 = vector.load %arg2[%c1_51, %c0_52, %c0_53] : memref<3x30x256xbf16, #tpu.memory_space<vmem>>, vector<1x30x256xbf16>
    %54 = vector.shape_cast %53 : vector<1x30x256xbf16> to vector<30x256xbf16>
    %cst_54 = arith.constant dense<0.000000e+00> : vector<16x256xf32>
    %55 = tpu.matmul %52, %54, %cst_54 {dimension_numbers = #tpu.dot_dimension_numbers<[1], [0], [0], [1], [0, 0, 1, 1], [], []>} : vector<16x30xbf16>, vector<30x256xbf16>, vector<16x256xf32> -> vector<16x256xf32>
    %56 = arith.addf %50, %55 : vector<16x256xf32>
    %c4 = arith.constant 4 : index
    %c0_55 = arith.constant 0 : index
    %c0_56 = arith.constant 0 : index
    %57 = vector.load %arg1[%c4, %c0_55, %c0_56] : memref<30x16x30xbf16, #tpu.memory_space<vmem>>, vector<1x16x30xbf16>
    %58 = vector.shape_cast %57 : vector<1x16x30xbf16> to vector<16x30xbf16>
    %c2_57 = arith.constant 2 : index
    %c0_58 = arith.constant 0 : index
    %c0_59 = arith.constant 0 : index
    %59 = vector.load %arg2[%c2_57, %c0_58, %c0_59] : memref<3x30x256xbf16, #tpu.memory_space<vmem>>, vector<1x30x256xbf16>
    %60 = vector.shape_cast %59 : vector<1x30x256xbf16> to vector<30x256xbf16>
    %cst_60 = arith.constant dense<0.000000e+00> : vector<16x256xf32>
    %61 = tpu.matmul %58, %60, %cst_60 {dimension_numbers = #tpu.dot_dimension_numbers<[1], [0], [0], [1], [0, 0, 1, 1], [], []>} : vector<16x30xbf16>, vector<30x256xbf16>, vector<16x256xf32> -> vector<16x256xf32>
    %62 = arith.addf %56, %61 : vector<16x256xf32>
    %63 = vector.extract_strided_slice %62 {offsets = [0, 0], sizes = [16, 128], strides = [1, 1]} : vector<16x256xf32> to vector<16x128xf32>
    %64 = vector.extract_strided_slice %62 {offsets = [0, 128], sizes = [16, 128], strides = [1, 1]} : vector<16x256xf32> to vector<16x128xf32>
    %65 = arith.maximumf %63, %64 : vector<16x128xf32>
    %c3_61 = arith.constant 3 : index
    %c0_62 = arith.constant 0 : index
    %c0_63 = arith.constant 0 : index
    %66 = vector.load %arg1[%c3_61, %c0_62, %c0_63] : memref<30x16x30xbf16, #tpu.memory_space<vmem>>, vector<1x16x30xbf16>
    %67 = vector.shape_cast %66 : vector<1x16x30xbf16> to vector<16x30xbf16>
    %c0_64 = arith.constant 0 : index
    %c0_65 = arith.constant 0 : index
    %c0_66 = arith.constant 0 : index
    %68 = vector.load %arg2[%c0_64, %c0_65, %c0_66] : memref<3x30x256xbf16, #tpu.memory_space<vmem>>, vector<1x30x256xbf16>
    %69 = vector.shape_cast %68 : vector<1x30x256xbf16> to vector<30x256xbf16>
    %cst_67 = arith.constant dense<0.000000e+00> : vector<16x256xf32>
    %70 = tpu.matmul %67, %69, %cst_67 {dimension_numbers = #tpu.dot_dimension_numbers<[1], [0], [0], [1], [0, 0, 1, 1], [], []>} : vector<16x30xbf16>, vector<30x256xbf16>, vector<16x256xf32> -> vector<16x256xf32>
    %c4_68 = arith.constant 4 : index
    %c0_69 = arith.constant 0 : index
    %c0_70 = arith.constant 0 : index
    %71 = vector.load %arg1[%c4_68, %c0_69, %c0_70] : memref<30x16x30xbf16, #tpu.memory_space<vmem>>, vector<1x16x30xbf16>
    %72 = vector.shape_cast %71 : vector<1x16x30xbf16> to vector<16x30xbf16>
    %c1_71 = arith.constant 1 : index
    %c0_72 = arith.constant 0 : index
    %c0_73 = arith.constant 0 : index
    %73 = vector.load %arg2[%c1_71, %c0_72, %c0_73] : memref<3x30x256xbf16, #tpu.memory_space<vmem>>, vector<1x30x256xbf16>
    %74 = vector.shape_cast %73 : vector<1x30x256xbf16> to vector<30x256xbf16>
    %cst_74 = arith.constant dense<0.000000e+00> : vector<16x256xf32>
    %75 = tpu.matmul %72, %74, %cst_74 {dimension_numbers = #tpu.dot_dimension_numbers<[1], [0], [0], [1], [0, 0, 1, 1], [], []>} : vector<16x30xbf16>, vector<30x256xbf16>, vector<16x256xf32> -> vector<16x256xf32>
    %76 = arith.addf %70, %75 : vector<16x256xf32>
    %c5 = arith.constant 5 : index
    %c0_75 = arith.constant 0 : index
    %c0_76 = arith.constant 0 : index
    %77 = vector.load %arg1[%c5, %c0_75, %c0_76] : memref<30x16x30xbf16, #tpu.memory_space<vmem>>, vector<1x16x30xbf16>
    %78 = vector.shape_cast %77 : vector<1x16x30xbf16> to vector<16x30xbf16>
    %c2_77 = arith.constant 2 : index
    %c0_78 = arith.constant 0 : index
    %c0_79 = arith.constant 0 : index
    %79 = vector.load %arg2[%c2_77, %c0_78, %c0_79] : memref<3x30x256xbf16, #tpu.memory_space<vmem>>, vector<1x30x256xbf16>
    %80 = vector.shape_cast %79 : vector<1x30x256xbf16> to vector<30x256xbf16>
    %cst_80 = arith.constant dense<0.000000e+00> : vector<16x256xf32>
    %81 = tpu.matmul %78, %80, %cst_80 {dimension_numbers = #tpu.dot_dimension_numbers<[1], [0], [0], [1], [0, 0, 1, 1], [], []>} : vector<16x30xbf16>, vector<30x256xbf16>, vector<16x256xf32> -> vector<16x256xf32>
    %82 = arith.addf %76, %81 : vector<16x256xf32>
    %83 = vector.extract_strided_slice %82 {offsets = [0, 0], sizes = [16, 128], strides = [1, 1]} : vector<16x256xf32> to vector<16x128xf32>
    %84 = vector.extract_strided_slice %82 {offsets = [0, 128], sizes = [16, 128], strides = [1, 1]} : vector<16x256xf32> to vector<16x128xf32>
    %85 = arith.maximumf %83, %84 : vector<16x128xf32>
    %86 = arith.maximumf %65, %85 : vector<16x128xf32>
    %87 = vector.broadcast %0 : vector<1x128xf32> to vector<16x128xf32>
    %88 = arith.addf %86, %87 : vector<16x128xf32>
    %89 = arith.truncf %88 : vector<16x128xf32> to vector<16x128xbf16>
    %c0_81 = arith.constant 0 : index
    %c128 = arith.constant 128 : index
    %90 = vector.load %arg9[%c0_81, %c128] : memref<16x1792xbf16, #tpu.memory_space<vmem>>, vector<16x128xbf16>
    tpu.vector_store %arg9[%c0_81, %c128], %89 {strides = array<i32>} : memref<16x1792xbf16, #tpu.memory_space<vmem>>, vector<16x128xbf16>,
    %c4_82 = arith.constant 4 : index
    %c0_83 = arith.constant 0 : index
    %c0_84 = arith.constant 0 : index
    %91 = vector.load %arg1[%c4_82, %c0_83, %c0_84] : memref<30x16x30xbf16, #tpu.memory_space<vmem>>, vector<1x16x30xbf16>
    %92 = vector.shape_cast %91 : vector<1x16x30xbf16> to vector<16x30xbf16>
    %c0_85 = arith.constant 0 : index
    %c0_86 = arith.constant 0 : index
    %c0_87 = arith.constant 0 : index
    %93 = vector.load %arg2[%c0_85, %c0_86, %c0_87] : memref<3x30x256xbf16, #tpu.memory_space<vmem>>, vector<1x30x256xbf16>
    %94 = vector.shape_cast %93 : vector<1x30x256xbf16> to vector<30x256xbf16>
    %cst_88 = arith.constant dense<0.000000e+00> : vector<16x256xf32>
    %95 = tpu.matmul %92, %94, %cst_88 {dimension_numbers = #tpu.dot_dimension_numbers<[1], [0], [0], [1], [0, 0, 1, 1], [], []>} : vector<16x30xbf16>, vector<30x256xbf16>, vector<16x256xf32> -> vector<16x256xf32>
    %c5_89 = arith.constant 5 : index
    %c0_90 = arith.constant 0 : index
    %c0_91 = arith.constant 0 : index
    %96 = vector.load %arg1[%c5_89, %c0_90, %c0_91] : memref<30x16x30xbf16, #tpu.memory_space<vmem>>, vector<1x16x30xbf16>
    %97 = vector.shape_cast %96 : vector<1x16x30xbf16> to vector<16x30xbf16>
    %c1_92 = arith.constant 1 : index
    %c0_93 = arith.constant 0 : index
    %c0_94 = arith.constant 0 : index
    %98 = vector.load %arg2[%c1_92, %c0_93, %c0_94] : memref<3x30x256xbf16, #tpu.memory_space<vmem>>, vector<1x30x256xbf16>
    %99 = vector.shape_cast %98 : vector<1x30x256xbf16> to vector<30x256xbf16>
    %cst_95 = arith.constant dense<0.000000e+00> : vector<16x256xf32>
    %100 = tpu.matmul %97, %99, %cst_95 {dimension_numbers = #tpu.dot_dimension_numbers<[1], [0], [0], [1], [0, 0, 1, 1], [], []>} : vector<16x30xbf16>, vector<30x256xbf16>, vector<16x256xf32> -> vector<16x256xf32>
    %101 = arith.addf %95, %100 : vector<16x256xf32>
    %c6 = arith.constant 6 : index
    %c0_96 = arith.constant 0 : index
    %c0_97 = arith.constant 0 : index
    %102 = vector.load %arg1[%c6, %c0_96, %c0_97] : memref<30x16x30xbf16, #tpu.memory_space<vmem>>, vector<1x16x30xbf16>
    %103 = vector.shape_cast %102 : vector<1x16x30xbf16> to vector<16x30xbf16>
    %c2_98 = arith.constant 2 : index
    %c0_99 = arith.constant 0 : index
    %c0_100 = arith.constant 0 : index
    %104 = vector.load %arg2[%c2_98, %c0_99, %c0_100] : memref<3x30x256xbf16, #tpu.memory_space<vmem>>, vector<1x30x256xbf16>
    %105 = vector.shape_cast %104 : vector<1x30x256xbf16> to vector<30x256xbf16>
    %cst_101 = arith.constant dense<0.000000e+00> : vector<16x256xf32>
    %106 = tpu.matmul %103, %105, %cst_101 {dimension_numbers = #tpu.dot_dimension_numbers<[1], [0], [0], [1], [0, 0, 1, 1], [], []>} : vector<16x30xbf16>, vector<30x256xbf16>, vector<16x256xf32> -> vector<16x256xf32>
    %107 = arith.addf %101, %106 : vector<16x256xf32>
    %108 = vector.extract_strided_slice %107 {offsets = [0, 0], sizes = [16, 128], strides = [1, 1]} : vector<16x256xf32> to vector<16x128xf32>
    %109 = vector.extract_strided_slice %107 {offsets = [0, 128], sizes = [16, 128], strides = [1, 1]} : vector<16x256xf32> to vector<16x128xf32>
    %110 = arith.maximumf %108, %109 : vector<16x128xf32>
    %c5_102 = arith.constant 5 : index
    %c0_103 = arith.constant 0 : index
    %c0_104 = arith.constant 0 : index
    %111 = vector.load %arg1[%c5_102, %c0_103, %c0_104] : memref<30x16x30xbf16, #tpu.memory_space<vmem>>, vector<1x16x30xbf16>
    %112 = vector.shape_cast %111 : vector<1x16x30xbf16> to vector<16x30xbf16>
    %c0_105 = arith.constant 0 : index
    %c0_106 = arith.constant 0 : index
    %c0_107 = arith.constant 0 : index
    %113 = vector.load %arg2[%c0_105, %c0_106, %c0_107] : memref<3x30x256xbf16, #tpu.memory_space<vmem>>, vector<1x30x256xbf16>
    %114 = vector.shape_cast %113 : vector<1x30x256xbf16> to vector<30x256xbf16>
    %cst_108 = arith.constant dense<0.000000e+00> : vector<16x256xf32>
    %115 = tpu.matmul %112, %114, %cst_108 {dimension_numbers = #tpu.dot_dimension_numbers<[1], [0], [0], [1], [0, 0, 1, 1], [], []>} : vector<16x30xbf16>, vector<30x256xbf16>, vector<16x256xf32> -> vector<16x256xf32>
    %c6_109 = arith.constant 6 : index
    %c0_110 = arith.constant 0 : index
    %c0_111 = arith.constant 0 : index
    %116 = vector.load %arg1[%c6_109, %c0_110, %c0_111] : memref<30x16x30xbf16, #tpu.memory_space<vmem>>, vector<1x16x30xbf16>
    %117 = vector.shape_cast %116 : vector<1x16x30xbf16> to vector<16x30xbf16>
    %c1_112 = arith.constant 1 : index
    %c0_113 = arith.constant 0 : index
    %c0_114 = arith.constant 0 : index
    %118 = vector.load %arg2[%c1_112, %c0_113, %c0_114] : memref<3x30x256xbf16, #tpu.memory_space<vmem>>, vector<1x30x256xbf16>
    %119 = vector.shape_cast %118 : vector<1x30x256xbf16> to vector<30x256xbf16>
    %cst_115 = arith.constant dense<0.000000e+00> : vector<16x256xf32>
    %120 = tpu.matmul %117, %119, %cst_115 {dimension_numbers = #tpu.dot_dimension_numbers<[1], [0], [0], [1], [0, 0, 1, 1], [], []>} : vector<16x30xbf16>, vector<30x256xbf16>, vector<16x256xf32> -> vector<16x256xf32>
    %121 = arith.addf %115, %120 : vector<16x256xf32>
    %c7 = arith.constant 7 : index
    %c0_116 = arith.constant 0 : index
    %c0_117 = arith.constant 0 : index
    %122 = vector.load %arg1[%c7, %c0_116, %c0_117] : memref<30x16x30xbf16, #tpu.memory_space<vmem>>, vector<1x16x30xbf16>
    %123 = vector.shape_cast %122 : vector<1x16x30xbf16> to vector<16x30xbf16>
    %c2_118 = arith.constant 2 : index
    %c0_119 = arith.constant 0 : index
    %c0_120 = arith.constant 0 : index
    %124 = vector.load %arg2[%c2_118, %c0_119, %c0_120] : memref<3x30x256xbf16, #tpu.memory_space<vmem>>, vector<1x30x256xbf16>
    %125 = vector.shape_cast %124 : vector<1x30x256xbf16> to vector<30x256xbf16>
    %cst_121 = arith.constant dense<0.000000e+00> : vector<16x256xf32>
    %126 = tpu.matmul %123, %125, %cst_121 {dimension_numbers = #tpu.dot_dimension_numbers<[1], [0], [0], [1], [0, 0, 1, 1], [], []>} : vector<16x30xbf16>, vector<30x256xbf16>, vector<16x256xf32> -> vector<16x256xf32>
    %127 = arith.addf %121, %126 : vector<16x256xf32>
    %128 = vector.extract_strided_slice %127 {offsets = [0, 0], sizes = [16, 128], strides = [1, 1]} : vector<16x256xf32> to vector<16x128xf32>
    %129 = vector.extract_strided_slice %127 {offsets = [0, 128], sizes = [16, 128], strides = [1, 1]} : vector<16x256xf32> to vector<16x128xf32>
    %130 = arith.maximumf %128, %129 : vector<16x128xf32>
    %131 = arith.maximumf %110, %130 : vector<16x128xf32>
    %132 = vector.broadcast %0 : vector<1x128xf32> to vector<16x128xf32>
    %133 = arith.addf %131, %132 : vector<16x128xf32>
    %134 = arith.truncf %133 : vector<16x128xf32> to vector<16x128xbf16>
    %c0_122 = arith.constant 0 : index
    %c256 = arith.constant 256 : index
    %135 = vector.load %arg9[%c0_122, %c256] : memref<16x1792xbf16, #tpu.memory_space<vmem>>, vector<16x128xbf16>
    tpu.vector_store %arg9[%c0_122, %c256], %134 {strides = array<i32>} : memref<16x1792xbf16, #tpu.memory_space<vmem>>, vector<16x128xbf16>,
    %c6_123 = arith.constant 6 : index
    %c0_124 = arith.constant 0 : index
    %c0_125 = arith.constant 0 : index
    %136 = vector.load %arg1[%c6_123, %c0_124, %c0_125] : memref<30x16x30xbf16, #tpu.memory_space<vmem>>, vector<1x16x30xbf16>
    %137 = vector.shape_cast %136 : vector<1x16x30xbf16> to vector<16x30xbf16>
    %c0_126 = arith.constant 0 : index
    %c0_127 = arith.constant 0 : index
    %c0_128 = arith.constant 0 : index
    %138 = vector.load %arg2[%c0_126, %c0_127, %c0_128] : memref<3x30x256xbf16, #tpu.memory_space<vmem>>, vector<1x30x256xbf16>
    %139 = vector.shape_cast %138 : vector<1x30x256xbf16> to vector<30x256xbf16>
    %cst_129 = arith.constant dense<0.000000e+00> : vector<16x256xf32>
    %140 = tpu.matmul %137, %139, %cst_129 {dimension_numbers = #tpu.dot_dimension_numbers<[1], [0], [0], [1], [0, 0, 1, 1], [], []>} : vector<16x30xbf16>, vector<30x256xbf16>, vector<16x256xf32> -> vector<16x256xf32>
    %c7_130 = arith.constant 7 : index
    %c0_131 = arith.constant 0 : index
    %c0_132 = arith.constant 0 : index
    %141 = vector.load %arg1[%c7_130, %c0_131, %c0_132] : memref<30x16x30xbf16, #tpu.memory_space<vmem>>, vector<1x16x30xbf16>
    %142 = vector.shape_cast %141 : vector<1x16x30xbf16> to vector<16x30xbf16>
    %c1_133 = arith.constant 1 : index
    %c0_134 = arith.constant 0 : index
    %c0_135 = arith.constant 0 : index
    %143 = vector.load %arg2[%c1_133, %c0_134, %c0_135] : memref<3x30x256xbf16, #tpu.memory_space<vmem>>, vector<1x30x256xbf16>
    %144 = vector.shape_cast %143 : vector<1x30x256xbf16> to vector<30x256xbf16>
    %cst_136 = arith.constant dense<0.000000e+00> : vector<16x256xf32>
    %145 = tpu.matmul %142, %144, %cst_136 {dimension_numbers = #tpu.dot_dimension_numbers<[1], [0], [0], [1], [0, 0, 1, 1], [], []>} : vector<16x30xbf16>, vector<30x256xbf16>, vector<16x256xf32> -> vector<16x256xf32>
    %146 = arith.addf %140, %145 : vector<16x256xf32>
    %c8 = arith.constant 8 : index
    %c0_137 = arith.constant 0 : index
    %c0_138 = arith.constant 0 : index
    %147 = vector.load %arg1[%c8, %c0_137, %c0_138] : memref<30x16x30xbf16, #tpu.memory_space<vmem>>, vector<1x16x30xbf16>
    %148 = vector.shape_cast %147 : vector<1x16x30xbf16> to vector<16x30xbf16>
    %c2_139 = arith.constant 2 : index
    %c0_140 = arith.constant 0 : index
    %c0_141 = arith.constant 0 : index
    %149 = vector.load %arg2[%c2_139, %c0_140, %c0_141] : memref<3x30x256xbf16, #tpu.memory_space<vmem>>, vector<1x30x256xbf16>
    %150 = vector.shape_cast %149 : vector<1x30x256xbf16> to vector<30x256xbf16>
    %cst_142 = arith.constant dense<0.000000e+00> : vector<16x256xf32>
    %151 = tpu.matmul %148, %150, %cst_142 {dimension_numbers = #tpu.dot_dimension_numbers<[1], [0], [0], [1], [0, 0, 1, 1], [], []>} : vector<16x30xbf16>, vector<30x256xbf16>, vector<16x256xf32> -> vector<16x256xf32>
    %152 = arith.addf %146, %151 : vector<16x256xf32>
    %153 = vector.extract_strided_slice %152 {offsets = [0, 0], sizes = [16, 128], strides = [1, 1]} : vector<16x256xf32> to vector<16x128xf32>
    %154 = vector.extract_strided_slice %152 {offsets = [0, 128], sizes = [16, 128], strides = [1, 1]} : vector<16x256xf32> to vector<16x128xf32>
    %155 = arith.maximumf %153, %154 : vector<16x128xf32>
    %c7_143 = arith.constant 7 : index
    %c0_144 = arith.constant 0 : index
    %c0_145 = arith.constant 0 : index
    %156 = vector.load %arg1[%c7_143, %c0_144, %c0_145] : memref<30x16x30xbf16, #tpu.memory_space<vmem>>, vector<1x16x30xbf16>
    %157 = vector.shape_cast %156 : vector<1x16x30xbf16> to vector<16x30xbf16>
    %c0_146 = arith.constant 0 : index
    %c0_147 = arith.constant 0 : index
    %c0_148 = arith.constant 0 : index
    %158 = vector.load %arg2[%c0_146, %c0_147, %c0_148] : memref<3x30x256xbf16, #tpu.memory_space<vmem>>, vector<1x30x256xbf16>
    %159 = vector.shape_cast %158 : vector<1x30x256xbf16> to vector<30x256xbf16>
    %cst_149 = arith.constant dense<0.000000e+00> : vector<16x256xf32>
    %160 = tpu.matmul %157, %159, %cst_149 {dimension_numbers = #tpu.dot_dimension_numbers<[1], [0], [0], [1], [0, 0, 1, 1], [], []>} : vector<16x30xbf16>, vector<30x256xbf16>, vector<16x256xf32> -> vector<16x256xf32>
    %c8_150 = arith.constant 8 : index
    %c0_151 = arith.constant 0 : index
    %c0_152 = arith.constant 0 : index
    %161 = vector.load %arg1[%c8_150, %c0_151, %c0_152] : memref<30x16x30xbf16, #tpu.memory_space<vmem>>, vector<1x16x30xbf16>
    %162 = vector.shape_cast %161 : vector<1x16x30xbf16> to vector<16x30xbf16>
    %c1_153 = arith.constant 1 : index
    %c0_154 = arith.constant 0 : index
    %c0_155 = arith.constant 0 : index
    %163 = vector.load %arg2[%c1_153, %c0_154, %c0_155] : memref<3x30x256xbf16, #tpu.memory_space<vmem>>, vector<1x30x256xbf16>
    %164 = vector.shape_cast %163 : vector<1x30x256xbf16> to vector<30x256xbf16>
    %cst_156 = arith.constant dense<0.000000e+00> : vector<16x256xf32>
    %165 = tpu.matmul %162, %164, %cst_156 {dimension_numbers = #tpu.dot_dimension_numbers<[1], [0], [0], [1], [0, 0, 1, 1], [], []>} : vector<16x30xbf16>, vector<30x256xbf16>, vector<16x256xf32> -> vector<16x256xf32>
    %166 = arith.addf %160, %165 : vector<16x256xf32>
    %c9 = arith.constant 9 : index
    %c0_157 = arith.constant 0 : index
    %c0_158 = arith.constant 0 : index
    %167 = vector.load %arg1[%c9, %c0_157, %c0_158] : memref<30x16x30xbf16, #tpu.memory_space<vmem>>, vector<1x16x30xbf16>
    %168 = vector.shape_cast %167 : vector<1x16x30xbf16> to vector<16x30xbf16>
    %c2_159 = arith.constant 2 : index
    %c0_160 = arith.constant 0 : index
    %c0_161 = arith.constant 0 : index
    %169 = vector.load %arg2[%c2_159, %c0_160, %c0_161] : memref<3x30x256xbf16, #tpu.memory_space<vmem>>, vector<1x30x256xbf16>
    %170 = vector.shape_cast %169 : vector<1x30x256xbf16> to vector<30x256xbf16>
    %cst_162 = arith.constant dense<0.000000e+00> : vector<16x256xf32>
    %171 = tpu.matmul %168, %170, %cst_162 {dimension_numbers = #tpu.dot_dimension_numbers<[1], [0], [0], [1], [0, 0, 1, 1], [], []>} : vector<16x30xbf16>, vector<30x256xbf16>, vector<16x256xf32> -> vector<16x256xf32>
    %172 = arith.addf %166, %171 : vector<16x256xf32>
    %173 = vector.extract_strided_slice %172 {offsets = [0, 0], sizes = [16, 128], strides = [1, 1]} : vector<16x256xf32> to vector<16x128xf32>
    %174 = vector.extract_strided_slice %172 {offsets = [0, 128], sizes = [16, 128], strides = [1, 1]} : vector<16x256xf32> to vector<16x128xf32>
    %175 = arith.maximumf %173, %174 : vector<16x128xf32>
    %176 = arith.maximumf %155, %175 : vector<16x128xf32>
    %177 = vector.broadcast %0 : vector<1x128xf32> to vector<16x128xf32>
    %178 = arith.addf %176, %177 : vector<16x128xf32>
    %179 = arith.truncf %178 : vector<16x128xf32> to vector<16x128xbf16>
    %c0_163 = arith.constant 0 : index
    %c384 = arith.constant 384 : index
    %180 = vector.load %arg9[%c0_163, %c384] : memref<16x1792xbf16, #tpu.memory_space<vmem>>, vector<16x128xbf16>
    tpu.vector_store %arg9[%c0_163, %c384], %179 {strides = array<i32>} : memref<16x1792xbf16, #tpu.memory_space<vmem>>, vector<16x128xbf16>,
    %c8_164 = arith.constant 8 : index
    %c0_165 = arith.constant 0 : index
    %c0_166 = arith.constant 0 : index
    %181 = vector.load %arg1[%c8_164, %c0_165, %c0_166] : memref<30x16x30xbf16, #tpu.memory_space<vmem>>, vector<1x16x30xbf16>
    %182 = vector.shape_cast %181 : vector<1x16x30xbf16> to vector<16x30xbf16>
    %c0_167 = arith.constant 0 : index
    %c0_168 = arith.constant 0 : index
    %c0_169 = arith.constant 0 : index
    %183 = vector.load %arg2[%c0_167, %c0_168, %c0_169] : memref<3x30x256xbf16, #tpu.memory_space<vmem>>, vector<1x30x256xbf16>
    %184 = vector.shape_cast %183 : vector<1x30x256xbf16> to vector<30x256xbf16>
    %cst_170 = arith.constant dense<0.000000e+00> : vector<16x256xf32>
    %185 = tpu.matmul %182, %184, %cst_170 {dimension_numbers = #tpu.dot_dimension_numbers<[1], [0], [0], [1], [0, 0, 1, 1], [], []>} : vector<16x30xbf16>, vector<30x256xbf16>, vector<16x256xf32> -> vector<16x256xf32>
    %c9_171 = arith.constant 9 : index
    %c0_172 = arith.constant 0 : index
    %c0_173 = arith.constant 0 : index
    %186 = vector.load %arg1[%c9_171, %c0_172, %c0_173] : memref<30x16x30xbf16, #tpu.memory_space<vmem>>, vector<1x16x30xbf16>
    %187 = vector.shape_cast %186 : vector<1x16x30xbf16> to vector<16x30xbf16>
    %c1_174 = arith.constant 1 : index
    %c0_175 = arith.constant 0 : index
    %c0_176 = arith.constant 0 : index
    %188 = vector.load %arg2[%c1_174, %c0_175, %c0_176] : memref<3x30x256xbf16, #tpu.memory_space<vmem>>, vector<1x30x256xbf16>
    %189 = vector.shape_cast %188 : vector<1x30x256xbf16> to vector<30x256xbf16>
    %cst_177 = arith.constant dense<0.000000e+00> : vector<16x256xf32>
    %190 = tpu.matmul %187, %189, %cst_177 {dimension_numbers = #tpu.dot_dimension_numbers<[1], [0], [0], [1], [0, 0, 1, 1], [], []>} : vector<16x30xbf16>, vector<30x256xbf16>, vector<16x256xf32> -> vector<16x256xf32>
    %191 = arith.addf %185, %190 : vector<16x256xf32>
    %c10 = arith.constant 10 : index
    %c0_178 = arith.constant 0 : index
    %c0_179 = arith.constant 0 : index
    %192 = vector.load %arg1[%c10, %c0_178, %c0_179] : memref<30x16x30xbf16, #tpu.memory_space<vmem>>, vector<1x16x30xbf16>
    %193 = vector.shape_cast %192 : vector<1x16x30xbf16> to vector<16x30xbf16>
    %c2_180 = arith.constant 2 : index
    %c0_181 = arith.constant 0 : index
    %c0_182 = arith.constant 0 : index
    %194 = vector.load %arg2[%c2_180, %c0_181, %c0_182] : memref<3x30x256xbf16, #tpu.memory_space<vmem>>, vector<1x30x256xbf16>
    %195 = vector.shape_cast %194 : vector<1x30x256xbf16> to vector<30x256xbf16>
    %cst_183 = arith.constant dense<0.000000e+00> : vector<16x256xf32>
    %196 = tpu.matmul %193, %195, %cst_183 {dimension_numbers = #tpu.dot_dimension_numbers<[1], [0], [0], [1], [0, 0, 1, 1], [], []>} : vector<16x30xbf16>, vector<30x256xbf16>, vector<16x256xf32> -> vector<16x256xf32>
    %197 = arith.addf %191, %196 : vector<16x256xf32>
    %198 = vector.extract_strided_slice %197 {offsets = [0, 0], sizes = [16, 128], strides = [1, 1]} : vector<16x256xf32> to vector<16x128xf32>
    %199 = vector.extract_strided_slice %197 {offsets = [0, 128], sizes = [16, 128], strides = [1, 1]} : vector<16x256xf32> to vector<16x128xf32>
    %200 = arith.maximumf %198, %199 : vector<16x128xf32>
    %c9_184 = arith.constant 9 : index
    %c0_185 = arith.constant 0 : index
    %c0_186 = arith.constant 0 : index
    %201 = vector.load %arg1[%c9_184, %c0_185, %c0_186] : memref<30x16x30xbf16, #tpu.memory_space<vmem>>, vector<1x16x30xbf16>
    %202 = vector.shape_cast %201 : vector<1x16x30xbf16> to vector<16x30xbf16>
    %c0_187 = arith.constant 0 : index
    %c0_188 = arith.constant 0 : index
    %c0_189 = arith.constant 0 : index
    %203 = vector.load %arg2[%c0_187, %c0_188, %c0_189] : memref<3x30x256xbf16, #tpu.memory_space<vmem>>, vector<1x30x256xbf16>
    %204 = vector.shape_cast %203 : vector<1x30x256xbf16> to vector<30x256xbf16>
    %cst_190 = arith.constant dense<0.000000e+00> : vector<16x256xf32>
    %205 = tpu.matmul %202, %204, %cst_190 {dimension_numbers = #tpu.dot_dimension_numbers<[1], [0], [0], [1], [0, 0, 1, 1], [], []>} : vector<16x30xbf16>, vector<30x256xbf16>, vector<16x256xf32> -> vector<16x256xf32>
    %c10_191 = arith.constant 10 : index
    %c0_192 = arith.constant 0 : index
    %c0_193 = arith.constant 0 : index
    %206 = vector.load %arg1[%c10_191, %c0_192, %c0_193] : memref<30x16x30xbf16, #tpu.memory_space<vmem>>, vector<1x16x30xbf16>
    %207 = vector.shape_cast %206 : vector<1x16x30xbf16> to vector<16x30xbf16>
    %c1_194 = arith.constant 1 : index
    %c0_195 = arith.constant 0 : index
    %c0_196 = arith.constant 0 : index
    %208 = vector.load %arg2[%c1_194, %c0_195, %c0_196] : memref<3x30x256xbf16, #tpu.memory_space<vmem>>, vector<1x30x256xbf16>
    %209 = vector.shape_cast %208 : vector<1x30x256xbf16> to vector<30x256xbf16>
    %cst_197 = arith.constant dense<0.000000e+00> : vector<16x256xf32>
    %210 = tpu.matmul %207, %209, %cst_197 {dimension_numbers = #tpu.dot_dimension_numbers<[1], [0], [0], [1], [0, 0, 1, 1], [], []>} : vector<16x30xbf16>, vector<30x256xbf16>, vector<16x256xf32> -> vector<16x256xf32>
    %211 = arith.addf %205, %210 : vector<16x256xf32>
    %c11 = arith.constant 11 : index
    %c0_198 = arith.constant 0 : index
    %c0_199 = arith.constant 0 : index
    %212 = vector.load %arg1[%c11, %c0_198, %c0_199] : memref<30x16x30xbf16, #tpu.memory_space<vmem>>, vector<1x16x30xbf16>
    %213 = vector.shape_cast %212 : vector<1x16x30xbf16> to vector<16x30xbf16>
    %c2_200 = arith.constant 2 : index
    %c0_201 = arith.constant 0 : index
    %c0_202 = arith.constant 0 : index
    %214 = vector.load %arg2[%c2_200, %c0_201, %c0_202] : memref<3x30x256xbf16, #tpu.memory_space<vmem>>, vector<1x30x256xbf16>
    %215 = vector.shape_cast %214 : vector<1x30x256xbf16> to vector<30x256xbf16>
    %cst_203 = arith.constant dense<0.000000e+00> : vector<16x256xf32>
    %216 = tpu.matmul %213, %215, %cst_203 {dimension_numbers = #tpu.dot_dimension_numbers<[1], [0], [0], [1], [0, 0, 1, 1], [], []>} : vector<16x30xbf16>, vector<30x256xbf16>, vector<16x256xf32> -> vector<16x256xf32>
    %217 = arith.addf %211, %216 : vector<16x256xf32>
    %218 = vector.extract_strided_slice %217 {offsets = [0, 0], sizes = [16, 128], strides = [1, 1]} : vector<16x256xf32> to vector<16x128xf32>
    %219 = vector.extract_strided_slice %217 {offsets = [0, 128], sizes = [16, 128], strides = [1, 1]} : vector<16x256xf32> to vector<16x128xf32>
    %220 = arith.maximumf %218, %219 : vector<16x128xf32>
    %221 = arith.maximumf %200, %220 : vector<16x128xf32>
    %222 = vector.broadcast %0 : vector<1x128xf32> to vector<16x128xf32>
    %223 = arith.addf %221, %222 : vector<16x128xf32>
    %224 = arith.truncf %223 : vector<16x128xf32> to vector<16x128xbf16>
    %c0_204 = arith.constant 0 : index
    %c512 = arith.constant 512 : index
    %225 = vector.load %arg9[%c0_204, %c512] : memref<16x1792xbf16, #tpu.memory_space<vmem>>, vector<16x128xbf16>
    tpu.vector_store %arg9[%c0_204, %c512], %224 {strides = array<i32>} : memref<16x1792xbf16, #tpu.memory_space<vmem>>, vector<16x128xbf16>,
    %c10_205 = arith.constant 10 : index
    %c0_206 = arith.constant 0 : index
    %c0_207 = arith.constant 0 : index
    %226 = vector.load %arg1[%c10_205, %c0_206, %c0_207] : memref<30x16x30xbf16, #tpu.memory_space<vmem>>, vector<1x16x30xbf16>
    %227 = vector.shape_cast %226 : vector<1x16x30xbf16> to vector<16x30xbf16>
    %c0_208 = arith.constant 0 : index
    %c0_209 = arith.constant 0 : index
    %c0_210 = arith.constant 0 : index
    %228 = vector.load %arg2[%c0_208, %c0_209, %c0_210] : memref<3x30x256xbf16, #tpu.memory_space<vmem>>, vector<1x30x256xbf16>
    %229 = vector.shape_cast %228 : vector<1x30x256xbf16> to vector<30x256xbf16>
    %cst_211 = arith.constant dense<0.000000e+00> : vector<16x256xf32>
    %230 = tpu.matmul %227, %229, %cst_211 {dimension_numbers = #tpu.dot_dimension_numbers<[1], [0], [0], [1], [0, 0, 1, 1], [], []>} : vector<16x30xbf16>, vector<30x256xbf16>, vector<16x256xf32> -> vector<16x256xf32>
    %c11_212 = arith.constant 11 : index
    %c0_213 = arith.constant 0 : index
    %c0_214 = arith.constant 0 : index
    %231 = vector.load %arg1[%c11_212, %c0_213, %c0_214] : memref<30x16x30xbf16, #tpu.memory_space<vmem>>, vector<1x16x30xbf16>
    %232 = vector.shape_cast %231 : vector<1x16x30xbf16> to vector<16x30xbf16>
    %c1_215 = arith.constant 1 : index
    %c0_216 = arith.constant 0 : index
    %c0_217 = arith.constant 0 : index
    %233 = vector.load %arg2[%c1_215, %c0_216, %c0_217] : memref<3x30x256xbf16, #tpu.memory_space<vmem>>, vector<1x30x256xbf16>
    %234 = vector.shape_cast %233 : vector<1x30x256xbf16> to vector<30x256xbf16>
    %cst_218 = arith.constant dense<0.000000e+00> : vector<16x256xf32>
    %235 = tpu.matmul %232, %234, %cst_218 {dimension_numbers = #tpu.dot_dimension_numbers<[1], [0], [0], [1], [0, 0, 1, 1], [], []>} : vector<16x30xbf16>, vector<30x256xbf16>, vector<16x256xf32> -> vector<16x256xf32>
    %236 = arith.addf %230, %235 : vector<16x256xf32>
    %c12 = arith.constant 12 : index
    %c0_219 = arith.constant 0 : index
    %c0_220 = arith.constant 0 : index
    %237 = vector.load %arg1[%c12, %c0_219, %c0_220] : memref<30x16x30xbf16, #tpu.memory_space<vmem>>, vector<1x16x30xbf16>
    %238 = vector.shape_cast %237 : vector<1x16x30xbf16> to vector<16x30xbf16>
    %c2_221 = arith.constant 2 : index
    %c0_222 = arith.constant 0 : index
    %c0_223 = arith.constant 0 : index
    %239 = vector.load %arg2[%c2_221, %c0_222, %c0_223] : memref<3x30x256xbf16, #tpu.memory_space<vmem>>, vector<1x30x256xbf16>
    %240 = vector.shape_cast %239 : vector<1x30x256xbf16> to vector<30x256xbf16>
    %cst_224 = arith.constant dense<0.000000e+00> : vector<16x256xf32>
    %241 = tpu.matmul %238, %240, %cst_224 {dimension_numbers = #tpu.dot_dimension_numbers<[1], [0], [0], [1], [0, 0, 1, 1], [], []>} : vector<16x30xbf16>, vector<30x256xbf16>, vector<16x256xf32> -> vector<16x256xf32>
    %242 = arith.addf %236, %241 : vector<16x256xf32>
    %243 = vector.extract_strided_slice %242 {offsets = [0, 0], sizes = [16, 128], strides = [1, 1]} : vector<16x256xf32> to vector<16x128xf32>
    %244 = vector.extract_strided_slice %242 {offsets = [0, 128], sizes = [16, 128], strides = [1, 1]} : vector<16x256xf32> to vector<16x128xf32>
    %245 = arith.maximumf %243, %244 : vector<16x128xf32>
    %c11_225 = arith.constant 11 : index
    %c0_226 = arith.constant 0 : index
    %c0_227 = arith.constant 0 : index
    %246 = vector.load %arg1[%c11_225, %c0_226, %c0_227] : memref<30x16x30xbf16, #tpu.memory_space<vmem>>, vector<1x16x30xbf16>
    %247 = vector.shape_cast %246 : vector<1x16x30xbf16> to vector<16x30xbf16>
    %c0_228 = arith.constant 0 : index
    %c0_229 = arith.constant 0 : index
    %c0_230 = arith.constant 0 : index
    %248 = vector.load %arg2[%c0_228, %c0_229, %c0_230] : memref<3x30x256xbf16, #tpu.memory_space<vmem>>, vector<1x30x256xbf16>
    %249 = vector.shape_cast %248 : vector<1x30x256xbf16> to vector<30x256xbf16>
    %cst_231 = arith.constant dense<0.000000e+00> : vector<16x256xf32>
    %250 = tpu.matmul %247, %249, %cst_231 {dimension_numbers = #tpu.dot_dimension_numbers<[1], [0], [0], [1], [0, 0, 1, 1], [], []>} : vector<16x30xbf16>, vector<30x256xbf16>, vector<16x256xf32> -> vector<16x256xf32>
    %c12_232 = arith.constant 12 : index
    %c0_233 = arith.constant 0 : index
    %c0_234 = arith.constant 0 : index
    %251 = vector.load %arg1[%c12_232, %c0_233, %c0_234] : memref<30x16x30xbf16, #tpu.memory_space<vmem>>, vector<1x16x30xbf16>
    %252 = vector.shape_cast %251 : vector<1x16x30xbf16> to vector<16x30xbf16>
    %c1_235 = arith.constant 1 : index
    %c0_236 = arith.constant 0 : index
    %c0_237 = arith.constant 0 : index
    %253 = vector.load %arg2[%c1_235, %c0_236, %c0_237] : memref<3x30x256xbf16, #tpu.memory_space<vmem>>, vector<1x30x256xbf16>
    %254 = vector.shape_cast %253 : vector<1x30x256xbf16> to vector<30x256xbf16>
    %cst_238 = arith.constant dense<0.000000e+00> : vector<16x256xf32>
    %255 = tpu.matmul %252, %254, %cst_238 {dimension_numbers = #tpu.dot_dimension_numbers<[1], [0], [0], [1], [0, 0, 1, 1], [], []>} : vector<16x30xbf16>, vector<30x256xbf16>, vector<16x256xf32> -> vector<16x256xf32>
    %256 = arith.addf %250, %255 : vector<16x256xf32>
    %c13 = arith.constant 13 : index
    %c0_239 = arith.constant 0 : index
    %c0_240 = arith.constant 0 : index
    %257 = vector.load %arg1[%c13, %c0_239, %c0_240] : memref<30x16x30xbf16, #tpu.memory_space<vmem>>, vector<1x16x30xbf16>
    %258 = vector.shape_cast %257 : vector<1x16x30xbf16> to vector<16x30xbf16>
    %c2_241 = arith.constant 2 : index
    %c0_242 = arith.constant 0 : index
    %c0_243 = arith.constant 0 : index
    %259 = vector.load %arg2[%c2_241, %c0_242, %c0_243] : memref<3x30x256xbf16, #tpu.memory_space<vmem>>, vector<1x30x256xbf16>
    %260 = vector.shape_cast %259 : vector<1x30x256xbf16> to vector<30x256xbf16>
    %cst_244 = arith.constant dense<0.000000e+00> : vector<16x256xf32>
    %261 = tpu.matmul %258, %260, %cst_244 {dimension_numbers = #tpu.dot_dimension_numbers<[1], [0], [0], [1], [0, 0, 1, 1], [], []>} : vector<16x30xbf16>, vector<30x256xbf16>, vector<16x256xf32> -> vector<16x256xf32>
    %262 = arith.addf %256, %261 : vector<16x256xf32>
    %263 = vector.extract_strided_slice %262 {offsets = [0, 0], sizes = [16, 128], strides = [1, 1]} : vector<16x256xf32> to vector<16x128xf32>
    %264 = vector.extract_strided_slice %262 {offsets = [0, 128], sizes = [16, 128], strides = [1, 1]} : vector<16x256xf32> to vector<16x128xf32>
    %265 = arith.maximumf %263, %264 : vector<16x128xf32>
    %266 = arith.maximumf %245, %265 : vector<16x128xf32>
    %267 = vector.broadcast %0 : vector<1x128xf32> to vector<16x128xf32>
    %268 = arith.addf %266, %267 : vector<16x128xf32>
    %269 = arith.truncf %268 : vector<16x128xf32> to vector<16x128xbf16>
    %c0_245 = arith.constant 0 : index
    %c640 = arith.constant 640 : index
    %270 = vector.load %arg9[%c0_245, %c640] : memref<16x1792xbf16, #tpu.memory_space<vmem>>, vector<16x128xbf16>
    tpu.vector_store %arg9[%c0_245, %c640], %269 {strides = array<i32>} : memref<16x1792xbf16, #tpu.memory_space<vmem>>, vector<16x128xbf16>,
    %c12_246 = arith.constant 12 : index
    %c0_247 = arith.constant 0 : index
    %c0_248 = arith.constant 0 : index
    %271 = vector.load %arg1[%c12_246, %c0_247, %c0_248] : memref<30x16x30xbf16, #tpu.memory_space<vmem>>, vector<1x16x30xbf16>
    %272 = vector.shape_cast %271 : vector<1x16x30xbf16> to vector<16x30xbf16>
    %c0_249 = arith.constant 0 : index
    %c0_250 = arith.constant 0 : index
    %c0_251 = arith.constant 0 : index
    %273 = vector.load %arg2[%c0_249, %c0_250, %c0_251] : memref<3x30x256xbf16, #tpu.memory_space<vmem>>, vector<1x30x256xbf16>
    %274 = vector.shape_cast %273 : vector<1x30x256xbf16> to vector<30x256xbf16>
    %cst_252 = arith.constant dense<0.000000e+00> : vector<16x256xf32>
    %275 = tpu.matmul %272, %274, %cst_252 {dimension_numbers = #tpu.dot_dimension_numbers<[1], [0], [0], [1], [0, 0, 1, 1], [], []>} : vector<16x30xbf16>, vector<30x256xbf16>, vector<16x256xf32> -> vector<16x256xf32>
    %c13_253 = arith.constant 13 : index
    %c0_254 = arith.constant 0 : index
    %c0_255 = arith.constant 0 : index
    %276 = vector.load %arg1[%c13_253, %c0_254, %c0_255] : memref<30x16x30xbf16, #tpu.memory_space<vmem>>, vector<1x16x30xbf16>
    %277 = vector.shape_cast %276 : vector<1x16x30xbf16> to vector<16x30xbf16>
    %c1_256 = arith.constant 1 : index
    %c0_257 = arith.constant 0 : index
    %c0_258 = arith.constant 0 : index
    %278 = vector.load %arg2[%c1_256, %c0_257, %c0_258] : memref<3x30x256xbf16, #tpu.memory_space<vmem>>, vector<1x30x256xbf16>
    %279 = vector.shape_cast %278 : vector<1x30x256xbf16> to vector<30x256xbf16>
    %cst_259 = arith.constant dense<0.000000e+00> : vector<16x256xf32>
    %280 = tpu.matmul %277, %279, %cst_259 {dimension_numbers = #tpu.dot_dimension_numbers<[1], [0], [0], [1], [0, 0, 1, 1], [], []>} : vector<16x30xbf16>, vector<30x256xbf16>, vector<16x256xf32> -> vector<16x256xf32>
    %281 = arith.addf %275, %280 : vector<16x256xf32>
    %c14 = arith.constant 14 : index
    %c0_260 = arith.constant 0 : index
    %c0_261 = arith.constant 0 : index
    %282 = vector.load %arg1[%c14, %c0_260, %c0_261] : memref<30x16x30xbf16, #tpu.memory_space<vmem>>, vector<1x16x30xbf16>
    %283 = vector.shape_cast %282 : vector<1x16x30xbf16> to vector<16x30xbf16>
    %c2_262 = arith.constant 2 : index
    %c0_263 = arith.constant 0 : index
    %c0_264 = arith.constant 0 : index
    %284 = vector.load %arg2[%c2_262, %c0_263, %c0_264] : memref<3x30x256xbf16, #tpu.memory_space<vmem>>, vector<1x30x256xbf16>
    %285 = vector.shape_cast %284 : vector<1x30x256xbf16> to vector<30x256xbf16>
    %cst_265 = arith.constant dense<0.000000e+00> : vector<16x256xf32>
    %286 = tpu.matmul %283, %285, %cst_265 {dimension_numbers = #tpu.dot_dimension_numbers<[1], [0], [0], [1], [0, 0, 1, 1], [], []>} : vector<16x30xbf16>, vector<30x256xbf16>, vector<16x256xf32> -> vector<16x256xf32>
    %287 = arith.addf %281, %286 : vector<16x256xf32>
    %288 = vector.extract_strided_slice %287 {offsets = [0, 0], sizes = [16, 128], strides = [1, 1]} : vector<16x256xf32> to vector<16x128xf32>
    %289 = vector.extract_strided_slice %287 {offsets = [0, 128], sizes = [16, 128], strides = [1, 1]} : vector<16x256xf32> to vector<16x128xf32>
    %290 = arith.maximumf %288, %289 : vector<16x128xf32>
    %c13_266 = arith.constant 13 : index
    %c0_267 = arith.constant 0 : index
    %c0_268 = arith.constant 0 : index
    %291 = vector.load %arg1[%c13_266, %c0_267, %c0_268] : memref<30x16x30xbf16, #tpu.memory_space<vmem>>, vector<1x16x30xbf16>
    %292 = vector.shape_cast %291 : vector<1x16x30xbf16> to vector<16x30xbf16>
    %c0_269 = arith.constant 0 : index
    %c0_270 = arith.constant 0 : index
    %c0_271 = arith.constant 0 : index
    %293 = vector.load %arg2[%c0_269, %c0_270, %c0_271] : memref<3x30x256xbf16, #tpu.memory_space<vmem>>, vector<1x30x256xbf16>
    %294 = vector.shape_cast %293 : vector<1x30x256xbf16> to vector<30x256xbf16>
    %cst_272 = arith.constant dense<0.000000e+00> : vector<16x256xf32>
    %295 = tpu.matmul %292, %294, %cst_272 {dimension_numbers = #tpu.dot_dimension_numbers<[1], [0], [0], [1], [0, 0, 1, 1], [], []>} : vector<16x30xbf16>, vector<30x256xbf16>, vector<16x256xf32> -> vector<16x256xf32>
    %c14_273 = arith.constant 14 : index
    %c0_274 = arith.constant 0 : index
    %c0_275 = arith.constant 0 : index
    %296 = vector.load %arg1[%c14_273, %c0_274, %c0_275] : memref<30x16x30xbf16, #tpu.memory_space<vmem>>, vector<1x16x30xbf16>
    %297 = vector.shape_cast %296 : vector<1x16x30xbf16> to vector<16x30xbf16>
    %c1_276 = arith.constant 1 : index
    %c0_277 = arith.constant 0 : index
    %c0_278 = arith.constant 0 : index
    %298 = vector.load %arg2[%c1_276, %c0_277, %c0_278] : memref<3x30x256xbf16, #tpu.memory_space<vmem>>, vector<1x30x256xbf16>
    %299 = vector.shape_cast %298 : vector<1x30x256xbf16> to vector<30x256xbf16>
    %cst_279 = arith.constant dense<0.000000e+00> : vector<16x256xf32>
    %300 = tpu.matmul %297, %299, %cst_279 {dimension_numbers = #tpu.dot_dimension_numbers<[1], [0], [0], [1], [0, 0, 1, 1], [], []>} : vector<16x30xbf16>, vector<30x256xbf16>, vector<16x256xf32> -> vector<16x256xf32>
    %301 = arith.addf %295, %300 : vector<16x256xf32>
    %c15 = arith.constant 15 : index
    %c0_280 = arith.constant 0 : index
    %c0_281 = arith.constant 0 : index
    %302 = vector.load %arg1[%c15, %c0_280, %c0_281] : memref<30x16x30xbf16, #tpu.memory_space<vmem>>, vector<1x16x30xbf16>
    %303 = vector.shape_cast %302 : vector<1x16x30xbf16> to vector<16x30xbf16>
    %c2_282 = arith.constant 2 : index
    %c0_283 = arith.constant 0 : index
    %c0_284 = arith.constant 0 : index
    %304 = vector.load %arg2[%c2_282, %c0_283, %c0_284] : memref<3x30x256xbf16, #tpu.memory_space<vmem>>, vector<1x30x256xbf16>
    %305 = vector.shape_cast %304 : vector<1x30x256xbf16> to vector<30x256xbf16>
    %cst_285 = arith.constant dense<0.000000e+00> : vector<16x256xf32>
    %306 = tpu.matmul %303, %305, %cst_285 {dimension_numbers = #tpu.dot_dimension_numbers<[1], [0], [0], [1], [0, 0, 1, 1], [], []>} : vector<16x30xbf16>, vector<30x256xbf16>, vector<16x256xf32> -> vector<16x256xf32>
    %307 = arith.addf %301, %306 : vector<16x256xf32>
    %308 = vector.extract_strided_slice %307 {offsets = [0, 0], sizes = [16, 128], strides = [1, 1]} : vector<16x256xf32> to vector<16x128xf32>
    %309 = vector.extract_strided_slice %307 {offsets = [0, 128], sizes = [16, 128], strides = [1, 1]} : vector<16x256xf32> to vector<16x128xf32>
    %310 = arith.maximumf %308, %309 : vector<16x128xf32>
    %311 = arith.maximumf %290, %310 : vector<16x128xf32>
    %312 = vector.broadcast %0 : vector<1x128xf32> to vector<16x128xf32>
    %313 = arith.addf %311, %312 : vector<16x128xf32>
    %314 = arith.truncf %313 : vector<16x128xf32> to vector<16x128xbf16>
    %c0_286 = arith.constant 0 : index
    %c768 = arith.constant 768 : index
    %315 = vector.load %arg9[%c0_286, %c768] : memref<16x1792xbf16, #tpu.memory_space<vmem>>, vector<16x128xbf16>
    tpu.vector_store %arg9[%c0_286, %c768], %314 {strides = array<i32>} : memref<16x1792xbf16, #tpu.memory_space<vmem>>, vector<16x128xbf16>,
    %c14_287 = arith.constant 14 : index
    %c0_288 = arith.constant 0 : index
    %c0_289 = arith.constant 0 : index
    %316 = vector.load %arg1[%c14_287, %c0_288, %c0_289] : memref<30x16x30xbf16, #tpu.memory_space<vmem>>, vector<1x16x30xbf16>
    %317 = vector.shape_cast %316 : vector<1x16x30xbf16> to vector<16x30xbf16>
    %c0_290 = arith.constant 0 : index
    %c0_291 = arith.constant 0 : index
    %c0_292 = arith.constant 0 : index
    %318 = vector.load %arg2[%c0_290, %c0_291, %c0_292] : memref<3x30x256xbf16, #tpu.memory_space<vmem>>, vector<1x30x256xbf16>
    %319 = vector.shape_cast %318 : vector<1x30x256xbf16> to vector<30x256xbf16>
    %cst_293 = arith.constant dense<0.000000e+00> : vector<16x256xf32>
    %320 = tpu.matmul %317, %319, %cst_293 {dimension_numbers = #tpu.dot_dimension_numbers<[1], [0], [0], [1], [0, 0, 1, 1], [], []>} : vector<16x30xbf16>, vector<30x256xbf16>, vector<16x256xf32> -> vector<16x256xf32>
    %c15_294 = arith.constant 15 : index
    %c0_295 = arith.constant 0 : index
    %c0_296 = arith.constant 0 : index
    %321 = vector.load %arg1[%c15_294, %c0_295, %c0_296] : memref<30x16x30xbf16, #tpu.memory_space<vmem>>, vector<1x16x30xbf16>
    %322 = vector.shape_cast %321 : vector<1x16x30xbf16> to vector<16x30xbf16>
    %c1_297 = arith.constant 1 : index
    %c0_298 = arith.constant 0 : index
    %c0_299 = arith.constant 0 : index
    %323 = vector.load %arg2[%c1_297, %c0_298, %c0_299] : memref<3x30x256xbf16, #tpu.memory_space<vmem>>, vector<1x30x256xbf16>
    %324 = vector.shape_cast %323 : vector<1x30x256xbf16> to vector<30x256xbf16>
    %cst_300 = arith.constant dense<0.000000e+00> : vector<16x256xf32>
    %325 = tpu.matmul %322, %324, %cst_300 {dimension_numbers = #tpu.dot_dimension_numbers<[1], [0], [0], [1], [0, 0, 1, 1], [], []>} : vector<16x30xbf16>, vector<30x256xbf16>, vector<16x256xf32> -> vector<16x256xf32>
    %326 = arith.addf %320, %325 : vector<16x256xf32>
    %c16 = arith.constant 16 : index
    %c0_301 = arith.constant 0 : index
    %c0_302 = arith.constant 0 : index
    %327 = vector.load %arg1[%c16, %c0_301, %c0_302] : memref<30x16x30xbf16, #tpu.memory_space<vmem>>, vector<1x16x30xbf16>
    %328 = vector.shape_cast %327 : vector<1x16x30xbf16> to vector<16x30xbf16>
    %c2_303 = arith.constant 2 : index
    %c0_304 = arith.constant 0 : index
    %c0_305 = arith.constant 0 : index
    %329 = vector.load %arg2[%c2_303, %c0_304, %c0_305] : memref<3x30x256xbf16, #tpu.memory_space<vmem>>, vector<1x30x256xbf16>
    %330 = vector.shape_cast %329 : vector<1x30x256xbf16> to vector<30x256xbf16>
    %cst_306 = arith.constant dense<0.000000e+00> : vector<16x256xf32>
    %331 = tpu.matmul %328, %330, %cst_306 {dimension_numbers = #tpu.dot_dimension_numbers<[1], [0], [0], [1], [0, 0, 1, 1], [], []>} : vector<16x30xbf16>, vector<30x256xbf16>, vector<16x256xf32> -> vector<16x256xf32>
    %332 = arith.addf %326, %331 : vector<16x256xf32>
    %333 = vector.extract_strided_slice %332 {offsets = [0, 0], sizes = [16, 128], strides = [1, 1]} : vector<16x256xf32> to vector<16x128xf32>
    %334 = vector.extract_strided_slice %332 {offsets = [0, 128], sizes = [16, 128], strides = [1, 1]} : vector<16x256xf32> to vector<16x128xf32>
    %335 = arith.maximumf %333, %334 : vector<16x128xf32>
    %c15_307 = arith.constant 15 : index
    %c0_308 = arith.constant 0 : index
    %c0_309 = arith.constant 0 : index
    %336 = vector.load %arg1[%c15_307, %c0_308, %c0_309] : memref<30x16x30xbf16, #tpu.memory_space<vmem>>, vector<1x16x30xbf16>
    %337 = vector.shape_cast %336 : vector<1x16x30xbf16> to vector<16x30xbf16>
    %c0_310 = arith.constant 0 : index
    %c0_311 = arith.constant 0 : index
    %c0_312 = arith.constant 0 : index
    %338 = vector.load %arg2[%c0_310, %c0_311, %c0_312] : memref<3x30x256xbf16, #tpu.memory_space<vmem>>, vector<1x30x256xbf16>
    %339 = vector.shape_cast %338 : vector<1x30x256xbf16> to vector<30x256xbf16>
    %cst_313 = arith.constant dense<0.000000e+00> : vector<16x256xf32>
    %340 = tpu.matmul %337, %339, %cst_313 {dimension_numbers = #tpu.dot_dimension_numbers<[1], [0], [0], [1], [0, 0, 1, 1], [], []>} : vector<16x30xbf16>, vector<30x256xbf16>, vector<16x256xf32> -> vector<16x256xf32>
    %c16_314 = arith.constant 16 : index
    %c0_315 = arith.constant 0 : index
    %c0_316 = arith.constant 0 : index
    %341 = vector.load %arg1[%c16_314, %c0_315, %c0_316] : memref<30x16x30xbf16, #tpu.memory_space<vmem>>, vector<1x16x30xbf16>
    %342 = vector.shape_cast %341 : vector<1x16x30xbf16> to vector<16x30xbf16>
    %c1_317 = arith.constant 1 : index
    %c0_318 = arith.constant 0 : index
    %c0_319 = arith.constant 0 : index
    %343 = vector.load %arg2[%c1_317, %c0_318, %c0_319] : memref<3x30x256xbf16, #tpu.memory_space<vmem>>, vector<1x30x256xbf16>
    %344 = vector.shape_cast %343 : vector<1x30x256xbf16> to vector<30x256xbf16>
    %cst_320 = arith.constant dense<0.000000e+00> : vector<16x256xf32>
    %345 = tpu.matmul %342, %344, %cst_320 {dimension_numbers = #tpu.dot_dimension_numbers<[1], [0], [0], [1], [0, 0, 1, 1], [], []>} : vector<16x30xbf16>, vector<30x256xbf16>, vector<16x256xf32> -> vector<16x256xf32>
    %346 = arith.addf %340, %345 : vector<16x256xf32>
    %c17 = arith.constant 17 : index
    %c0_321 = arith.constant 0 : index
    %c0_322 = arith.constant 0 : index
    %347 = vector.load %arg1[%c17, %c0_321, %c0_322] : memref<30x16x30xbf16, #tpu.memory_space<vmem>>, vector<1x16x30xbf16>
    %348 = vector.shape_cast %347 : vector<1x16x30xbf16> to vector<16x30xbf16>
    %c2_323 = arith.constant 2 : index
    %c0_324 = arith.constant 0 : index
    %c0_325 = arith.constant 0 : index
    %349 = vector.load %arg2[%c2_323, %c0_324, %c0_325] : memref<3x30x256xbf16, #tpu.memory_space<vmem>>, vector<1x30x256xbf16>
    %350 = vector.shape_cast %349 : vector<1x30x256xbf16> to vector<30x256xbf16>
    %cst_326 = arith.constant dense<0.000000e+00> : vector<16x256xf32>
    %351 = tpu.matmul %348, %350, %cst_326 {dimension_numbers = #tpu.dot_dimension_numbers<[1], [0], [0], [1], [0, 0, 1, 1], [], []>} : vector<16x30xbf16>, vector<30x256xbf16>, vector<16x256xf32> -> vector<16x256xf32>
    %352 = arith.addf %346, %351 : vector<16x256xf32>
    %353 = vector.extract_strided_slice %352 {offsets = [0, 0], sizes = [16, 128], strides = [1, 1]} : vector<16x256xf32> to vector<16x128xf32>
    %354 = vector.extract_strided_slice %352 {offsets = [0, 128], sizes = [16, 128], strides = [1, 1]} : vector<16x256xf32> to vector<16x128xf32>
    %355 = arith.maximumf %353, %354 : vector<16x128xf32>
    %356 = arith.maximumf %335, %355 : vector<16x128xf32>
    %357 = vector.broadcast %0 : vector<1x128xf32> to vector<16x128xf32>
    %358 = arith.addf %356, %357 : vector<16x128xf32>
    %359 = arith.truncf %358 : vector<16x128xf32> to vector<16x128xbf16>
    %c0_327 = arith.constant 0 : index
    %c896 = arith.constant 896 : index
    %360 = vector.load %arg9[%c0_327, %c896] : memref<16x1792xbf16, #tpu.memory_space<vmem>>, vector<16x128xbf16>
    tpu.vector_store %arg9[%c0_327, %c896], %359 {strides = array<i32>} : memref<16x1792xbf16, #tpu.memory_space<vmem>>, vector<16x128xbf16>,
    %c16_328 = arith.constant 16 : index
    %c0_329 = arith.constant 0 : index
    %c0_330 = arith.constant 0 : index
    %361 = vector.load %arg1[%c16_328, %c0_329, %c0_330] : memref<30x16x30xbf16, #tpu.memory_space<vmem>>, vector<1x16x30xbf16>
    %362 = vector.shape_cast %361 : vector<1x16x30xbf16> to vector<16x30xbf16>
    %c0_331 = arith.constant 0 : index
    %c0_332 = arith.constant 0 : index
    %c0_333 = arith.constant 0 : index
    %363 = vector.load %arg2[%c0_331, %c0_332, %c0_333] : memref<3x30x256xbf16, #tpu.memory_space<vmem>>, vector<1x30x256xbf16>
    %364 = vector.shape_cast %363 : vector<1x30x256xbf16> to vector<30x256xbf16>
    %cst_334 = arith.constant dense<0.000000e+00> : vector<16x256xf32>
    %365 = tpu.matmul %362, %364, %cst_334 {dimension_numbers = #tpu.dot_dimension_numbers<[1], [0], [0], [1], [0, 0, 1, 1], [], []>} : vector<16x30xbf16>, vector<30x256xbf16>, vector<16x256xf32> -> vector<16x256xf32>
    %c17_335 = arith.constant 17 : index
    %c0_336 = arith.constant 0 : index
    %c0_337 = arith.constant 0 : index
    %366 = vector.load %arg1[%c17_335, %c0_336, %c0_337] : memref<30x16x30xbf16, #tpu.memory_space<vmem>>, vector<1x16x30xbf16>
    %367 = vector.shape_cast %366 : vector<1x16x30xbf16> to vector<16x30xbf16>
    %c1_338 = arith.constant 1 : index
    %c0_339 = arith.constant 0 : index
    %c0_340 = arith.constant 0 : index
    %368 = vector.load %arg2[%c1_338, %c0_339, %c0_340] : memref<3x30x256xbf16, #tpu.memory_space<vmem>>, vector<1x30x256xbf16>
    %369 = vector.shape_cast %368 : vector<1x30x256xbf16> to vector<30x256xbf16>
    %cst_341 = arith.constant dense<0.000000e+00> : vector<16x256xf32>
    %370 = tpu.matmul %367, %369, %cst_341 {dimension_numbers = #tpu.dot_dimension_numbers<[1], [0], [0], [1], [0, 0, 1, 1], [], []>} : vector<16x30xbf16>, vector<30x256xbf16>, vector<16x256xf32> -> vector<16x256xf32>
    %371 = arith.addf %365, %370 : vector<16x256xf32>
    %c18 = arith.constant 18 : index
    %c0_342 = arith.constant 0 : index
    %c0_343 = arith.constant 0 : index
    %372 = vector.load %arg1[%c18, %c0_342, %c0_343] : memref<30x16x30xbf16, #tpu.memory_space<vmem>>, vector<1x16x30xbf16>
    %373 = vector.shape_cast %372 : vector<1x16x30xbf16> to vector<16x30xbf16>
    %c2_344 = arith.constant 2 : index
    %c0_345 = arith.constant 0 : index
    %c0_346 = arith.constant 0 : index
    %374 = vector.load %arg2[%c2_344, %c0_345, %c0_346] : memref<3x30x256xbf16, #tpu.memory_space<vmem>>, vector<1x30x256xbf16>
    %375 = vector.shape_cast %374 : vector<1x30x256xbf16> to vector<30x256xbf16>
    %cst_347 = arith.constant dense<0.000000e+00> : vector<16x256xf32>
    %376 = tpu.matmul %373, %375, %cst_347 {dimension_numbers = #tpu.dot_dimension_numbers<[1], [0], [0], [1], [0, 0, 1, 1], [], []>} : vector<16x30xbf16>, vector<30x256xbf16>, vector<16x256xf32> -> vector<16x256xf32>
    %377 = arith.addf %371, %376 : vector<16x256xf32>
    %378 = vector.extract_strided_slice %377 {offsets = [0, 0], sizes = [16, 128], strides = [1, 1]} : vector<16x256xf32> to vector<16x128xf32>
    %379 = vector.extract_strided_slice %377 {offsets = [0, 128], sizes = [16, 128], strides = [1, 1]} : vector<16x256xf32> to vector<16x128xf32>
    %380 = arith.maximumf %378, %379 : vector<16x128xf32>
    %c17_348 = arith.constant 17 : index
    %c0_349 = arith.constant 0 : index
    %c0_350 = arith.constant 0 : index
    %381 = vector.load %arg1[%c17_348, %c0_349, %c0_350] : memref<30x16x30xbf16, #tpu.memory_space<vmem>>, vector<1x16x30xbf16>
    %382 = vector.shape_cast %381 : vector<1x16x30xbf16> to vector<16x30xbf16>
    %c0_351 = arith.constant 0 : index
    %c0_352 = arith.constant 0 : index
    %c0_353 = arith.constant 0 : index
    %383 = vector.load %arg2[%c0_351, %c0_352, %c0_353] : memref<3x30x256xbf16, #tpu.memory_space<vmem>>, vector<1x30x256xbf16>
    %384 = vector.shape_cast %383 : vector<1x30x256xbf16> to vector<30x256xbf16>
    %cst_354 = arith.constant dense<0.000000e+00> : vector<16x256xf32>
    %385 = tpu.matmul %382, %384, %cst_354 {dimension_numbers = #tpu.dot_dimension_numbers<[1], [0], [0], [1], [0, 0, 1, 1], [], []>} : vector<16x30xbf16>, vector<30x256xbf16>, vector<16x256xf32> -> vector<16x256xf32>
    %c18_355 = arith.constant 18 : index
    %c0_356 = arith.constant 0 : index
    %c0_357 = arith.constant 0 : index
    %386 = vector.load %arg1[%c18_355, %c0_356, %c0_357] : memref<30x16x30xbf16, #tpu.memory_space<vmem>>, vector<1x16x30xbf16>
    %387 = vector.shape_cast %386 : vector<1x16x30xbf16> to vector<16x30xbf16>
    %c1_358 = arith.constant 1 : index
    %c0_359 = arith.constant 0 : index
    %c0_360 = arith.constant 0 : index
    %388 = vector.load %arg2[%c1_358, %c0_359, %c0_360] : memref<3x30x256xbf16, #tpu.memory_space<vmem>>, vector<1x30x256xbf16>
    %389 = vector.shape_cast %388 : vector<1x30x256xbf16> to vector<30x256xbf16>
    %cst_361 = arith.constant dense<0.000000e+00> : vector<16x256xf32>
    %390 = tpu.matmul %387, %389, %cst_361 {dimension_numbers = #tpu.dot_dimension_numbers<[1], [0], [0], [1], [0, 0, 1, 1], [], []>} : vector<16x30xbf16>, vector<30x256xbf16>, vector<16x256xf32> -> vector<16x256xf32>
    %391 = arith.addf %385, %390 : vector<16x256xf32>
    %c19 = arith.constant 19 : index
    %c0_362 = arith.constant 0 : index
    %c0_363 = arith.constant 0 : index
    %392 = vector.load %arg1[%c19, %c0_362, %c0_363] : memref<30x16x30xbf16, #tpu.memory_space<vmem>>, vector<1x16x30xbf16>
    %393 = vector.shape_cast %392 : vector<1x16x30xbf16> to vector<16x30xbf16>
    %c2_364 = arith.constant 2 : index
    %c0_365 = arith.constant 0 : index
    %c0_366 = arith.constant 0 : index
    %394 = vector.load %arg2[%c2_364, %c0_365, %c0_366] : memref<3x30x256xbf16, #tpu.memory_space<vmem>>, vector<1x30x256xbf16>
    %395 = vector.shape_cast %394 : vector<1x30x256xbf16> to vector<30x256xbf16>
    %cst_367 = arith.constant dense<0.000000e+00> : vector<16x256xf32>
    %396 = tpu.matmul %393, %395, %cst_367 {dimension_numbers = #tpu.dot_dimension_numbers<[1], [0], [0], [1], [0, 0, 1, 1], [], []>} : vector<16x30xbf16>, vector<30x256xbf16>, vector<16x256xf32> -> vector<16x256xf32>
    %397 = arith.addf %391, %396 : vector<16x256xf32>
    %398 = vector.extract_strided_slice %397 {offsets = [0, 0], sizes = [16, 128], strides = [1, 1]} : vector<16x256xf32> to vector<16x128xf32>
    %399 = vector.extract_strided_slice %397 {offsets = [0, 128], sizes = [16, 128], strides = [1, 1]} : vector<16x256xf32> to vector<16x128xf32>
    %400 = arith.maximumf %398, %399 : vector<16x128xf32>
    %401 = arith.maximumf %380, %400 : vector<16x128xf32>
    %402 = vector.broadcast %0 : vector<1x128xf32> to vector<16x128xf32>
    %403 = arith.addf %401, %402 : vector<16x128xf32>
    %404 = arith.truncf %403 : vector<16x128xf32> to vector<16x128xbf16>
    %c0_368 = arith.constant 0 : index
    %c1024 = arith.constant 1024 : index
    %405 = vector.load %arg9[%c0_368, %c1024] : memref<16x1792xbf16, #tpu.memory_space<vmem>>, vector<16x128xbf16>
    tpu.vector_store %arg9[%c0_368, %c1024], %404 {strides = array<i32>} : memref<16x1792xbf16, #tpu.memory_space<vmem>>, vector<16x128xbf16>,
    %c18_369 = arith.constant 18 : index
    %c0_370 = arith.constant 0 : index
    %c0_371 = arith.constant 0 : index
    %406 = vector.load %arg1[%c18_369, %c0_370, %c0_371] : memref<30x16x30xbf16, #tpu.memory_space<vmem>>, vector<1x16x30xbf16>
    %407 = vector.shape_cast %406 : vector<1x16x30xbf16> to vector<16x30xbf16>
    %c0_372 = arith.constant 0 : index
    %c0_373 = arith.constant 0 : index
    %c0_374 = arith.constant 0 : index
    %408 = vector.load %arg2[%c0_372, %c0_373, %c0_374] : memref<3x30x256xbf16, #tpu.memory_space<vmem>>, vector<1x30x256xbf16>
    %409 = vector.shape_cast %408 : vector<1x30x256xbf16> to vector<30x256xbf16>
    %cst_375 = arith.constant dense<0.000000e+00> : vector<16x256xf32>
    %410 = tpu.matmul %407, %409, %cst_375 {dimension_numbers = #tpu.dot_dimension_numbers<[1], [0], [0], [1], [0, 0, 1, 1], [], []>} : vector<16x30xbf16>, vector<30x256xbf16>, vector<16x256xf32> -> vector<16x256xf32>
    %c19_376 = arith.constant 19 : index
    %c0_377 = arith.constant 0 : index
    %c0_378 = arith.constant 0 : index
    %411 = vector.load %arg1[%c19_376, %c0_377, %c0_378] : memref<30x16x30xbf16, #tpu.memory_space<vmem>>, vector<1x16x30xbf16>
    %412 = vector.shape_cast %411 : vector<1x16x30xbf16> to vector<16x30xbf16>
    %c1_379 = arith.constant 1 : index
    %c0_380 = arith.constant 0 : index
    %c0_381 = arith.constant 0 : index
    %413 = vector.load %arg2[%c1_379, %c0_380, %c0_381] : memref<3x30x256xbf16, #tpu.memory_space<vmem>>, vector<1x30x256xbf16>
    %414 = vector.shape_cast %413 : vector<1x30x256xbf16> to vector<30x256xbf16>
    %cst_382 = arith.constant dense<0.000000e+00> : vector<16x256xf32>
    %415 = tpu.matmul %412, %414, %cst_382 {dimension_numbers = #tpu.dot_dimension_numbers<[1], [0], [0], [1], [0, 0, 1, 1], [], []>} : vector<16x30xbf16>, vector<30x256xbf16>, vector<16x256xf32> -> vector<16x256xf32>
    %416 = arith.addf %410, %415 : vector<16x256xf32>
    %c20 = arith.constant 20 : index
    %c0_383 = arith.constant 0 : index
    %c0_384 = arith.constant 0 : index
    %417 = vector.load %arg1[%c20, %c0_383, %c0_384] : memref<30x16x30xbf16, #tpu.memory_space<vmem>>, vector<1x16x30xbf16>
    %418 = vector.shape_cast %417 : vector<1x16x30xbf16> to vector<16x30xbf16>
    %c2_385 = arith.constant 2 : index
    %c0_386 = arith.constant 0 : index
    %c0_387 = arith.constant 0 : index
    %419 = vector.load %arg2[%c2_385, %c0_386, %c0_387] : memref<3x30x256xbf16, #tpu.memory_space<vmem>>, vector<1x30x256xbf16>
    %420 = vector.shape_cast %419 : vector<1x30x256xbf16> to vector<30x256xbf16>
    %cst_388 = arith.constant dense<0.000000e+00> : vector<16x256xf32>
    %421 = tpu.matmul %418, %420, %cst_388 {dimension_numbers = #tpu.dot_dimension_numbers<[1], [0], [0], [1], [0, 0, 1, 1], [], []>} : vector<16x30xbf16>, vector<30x256xbf16>, vector<16x256xf32> -> vector<16x256xf32>
    %422 = arith.addf %416, %421 : vector<16x256xf32>
    %423 = vector.extract_strided_slice %422 {offsets = [0, 0], sizes = [16, 128], strides = [1, 1]} : vector<16x256xf32> to vector<16x128xf32>
    %424 = vector.extract_strided_slice %422 {offsets = [0, 128], sizes = [16, 128], strides = [1, 1]} : vector<16x256xf32> to vector<16x128xf32>
    %425 = arith.maximumf %423, %424 : vector<16x128xf32>
    %c19_389 = arith.constant 19 : index
    %c0_390 = arith.constant 0 : index
    %c0_391 = arith.constant 0 : index
    %426 = vector.load %arg1[%c19_389, %c0_390, %c0_391] : memref<30x16x30xbf16, #tpu.memory_space<vmem>>, vector<1x16x30xbf16>
    %427 = vector.shape_cast %426 : vector<1x16x30xbf16> to vector<16x30xbf16>
    %c0_392 = arith.constant 0 : index
    %c0_393 = arith.constant 0 : index
    %c0_394 = arith.constant 0 : index
    %428 = vector.load %arg2[%c0_392, %c0_393, %c0_394] : memref<3x30x256xbf16, #tpu.memory_space<vmem>>, vector<1x30x256xbf16>
    %429 = vector.shape_cast %428 : vector<1x30x256xbf16> to vector<30x256xbf16>
    %cst_395 = arith.constant dense<0.000000e+00> : vector<16x256xf32>
    %430 = tpu.matmul %427, %429, %cst_395 {dimension_numbers = #tpu.dot_dimension_numbers<[1], [0], [0], [1], [0, 0, 1, 1], [], []>} : vector<16x30xbf16>, vector<30x256xbf16>, vector<16x256xf32> -> vector<16x256xf32>
    %c20_396 = arith.constant 20 : index
    %c0_397 = arith.constant 0 : index
    %c0_398 = arith.constant 0 : index
    %431 = vector.load %arg1[%c20_396, %c0_397, %c0_398] : memref<30x16x30xbf16, #tpu.memory_space<vmem>>, vector<1x16x30xbf16>
    %432 = vector.shape_cast %431 : vector<1x16x30xbf16> to vector<16x30xbf16>
    %c1_399 = arith.constant 1 : index
    %c0_400 = arith.constant 0 : index
    %c0_401 = arith.constant 0 : index
    %433 = vector.load %arg2[%c1_399, %c0_400, %c0_401] : memref<3x30x256xbf16, #tpu.memory_space<vmem>>, vector<1x30x256xbf16>
    %434 = vector.shape_cast %433 : vector<1x30x256xbf16> to vector<30x256xbf16>
    %cst_402 = arith.constant dense<0.000000e+00> : vector<16x256xf32>
    %435 = tpu.matmul %432, %434, %cst_402 {dimension_numbers = #tpu.dot_dimension_numbers<[1], [0], [0], [1], [0, 0, 1, 1], [], []>} : vector<16x30xbf16>, vector<30x256xbf16>, vector<16x256xf32> -> vector<16x256xf32>
    %436 = arith.addf %430, %435 : vector<16x256xf32>
    %c21 = arith.constant 21 : index
    %c0_403 = arith.constant 0 : index
    %c0_404 = arith.constant 0 : index
    %437 = vector.load %arg1[%c21, %c0_403, %c0_404] : memref<30x16x30xbf16, #tpu.memory_space<vmem>>, vector<1x16x30xbf16>
    %438 = vector.shape_cast %437 : vector<1x16x30xbf16> to vector<16x30xbf16>
    %c2_405 = arith.constant 2 : index
    %c0_406 = arith.constant 0 : index
    %c0_407 = arith.constant 0 : index
    %439 = vector.load %arg2[%c2_405, %c0_406, %c0_407] : memref<3x30x256xbf16, #tpu.memory_space<vmem>>, vector<1x30x256xbf16>
    %440 = vector.shape_cast %439 : vector<1x30x256xbf16> to vector<30x256xbf16>
    %cst_408 = arith.constant dense<0.000000e+00> : vector<16x256xf32>
    %441 = tpu.matmul %438, %440, %cst_408 {dimension_numbers = #tpu.dot_dimension_numbers<[1], [0], [0], [1], [0, 0, 1, 1], [], []>} : vector<16x30xbf16>, vector<30x256xbf16>, vector<16x256xf32> -> vector<16x256xf32>
    %442 = arith.addf %436, %441 : vector<16x256xf32>
    %443 = vector.extract_strided_slice %442 {offsets = [0, 0], sizes = [16, 128], strides = [1, 1]} : vector<16x256xf32> to vector<16x128xf32>
    %444 = vector.extract_strided_slice %442 {offsets = [0, 128], sizes = [16, 128], strides = [1, 1]} : vector<16x256xf32> to vector<16x128xf32>
    %445 = arith.maximumf %443, %444 : vector<16x128xf32>
    %446 = arith.maximumf %425, %445 : vector<16x128xf32>
    %447 = vector.broadcast %0 : vector<1x128xf32> to vector<16x128xf32>
    %448 = arith.addf %446, %447 : vector<16x128xf32>
    %449 = arith.truncf %448 : vector<16x128xf32> to vector<16x128xbf16>
    %c0_409 = arith.constant 0 : index
    %c1152 = arith.constant 1152 : index
    %450 = vector.load %arg9[%c0_409, %c1152] : memref<16x1792xbf16, #tpu.memory_space<vmem>>, vector<16x128xbf16>
    tpu.vector_store %arg9[%c0_409, %c1152], %449 {strides = array<i32>} : memref<16x1792xbf16, #tpu.memory_space<vmem>>, vector<16x128xbf16>,
    %c20_410 = arith.constant 20 : index
    %c0_411 = arith.constant 0 : index
    %c0_412 = arith.constant 0 : index
    %451 = vector.load %arg1[%c20_410, %c0_411, %c0_412] : memref<30x16x30xbf16, #tpu.memory_space<vmem>>, vector<1x16x30xbf16>
    %452 = vector.shape_cast %451 : vector<1x16x30xbf16> to vector<16x30xbf16>
    %c0_413 = arith.constant 0 : index
    %c0_414 = arith.constant 0 : index
    %c0_415 = arith.constant 0 : index
    %453 = vector.load %arg2[%c0_413, %c0_414, %c0_415] : memref<3x30x256xbf16, #tpu.memory_space<vmem>>, vector<1x30x256xbf16>
    %454 = vector.shape_cast %453 : vector<1x30x256xbf16> to vector<30x256xbf16>
    %cst_416 = arith.constant dense<0.000000e+00> : vector<16x256xf32>
    %455 = tpu.matmul %452, %454, %cst_416 {dimension_numbers = #tpu.dot_dimension_numbers<[1], [0], [0], [1], [0, 0, 1, 1], [], []>} : vector<16x30xbf16>, vector<30x256xbf16>, vector<16x256xf32> -> vector<16x256xf32>
    %c21_417 = arith.constant 21 : index
    %c0_418 = arith.constant 0 : index
    %c0_419 = arith.constant 0 : index
    %456 = vector.load %arg1[%c21_417, %c0_418, %c0_419] : memref<30x16x30xbf16, #tpu.memory_space<vmem>>, vector<1x16x30xbf16>
    %457 = vector.shape_cast %456 : vector<1x16x30xbf16> to vector<16x30xbf16>
    %c1_420 = arith.constant 1 : index
    %c0_421 = arith.constant 0 : index
    %c0_422 = arith.constant 0 : index
    %458 = vector.load %arg2[%c1_420, %c0_421, %c0_422] : memref<3x30x256xbf16, #tpu.memory_space<vmem>>, vector<1x30x256xbf16>
    %459 = vector.shape_cast %458 : vector<1x30x256xbf16> to vector<30x256xbf16>
    %cst_423 = arith.constant dense<0.000000e+00> : vector<16x256xf32>
    %460 = tpu.matmul %457, %459, %cst_423 {dimension_numbers = #tpu.dot_dimension_numbers<[1], [0], [0], [1], [0, 0, 1, 1], [], []>} : vector<16x30xbf16>, vector<30x256xbf16>, vector<16x256xf32> -> vector<16x256xf32>
    %461 = arith.addf %455, %460 : vector<16x256xf32>
    %c22 = arith.constant 22 : index
    %c0_424 = arith.constant 0 : index
    %c0_425 = arith.constant 0 : index
    %462 = vector.load %arg1[%c22, %c0_424, %c0_425] : memref<30x16x30xbf16, #tpu.memory_space<vmem>>, vector<1x16x30xbf16>
    %463 = vector.shape_cast %462 : vector<1x16x30xbf16> to vector<16x30xbf16>
    %c2_426 = arith.constant 2 : index
    %c0_427 = arith.constant 0 : index
    %c0_428 = arith.constant 0 : index
    %464 = vector.load %arg2[%c2_426, %c0_427, %c0_428] : memref<3x30x256xbf16, #tpu.memory_space<vmem>>, vector<1x30x256xbf16>
    %465 = vector.shape_cast %464 : vector<1x30x256xbf16> to vector<30x256xbf16>
    %cst_429 = arith.constant dense<0.000000e+00> : vector<16x256xf32>
    %466 = tpu.matmul %463, %465, %cst_429 {dimension_numbers = #tpu.dot_dimension_numbers<[1], [0], [0], [1], [0, 0, 1, 1], [], []>} : vector<16x30xbf16>, vector<30x256xbf16>, vector<16x256xf32> -> vector<16x256xf32>
    %467 = arith.addf %461, %466 : vector<16x256xf32>
    %468 = vector.extract_strided_slice %467 {offsets = [0, 0], sizes = [16, 128], strides = [1, 1]} : vector<16x256xf32> to vector<16x128xf32>
    %469 = vector.extract_strided_slice %467 {offsets = [0, 128], sizes = [16, 128], strides = [1, 1]} : vector<16x256xf32> to vector<16x128xf32>
    %470 = arith.maximumf %468, %469 : vector<16x128xf32>
    %c21_430 = arith.constant 21 : index
    %c0_431 = arith.constant 0 : index
    %c0_432 = arith.constant 0 : index
    %471 = vector.load %arg1[%c21_430, %c0_431, %c0_432] : memref<30x16x30xbf16, #tpu.memory_space<vmem>>, vector<1x16x30xbf16>
    %472 = vector.shape_cast %471 : vector<1x16x30xbf16> to vector<16x30xbf16>
    %c0_433 = arith.constant 0 : index
    %c0_434 = arith.constant 0 : index
    %c0_435 = arith.constant 0 : index
    %473 = vector.load %arg2[%c0_433, %c0_434, %c0_435] : memref<3x30x256xbf16, #tpu.memory_space<vmem>>, vector<1x30x256xbf16>
    %474 = vector.shape_cast %473 : vector<1x30x256xbf16> to vector<30x256xbf16>
    %cst_436 = arith.constant dense<0.000000e+00> : vector<16x256xf32>
    %475 = tpu.matmul %472, %474, %cst_436 {dimension_numbers = #tpu.dot_dimension_numbers<[1], [0], [0], [1], [0, 0, 1, 1], [], []>} : vector<16x30xbf16>, vector<30x256xbf16>, vector<16x256xf32> -> vector<16x256xf32>
    %c22_437 = arith.constant 22 : index
    %c0_438 = arith.constant 0 : index
    %c0_439 = arith.constant 0 : index
    %476 = vector.load %arg1[%c22_437, %c0_438, %c0_439] : memref<30x16x30xbf16, #tpu.memory_space<vmem>>, vector<1x16x30xbf16>
    %477 = vector.shape_cast %476 : vector<1x16x30xbf16> to vector<16x30xbf16>
    %c1_440 = arith.constant 1 : index
    %c0_441 = arith.constant 0 : index
    %c0_442 = arith.constant 0 : index
    %478 = vector.load %arg2[%c1_440, %c0_441, %c0_442] : memref<3x30x256xbf16, #tpu.memory_space<vmem>>, vector<1x30x256xbf16>
    %479 = vector.shape_cast %478 : vector<1x30x256xbf16> to vector<30x256xbf16>
    %cst_443 = arith.constant dense<0.000000e+00> : vector<16x256xf32>
    %480 = tpu.matmul %477, %479, %cst_443 {dimension_numbers = #tpu.dot_dimension_numbers<[1], [0], [0], [1], [0, 0, 1, 1], [], []>} : vector<16x30xbf16>, vector<30x256xbf16>, vector<16x256xf32> -> vector<16x256xf32>
    %481 = arith.addf %475, %480 : vector<16x256xf32>
    %c23 = arith.constant 23 : index
    %c0_444 = arith.constant 0 : index
    %c0_445 = arith.constant 0 : index
    %482 = vector.load %arg1[%c23, %c0_444, %c0_445] : memref<30x16x30xbf16, #tpu.memory_space<vmem>>, vector<1x16x30xbf16>
    %483 = vector.shape_cast %482 : vector<1x16x30xbf16> to vector<16x30xbf16>
    %c2_446 = arith.constant 2 : index
    %c0_447 = arith.constant 0 : index
    %c0_448 = arith.constant 0 : index
    %484 = vector.load %arg2[%c2_446, %c0_447, %c0_448] : memref<3x30x256xbf16, #tpu.memory_space<vmem>>, vector<1x30x256xbf16>
    %485 = vector.shape_cast %484 : vector<1x30x256xbf16> to vector<30x256xbf16>
    %cst_449 = arith.constant dense<0.000000e+00> : vector<16x256xf32>
    %486 = tpu.matmul %483, %485, %cst_449 {dimension_numbers = #tpu.dot_dimension_numbers<[1], [0], [0], [1], [0, 0, 1, 1], [], []>} : vector<16x30xbf16>, vector<30x256xbf16>, vector<16x256xf32> -> vector<16x256xf32>
    %487 = arith.addf %481, %486 : vector<16x256xf32>
    %488 = vector.extract_strided_slice %487 {offsets = [0, 0], sizes = [16, 128], strides = [1, 1]} : vector<16x256xf32> to vector<16x128xf32>
    %489 = vector.extract_strided_slice %487 {offsets = [0, 128], sizes = [16, 128], strides = [1, 1]} : vector<16x256xf32> to vector<16x128xf32>
    %490 = arith.maximumf %488, %489 : vector<16x128xf32>
    %491 = arith.maximumf %470, %490 : vector<16x128xf32>
    %492 = vector.broadcast %0 : vector<1x128xf32> to vector<16x128xf32>
    %493 = arith.addf %491, %492 : vector<16x128xf32>
    %494 = arith.truncf %493 : vector<16x128xf32> to vector<16x128xbf16>
    %c0_450 = arith.constant 0 : index
    %c1280 = arith.constant 1280 : index
    %495 = vector.load %arg9[%c0_450, %c1280] : memref<16x1792xbf16, #tpu.memory_space<vmem>>, vector<16x128xbf16>
    tpu.vector_store %arg9[%c0_450, %c1280], %494 {strides = array<i32>} : memref<16x1792xbf16, #tpu.memory_space<vmem>>, vector<16x128xbf16>,
    %c22_451 = arith.constant 22 : index
    %c0_452 = arith.constant 0 : index
    %c0_453 = arith.constant 0 : index
    %496 = vector.load %arg1[%c22_451, %c0_452, %c0_453] : memref<30x16x30xbf16, #tpu.memory_space<vmem>>, vector<1x16x30xbf16>
    %497 = vector.shape_cast %496 : vector<1x16x30xbf16> to vector<16x30xbf16>
    %c0_454 = arith.constant 0 : index
    %c0_455 = arith.constant 0 : index
    %c0_456 = arith.constant 0 : index
    %498 = vector.load %arg2[%c0_454, %c0_455, %c0_456] : memref<3x30x256xbf16, #tpu.memory_space<vmem>>, vector<1x30x256xbf16>
    %499 = vector.shape_cast %498 : vector<1x30x256xbf16> to vector<30x256xbf16>
    %cst_457 = arith.constant dense<0.000000e+00> : vector<16x256xf32>
    %500 = tpu.matmul %497, %499, %cst_457 {dimension_numbers = #tpu.dot_dimension_numbers<[1], [0], [0], [1], [0, 0, 1, 1], [], []>} : vector<16x30xbf16>, vector<30x256xbf16>, vector<16x256xf32> -> vector<16x256xf32>
    %c23_458 = arith.constant 23 : index
    %c0_459 = arith.constant 0 : index
    %c0_460 = arith.constant 0 : index
    %501 = vector.load %arg1[%c23_458, %c0_459, %c0_460] : memref<30x16x30xbf16, #tpu.memory_space<vmem>>, vector<1x16x30xbf16>
    %502 = vector.shape_cast %501 : vector<1x16x30xbf16> to vector<16x30xbf16>
    %c1_461 = arith.constant 1 : index
    %c0_462 = arith.constant 0 : index
    %c0_463 = arith.constant 0 : index
    %503 = vector.load %arg2[%c1_461, %c0_462, %c0_463] : memref<3x30x256xbf16, #tpu.memory_space<vmem>>, vector<1x30x256xbf16>
    %504 = vector.shape_cast %503 : vector<1x30x256xbf16> to vector<30x256xbf16>
    %cst_464 = arith.constant dense<0.000000e+00> : vector<16x256xf32>
    %505 = tpu.matmul %502, %504, %cst_464 {dimension_numbers = #tpu.dot_dimension_numbers<[1], [0], [0], [1], [0, 0, 1, 1], [], []>} : vector<16x30xbf16>, vector<30x256xbf16>, vector<16x256xf32> -> vector<16x256xf32>
    %506 = arith.addf %500, %505 : vector<16x256xf32>
    %c24 = arith.constant 24 : index
    %c0_465 = arith.constant 0 : index
    %c0_466 = arith.constant 0 : index
    %507 = vector.load %arg1[%c24, %c0_465, %c0_466] : memref<30x16x30xbf16, #tpu.memory_space<vmem>>, vector<1x16x30xbf16>
    %508 = vector.shape_cast %507 : vector<1x16x30xbf16> to vector<16x30xbf16>
    %c2_467 = arith.constant 2 : index
    %c0_468 = arith.constant 0 : index
    %c0_469 = arith.constant 0 : index
    %509 = vector.load %arg2[%c2_467, %c0_468, %c0_469] : memref<3x30x256xbf16, #tpu.memory_space<vmem>>, vector<1x30x256xbf16>
    %510 = vector.shape_cast %509 : vector<1x30x256xbf16> to vector<30x256xbf16>
    %cst_470 = arith.constant dense<0.000000e+00> : vector<16x256xf32>
    %511 = tpu.matmul %508, %510, %cst_470 {dimension_numbers = #tpu.dot_dimension_numbers<[1], [0], [0], [1], [0, 0, 1, 1], [], []>} : vector<16x30xbf16>, vector<30x256xbf16>, vector<16x256xf32> -> vector<16x256xf32>
    %512 = arith.addf %506, %511 : vector<16x256xf32>
    %513 = vector.extract_strided_slice %512 {offsets = [0, 0], sizes = [16, 128], strides = [1, 1]} : vector<16x256xf32> to vector<16x128xf32>
    %514 = vector.extract_strided_slice %512 {offsets = [0, 128], sizes = [16, 128], strides = [1, 1]} : vector<16x256xf32> to vector<16x128xf32>
    %515 = arith.maximumf %513, %514 : vector<16x128xf32>
    %c23_471 = arith.constant 23 : index
    %c0_472 = arith.constant 0 : index
    %c0_473 = arith.constant 0 : index
    %516 = vector.load %arg1[%c23_471, %c0_472, %c0_473] : memref<30x16x30xbf16, #tpu.memory_space<vmem>>, vector<1x16x30xbf16>
    %517 = vector.shape_cast %516 : vector<1x16x30xbf16> to vector<16x30xbf16>
    %c0_474 = arith.constant 0 : index
    %c0_475 = arith.constant 0 : index
    %c0_476 = arith.constant 0 : index
    %518 = vector.load %arg2[%c0_474, %c0_475, %c0_476] : memref<3x30x256xbf16, #tpu.memory_space<vmem>>, vector<1x30x256xbf16>
    %519 = vector.shape_cast %518 : vector<1x30x256xbf16> to vector<30x256xbf16>
    %cst_477 = arith.constant dense<0.000000e+00> : vector<16x256xf32>
    %520 = tpu.matmul %517, %519, %cst_477 {dimension_numbers = #tpu.dot_dimension_numbers<[1], [0], [0], [1], [0, 0, 1, 1], [], []>} : vector<16x30xbf16>, vector<30x256xbf16>, vector<16x256xf32> -> vector<16x256xf32>
    %c24_478 = arith.constant 24 : index
    %c0_479 = arith.constant 0 : index
    %c0_480 = arith.constant 0 : index
    %521 = vector.load %arg1[%c24_478, %c0_479, %c0_480] : memref<30x16x30xbf16, #tpu.memory_space<vmem>>, vector<1x16x30xbf16>
    %522 = vector.shape_cast %521 : vector<1x16x30xbf16> to vector<16x30xbf16>
    %c1_481 = arith.constant 1 : index
    %c0_482 = arith.constant 0 : index
    %c0_483 = arith.constant 0 : index
    %523 = vector.load %arg2[%c1_481, %c0_482, %c0_483] : memref<3x30x256xbf16, #tpu.memory_space<vmem>>, vector<1x30x256xbf16>
    %524 = vector.shape_cast %523 : vector<1x30x256xbf16> to vector<30x256xbf16>
    %cst_484 = arith.constant dense<0.000000e+00> : vector<16x256xf32>
    %525 = tpu.matmul %522, %524, %cst_484 {dimension_numbers = #tpu.dot_dimension_numbers<[1], [0], [0], [1], [0, 0, 1, 1], [], []>} : vector<16x30xbf16>, vector<30x256xbf16>, vector<16x256xf32> -> vector<16x256xf32>
    %526 = arith.addf %520, %525 : vector<16x256xf32>
    %c25 = arith.constant 25 : index
    %c0_485 = arith.constant 0 : index
    %c0_486 = arith.constant 0 : index
    %527 = vector.load %arg1[%c25, %c0_485, %c0_486] : memref<30x16x30xbf16, #tpu.memory_space<vmem>>, vector<1x16x30xbf16>
    %528 = vector.shape_cast %527 : vector<1x16x30xbf16> to vector<16x30xbf16>
    %c2_487 = arith.constant 2 : index
    %c0_488 = arith.constant 0 : index
    %c0_489 = arith.constant 0 : index
    %529 = vector.load %arg2[%c2_487, %c0_488, %c0_489] : memref<3x30x256xbf16, #tpu.memory_space<vmem>>, vector<1x30x256xbf16>
    %530 = vector.shape_cast %529 : vector<1x30x256xbf16> to vector<30x256xbf16>
    %cst_490 = arith.constant dense<0.000000e+00> : vector<16x256xf32>
    %531 = tpu.matmul %528, %530, %cst_490 {dimension_numbers = #tpu.dot_dimension_numbers<[1], [0], [0], [1], [0, 0, 1, 1], [], []>} : vector<16x30xbf16>, vector<30x256xbf16>, vector<16x256xf32> -> vector<16x256xf32>
    %532 = arith.addf %526, %531 : vector<16x256xf32>
    %533 = vector.extract_strided_slice %532 {offsets = [0, 0], sizes = [16, 128], strides = [1, 1]} : vector<16x256xf32> to vector<16x128xf32>
    %534 = vector.extract_strided_slice %532 {offsets = [0, 128], sizes = [16, 128], strides = [1, 1]} : vector<16x256xf32> to vector<16x128xf32>
    %535 = arith.maximumf %533, %534 : vector<16x128xf32>
    %536 = arith.maximumf %515, %535 : vector<16x128xf32>
    %537 = vector.broadcast %0 : vector<1x128xf32> to vector<16x128xf32>
    %538 = arith.addf %536, %537 : vector<16x128xf32>
    %539 = arith.truncf %538 : vector<16x128xf32> to vector<16x128xbf16>
    %c0_491 = arith.constant 0 : index
    %c1408 = arith.constant 1408 : index
    %540 = vector.load %arg9[%c0_491, %c1408] : memref<16x1792xbf16, #tpu.memory_space<vmem>>, vector<16x128xbf16>
    tpu.vector_store %arg9[%c0_491, %c1408], %539 {strides = array<i32>} : memref<16x1792xbf16, #tpu.memory_space<vmem>>, vector<16x128xbf16>,
    %c24_492 = arith.constant 24 : index
    %c0_493 = arith.constant 0 : index
    %c0_494 = arith.constant 0 : index
    %541 = vector.load %arg1[%c24_492, %c0_493, %c0_494] : memref<30x16x30xbf16, #tpu.memory_space<vmem>>, vector<1x16x30xbf16>
    %542 = vector.shape_cast %541 : vector<1x16x30xbf16> to vector<16x30xbf16>
    %c0_495 = arith.constant 0 : index
    %c0_496 = arith.constant 0 : index
    %c0_497 = arith.constant 0 : index
    %543 = vector.load %arg2[%c0_495, %c0_496, %c0_497] : memref<3x30x256xbf16, #tpu.memory_space<vmem>>, vector<1x30x256xbf16>
    %544 = vector.shape_cast %543 : vector<1x30x256xbf16> to vector<30x256xbf16>
    %cst_498 = arith.constant dense<0.000000e+00> : vector<16x256xf32>
    %545 = tpu.matmul %542, %544, %cst_498 {dimension_numbers = #tpu.dot_dimension_numbers<[1], [0], [0], [1], [0, 0, 1, 1], [], []>} : vector<16x30xbf16>, vector<30x256xbf16>, vector<16x256xf32> -> vector<16x256xf32>
    %c25_499 = arith.constant 25 : index
    %c0_500 = arith.constant 0 : index
    %c0_501 = arith.constant 0 : index
    %546 = vector.load %arg1[%c25_499, %c0_500, %c0_501] : memref<30x16x30xbf16, #tpu.memory_space<vmem>>, vector<1x16x30xbf16>
    %547 = vector.shape_cast %546 : vector<1x16x30xbf16> to vector<16x30xbf16>
    %c1_502 = arith.constant 1 : index
    %c0_503 = arith.constant 0 : index
    %c0_504 = arith.constant 0 : index
    %548 = vector.load %arg2[%c1_502, %c0_503, %c0_504] : memref<3x30x256xbf16, #tpu.memory_space<vmem>>, vector<1x30x256xbf16>
    %549 = vector.shape_cast %548 : vector<1x30x256xbf16> to vector<30x256xbf16>
    %cst_505 = arith.constant dense<0.000000e+00> : vector<16x256xf32>
    %550 = tpu.matmul %547, %549, %cst_505 {dimension_numbers = #tpu.dot_dimension_numbers<[1], [0], [0], [1], [0, 0, 1, 1], [], []>} : vector<16x30xbf16>, vector<30x256xbf16>, vector<16x256xf32> -> vector<16x256xf32>
    %551 = arith.addf %545, %550 : vector<16x256xf32>
    %c26 = arith.constant 26 : index
    %c0_506 = arith.constant 0 : index
    %c0_507 = arith.constant 0 : index
    %552 = vector.load %arg1[%c26, %c0_506, %c0_507] : memref<30x16x30xbf16, #tpu.memory_space<vmem>>, vector<1x16x30xbf16>
    %553 = vector.shape_cast %552 : vector<1x16x30xbf16> to vector<16x30xbf16>
    %c2_508 = arith.constant 2 : index
    %c0_509 = arith.constant 0 : index
    %c0_510 = arith.constant 0 : index
    %554 = vector.load %arg2[%c2_508, %c0_509, %c0_510] : memref<3x30x256xbf16, #tpu.memory_space<vmem>>, vector<1x30x256xbf16>
    %555 = vector.shape_cast %554 : vector<1x30x256xbf16> to vector<30x256xbf16>
    %cst_511 = arith.constant dense<0.000000e+00> : vector<16x256xf32>
    %556 = tpu.matmul %553, %555, %cst_511 {dimension_numbers = #tpu.dot_dimension_numbers<[1], [0], [0], [1], [0, 0, 1, 1], [], []>} : vector<16x30xbf16>, vector<30x256xbf16>, vector<16x256xf32> -> vector<16x256xf32>
    %557 = arith.addf %551, %556 : vector<16x256xf32>
    %558 = vector.extract_strided_slice %557 {offsets = [0, 0], sizes = [16, 128], strides = [1, 1]} : vector<16x256xf32> to vector<16x128xf32>
    %559 = vector.extract_strided_slice %557 {offsets = [0, 128], sizes = [16, 128], strides = [1, 1]} : vector<16x256xf32> to vector<16x128xf32>
    %560 = arith.maximumf %558, %559 : vector<16x128xf32>
    %c25_512 = arith.constant 25 : index
    %c0_513 = arith.constant 0 : index
    %c0_514 = arith.constant 0 : index
    %561 = vector.load %arg1[%c25_512, %c0_513, %c0_514] : memref<30x16x30xbf16, #tpu.memory_space<vmem>>, vector<1x16x30xbf16>
    %562 = vector.shape_cast %561 : vector<1x16x30xbf16> to vector<16x30xbf16>
    %c0_515 = arith.constant 0 : index
    %c0_516 = arith.constant 0 : index
    %c0_517 = arith.constant 0 : index
    %563 = vector.load %arg2[%c0_515, %c0_516, %c0_517] : memref<3x30x256xbf16, #tpu.memory_space<vmem>>, vector<1x30x256xbf16>
    %564 = vector.shape_cast %563 : vector<1x30x256xbf16> to vector<30x256xbf16>
    %cst_518 = arith.constant dense<0.000000e+00> : vector<16x256xf32>
    %565 = tpu.matmul %562, %564, %cst_518 {dimension_numbers = #tpu.dot_dimension_numbers<[1], [0], [0], [1], [0, 0, 1, 1], [], []>} : vector<16x30xbf16>, vector<30x256xbf16>, vector<16x256xf32> -> vector<16x256xf32>
    %c26_519 = arith.constant 26 : index
    %c0_520 = arith.constant 0 : index
    %c0_521 = arith.constant 0 : index
    %566 = vector.load %arg1[%c26_519, %c0_520, %c0_521] : memref<30x16x30xbf16, #tpu.memory_space<vmem>>, vector<1x16x30xbf16>
    %567 = vector.shape_cast %566 : vector<1x16x30xbf16> to vector<16x30xbf16>
    %c1_522 = arith.constant 1 : index
    %c0_523 = arith.constant 0 : index
    %c0_524 = arith.constant 0 : index
    %568 = vector.load %arg2[%c1_522, %c0_523, %c0_524] : memref<3x30x256xbf16, #tpu.memory_space<vmem>>, vector<1x30x256xbf16>
    %569 = vector.shape_cast %568 : vector<1x30x256xbf16> to vector<30x256xbf16>
    %cst_525 = arith.constant dense<0.000000e+00> : vector<16x256xf32>
    %570 = tpu.matmul %567, %569, %cst_525 {dimension_numbers = #tpu.dot_dimension_numbers<[1], [0], [0], [1], [0, 0, 1, 1], [], []>} : vector<16x30xbf16>, vector<30x256xbf16>, vector<16x256xf32> -> vector<16x256xf32>
    %571 = arith.addf %565, %570 : vector<16x256xf32>
    %c27 = arith.constant 27 : index
    %c0_526 = arith.constant 0 : index
    %c0_527 = arith.constant 0 : index
    %572 = vector.load %arg1[%c27, %c0_526, %c0_527] : memref<30x16x30xbf16, #tpu.memory_space<vmem>>, vector<1x16x30xbf16>
    %573 = vector.shape_cast %572 : vector<1x16x30xbf16> to vector<16x30xbf16>
    %c2_528 = arith.constant 2 : index
    %c0_529 = arith.constant 0 : index
    %c0_530 = arith.constant 0 : index
    %574 = vector.load %arg2[%c2_528, %c0_529, %c0_530] : memref<3x30x256xbf16, #tpu.memory_space<vmem>>, vector<1x30x256xbf16>
    %575 = vector.shape_cast %574 : vector<1x30x256xbf16> to vector<30x256xbf16>
    %cst_531 = arith.constant dense<0.000000e+00> : vector<16x256xf32>
    %576 = tpu.matmul %573, %575, %cst_531 {dimension_numbers = #tpu.dot_dimension_numbers<[1], [0], [0], [1], [0, 0, 1, 1], [], []>} : vector<16x30xbf16>, vector<30x256xbf16>, vector<16x256xf32> -> vector<16x256xf32>
    %577 = arith.addf %571, %576 : vector<16x256xf32>
    %578 = vector.extract_strided_slice %577 {offsets = [0, 0], sizes = [16, 128], strides = [1, 1]} : vector<16x256xf32> to vector<16x128xf32>
    %579 = vector.extract_strided_slice %577 {offsets = [0, 128], sizes = [16, 128], strides = [1, 1]} : vector<16x256xf32> to vector<16x128xf32>
    %580 = arith.maximumf %578, %579 : vector<16x128xf32>
    %581 = arith.maximumf %560, %580 : vector<16x128xf32>
    %582 = vector.broadcast %0 : vector<1x128xf32> to vector<16x128xf32>
    %583 = arith.addf %581, %582 : vector<16x128xf32>
    %584 = arith.truncf %583 : vector<16x128xf32> to vector<16x128xbf16>
    %c0_532 = arith.constant 0 : index
    %c1536 = arith.constant 1536 : index
    %585 = vector.load %arg9[%c0_532, %c1536] : memref<16x1792xbf16, #tpu.memory_space<vmem>>, vector<16x128xbf16>
    tpu.vector_store %arg9[%c0_532, %c1536], %584 {strides = array<i32>} : memref<16x1792xbf16, #tpu.memory_space<vmem>>, vector<16x128xbf16>,
    %c26_533 = arith.constant 26 : index
    %c0_534 = arith.constant 0 : index
    %c0_535 = arith.constant 0 : index
    %586 = vector.load %arg1[%c26_533, %c0_534, %c0_535] : memref<30x16x30xbf16, #tpu.memory_space<vmem>>, vector<1x16x30xbf16>
    %587 = vector.shape_cast %586 : vector<1x16x30xbf16> to vector<16x30xbf16>
    %c0_536 = arith.constant 0 : index
    %c0_537 = arith.constant 0 : index
    %c0_538 = arith.constant 0 : index
    %588 = vector.load %arg2[%c0_536, %c0_537, %c0_538] : memref<3x30x256xbf16, #tpu.memory_space<vmem>>, vector<1x30x256xbf16>
    %589 = vector.shape_cast %588 : vector<1x30x256xbf16> to vector<30x256xbf16>
    %cst_539 = arith.constant dense<0.000000e+00> : vector<16x256xf32>
    %590 = tpu.matmul %587, %589, %cst_539 {dimension_numbers = #tpu.dot_dimension_numbers<[1], [0], [0], [1], [0, 0, 1, 1], [], []>} : vector<16x30xbf16>, vector<30x256xbf16>, vector<16x256xf32> -> vector<16x256xf32>
    %c27_540 = arith.constant 27 : index
    %c0_541 = arith.constant 0 : index
    %c0_542 = arith.constant 0 : index
    %591 = vector.load %arg1[%c27_540, %c0_541, %c0_542] : memref<30x16x30xbf16, #tpu.memory_space<vmem>>, vector<1x16x30xbf16>
    %592 = vector.shape_cast %591 : vector<1x16x30xbf16> to vector<16x30xbf16>
    %c1_543 = arith.constant 1 : index
    %c0_544 = arith.constant 0 : index
    %c0_545 = arith.constant 0 : index
    %593 = vector.load %arg2[%c1_543, %c0_544, %c0_545] : memref<3x30x256xbf16, #tpu.memory_space<vmem>>, vector<1x30x256xbf16>
    %594 = vector.shape_cast %593 : vector<1x30x256xbf16> to vector<30x256xbf16>
    %cst_546 = arith.constant dense<0.000000e+00> : vector<16x256xf32>
    %595 = tpu.matmul %592, %594, %cst_546 {dimension_numbers = #tpu.dot_dimension_numbers<[1], [0], [0], [1], [0, 0, 1, 1], [], []>} : vector<16x30xbf16>, vector<30x256xbf16>, vector<16x256xf32> -> vector<16x256xf32>
    %596 = arith.addf %590, %595 : vector<16x256xf32>
    %c28 = arith.constant 28 : index
    %c0_547 = arith.constant 0 : index
    %c0_548 = arith.constant 0 : index
    %597 = vector.load %arg1[%c28, %c0_547, %c0_548] : memref<30x16x30xbf16, #tpu.memory_space<vmem>>, vector<1x16x30xbf16>
    %598 = vector.shape_cast %597 : vector<1x16x30xbf16> to vector<16x30xbf16>
    %c2_549 = arith.constant 2 : index
    %c0_550 = arith.constant 0 : index
    %c0_551 = arith.constant 0 : index
    %599 = vector.load %arg2[%c2_549, %c0_550, %c0_551] : memref<3x30x256xbf16, #tpu.memory_space<vmem>>, vector<1x30x256xbf16>
    %600 = vector.shape_cast %599 : vector<1x30x256xbf16> to vector<30x256xbf16>
    %cst_552 = arith.constant dense<0.000000e+00> : vector<16x256xf32>
    %601 = tpu.matmul %598, %600, %cst_552 {dimension_numbers = #tpu.dot_dimension_numbers<[1], [0], [0], [1], [0, 0, 1, 1], [], []>} : vector<16x30xbf16>, vector<30x256xbf16>, vector<16x256xf32> -> vector<16x256xf32>
    %602 = arith.addf %596, %601 : vector<16x256xf32>
    %603 = vector.extract_strided_slice %602 {offsets = [0, 0], sizes = [16, 128], strides = [1, 1]} : vector<16x256xf32> to vector<16x128xf32>
    %604 = vector.extract_strided_slice %602 {offsets = [0, 128], sizes = [16, 128], strides = [1, 1]} : vector<16x256xf32> to vector<16x128xf32>
    %605 = arith.maximumf %603, %604 : vector<16x128xf32>
    %c27_553 = arith.constant 27 : index
    %c0_554 = arith.constant 0 : index
    %c0_555 = arith.constant 0 : index
    %606 = vector.load %arg1[%c27_553, %c0_554, %c0_555] : memref<30x16x30xbf16, #tpu.memory_space<vmem>>, vector<1x16x30xbf16>
    %607 = vector.shape_cast %606 : vector<1x16x30xbf16> to vector<16x30xbf16>
    %c0_556 = arith.constant 0 : index
    %c0_557 = arith.constant 0 : index
    %c0_558 = arith.constant 0 : index
    %608 = vector.load %arg2[%c0_556, %c0_557, %c0_558] : memref<3x30x256xbf16, #tpu.memory_space<vmem>>, vector<1x30x256xbf16>
    %609 = vector.shape_cast %608 : vector<1x30x256xbf16> to vector<30x256xbf16>
    %cst_559 = arith.constant dense<0.000000e+00> : vector<16x256xf32>
    %610 = tpu.matmul %607, %609, %cst_559 {dimension_numbers = #tpu.dot_dimension_numbers<[1], [0], [0], [1], [0, 0, 1, 1], [], []>} : vector<16x30xbf16>, vector<30x256xbf16>, vector<16x256xf32> -> vector<16x256xf32>
    %c28_560 = arith.constant 28 : index
    %c0_561 = arith.constant 0 : index
    %c0_562 = arith.constant 0 : index
    %611 = vector.load %arg1[%c28_560, %c0_561, %c0_562] : memref<30x16x30xbf16, #tpu.memory_space<vmem>>, vector<1x16x30xbf16>
    %612 = vector.shape_cast %611 : vector<1x16x30xbf16> to vector<16x30xbf16>
    %c1_563 = arith.constant 1 : index
    %c0_564 = arith.constant 0 : index
    %c0_565 = arith.constant 0 : index
    %613 = vector.load %arg2[%c1_563, %c0_564, %c0_565] : memref<3x30x256xbf16, #tpu.memory_space<vmem>>, vector<1x30x256xbf16>
    %614 = vector.shape_cast %613 : vector<1x30x256xbf16> to vector<30x256xbf16>
    %cst_566 = arith.constant dense<0.000000e+00> : vector<16x256xf32>
    %615 = tpu.matmul %612, %614, %cst_566 {dimension_numbers = #tpu.dot_dimension_numbers<[1], [0], [0], [1], [0, 0, 1, 1], [], []>} : vector<16x30xbf16>, vector<30x256xbf16>, vector<16x256xf32> -> vector<16x256xf32>
    %616 = arith.addf %610, %615 : vector<16x256xf32>
    %c29 = arith.constant 29 : index
    %c0_567 = arith.constant 0 : index
    %c0_568 = arith.constant 0 : index
    %617 = vector.load %arg1[%c29, %c0_567, %c0_568] : memref<30x16x30xbf16, #tpu.memory_space<vmem>>, vector<1x16x30xbf16>
    %618 = vector.shape_cast %617 : vector<1x16x30xbf16> to vector<16x30xbf16>
    %c2_569 = arith.constant 2 : index
    %c0_570 = arith.constant 0 : index
    %c0_571 = arith.constant 0 : index
    %619 = vector.load %arg2[%c2_569, %c0_570, %c0_571] : memref<3x30x256xbf16, #tpu.memory_space<vmem>>, vector<1x30x256xbf16>
    %620 = vector.shape_cast %619 : vector<1x30x256xbf16> to vector<30x256xbf16>
    %cst_572 = arith.constant dense<0.000000e+00> : vector<16x256xf32>
    %621 = tpu.matmul %618, %620, %cst_572 {dimension_numbers = #tpu.dot_dimension_numbers<[1], [0], [0], [1], [0, 0, 1, 1], [], []>} : vector<16x30xbf16>, vector<30x256xbf16>, vector<16x256xf32> -> vector<16x256xf32>
    %622 = arith.addf %616, %621 : vector<16x256xf32>
    %623 = vector.extract_strided_slice %622 {offsets = [0, 0], sizes = [16, 128], strides = [1, 1]} : vector<16x256xf32> to vector<16x128xf32>
    %624 = vector.extract_strided_slice %622 {offsets = [0, 128], sizes = [16, 128], strides = [1, 1]} : vector<16x256xf32> to vector<16x128xf32>
    %625 = arith.maximumf %623, %624 : vector<16x128xf32>
    %626 = arith.maximumf %605, %625 : vector<16x128xf32>
    %627 = vector.broadcast %0 : vector<1x128xf32> to vector<16x128xf32>
    %628 = arith.addf %626, %627 : vector<16x128xf32>
    %629 = arith.truncf %628 : vector<16x128xf32> to vector<16x128xbf16>
    %c0_573 = arith.constant 0 : index
    %c1664 = arith.constant 1664 : index
    %630 = vector.load %arg9[%c0_573, %c1664] : memref<16x1792xbf16, #tpu.memory_space<vmem>>, vector<16x128xbf16>
    tpu.vector_store %arg9[%c0_573, %c1664], %629 {strides = array<i32>} : memref<16x1792xbf16, #tpu.memory_space<vmem>>, vector<16x128xbf16>,
    %c0_574 = arith.constant 0 : index
    %c0_575 = arith.constant 0 : index
    %631 = vector.load %arg5[%c0_574, %c0_575] : memref<1x128xf32, #tpu.memory_space<vmem>>, vector<1x128xf32>
    %cst_576 = arith.constant 0.000000e+00 : f32
    %632 = vector.broadcast %cst_576 : f32 to vector<16x10xf32>
    %c0_577 = arith.constant 0 : index
    %c0_578 = arith.constant 0 : index
    %633 = vector.load %arg7[%c0_577, %c0_578] : memref<1x10xf32, #tpu.memory_space<vmem>>, vector<1x10xf32>
    %634 = vector.broadcast %633 : vector<1x10xf32> to vector<16x10xf32>
    %635 = arith.addf %632, %634 : vector<16x10xf32>
    %c0_579 = arith.constant 0 : index
    %c0_580 = arith.constant 0 : index
    %636 = vector.load %arg8[%c0_579, %c0_580] : memref<16x10xf32, #tpu.memory_space<vmem>>, vector<16x10xf32>
    tpu.vector_store %arg8[%c0_579, %c0_580], %635 {strides = array<i32>} : memref<16x10xf32, #tpu.memory_space<vmem>>, vector<16x10xf32>,
    %c0_581 = arith.constant 0 : index
    %c0_582 = arith.constant 0 : index
    %637 = vector.load %arg9[%c0_581, %c0_582] : memref<16x1792xbf16, #tpu.memory_space<vmem>>, vector<16x640xbf16>
    %c0_583 = arith.constant 0 : index
    %c0_584 = arith.constant 0 : index
    %638 = vector.load %arg4[%c0_583, %c0_584] : memref<640x256xbf16, #tpu.memory_space<vmem>>, vector<640x256xbf16>
    %cst_585 = arith.constant dense<0.000000e+00> : vector<16x256xf32>
    %639 = tpu.matmul %637, %638, %cst_585 {dimension_numbers = #tpu.dot_dimension_numbers<[1], [0], [0], [1], [0, 0, 1, 1], [], []>} : vector<16x640xbf16>, vector<640x256xbf16>, vector<16x256xf32> -> vector<16x256xf32>
    %640 = vector.extract_strided_slice %639 {offsets = [0, 0], sizes = [16, 128], strides = [1, 1]} : vector<16x256xf32> to vector<16x128xf32>
    %641 = vector.extract_strided_slice %639 {offsets = [0, 128], sizes = [16, 128], strides = [1, 1]} : vector<16x256xf32> to vector<16x128xf32>
    %642 = arith.maximumf %640, %641 : vector<16x128xf32>
    %c0_586 = arith.constant 0 : index
    %c128_587 = arith.constant 128 : index
    %643 = vector.load %arg9[%c0_586, %c128_587] : memref<16x1792xbf16, #tpu.memory_space<vmem>>, vector<16x640xbf16>
    %c0_588 = arith.constant 0 : index
    %c0_589 = arith.constant 0 : index
    %644 = vector.load %arg4[%c0_588, %c0_589] : memref<640x256xbf16, #tpu.memory_space<vmem>>, vector<640x256xbf16>
    %cst_590 = arith.constant dense<0.000000e+00> : vector<16x256xf32>
    %645 = tpu.matmul %643, %644, %cst_590 {dimension_numbers = #tpu.dot_dimension_numbers<[1], [0], [0], [1], [0, 0, 1, 1], [], []>} : vector<16x640xbf16>, vector<640x256xbf16>, vector<16x256xf32> -> vector<16x256xf32>
    %646 = vector.extract_strided_slice %645 {offsets = [0, 0], sizes = [16, 128], strides = [1, 1]} : vector<16x256xf32> to vector<16x128xf32>
    %647 = vector.extract_strided_slice %645 {offsets = [0, 128], sizes = [16, 128], strides = [1, 1]} : vector<16x256xf32> to vector<16x128xf32>
    %648 = arith.maximumf %646, %647 : vector<16x128xf32>
    %649 = arith.maximumf %642, %648 : vector<16x128xf32>
    %650 = vector.broadcast %631 : vector<1x128xf32> to vector<16x128xf32>
    %651 = arith.addf %649, %650 : vector<16x128xf32>
    %c0_591 = arith.constant 0 : index
    %c0_592 = arith.constant 0 : index
    %652 = vector.load %arg8[%c0_591, %c0_592] : memref<16x10xf32, #tpu.memory_space<vmem>>, vector<16x10xf32>
    %653 = arith.truncf %651 : vector<16x128xf32> to vector<16x128xbf16>
    %c0_593 = arith.constant 0 : index
    %c0_594 = arith.constant 0 : index
    %c0_595 = arith.constant 0 : index
    %654 = vector.load %arg6[%c0_593, %c0_594, %c0_595] : memref<5x128x10xbf16, #tpu.memory_space<vmem>>, vector<1x128x10xbf16>
    %655 = vector.shape_cast %654 : vector<1x128x10xbf16> to vector<128x10xbf16>
    %cst_596 = arith.constant dense<0.000000e+00> : vector<16x10xf32>
    %656 = tpu.matmul %653, %655, %cst_596 {dimension_numbers = #tpu.dot_dimension_numbers<[1], [0], [0], [1], [0, 0, 1, 1], [], []>} : vector<16x128xbf16>, vector<128x10xbf16>, vector<16x10xf32> -> vector<16x10xf32>
    %657 = arith.addf %652, %656 : vector<16x10xf32>
    %c0_597 = arith.constant 0 : index
    %c0_598 = arith.constant 0 : index
    %658 = vector.load %arg8[%c0_597, %c0_598] : memref<16x10xf32, #tpu.memory_space<vmem>>, vector<16x10xf32>
    tpu.vector_store %arg8[%c0_597, %c0_598], %657 {strides = array<i32>} : memref<16x10xf32, #tpu.memory_space<vmem>>, vector<16x10xf32>,
    %c0_599 = arith.constant 0 : index
    %c256_600 = arith.constant 256 : index
    %659 = vector.load %arg9[%c0_599, %c256_600] : memref<16x1792xbf16, #tpu.memory_space<vmem>>, vector<16x640xbf16>
    %c0_601 = arith.constant 0 : index
    %c0_602 = arith.constant 0 : index
    %660 = vector.load %arg4[%c0_601, %c0_602] : memref<640x256xbf16, #tpu.memory_space<vmem>>, vector<640x256xbf16>
    %cst_603 = arith.constant dense<0.000000e+00> : vector<16x256xf32>
    %661 = tpu.matmul %659, %660, %cst_603 {dimension_numbers = #tpu.dot_dimension_numbers<[1], [0], [0], [1], [0, 0, 1, 1], [], []>} : vector<16x640xbf16>, vector<640x256xbf16>, vector<16x256xf32> -> vector<16x256xf32>
    %662 = vector.extract_strided_slice %661 {offsets = [0, 0], sizes = [16, 128], strides = [1, 1]} : vector<16x256xf32> to vector<16x128xf32>
    %663 = vector.extract_strided_slice %661 {offsets = [0, 128], sizes = [16, 128], strides = [1, 1]} : vector<16x256xf32> to vector<16x128xf32>
    %664 = arith.maximumf %662, %663 : vector<16x128xf32>
    %c0_604 = arith.constant 0 : index
    %c384_605 = arith.constant 384 : index
    %665 = vector.load %arg9[%c0_604, %c384_605] : memref<16x1792xbf16, #tpu.memory_space<vmem>>, vector<16x640xbf16>
    %c0_606 = arith.constant 0 : index
    %c0_607 = arith.constant 0 : index
    %666 = vector.load %arg4[%c0_606, %c0_607] : memref<640x256xbf16, #tpu.memory_space<vmem>>, vector<640x256xbf16>
    %cst_608 = arith.constant dense<0.000000e+00> : vector<16x256xf32>
    %667 = tpu.matmul %665, %666, %cst_608 {dimension_numbers = #tpu.dot_dimension_numbers<[1], [0], [0], [1], [0, 0, 1, 1], [], []>} : vector<16x640xbf16>, vector<640x256xbf16>, vector<16x256xf32> -> vector<16x256xf32>
    %668 = vector.extract_strided_slice %667 {offsets = [0, 0], sizes = [16, 128], strides = [1, 1]} : vector<16x256xf32> to vector<16x128xf32>
    %669 = vector.extract_strided_slice %667 {offsets = [0, 128], sizes = [16, 128], strides = [1, 1]} : vector<16x256xf32> to vector<16x128xf32>
    %670 = arith.maximumf %668, %669 : vector<16x128xf32>
    %671 = arith.maximumf %664, %670 : vector<16x128xf32>
    %672 = vector.broadcast %631 : vector<1x128xf32> to vector<16x128xf32>
    %673 = arith.addf %671, %672 : vector<16x128xf32>
    %c0_609 = arith.constant 0 : index
    %c0_610 = arith.constant 0 : index
    %674 = vector.load %arg8[%c0_609, %c0_610] : memref<16x10xf32, #tpu.memory_space<vmem>>, vector<16x10xf32>
    %675 = arith.truncf %673 : vector<16x128xf32> to vector<16x128xbf16>
    %c1_611 = arith.constant 1 : index
    %c0_612 = arith.constant 0 : index
    %c0_613 = arith.constant 0 : index
    %676 = vector.load %arg6[%c1_611, %c0_612, %c0_613] : memref<5x128x10xbf16, #tpu.memory_space<vmem>>, vector<1x128x10xbf16>
    %677 = vector.shape_cast %676 : vector<1x128x10xbf16> to vector<128x10xbf16>
    %cst_614 = arith.constant dense<0.000000e+00> : vector<16x10xf32>
    %678 = tpu.matmul %675, %677, %cst_614 {dimension_numbers = #tpu.dot_dimension_numbers<[1], [0], [0], [1], [0, 0, 1, 1], [], []>} : vector<16x128xbf16>, vector<128x10xbf16>, vector<16x10xf32> -> vector<16x10xf32>
    %679 = arith.addf %674, %678 : vector<16x10xf32>
    %c0_615 = arith.constant 0 : index
    %c0_616 = arith.constant 0 : index
    %680 = vector.load %arg8[%c0_615, %c0_616] : memref<16x10xf32, #tpu.memory_space<vmem>>, vector<16x10xf32>
    tpu.vector_store %arg8[%c0_615, %c0_616], %679 {strides = array<i32>} : memref<16x10xf32, #tpu.memory_space<vmem>>, vector<16x10xf32>,
    %c0_617 = arith.constant 0 : index
    %c512_618 = arith.constant 512 : index
    %681 = vector.load %arg9[%c0_617, %c512_618] : memref<16x1792xbf16, #tpu.memory_space<vmem>>, vector<16x640xbf16>
    %c0_619 = arith.constant 0 : index
    %c0_620 = arith.constant 0 : index
    %682 = vector.load %arg4[%c0_619, %c0_620] : memref<640x256xbf16, #tpu.memory_space<vmem>>, vector<640x256xbf16>
    %cst_621 = arith.constant dense<0.000000e+00> : vector<16x256xf32>
    %683 = tpu.matmul %681, %682, %cst_621 {dimension_numbers = #tpu.dot_dimension_numbers<[1], [0], [0], [1], [0, 0, 1, 1], [], []>} : vector<16x640xbf16>, vector<640x256xbf16>, vector<16x256xf32> -> vector<16x256xf32>
    %684 = vector.extract_strided_slice %683 {offsets = [0, 0], sizes = [16, 128], strides = [1, 1]} : vector<16x256xf32> to vector<16x128xf32>
    %685 = vector.extract_strided_slice %683 {offsets = [0, 128], sizes = [16, 128], strides = [1, 1]} : vector<16x256xf32> to vector<16x128xf32>
    %686 = arith.maximumf %684, %685 : vector<16x128xf32>
    %c0_622 = arith.constant 0 : index
    %c640_623 = arith.constant 640 : index
    %687 = vector.load %arg9[%c0_622, %c640_623] : memref<16x1792xbf16, #tpu.memory_space<vmem>>, vector<16x640xbf16>
    %c0_624 = arith.constant 0 : index
    %c0_625 = arith.constant 0 : index
    %688 = vector.load %arg4[%c0_624, %c0_625] : memref<640x256xbf16, #tpu.memory_space<vmem>>, vector<640x256xbf16>
    %cst_626 = arith.constant dense<0.000000e+00> : vector<16x256xf32>
    %689 = tpu.matmul %687, %688, %cst_626 {dimension_numbers = #tpu.dot_dimension_numbers<[1], [0], [0], [1], [0, 0, 1, 1], [], []>} : vector<16x640xbf16>, vector<640x256xbf16>, vector<16x256xf32> -> vector<16x256xf32>
    %690 = vector.extract_strided_slice %689 {offsets = [0, 0], sizes = [16, 128], strides = [1, 1]} : vector<16x256xf32> to vector<16x128xf32>
    %691 = vector.extract_strided_slice %689 {offsets = [0, 128], sizes = [16, 128], strides = [1, 1]} : vector<16x256xf32> to vector<16x128xf32>
    %692 = arith.maximumf %690, %691 : vector<16x128xf32>
    %693 = arith.maximumf %686, %692 : vector<16x128xf32>
    %694 = vector.broadcast %631 : vector<1x128xf32> to vector<16x128xf32>
    %695 = arith.addf %693, %694 : vector<16x128xf32>
    %c0_627 = arith.constant 0 : index
    %c0_628 = arith.constant 0 : index
    %696 = vector.load %arg8[%c0_627, %c0_628] : memref<16x10xf32, #tpu.memory_space<vmem>>, vector<16x10xf32>
    %697 = arith.truncf %695 : vector<16x128xf32> to vector<16x128xbf16>
    %c2_629 = arith.constant 2 : index
    %c0_630 = arith.constant 0 : index
    %c0_631 = arith.constant 0 : index
    %698 = vector.load %arg6[%c2_629, %c0_630, %c0_631] : memref<5x128x10xbf16, #tpu.memory_space<vmem>>, vector<1x128x10xbf16>
    %699 = vector.shape_cast %698 : vector<1x128x10xbf16> to vector<128x10xbf16>
    %cst_632 = arith.constant dense<0.000000e+00> : vector<16x10xf32>
    %700 = tpu.matmul %697, %699, %cst_632 {dimension_numbers = #tpu.dot_dimension_numbers<[1], [0], [0], [1], [0, 0, 1, 1], [], []>} : vector<16x128xbf16>, vector<128x10xbf16>, vector<16x10xf32> -> vector<16x10xf32>
    %701 = arith.addf %696, %700 : vector<16x10xf32>
    %c0_633 = arith.constant 0 : index
    %c0_634 = arith.constant 0 : index
    %702 = vector.load %arg8[%c0_633, %c0_634] : memref<16x10xf32, #tpu.memory_space<vmem>>, vector<16x10xf32>
    tpu.vector_store %arg8[%c0_633, %c0_634], %701 {strides = array<i32>} : memref<16x10xf32, #tpu.memory_space<vmem>>, vector<16x10xf32>,
    %c0_635 = arith.constant 0 : index
    %c768_636 = arith.constant 768 : index
    %703 = vector.load %arg9[%c0_635, %c768_636] : memref<16x1792xbf16, #tpu.memory_space<vmem>>, vector<16x640xbf16>
    %c0_637 = arith.constant 0 : index
    %c0_638 = arith.constant 0 : index
    %704 = vector.load %arg4[%c0_637, %c0_638] : memref<640x256xbf16, #tpu.memory_space<vmem>>, vector<640x256xbf16>
    %cst_639 = arith.constant dense<0.000000e+00> : vector<16x256xf32>
    %705 = tpu.matmul %703, %704, %cst_639 {dimension_numbers = #tpu.dot_dimension_numbers<[1], [0], [0], [1], [0, 0, 1, 1], [], []>} : vector<16x640xbf16>, vector<640x256xbf16>, vector<16x256xf32> -> vector<16x256xf32>
    %706 = vector.extract_strided_slice %705 {offsets = [0, 0], sizes = [16, 128], strides = [1, 1]} : vector<16x256xf32> to vector<16x128xf32>
    %707 = vector.extract_strided_slice %705 {offsets = [0, 128], sizes = [16, 128], strides = [1, 1]} : vector<16x256xf32> to vector<16x128xf32>
    %708 = arith.maximumf %706, %707 : vector<16x128xf32>
    %c0_640 = arith.constant 0 : index
    %c896_641 = arith.constant 896 : index
    %709 = vector.load %arg9[%c0_640, %c896_641] : memref<16x1792xbf16, #tpu.memory_space<vmem>>, vector<16x640xbf16>
    %c0_642 = arith.constant 0 : index
    %c0_643 = arith.constant 0 : index
    %710 = vector.load %arg4[%c0_642, %c0_643] : memref<640x256xbf16, #tpu.memory_space<vmem>>, vector<640x256xbf16>
    %cst_644 = arith.constant dense<0.000000e+00> : vector<16x256xf32>
    %711 = tpu.matmul %709, %710, %cst_644 {dimension_numbers = #tpu.dot_dimension_numbers<[1], [0], [0], [1], [0, 0, 1, 1], [], []>} : vector<16x640xbf16>, vector<640x256xbf16>, vector<16x256xf32> -> vector<16x256xf32>
    %712 = vector.extract_strided_slice %711 {offsets = [0, 0], sizes = [16, 128], strides = [1, 1]} : vector<16x256xf32> to vector<16x128xf32>
    %713 = vector.extract_strided_slice %711 {offsets = [0, 128], sizes = [16, 128], strides = [1, 1]} : vector<16x256xf32> to vector<16x128xf32>
    %714 = arith.maximumf %712, %713 : vector<16x128xf32>
    %715 = arith.maximumf %708, %714 : vector<16x128xf32>
    %716 = vector.broadcast %631 : vector<1x128xf32> to vector<16x128xf32>
    %717 = arith.addf %715, %716 : vector<16x128xf32>
    %c0_645 = arith.constant 0 : index
    %c0_646 = arith.constant 0 : index
    %718 = vector.load %arg8[%c0_645, %c0_646] : memref<16x10xf32, #tpu.memory_space<vmem>>, vector<16x10xf32>
    %719 = arith.truncf %717 : vector<16x128xf32> to vector<16x128xbf16>
    %c3_647 = arith.constant 3 : index
    %c0_648 = arith.constant 0 : index
    %c0_649 = arith.constant 0 : index
    %720 = vector.load %arg6[%c3_647, %c0_648, %c0_649] : memref<5x128x10xbf16, #tpu.memory_space<vmem>>, vector<1x128x10xbf16>
    %721 = vector.shape_cast %720 : vector<1x128x10xbf16> to vector<128x10xbf16>
    %cst_650 = arith.constant dense<0.000000e+00> : vector<16x10xf32>
    %722 = tpu.matmul %719, %721, %cst_650 {dimension_numbers = #tpu.dot_dimension_numbers<[1], [0], [0], [1], [0, 0, 1, 1], [], []>} : vector<16x128xbf16>, vector<128x10xbf16>, vector<16x10xf32> -> vector<16x10xf32>
    %723 = arith.addf %718, %722 : vector<16x10xf32>
    %c0_651 = arith.constant 0 : index
    %c0_652 = arith.constant 0 : index
    %724 = vector.load %arg8[%c0_651, %c0_652] : memref<16x10xf32, #tpu.memory_space<vmem>>, vector<16x10xf32>
    tpu.vector_store %arg8[%c0_651, %c0_652], %723 {strides = array<i32>} : memref<16x10xf32, #tpu.memory_space<vmem>>, vector<16x10xf32>,
    %c0_653 = arith.constant 0 : index
    %c1024_654 = arith.constant 1024 : index
    %725 = vector.load %arg9[%c0_653, %c1024_654] : memref<16x1792xbf16, #tpu.memory_space<vmem>>, vector<16x640xbf16>
    %c0_655 = arith.constant 0 : index
    %c0_656 = arith.constant 0 : index
    %726 = vector.load %arg4[%c0_655, %c0_656] : memref<640x256xbf16, #tpu.memory_space<vmem>>, vector<640x256xbf16>
    %cst_657 = arith.constant dense<0.000000e+00> : vector<16x256xf32>
    %727 = tpu.matmul %725, %726, %cst_657 {dimension_numbers = #tpu.dot_dimension_numbers<[1], [0], [0], [1], [0, 0, 1, 1], [], []>} : vector<16x640xbf16>, vector<640x256xbf16>, vector<16x256xf32> -> vector<16x256xf32>
    %728 = vector.extract_strided_slice %727 {offsets = [0, 0], sizes = [16, 128], strides = [1, 1]} : vector<16x256xf32> to vector<16x128xf32>
    %729 = vector.extract_strided_slice %727 {offsets = [0, 128], sizes = [16, 128], strides = [1, 1]} : vector<16x256xf32> to vector<16x128xf32>
    %730 = arith.maximumf %728, %729 : vector<16x128xf32>
    %c0_658 = arith.constant 0 : index
    %c1152_659 = arith.constant 1152 : index
    %731 = vector.load %arg9[%c0_658, %c1152_659] : memref<16x1792xbf16, #tpu.memory_space<vmem>>, vector<16x640xbf16>
    %c0_660 = arith.constant 0 : index
    %c0_661 = arith.constant 0 : index
    %732 = vector.load %arg4[%c0_660, %c0_661] : memref<640x256xbf16, #tpu.memory_space<vmem>>, vector<640x256xbf16>
    %cst_662 = arith.constant dense<0.000000e+00> : vector<16x256xf32>
    %733 = tpu.matmul %731, %732, %cst_662 {dimension_numbers = #tpu.dot_dimension_numbers<[1], [0], [0], [1], [0, 0, 1, 1], [], []>} : vector<16x640xbf16>, vector<640x256xbf16>, vector<16x256xf32> -> vector<16x256xf32>
    %734 = vector.extract_strided_slice %733 {offsets = [0, 0], sizes = [16, 128], strides = [1, 1]} : vector<16x256xf32> to vector<16x128xf32>
    %735 = vector.extract_strided_slice %733 {offsets = [0, 128], sizes = [16, 128], strides = [1, 1]} : vector<16x256xf32> to vector<16x128xf32>
    %736 = arith.maximumf %734, %735 : vector<16x128xf32>
    %737 = arith.maximumf %730, %736 : vector<16x128xf32>
    %738 = vector.broadcast %631 : vector<1x128xf32> to vector<16x128xf32>
    %739 = arith.addf %737, %738 : vector<16x128xf32>
    %c0_663 = arith.constant 0 : index
    %c0_664 = arith.constant 0 : index
    %740 = vector.load %arg8[%c0_663, %c0_664] : memref<16x10xf32, #tpu.memory_space<vmem>>, vector<16x10xf32>
    %741 = arith.truncf %739 : vector<16x128xf32> to vector<16x128xbf16>
    %c4_665 = arith.constant 4 : index
    %c0_666 = arith.constant 0 : index
    %c0_667 = arith.constant 0 : index
    %742 = vector.load %arg6[%c4_665, %c0_666, %c0_667] : memref<5x128x10xbf16, #tpu.memory_space<vmem>>, vector<1x128x10xbf16>
    %743 = vector.shape_cast %742 : vector<1x128x10xbf16> to vector<128x10xbf16>
    %cst_668 = arith.constant dense<0.000000e+00> : vector<16x10xf32>
    %744 = tpu.matmul %741, %743, %cst_668 {dimension_numbers = #tpu.dot_dimension_numbers<[1], [0], [0], [1], [0, 0, 1, 1], [], []>} : vector<16x128xbf16>, vector<128x10xbf16>, vector<16x10xf32> -> vector<16x10xf32>
    %745 = arith.addf %740, %744 : vector<16x10xf32>
    %c0_669 = arith.constant 0 : index
    %c0_670 = arith.constant 0 : index
    %746 = vector.load %arg8[%c0_669, %c0_670] : memref<16x10xf32, #tpu.memory_space<vmem>>, vector<16x10xf32>
    tpu.vector_store %arg8[%c0_669, %c0_670], %745 {strides = array<i32>} : memref<16x10xf32, #tpu.memory_space<vmem>>, vector<16x10xf32>,
    return
  }
  func.func @transform_0(%arg0: i32) -> (i32, i32, i32) {
    %c0_i32 = arith.constant 0 : i32
    %c0_i32_0 = arith.constant 0 : i32
    %c0_i32_1 = arith.constant 0 : i32
    return %c0_i32, %arg0, %c0_i32_0 : i32, i32, i32
  }
  func.func @transform_1(%arg0: i32) -> (i32, i32, i32) {
    %c0_i32 = arith.constant 0 : i32
    %c0_i32_0 = arith.constant 0 : i32
    %c0_i32_1 = arith.constant 0 : i32
    %c0_i32_2 = arith.constant 0 : i32
    return %c0_i32, %c0_i32_0, %c0_i32_1 : i32, i32, i32
  }
  func.func @transform_2(%arg0: i32) -> (i32, i32) {
    %c0_i32 = arith.constant 0 : i32
    %c0_i32_0 = arith.constant 0 : i32
    %c0_i32_1 = arith.constant 0 : i32
    return %c0_i32, %c0_i32_0 : i32, i32
  }
  func.func @transform_3(%arg0: i32) -> (i32, i32) {
    %c0_i32 = arith.constant 0 : i32
    %c0_i32_0 = arith.constant 0 : i32
    %c0_i32_1 = arith.constant 0 : i32
    return %c0_i32, %c0_i32_0 : i32, i32
  }
  func.func @transform_4(%arg0: i32) -> (i32, i32) {
    %c0_i32 = arith.constant 0 : i32
    %c0_i32_0 = arith.constant 0 : i32
    %c0_i32_1 = arith.constant 0 : i32
    return %c0_i32, %c0_i32_0 : i32, i32
  }
  func.func @transform_5(%arg0: i32) -> (i32, i32, i32) {
    %c0_i32 = arith.constant 0 : i32
    %c0_i32_0 = arith.constant 0 : i32
    %c0_i32_1 = arith.constant 0 : i32
    %c0_i32_2 = arith.constant 0 : i32
    return %c0_i32, %c0_i32_0, %c0_i32_1 : i32, i32, i32
  }
  func.func @transform_6(%arg0: i32) -> (i32, i32) {
    %c0_i32 = arith.constant 0 : i32
    %c0_i32_0 = arith.constant 0 : i32
    %c0_i32_1 = arith.constant 0 : i32
    return %c0_i32, %c0_i32_0 : i32, i32
  }
  func.func @transform_7(%arg0: i32) -> (i32, i32) {
    %c0_i32 = arith.constant 0 : i32
    %c0_i32_0 = arith.constant 0 : i32
    return %arg0, %c0_i32 : i32, i32
  }
}

</mosaic_0001>

<bundles_post_ra>
// kernel: _lambda_.1
= control target key start
LH: loop header
LB: loop body
LE: loop exit
PB: predicated region body
PF: predicated region fallthrough
CT: control target
= control target key end

     0   :  { %12 = vsyncpa [#allocation4], 0  ;;  %s16932_s0 = inlined_call_operand.vmem [shape: bf16[30,16,30], index: 0, kind: input, shape index: {}]   ;;  %s16933_s1 = inlined_call_operand.hbm [shape: bf16[3,30,256], index: 1, kind: input, shape index: {}]   ;;  %s16934_s2 = inlined_call_operand.vmem [shape: f32[1,128], index: 2, kind: input, shape index: {}]   ;;  %s16935_s3 = inlined_call_operand.hbm [shape: bf16[640,256], index: 3, kind: input, shape index: {}]   ;;  %s16936_s4 = inlined_call_operand.vmem [shape: f32[1,128], index: 4, kind: input, shape index: {}]   ;;  %s16937_s5 = inlined_call_operand.vmem [shape: bf16[5,128,10], index: 5, kind: input, shape index: {}]   ;;  %s16938_s6 = inlined_call_operand.vmem [shape: f32[1,10], index: 6, kind: input, shape index: {}]   ;;  %s16939_s7 = inlined_call_operand.vmem [shape: f32[16,10], index: 7, kind: output, shape index: {}]  }
   0x1   :  { %s20_s26 = sshll.u32 %s16933_s1, 4  ;;  %s21_s26 = int_to_ptr.hbm [resolvable:$true] %s20_s26 }
   0x2   :  { %13 = vsyncpa [#allocation6], 0  ;;  %s13048_s27 = smov [#allocation3]   ;;  %s35_s8 = sshll.u32 %s16935_s3, 4  ;;  %s36_s8 = int_to_ptr.hbm [resolvable:$true] %s35_s8 }
   0x3   :  { %s22_s28 = sshll.u32 %s13048_s27, 4  ;;  %s13049_s9 = smov 128   ;;  %s23_s28 = int_to_ptr.vmem [resolvable:$true] %s22_s28 }
   0x4   :  { %s13050_s10 = smov 8   ;;  %s13051_s11 = smov [#allocation5]  }
   0x5   :  { %28 = dma.hbm_to_vmem [thread:$0]  %s21_s26, 1536, %s23_s28, [#allocation4], %s13049_s9, %s13049_s9, %s13050_s10  }
   0x6   :  { %s37_s12 = sshll.u32 %s13051_s11, 4  ;;  %s38_s12 = int_to_ptr.vmem [resolvable:$true] %s37_s12 }
   0x7   :  { %43 = dma.hbm_to_vmem [thread:$0]  %s36_s8, 10240, %s38_s12, [#allocation6], %s13049_s9, %s13049_s9, %s13050_s10  }
   0x8   :  { %13044 = dma.done.wait [#allocation4], 1536  }
   0x9   :  { %13045 = vsyncadd [#allocation4], 4294965760 }
   0xa   :  { %13046 = dma.done.wait [#allocation6], 10240  }
   0xb   :  { %13047 = vsyncadd [#allocation6], 4294957056  ;;  %vm101_vm0 = vcmask 1046528   ;;  %v9087_v0 = vld [vmem:[#allocation3 + $0x30] sm:$0xf]  ;;  %v13110_v27 = vld [vmem:[%s16932_s0 + $0x8] sm:$0xff] }
   0xc   :  { %v12278_v1 = vld [vmem:[#allocation3 + $0x34] sm:$0x70]  ;;  %v9109_v2 = vld [vmem:[#allocation3 + $0x10] sm:$0xf]  ;;  %v12272_v5 = vld [vmem:[#allocation3 + $0x14] sm:$0xf] }
   0xd   :  { %v9088_v3 = vor.u32 %v12278_v1, %v9087_v0  ;;  %v12273_v4 = vld [vmem:[#allocation3 + $0x14] sm:$0x70]  ;;  %v9111_v6 = vld [vmem:[#allocation3 + $0x18] sm:$0x70]  ;;  %v9133_v9 = vld [vmem:[#allocation3 + $0x50] sm:$0xf] }
   0xe   :  { %v9110_v7 = vor.u32 %v12273_v4, %v9109_v2  ;;  %v9114_v8 = vor.u32 %v12272_v5, %v9111_v6  ;;  %v12283_v10 = vld [vmem:[#allocation3 + $0x54] sm:$0x70]  ;;  %v9079_v11 = vld [vmem:[#allocation3 + $0x20] sm:$0xf]  ;;  %v12276_v14 = vld [vmem:[#allocation3 + $0x24] sm:$0xf0] }
   0xf   :  { %v103_v12 = vsel %vm101_vm0, %v9088_v3, 0  ;;  %v9134_v13 = vor.u32 %v12283_v10, %v9133_v9  ;;  %v9101_v15 = vld [vmem:[#allocation3] sm:$0xf]  ;;  %v9080_v18 = vor.u32 %v12276_v14, %v9079_v11  ;;  %v12271_v19 = vld [vmem:[#allocation3 + $0x4] sm:$0xf0]  ;;  %vm97_vm1 = vcmask 244736  }
  0x10   :  { %114 = vmatpush.bf16.msra.mxu1 %v103_v12  ;;  %v163_v16 = vsel %vm101_vm0, %v9110_v7, 0  ;;  %v13101_v17 = vsel %vm101_vm0, %v9114_v8, 0  ;;  %v12270_v20 = vld [vmem:[#allocation3 + $0x4] sm:$0xf]  ;;  %v9102_v22 = vor.u32 %v12271_v19, %v9101_v15  ;;  %v9103_v23 = vld [vmem:[#allocation3 + $0x8] sm:$0xf0] }
  0x11   :  { %174 = vmatpush.bf16.msra.mxu2 %v163_v16  ;;  %188 = vmatpush.bf16.msra.mxu3 %v13101_v17  ;;  %v231_v21 = vsel %vm101_vm0, %v9134_v13, 0  ;;  %v9125_v24 = vld [vmem:[#allocation3 + $0x40] sm:$0xf]  ;;  %v13105_v25 = vor.u32 %v12270_v20, %v9103_v23  ;;  %v12281_v26 = vld [vmem:[#allocation3 + $0x44] sm:$0xf0]  ;;  %v12269_v30 = vld [vmem:[%s16932_s0] sm:$0xff] }
  0x12   :  { %242 = vmatpush.bf16.msra.mxu0 %v231_v21  ;;  %v12277_v28 = vld [vmem:[#allocation3 + $0x34] sm:$0xf]  ;;  %v9126_v29 = vor.u32 %v12281_v26, %v9125_v24  ;;  %v9089_v31 = vld [vmem:[#allocation3 + $0x38] sm:$0x70]  ;;  %v12275_v32 = vld [vmem:[#allocation3 + $0x24] sm:$0xf] }
  0x13   :  { %v9092_v33 = vor.u32 %v12277_v28, %v9089_v31  ;;  %v9081_v34 = vld [vmem:[#allocation3 + $0x28] sm:$0xf0]  ;;  %v12282_v35 = vld [vmem:[#allocation3 + $0x54] sm:$0xf]  ;;  %v9135_v36 = vld [vmem:[#allocation3 + $0x58] sm:$0x70] }
  0x14   :  { %115 = vmatpush.bf16.msra.mxu1 %v9080_v18  ;;  %v13119_v37 = vld [vmem:[%s16932_s0 + $0x10] sm:$0xff]  ;;  %v9138_v38 = vor.u32 %v12282_v35, %v9135_v36  ;;  %v9171_v39 = vld [vmem:[#allocation3 + $0x30] sm:$0xf]  ;;  %v12294_v40 = vld [vmem:[#allocation3 + $0x34] sm:$0x70]  ;;  %v9084_v42 = vor.u32 %v12275_v32, %v9081_v34  ;;  %vm4470_vm2 = vcmask 80896  }
  0x15   :  { %175 = vmatpush.bf16.msra.mxu2 %v9102_v22  ;;  %189 = vmatpush.bf16.msra.mxu3 %v13105_v25  ;;  %v106_v41 = vsel %vm101_vm0, %v9092_v33, 0  ;;  %v9172_v43 = vor.u32 %v12294_v40, %v9171_v39  ;;  %v12280_v45 = vld [vmem:[#allocation3 + $0x44] sm:$0xf]  ;;  %v9127_v46 = vld [vmem:[#allocation3 + $0x48] sm:$0xf0] }
  0x16   :  { %243 = vmatpush.bf16.msra.mxu0 %v9126_v29  ;;  %v234_v44 = vsel %vm101_vm0, %v9138_v38, 0  ;;  %v9130_v48 = vor.u32 %v12280_v45, %v9127_v46  ;;  %v9163_v49 = vld [vmem:[#allocation3 + $0x20] sm:$0xf]  ;;  %v12292_v50 = vld [vmem:[#allocation3 + $0x24] sm:$0xf0] }
  0x17   :  { %9093 = vmatmul.msk.bf16.vlgmr.msra.gmra.mxu1 %vm97_vm1, %v13110_v27  ;;  %v421_v47 = vsel %vm101_vm0, %v9172_v43, 0  ;;  %v9164_v51 = vor.u32 %v12292_v50, %v9163_v49  ;;  %v9193_v52 = vld [vmem:[#allocation3 + $0x10] sm:$0xf]  ;;  %v12289_v53 = vld [vmem:[#allocation3 + $0x14] sm:$0x70]  ;;  %v13155_v13 = vld [vmem:[%s16932_s0 + $0x18] sm:$0xff] }
  0x18   :  { %9115 = vmatmul.msk.bf16.vlgmr.msra.gmra.mxu2 %vm97_vm1, %v12269_v30  ;;  %9116 = vmatmul.msk.bf16.vlgmr.msra.gmra.mxu3 %vm97_vm1, %v12269_v30  ;;  %v12288_v54 = vld [vmem:[#allocation3 + $0x14] sm:$0xf]  ;;  %v9195_v55 = vld [vmem:[#allocation3 + $0x18] sm:$0x70]  ;;  %v9217_v56 = vld [vmem:[#allocation3 + $0x50] sm:$0xf]  ;;  %v9194_v58 = vor.u32 %v12289_v53, %v9193_v52 }
  0x19   :  { %276 = vmatpush.bf16.msrb.mxu2 %v103_v12  ;;  %290 = vmatpush.bf16.msrb.mxu3 %v106_v41  ;;  %v12299_v57 = vld [vmem:[#allocation3 + $0x54] sm:$0x70]  ;;  %v9198_v59 = vor.u32 %v12288_v54, %v9195_v55  ;;  %v9185_v61 = vld [vmem:[#allocation3] sm:$0xf]  ;;  %v12287_v62 = vld [vmem:[#allocation3 + $0x4] sm:$0xf0] }
  0x1a   :  { %9139 = vmatmul.msk.bf16.vlgmr.msra.gmra.mxu0 %vm97_vm1, %v13119_v37  ;;  %128 = vmatpush.bf16.msrb.mxu1 %v106_v41  ;;  %v9218_v60 = vor.u32 %v12299_v57, %v9217_v56  ;;  %v481_v63 = vsel %vm101_vm0, %v9194_v58, 0  ;;  %v12286_v1 = vld [vmem:[#allocation3 + $0x4] sm:$0xf]  ;;  %v9187_v2 = vld [vmem:[#allocation3 + $0x8] sm:$0xf0]  ;;  %v9186_v6 = vor.u32 %v12287_v62, %v9185_v61  ;;  %v12300_v58 = vld [vmem:[%s16932_s0 + $0x28] sm:$0xff] }
  0x1b   :  { %304 = vmatpush.bf16.msrb.mxu0 %v163_v16  ;;  %v13134_v0 = vsel %vm101_vm0, %v9198_v59, 0  ;;  %v9209_v4 = vld [vmem:[#allocation3 + $0x40] sm:$0xf]  ;;  %v12297_v5 = vld [vmem:[#allocation3 + $0x44] sm:$0xf0]  ;;  %v13145_v7 = vor.u32 %v12286_v1, %v9187_v2  ;;  %v13200_v59 = vld [vmem:[%s16932_s0 + $0x28] sm:$0xff] }
  0x1c   :  { %v548_v3 = vsel %vm101_vm0, %v9218_v60, 0  ;;  %v9210_v8 = vor.u32 %v12297_v5, %v9209_v4  ;;  %v12293_v9 = vld [vmem:[#allocation3 + $0x34] sm:$0xf]  ;;  %v9173_v10 = vld [vmem:[#allocation3 + $0x38] sm:$0x70]  ;;  %v12284_v12 = vld [vmem:[%s16932_s0 + $0x18] sm:$0xff] }
  0x1d   :  { %277 = vmatpush.bf16.msrb.mxu2 %v9080_v18  ;;  %291 = vmatpush.bf16.msrb.mxu3 %v9084_v42  ;;  %v9176_v11 = vor.u32 %v12293_v9, %v9173_v10  ;;  %v12291_v15 = vld [vmem:[#allocation3 + $0x24] sm:$0xf]  ;;  %v9165_v16 = vld [vmem:[#allocation3 + $0x28] sm:$0xf0]  ;;  %v12298_v18 = vld [vmem:[#allocation3 + $0x54] sm:$0xf] }
  0x1e   :  { %129 = vmatpush.bf16.msrb.mxu1 %v9084_v42  ;;  %v9219_v19 = vld [vmem:[#allocation3 + $0x58] sm:$0x70]  ;;  %v9255_v20 = vld [vmem:[#allocation3 + $0x30] sm:$0xf]  ;;  %v12285_v23 = vld [vmem:[%s16932_s0 + $0x10] sm:$0xff] }
  0x1f   :  { %305 = vmatpush.bf16.msrb.mxu0 %v9102_v22  ;;  %v424_v14 = vsel %vm101_vm0, %v9176_v11, 0  ;;  %v9222_v22 = vor.u32 %v12298_v18, %v9219_v19  ;;  %v12296_v28 = vld [vmem:[#allocation3 + $0x44] sm:$0xf]  ;;  %v9247_v31 = vld [vmem:[#allocation3 + $0x20] sm:$0xf]  ;;  %v12301_v5 = vld [vmem:[%s16932_s0 + $0x20] sm:$0xff] }
  0x20   :  { %v12308_v32 = vld [vmem:[#allocation3 + $0x24] sm:$0xf0]  ;;  %v12305_v35 = vld [vmem:[#allocation3 + $0x14] sm:$0x70]  ;;  %v12304_v36 = vld [vmem:[#allocation3 + $0x14] sm:$0xf] }
  0x21   :  { %343 = vmatpush.bf16.msra.mxu2 %v231_v21  ;;  %357 = vmatpush.bf16.msra.mxu3 %v234_v44  ;;  %v12310_v21 = vld [vmem:[#allocation3 + $0x34] sm:$0x70]  ;;  %v551_v26 = vsel %vm101_vm0, %v9222_v22, 0  ;;  %v9248_v34 = vor.u32 %v12308_v32, %v9247_v31  ;;  %v9301_v38 = vld [vmem:[#allocation3 + $0x50] sm:$0xf] }
  0x22   :  { %256 = vmatpush.bf16.msra.mxu1 %v234_v44  ;;  %v9256_v24 = vor.u32 %v12310_v21, %v9255_v20  ;;  %v12315_v39 = vld [vmem:[#allocation3 + $0x54] sm:$0x70]  ;;  %v9269_v43 = vld [vmem:[#allocation3] sm:$0xf]  ;;  %v12303_v44 = vld [vmem:[#allocation3 + $0x4] sm:$0xf0] }
  0x23   :  { %432 = vmatpush.bf16.msra.mxu0 %v421_v47  ;;  %v9302_v42 = vor.u32 %v12315_v39, %v9301_v38  ;;  %v9293_v50 = vld [vmem:[#allocation3 + $0x40] sm:$0xf]  ;;  %v9270_v52 = vor.u32 %v12303_v44, %v9269_v43  ;;  %v12309_v55 = vld [vmem:[#allocation3 + $0x34] sm:$0xf]  ;;  %v9257_v56 = vld [vmem:[#allocation3 + $0x38] sm:$0x70] }
  0x24   :  { %v735_v30 = vsel %vm101_vm0, %v9256_v24, 0  ;;  %v9260_v57 = vor.u32 %v12309_v55, %v9257_v56  ;;  %v12307_v61 = vld [vmem:[#allocation3 + $0x24] sm:$0xf]  ;;  %v9249_v62 = vld [vmem:[#allocation3 + $0x28] sm:$0xf0] }
  0x25   :  { %344 = vmatpush.bf16.msra.mxu2 %v9126_v29  ;;  %358 = vmatpush.bf16.msra.mxu3 %v9130_v48  ;;  %v9211_v29 = vld [vmem:[#allocation3 + $0x48] sm:$0xf0]  ;;  %v862_v49 = vsel %vm101_vm0, %v9302_v42, 0  ;;  %v9303_v1 = vld [vmem:[#allocation3 + $0x58] sm:$0x70] }
  0x26   :  { %257 = vmatpush.bf16.msra.mxu1 %v9130_v48  ;;  %v9214_v33 = vor.u32 %v12296_v28, %v9211_v29  ;;  %v9271_v48 = vld [vmem:[#allocation3 + $0x8] sm:$0xf0]  ;;  %v738_v60 = vsel %vm101_vm0, %v9260_v57, 0  ;;  %v9339_v2 = vld [vmem:[#allocation3 + $0x30] sm:$0xf] }
  0x27   :  { %433 = vmatpush.bf16.msra.mxu0 %v9164_v51  ;;  %9094 = vmatmul.msk.bf16.vlgmr.msrb.gmra.mxu1 %vm97_vm1, %v13110_v27  ;;  %v12312_v9 = vld [vmem:[#allocation3 + $0x44] sm:$0xf]  ;;  %v9295_v10 = vld [vmem:[#allocation3 + $0x48] sm:$0xf0]  ;;  %v12320_v18 = vld [vmem:[#allocation3 + $0x14] sm:$0xf] }
  0x28   :  { %9141 = vmatmul.msk.bf16.vlgmr.msrb.gmra.mxu2 %vm97_vm1, %v13119_v37  ;;  %9142 = vmatmul.msk.bf16.vlgmr.msrb.gmra.mxu3 %vm97_vm1, %v13119_v37  ;;  %v9363_v19 = vld [vmem:[#allocation3 + $0x18] sm:$0x70]  ;;  %v9385_v20 = vld [vmem:[#allocation3 + $0x50] sm:$0xf]  ;;  %v12331_v21 = vld [vmem:[#allocation3 + $0x54] sm:$0x70] }
  0x29   :  { %492 = vmatpush.bf16.msrb.mxu2 %v481_v63  ;;  %506 = vmatpush.bf16.msrb.mxu3 %v13134_v0  ;;  %v9386_v24 = vor.u32 %v12331_v21, %v9385_v20  ;;  %v9353_v28 = vld [vmem:[#allocation3] sm:$0xf]  ;;  %v12319_v29 = vld [vmem:[#allocation3 + $0x4] sm:$0xf0]  ;;  %v9355_v31 = vld [vmem:[#allocation3 + $0x8] sm:$0xf0] }
  0x2a   :  { %9143 = vmatmul.msk.bf16.vlgmr.msrb.gmra.mxu0 %vm97_vm1, %v13110_v27  ;;  %318 = vmatpush.bf16.msrb.mxu1 %v13101_v17  ;;  %v9168_v17 = vor.u32 %v12291_v15, %v9165_v16  ;;  %v9298_v15 = vor.u32 %v12312_v9, %v9295_v10  ;;  %v9341_v38 = vld [vmem:[#allocation3 + $0x38] sm:$0x70]  ;;  %v13260_v42 = vld [vmem:[%s16932_s0 + $0x38] sm:$0xff]  ;;  %v12342_v55 = vld [vmem:[#allocation3 + $0x34] sm:$0x70] }
  0x2b   :  { %559 = vmatpush.bf16.msrb.mxu0 %v548_v3  ;;  %v13238_v32 = vsel %vm101_vm0, %v9386_v24, 0 }
  0x2d   :  { %493 = vmatpush.bf16.msrb.mxu2 %v9186_v6  ;;  %507 = vmatpush.bf16.msrb.mxu3 %v13145_v7 }
  0x2e   :  { %319 = vmatpush.bf16.msrb.mxu1 %v13105_v25  ;;  %v12295_v25 = vld [vmem:[%s16932_s0 + $0x20] sm:$0xff] }
  0x2f   :  { %560 = vmatpush.bf16.msrb.mxu0 %v9210_v8 }
  0x37   :  { %9140 = vmatmul.msk.bf16.vlgmr.msra.gmra.mxu1 %vm97_vm1, %v13119_v37  ;;  %v9279_v37 = vld [vmem:[#allocation3 + $0x18] sm:$0x70] }
  0x38   :  { %9151 = vmatmul.msk.bf16.vlgmr.msra.gmra.mxu2 %vm97_vm1, %v12284_v12  ;;  %9152 = vmatmul.msk.bf16.vlgmr.msra.gmra.mxu3 %vm97_vm1, %v12284_v12  ;;  %v9282_v41 = vor.u32 %v12304_v36, %v9279_v37  ;;  %v9331_v12 = vld [vmem:[#allocation3 + $0x20] sm:$0xf]  ;;  %v12325_v37 = vld [vmem:[#allocation3 + $0x34] sm:$0xf] }
  0x39   :  { %446 = vmatpush.bf16.msra.mxu1 %v424_v14  ;;  %593 = vmatpush.bf16.msra.mxu2 %v421_v47  ;;  %v12302_v47 = vld [vmem:[#allocation3 + $0x4] sm:$0xf]  ;;  %v9344_v39 = vor.u32 %v12325_v37, %v9341_v38 }
  0x3a   :  { %9177 = vmatmul.msk.bf16.vlgmr.msra.gmra.mxu0 %vm97_vm1, %v13155_v13  ;;  %607 = vmatpush.bf16.msra.mxu3 %v424_v14  ;;  %v13181_v46 = vsel %vm101_vm0, %v9282_v41, 0  ;;  %v13190_v53 = vor.u32 %v12302_v47, %v9271_v48  ;;  %v12324_v14 = vld [vmem:[#allocation3 + $0x24] sm:$0xf0] }
  0x3b   :  { %621 = vmatpush.bf16.msra.mxu0 %v481_v63  ;;  %v9252_v63 = vor.u32 %v12307_v61, %v9249_v62  ;;  %v9332_v16 = vor.u32 %v12324_v14, %v9331_v12  ;;  %v12316_v41 = vld [vmem:[%s16932_s0 + $0x38] sm:$0xff]  ;;  %v1052_v44 = vsel %vm101_vm0, %v9344_v39, 0  ;;  %v12317_v61 = vld [vmem:[%s16932_s0 + $0x30] sm:$0xff]  ;;  %v9445_v12 = vld [vmem:[#allocation3 + $0x10] sm:$0xf] }
  0x3c   :  { %v12337_v14 = vld [vmem:[#allocation3 + $0x14] sm:$0x70] }
  0x3d   :  { %447 = vmatpush.bf16.msra.mxu1 %v9168_v17  ;;  %594 = vmatpush.bf16.msra.mxu2 %v9164_v51  ;;  %v12313_v51 = vld [vmem:[#allocation3 + $0x44] sm:$0xf0] }
  0x3e   :  { %608 = vmatpush.bf16.msra.mxu3 %v9168_v17  ;;  %v9294_v54 = vor.u32 %v12313_v51, %v9293_v50  ;;  %v12321_v17 = vld [vmem:[#allocation3 + $0x14] sm:$0x70] }
  0x3f   :  { %622 = vmatpush.bf16.msra.mxu0 %v9186_v6 }
  0x47   :  { %9144 = vmatmul.msk.bf16.vlgmr.msrb.gmra.mxu1 %vm97_vm1, %v13110_v27  ;;  %v9277_v27 = vld [vmem:[#allocation3 + $0x10] sm:$0xf] }
  0x48   :  { %9199 = vmatmul.msk.bf16.vlgmr.msrb.gmra.mxu2 %vm97_vm1, %v12285_v23  ;;  %9200 = vmatmul.msk.bf16.vlgmr.msrb.gmra.mxu3 %vm97_vm1, %v12285_v23  ;;  %v9278_v40 = vor.u32 %v12305_v35, %v9277_v27  ;;  %v9366_v23 = vor.u32 %v12320_v18, %v9363_v19  ;;  %v9354_v27 = vor.u32 %v12319_v29, %v9353_v28  ;;  %v9437_v29 = vld [vmem:[#allocation3] sm:$0xf] }
  0x49   :  { %573 = vmatpush.bf16.msrb.mxu1 %v551_v26  ;;  %660 = vmatpush.bf16.msrb.mxu2 %v548_v3  ;;  %v12326_v3 = vld [vmem:[#allocation3 + $0x34] sm:$0x70]  ;;  %v9446_v18 = vor.u32 %v12337_v14, %v9445_v12 }
  0x4a   :  { %9223 = vmatmul.msk.bf16.vlgmr.msrb.gmra.mxu0 %vm97_vm1, %v12295_v25  ;;  %674 = vmatpush.bf16.msrb.mxu3 %v551_v26  ;;  %v795_v45 = vsel %vm101_vm0, %v9278_v40, 0  ;;  %v9340_v6 = vor.u32 %v12326_v3, %v9339_v2  ;;  %v13229_v26 = vsel %vm101_vm0, %v9366_v23, 0  ;;  %v12328_v2 = vld [vmem:[#allocation3 + $0x44] sm:$0xf]  ;;  %v9379_v3 = vld [vmem:[#allocation3 + $0x48] sm:$0xf0] }
  0x4b   :  { %746 = vmatpush.bf16.msrb.mxu0 %v735_v30 }
  0x4c   :  { %v13222_v11 = vsel %vm101_vm0, %v9340_v6, 0  ;;  %v12340_v6 = vld [vmem:[#allocation3 + $0x24] sm:$0xf0] }
  0x4d   :  { %574 = vmatpush.bf16.msrb.mxu1 %v9214_v33  ;;  %661 = vmatpush.bf16.msrb.mxu2 %v9210_v8 }
  0x4e   :  { %675 = vmatpush.bf16.msrb.mxu3 %v9214_v33  ;;  %v9377_v33 = vld [vmem:[#allocation3 + $0x40] sm:$0xf] }
  0x4f   :  { %747 = vmatpush.bf16.msrb.mxu0 %v9248_v34 }
  0x57   :  { %9178 = vmatmul.msk.bf16.vlgmr.msra.gmra.mxu1 %vm97_vm1, %v13155_v13 }
  0x58   :  { %9225 = vmatmul.msk.bf16.vlgmr.msra.gmra.mxu2 %vm97_vm1, %v12295_v25  ;;  %9226 = vmatmul.msk.bf16.vlgmr.msra.gmra.mxu3 %vm97_vm1, %v12295_v25 }
  0x59   :  { %635 = vmatpush.bf16.msra.mxu1 %v13134_v0  ;;  %806 = vmatpush.bf16.msra.mxu2 %v795_v45  ;;  %v12314_v0 = vld [vmem:[#allocation3 + $0x54] sm:$0xf] }
  0x5a   :  { %9227 = vmatmul.msk.bf16.vlgmr.msra.gmra.mxu0 %vm97_vm1, %v13155_v13  ;;  %820 = vmatpush.bf16.msra.mxu3 %v13181_v46  ;;  %v9306_v4 = vor.u32 %v12314_v0, %v9303_v1 }
  0x5b   :  { %873 = vmatpush.bf16.msra.mxu0 %v862_v49 }
  0x5c   :  { %v865_v8 = vsel %vm101_vm0, %v9306_v4, 0 }
  0x5d   :  { %636 = vmatpush.bf16.msra.mxu1 %v13145_v7  ;;  %807 = vmatpush.bf16.msra.mxu2 %v9270_v52  ;;  %v13214_v7 = vld [vmem:[%s16932_s0 + $0x30] sm:$0xff] }
  0x5e   :  { %821 = vmatpush.bf16.msra.mxu3 %v13190_v53 }
  0x5f   :  { %874 = vmatpush.bf16.msra.mxu0 %v9294_v54 }
  0x67   :  { %9224 = vmatmul.msk.bf16.vlgmr.msrb.gmra.mxu1 %vm97_vm1, %v12295_v25 }
  0x68   :  { %9235 = vmatmul.msk.bf16.vlgmr.msrb.gmra.mxu2 %vm97_vm1, %v12300_v58  ;;  %9236 = vmatmul.msk.bf16.vlgmr.msrb.gmra.mxu3 %vm97_vm1, %v12300_v58 }
  0x69   :  { %760 = vmatpush.bf16.msrb.mxu1 %v738_v60  ;;  %907 = vmatpush.bf16.msrb.mxu2 %v735_v30  ;;  %v12318_v30 = vld [vmem:[#allocation3 + $0x4] sm:$0xf] }
  0x6a   :  { %9261 = vmatmul.msk.bf16.vlgmr.msrb.gmra.mxu0 %vm97_vm1, %v13200_v59  ;;  %921 = vmatpush.bf16.msrb.mxu3 %v738_v60  ;;  %v13244_v35 = vor.u32 %v12318_v30, %v9355_v31  ;;  %v12335_v30 = vld [vmem:[#allocation3 + $0x4] sm:$0xf0]  ;;  %v12334_v31 = vld [vmem:[#allocation3 + $0x4] sm:$0xf] }
  0x6b   :  { %935 = vmatpush.bf16.msrb.mxu0 %v795_v45  ;;  %v12323_v45 = vld [vmem:[#allocation3 + $0x24] sm:$0xf] }
  0x6d   :  { %761 = vmatpush.bf16.msrb.mxu1 %v9252_v63  ;;  %908 = vmatpush.bf16.msrb.mxu2 %v9248_v34  ;;  %v12329_v34 = vld [vmem:[#allocation3 + $0x44] sm:$0xf0] }
  0x6e   :  { %922 = vmatpush.bf16.msrb.mxu3 %v9252_v63  ;;  %v13247_v36 = vor.u32 %v12329_v34, %v9377_v33  ;;  %v13292_v63 = vld [vmem:[%s16932_s0 + $0x40] sm:$0xff]  ;;  %v9461_v34 = vld [vmem:[#allocation3 + $0x40] sm:$0xf] }
  0x6f   :  { %936 = vmatpush.bf16.msrb.mxu0 %v9270_v52  ;;  %v12330_v52 = vld [vmem:[#allocation3 + $0x54] sm:$0xf] }
  0x77   :  { %9228 = vmatmul.msk.bf16.vlgmr.msra.gmra.mxu1 %vm97_vm1, %v13155_v13  ;;  %v9361_v13 = vld [vmem:[#allocation3 + $0x10] sm:$0xf] }
  0x78   :  { %9283 = vmatmul.msk.bf16.vlgmr.msra.gmra.mxu2 %vm97_vm1, %v12301_v5  ;;  %9284 = vmatmul.msk.bf16.vlgmr.msra.gmra.mxu3 %vm97_vm1, %v12301_v5  ;;  %v9362_v22 = vor.u32 %v12321_v17, %v9361_v13  ;;  %v9415_v5 = vld [vmem:[#allocation3 + $0x20] sm:$0xf]  ;;  %v9469_v13 = vld [vmem:[#allocation3 + $0x50] sm:$0xf]  ;;  %v12347_v17 = vld [vmem:[#allocation3 + $0x54] sm:$0x70] }
  0x79   :  { %887 = vmatpush.bf16.msra.mxu1 %v865_v8  ;;  %974 = vmatpush.bf16.msra.mxu2 %v862_v49  ;;  %v9470_v23 = vor.u32 %v12347_v17, %v9469_v13 }
  0x7a   :  { %9307 = vmatmul.msk.bf16.vlgmr.msra.gmra.mxu0 %vm97_vm1, %v13214_v7  ;;  %988 = vmatpush.bf16.msra.mxu3 %v865_v8  ;;  %v1109_v25 = vsel %vm101_vm0, %v9362_v22, 0 }
  0x7b   :  { %1060 = vmatpush.bf16.msra.mxu0 %v13222_v11  ;;  %v13335_v33 = vsel %vm101_vm0, %v9470_v23, 0  ;;  %v9471_v23 = vld [vmem:[#allocation3 + $0x58] sm:$0x70] }
  0x7d   :  { %888 = vmatpush.bf16.msra.mxu1 %v9298_v15  ;;  %975 = vmatpush.bf16.msra.mxu2 %v9294_v54  ;;  %v9423_v54 = vld [vmem:[#allocation3 + $0x30] sm:$0xf] }
  0x7e   :  { %989 = vmatpush.bf16.msra.mxu3 %v9298_v15  ;;  %v9424_v62 = vor.u32 %v12342_v55, %v9423_v54  ;;  %v12336_v15 = vld [vmem:[#allocation3 + $0x14] sm:$0xf] }
  0x7f   :  { %1061 = vmatpush.bf16.msra.mxu0 %v9332_v16 }
  0x80   :  { %v13302_v4 = vsel %vm101_vm0, %v9424_v62, 0 }
  0x87   :  { %9262 = vmatmul.msk.bf16.vlgmr.msrb.gmra.mxu1 %vm97_vm1, %v13200_v59 }
  0x88   :  { %9309 = vmatmul.msk.bf16.vlgmr.msrb.gmra.mxu2 %vm97_vm1, %v13214_v7  ;;  %9310 = vmatmul.msk.bf16.vlgmr.msrb.gmra.mxu3 %vm97_vm1, %v13214_v7 }
  0x89   :  { %949 = vmatpush.bf16.msrb.mxu1 %v13181_v46  ;;  %1120 = vmatpush.bf16.msrb.mxu2 %v1109_v25  ;;  %v9333_v46 = vld [vmem:[#allocation3 + $0x28] sm:$0xf0] }
  0x8a   :  { %9311 = vmatmul.msk.bf16.vlgmr.msrb.gmra.mxu0 %vm97_vm1, %v13200_v59  ;;  %1134 = vmatpush.bf16.msrb.mxu3 %v13229_v26  ;;  %v9336_v47 = vor.u32 %v12323_v45, %v9333_v46  ;;  %v9425_v46 = vld [vmem:[#allocation3 + $0x38] sm:$0x70] }
  0x8b   :  { %1187 = vmatpush.bf16.msrb.mxu0 %v13238_v32 }
  0x8d   :  { %950 = vmatpush.bf16.msrb.mxu1 %v13190_v53  ;;  %1121 = vmatpush.bf16.msrb.mxu2 %v9354_v27  ;;  %v9387_v53 = vld [vmem:[#allocation3 + $0x58] sm:$0x70] }
  0x8e   :  { %1135 = vmatpush.bf16.msrb.mxu3 %v13244_v35  ;;  %v9390_v56 = vor.u32 %v12330_v52, %v9387_v53 }
  0x8f   :  { %1188 = vmatpush.bf16.msrb.mxu0 %v13247_v36 }
  0x90   :  { %v1179_v1 = vsel %vm101_vm0, %v9390_v56, 0 }
  0x94   :  { %v13252_v40 = vpop.f32.mrf.mxu1 }
  0x97   :  { %v13262_v43 = vpop.f32.mrf.mxu0  ;;  %9308 = vmatmul.msk.bf16.vlgmr.msra.gmra.mxu1 %vm97_vm1, %v13214_v7  ;;  %v9382_v7 = vor.u32 %v12328_v2, %v9379_v3  ;;  %v13363_v2 = vld [vmem:[%s16932_s0 + $0x48] sm:$0xff] }
  0x98   :  { %9319 = vmatmul.msk.bf16.vlgmr.msra.gmra.mxu2 %vm97_vm1, %v12316_v41  ;;  %9320 = vmatmul.msk.bf16.vlgmr.msra.gmra.mxu3 %vm97_vm1, %v12316_v41 }
  0x99   :  { %1074 = vmatpush.bf16.msra.mxu1 %v1052_v44  ;;  %1221 = vmatpush.bf16.msra.mxu2 %v13222_v11 }
  0x9a   :  { %9345 = vmatmul.msk.bf16.vlgmr.msra.gmra.mxu0 %vm97_vm1, %v13260_v42  ;;  %1235 = vmatpush.bf16.msra.mxu3 %v1052_v44 }
  0x9b   :  { %v13272_v48 = vpop.f32.mrf.mxu2  ;;  %v13274_v49 = vpop.f32.mrf.mxu3  ;;  %1249 = vmatpush.bf16.msra.mxu0 %v1109_v25  ;;  %v13323_v25 = vsel %vm101_vm0, %v9446_v18, 0 }
  0x9c   :  { %v13276_v50 = vpop.f32.mrf.mxu1  ;;  %v178_v52 = vadd.f32 %v13272_v48, %v13252_v40 }
  0x9d   :  { %1075 = vmatpush.bf16.msra.mxu1 %v9336_v47  ;;  %1222 = vmatpush.bf16.msra.mxu2 %v9332_v16  ;;  %v9447_v16 = vld [vmem:[#allocation3 + $0x18] sm:$0x70] }
  0x9e   :  { %1236 = vmatpush.bf16.msra.mxu3 %v9336_v47  ;;  %v9450_v19 = vor.u32 %v12336_v15, %v9447_v16  ;;  %v264_v3 = vadd.f32 %v13262_v43, %v178_v52  ;;  %v9499_v52 = vld [vmem:[#allocation3 + $0x20] sm:$0xf] }
  0x9f   :  { %v13278_v51 = vpop.f32.mrf.mxu0  ;;  %1250 = vmatpush.bf16.msra.mxu0 %v9354_v27  ;;  %v12345_v27 = vld [vmem:[#allocation3 + $0x44] sm:$0xf0] }
  0xa0   :  { %v13326_v28 = vsel %vm101_vm0, %v9450_v19, 0  ;;  %v13345_v41 = vor.u32 %v12345_v27, %v9461_v34 }
  0xa3   :  { %v13280_v57 = vpop.f32.mrf.mxu2  ;;  %v13282_v58 = vpop.f32.mrf.mxu3 }
  0xa4   :  { %v13284_v60 = vpop.f32.mrf.mxu1 }
  0xa5   :  { %v192_v53 = vadd.f32 %v13274_v49, %v13284_v60  ;;  %v12339_v49 = vld [vmem:[#allocation3 + $0x24] sm:$0xf]  ;;  %v9417_v60 = vld [vmem:[#allocation3 + $0x28] sm:$0xf0] }
  0xa6   :  { %v9420_v43 = vor.u32 %v12339_v49, %v9417_v60  ;;  %v9553_v49 = vld [vmem:[#allocation3 + $0x50] sm:$0xf]  ;;  %v12363_v60 = vld [vmem:[#allocation3 + $0x54] sm:$0x70] }
  0xa7   :  { %v13294_v0 = vpop.f32.mrf.mxu0  ;;  %9312 = vmatmul.msk.bf16.vlgmr.msrb.gmra.mxu1 %vm97_vm1, %v13200_v59  ;;  %v13308_v59 = vor.u32 %v12340_v6, %v9415_v5 }
  0xa8   :  { %9367 = vmatmul.msk.bf16.vlgmr.msrb.gmra.mxu2 %vm97_vm1, %v12317_v61  ;;  %9368 = vmatmul.msk.bf16.vlgmr.msrb.gmra.mxu3 %vm97_vm1, %v12317_v61 }
  0xa9   :  { %1201 = vmatpush.bf16.msrb.mxu1 %v1179_v1  ;;  %1288 = vmatpush.bf16.msrb.mxu2 %v13238_v32  ;;  %v9439_v32 = vld [vmem:[#allocation3 + $0x8] sm:$0xf0] }
  0xaa   :  { %9391 = vmatmul.msk.bf16.vlgmr.msrb.gmra.mxu0 %vm97_vm1, %v13292_v63  ;;  %1302 = vmatpush.bf16.msrb.mxu3 %v1179_v1  ;;  %v13342_v37 = vor.u32 %v12334_v31, %v9439_v32 }
  0xab   :  { %v279_v8 = vpop.f32.mrf.mxu2  ;;  %v293_v9 = vpop.f32.mrf.mxu3  ;;  %1374 = vmatpush.bf16.msrb.mxu0 %v13302_v4 }
  0xac   :  { %v13310_v10 = vpop.f32.mrf.mxu1  ;;  %v308_v61 = vadd.f32 %v13294_v0, %v279_v8  ;;  %v13376_v8 = vld [vmem:[%s16934_s2] ss:$0 sm:$0xff] }
  0xad   :  { %1202 = vmatpush.bf16.msrb.mxu1 %v9382_v7  ;;  %1289 = vmatpush.bf16.msrb.mxu2 %v13247_v36  ;;  %v9438_v36 = vor.u32 %v12335_v30, %v9437_v29  ;;  %v12358_v29 = vld [vmem:[#allocation3 + $0x34] sm:$0x70] }
  0xae   :  { %1303 = vmatpush.bf16.msrb.mxu3 %v9382_v7 }
  0xaf   :  { %v13312_v11 = vpop.f32.mrf.mxu0  ;;  %1375 = vmatpush.bf16.msrb.mxu0 %v13308_v59 }
  0xb3   :  { %v13316_v20 = vpop.f32.mrf.mxu2  ;;  %v13318_v21 = vpop.f32.mrf.mxu3 }
  0xb4   :  { %v259_v22 = vpop.f32.mrf.mxu1  ;;  %v310_v13 = vadd.f32 %v13312_v11, %v13316_v20 }
  0xb5   :  { %v265_v62 = vadd.f32 %v259_v22, %v192_v53  ;;  %v12346_v22 = vld [vmem:[#allocation3 + $0x54] sm:$0xf]  ;;  %v12356_v53 = vld [vmem:[#allocation3 + $0x24] sm:$0xf0] }
  0xb7   :  { %v13320_v24 = vpop.f32.mrf.mxu0  ;;  %9346 = vmatmul.msk.bf16.vlgmr.msra.gmra.mxu1 %vm97_vm1, %v13260_v42  ;;  %v268_v0 = vmax.f32 %v264_v3, %v265_v62  ;;  %v9529_v62 = vld [vmem:[#allocation3 + $0x10] sm:$0xf] }
  0xb8   :  { %9393 = vmatmul.msk.bf16.vlgmr.msra.gmra.mxu2 %vm97_vm1, %v13292_v63  ;;  %9394 = vmatmul.msk.bf16.vlgmr.msra.gmra.mxu3 %vm97_vm1, %v13292_v63 }
  0xb9   :  { %1263 = vmatpush.bf16.msra.mxu1 %v13229_v26  ;;  %1434 = vmatpush.bf16.msra.mxu2 %v13323_v25  ;;  %v12341_v26 = vld [vmem:[#allocation3 + $0x34] sm:$0xf] }
  0xba   :  { %9395 = vmatmul.msk.bf16.vlgmr.msra.gmra.mxu0 %vm97_vm1, %v13260_v42  ;;  %1448 = vmatpush.bf16.msra.mxu3 %v13326_v28  ;;  %v9428_v47 = vor.u32 %v12341_v26, %v9425_v46  ;;  %v9463_v26 = vld [vmem:[#allocation3 + $0x48] sm:$0xf0] }
  0xbb   :  { %v346_v38 = vpop.f32.mrf.mxu2  ;;  %v360_v39 = vpop.f32.mrf.mxu3  ;;  %1501 = vmatpush.bf16.msra.mxu0 %v13335_v33 }
  0xbc   :  { %v261_v44 = vpop.f32.mrf.mxu1  ;;  %v1366_v48 = vsel %vm101_vm0, %v9428_v47, 0  ;;  %v365_v5 = vadd.f32 %v346_v38, %v308_v61 }
  0xbd   :  { %1264 = vmatpush.bf16.msra.mxu1 %v13244_v35  ;;  %1435 = vmatpush.bf16.msra.mxu2 %v9438_v36  ;;  %v12332_v35 = vld [vmem:[%s16932_s0 + $0x48] sm:$0xff] }
  0xbe   :  { %1449 = vmatpush.bf16.msra.mxu3 %v13342_v37 }
  0xbf   :  { %v13348_v45 = vpop.f32.mrf.mxu0  ;;  %1502 = vmatpush.bf16.msra.mxu0 %v13345_v41 }
  0xc3   :  { %v348_v54 = vpop.f32.mrf.mxu2  ;;  %v362_v55 = vpop.f32.mrf.mxu3 }
  0xc4   :  { %v321_v56 = vpop.f32.mrf.mxu1 }
  0xc5   :  { %v322_v1 = vadd.f32 %v321_v56, %v293_v9  ;;  %v194_v9 = vadd.f32 %v13282_v58, %v13310_v10  ;;  %v367_v58 = vadd.f32 %v348_v54, %v310_v13  ;;  %v13427_v56 = vor.u32 %v12356_v53, %v9499_v52  ;;  %v12350_v13 = vld [vmem:[#allocation3 + $0x4] sm:$0xf] }
  0xc7   :  { %v13365_v40 = vpop.f32.mrf.mxu0  ;;  %v366_v6 = vadd.f32 %v360_v39, %v322_v1  ;;  %9392 = vmatmul.msk.bf16.vlgmr.msrb.gmra.mxu1 %vm97_vm1, %v13292_v63  ;;  %v180_v63 = vadd.f32 %v13280_v57, %v13276_v50  ;;  %v267_v17 = vadd.f32 %v261_v44, %v194_v9  ;;  %v12344_v44 = vld [vmem:[#allocation3 + $0x44] sm:$0xf]  ;;  %v12353_v1 = vld [vmem:[#allocation3 + $0x14] sm:$0x70] }
  0xc8   :  { %9403 = vmatmul.msk.bf16.vlgmr.msrb.gmra.mxu2 %vm97_vm1, %v12332_v35  ;;  %9404 = vmatmul.msk.bf16.vlgmr.msrb.gmra.mxu3 %vm97_vm1, %v12332_v35  ;;  %v9466_v54 = vor.u32 %v12344_v44, %v9463_v26  ;;  %v9530_v3 = vor.u32 %v12353_v1, %v9529_v62 }
  0xc9   :  { %v369_v7 = vmax.f32 %v365_v5, %v366_v6  ;;  %1388 = vmatpush.bf16.msrb.mxu1 %v1366_v48  ;;  %1535 = vmatpush.bf16.msrb.mxu2 %v13302_v4  ;;  %v266_v57 = vadd.f32 %v13278_v51, %v180_v63  ;;  %v12333_v51 = vld [vmem:[%s16932_s0 + $0x40] sm:$0xff] }
  0xca   :  { %9429 = vmatmul.msk.bf16.vlgmr.msrb.gmra.mxu0 %vm97_vm1, %v13363_v2  ;;  %1549 = vmatpush.bf16.msrb.mxu3 %v1366_v48  ;;  %v9531_v48 = vld [vmem:[#allocation3 + $0x18] sm:$0x70] }
  0xcb   :  { %v371_v12 = vmax.f32 %v268_v0, %v369_v7  ;;  %v13385_v14 = vpop.f32.mrf.mxu2  ;;  %v13387_v15 = vpop.f32.mrf.mxu3  ;;  %1563 = vmatpush.bf16.msrb.mxu0 %v13323_v25  ;;  %v269_v11 = vmax.f32 %v266_v57, %v267_v17  ;;  %v9507_v25 = vld [vmem:[#allocation3 + $0x30] sm:$0xf]  ;;  %v9523_v17 = vld [vmem:[#allocation3 + $0x8] sm:$0xf0]  ;;  %v12361_v57 = vld [vmem:[#allocation3 + $0x44] sm:$0xf0] }
  0xcc   :  { %v323_v16 = vpop.f32.mrf.mxu1  ;;  %v9508_v34 = vor.u32 %v12358_v29, %v9507_v25  ;;  %v9509_v25 = vld [vmem:[#allocation3 + $0x38] sm:$0x70] }
  0xcd   :  { %v376_v4 = vadd.f32 %v13376_v8, %v371_v12  ;;  %v324_v18 = vadd.f32 %v323_v16, %v13318_v21  ;;  %1389 = vmatpush.bf16.msrb.mxu1 %v9420_v43  ;;  %1536 = vmatpush.bf16.msrb.mxu2 %v13308_v59  ;;  %v9474_v21 = vor.u32 %v12346_v22, %v9471_v23  ;;  %v9521_v12 = vld [vmem:[#allocation3] sm:$0xf]  ;;  %v12351_v16 = vld [vmem:[#allocation3 + $0x4] sm:$0xf0] }
  0xce   :  { %1550 = vmatpush.bf16.msrb.mxu3 %v9420_v43  ;;  %v13421_v47 = vsel %vm101_vm0, %v9508_v34, 0  ;;  %v9554_v43 = vor.u32 %v12363_v60, %v9553_v49 }
  0xcf   :  { %v13394_v50 = vpop.f32.mrf.mxu0  ;;  %v378_v10 = vpack.c.bf16 %v376_v4, %v376_v4  ;;  %v368_v19 = vadd.f32 %v362_v55, %v324_v18  ;;  %1564 = vmatpush.bf16.msrb.mxu0 %v9438_v36  ;;  %v13411_v36 = vld [vmem:[%s16932_s0 + $0x50] sm:$0xff]  ;;  %v1493_v39 = vsel %vm101_vm0, %v9474_v21, 0  ;;  %v496_v21 = vadd.f32 %v13385_v14, %v13320_v24 }
  0xd0   :  { %v13452_v4 = vsel %vm101_vm0, %v9554_v43, 0  ;;  %v9545_v18 = vld [vmem:[#allocation3 + $0x40] sm:$0xf]  ;;  %v9555_v43 = vld [vmem:[#allocation3 + $0x58] sm:$0x70] }
  0xd1   :  { %380 = vst [vmem:[#allocation2] sm:$0xf] %v378_v10  ;;  %v370_v20 = vmax.f32 %v367_v58, %v368_v19  ;;  %v9522_v58 = vor.u32 %v12351_v16, %v9521_v12  ;;  %v13458_v10 = vor.u32 %v12350_v13, %v9523_v17  ;;  %v13461_v23 = vor.u32 %v12361_v57, %v9545_v18  ;;  %v12374_v12 = vld [vmem:[#allocation3 + $0x34] sm:$0x70] }
  0xd2   :  { %v581_v52 = vadd.f32 %v13365_v40, %v496_v21  ;;  %v9583_v21 = vld [vmem:[#allocation3 + $0x20] sm:$0xf] }
  0xd3   :  { %v372_v30 = vmax.f32 %v269_v11, %v370_v20  ;;  %v13398_v31 = vpop.f32.mrf.mxu2  ;;  %v13400_v32 = vpop.f32.mrf.mxu3 }
  0xd4   :  { %v13402_v59 = vpop.f32.mrf.mxu1  ;;  %v498_v40 = vadd.f32 %v13398_v31, %v13348_v45 }
  0xd5   :  { %v377_v27 = vadd.f32 %v13376_v8, %v372_v30  ;;  %v510_v30 = vadd.f32 %v13387_v15, %v13402_v59  ;;  %v12355_v15 = vld [vmem:[#allocation3 + $0x24] sm:$0xf]  ;;  %v9501_v59 = vld [vmem:[#allocation3 + $0x28] sm:$0xf0] }
  0xd6   :  { %v583_v31 = vadd.f32 %v13394_v50, %v498_v40  ;;  %v12349_v50 = vld [vmem:[%s16932_s0 + $0x50] sm:$0xff] }
  0xd7   :  { %v13413_v38 = vpop.f32.mrf.mxu0  ;;  %v379_v46 = vpack.c.bf16 %v377_v27, %v377_v27  ;;  %9396 = vmatmul.msk.bf16.vlgmr.msra.gmra.mxu1 %vm97_vm1, %v13260_v42 }
  0xd8   :  { %9451 = vmatmul.msk.bf16.vlgmr.msra.gmra.mxu2 %vm97_vm1, %v12333_v51  ;;  %9452 = vmatmul.msk.bf16.vlgmr.msra.gmra.mxu3 %vm97_vm1, %v12333_v51 }
  0xd9   :  { %381 = vst [vmem:[#allocation2 + $0x38] sm:$0xf] %v379_v46  ;;  %1515 = vmatpush.bf16.msra.mxu1 %v1493_v39  ;;  %1602 = vmatpush.bf16.msra.mxu2 %v13335_v33  ;;  %v12352_v33 = vld [vmem:[#allocation3 + $0x14] sm:$0xf]  ;;  %v13479_v46 = vld [vmem:[%s16932_s0 + $0x58] sm:$0xff] }
  0xda   :  { %9475 = vmatmul.msk.bf16.vlgmr.msra.gmra.mxu0 %vm97_vm1, %v13411_v36  ;;  %1616 = vmatpush.bf16.msra.mxu3 %v1493_v39  ;;  %v9534_v5 = vor.u32 %v12352_v33, %v9531_v48 }
  0xdb   :  { %v596_v55 = vpop.f32.mrf.mxu2  ;;  %v610_v42 = vpop.f32.mrf.mxu3  ;;  %1688 = vmatpush.bf16.msra.mxu0 %v13421_v47 }
  0xdc   :  { %v13429_v35 = vpop.f32.mrf.mxu1  ;;  %v13443_v9 = vsel %vm101_vm0, %v9534_v5, 0  ;;  %v625_v39 = vadd.f32 %v13413_v38, %v596_v55 }
  0xdd   :  { %1516 = vmatpush.bf16.msra.mxu1 %v9466_v54  ;;  %1603 = vmatpush.bf16.msra.mxu2 %v13345_v41  ;;  %v1737_v41 = vsel %vm101_vm0, %v9530_v3, 0 }
  0xde   :  { %1617 = vmatpush.bf16.msra.mxu3 %v9466_v54 }
  0xdf   :  { %v13431_v61 = vpop.f32.mrf.mxu0  ;;  %1689 = vmatpush.bf16.msra.mxu0 %v13427_v56 }
  0xe3   :  { %v13435_v6 = vpop.f32.mrf.mxu2  ;;  %v13437_v0 = vpop.f32.mrf.mxu3 }
  0xe4   :  { %v576_v7 = vpop.f32.mrf.mxu1  ;;  %v627_v49 = vadd.f32 %v13431_v61, %v13435_v6 }
  0xe5   :  { %v582_v44 = vadd.f32 %v576_v7, %v510_v30  ;;  %v12362_v7 = vld [vmem:[#allocation3 + $0x54] sm:$0xf]  ;;  %v12372_v30 = vld [vmem:[#allocation3 + $0x24] sm:$0xf0] }
  0xe7   :  { %v13439_v63 = vpop.f32.mrf.mxu0  ;;  %9430 = vmatmul.msk.bf16.vlgmr.msrb.gmra.mxu1 %vm97_vm1, %v13363_v2  ;;  %v585_v38 = vmax.f32 %v581_v52, %v582_v44  ;;  %v9613_v44 = vld [vmem:[#allocation3 + $0x10] sm:$0xf] }
  0xe8   :  { %9477 = vmatmul.msk.bf16.vlgmr.msrb.gmra.mxu2 %vm97_vm1, %v13411_v36  ;;  %9478 = vmatmul.msk.bf16.vlgmr.msrb.gmra.mxu3 %vm97_vm1, %v13411_v36 }
  0xe9   :  { %1577 = vmatpush.bf16.msrb.mxu1 %v13326_v28  ;;  %1748 = vmatpush.bf16.msrb.mxu2 %v1737_v41  ;;  %v12357_v28 = vld [vmem:[#allocation3 + $0x34] sm:$0xf] }
  0xea   :  { %9479 = vmatmul.msk.bf16.vlgmr.msrb.gmra.mxu0 %vm97_vm1, %v13363_v2  ;;  %1762 = vmatpush.bf16.msrb.mxu3 %v13443_v9  ;;  %v9512_v29 = vor.u32 %v12357_v28, %v9509_v25  ;;  %v9547_v28 = vld [vmem:[#allocation3 + $0x48] sm:$0xf0] }
  0xeb   :  { %v663_v19 = vpop.f32.mrf.mxu2  ;;  %v677_v22 = vpop.f32.mrf.mxu3  ;;  %1815 = vmatpush.bf16.msrb.mxu0 %v13452_v4 }
  0xec   :  { %v578_v11 = vpop.f32.mrf.mxu1  ;;  %v1680_v14 = vsel %vm101_vm0, %v9512_v29, 0  ;;  %v682_v53 = vadd.f32 %v663_v19, %v625_v39 }
  0xed   :  { %1578 = vmatpush.bf16.msrb.mxu1 %v13342_v37  ;;  %1749 = vmatpush.bf16.msrb.mxu2 %v9522_v58  ;;  %v12348_v37 = vld [vmem:[%s16932_s0 + $0x58] sm:$0xff] }
  0xee   :  { %1763 = vmatpush.bf16.msrb.mxu3 %v13458_v10 }
  0xef   :  { %v13464_v20 = vpop.f32.mrf.mxu0  ;;  %1816 = vmatpush.bf16.msrb.mxu0 %v13461_v23 }
  0xf3   :  { %v665_v51 = vpop.f32.mrf.mxu2  ;;  %v679_v34 = vpop.f32.mrf.mxu3 }
  0xf4   :  { %v638_v27 = vpop.f32.mrf.mxu1 }
  0xf5   :  { %v639_v26 = vadd.f32 %v638_v27, %v610_v42  ;;  %v9504_v42 = vor.u32 %v12355_v15, %v9501_v59  ;;  %v13537_v27 = vor.u32 %v12372_v30, %v9583_v21  ;;  %v9637_v15 = vld [vmem:[#allocation3 + $0x50] sm:$0xf]  ;;  %v12379_v59 = vld [vmem:[#allocation3 + $0x54] sm:$0x70] }
  0xf7   :  { %v13481_v24 = vpop.f32.mrf.mxu0  ;;  %v683_v54 = vadd.f32 %v677_v22, %v639_v26  ;;  %9476 = vmatmul.msk.bf16.vlgmr.msra.gmra.mxu1 %vm97_vm1, %v13411_v36  ;;  %v512_v36 = vadd.f32 %v13400_v32, %v13429_v35  ;;  %v684_v32 = vadd.f32 %v665_v51, %v627_v49  ;;  %v12369_v26 = vld [vmem:[#allocation3 + $0x14] sm:$0x70]  ;;  %v12366_v49 = vld [vmem:[#allocation3 + $0x4] sm:$0xf] }
  0xf8   :  { %9487 = vmatmul.msk.bf16.vlgmr.msra.gmra.mxu2 %vm97_vm1, %v12348_v37  ;;  %9488 = vmatmul.msk.bf16.vlgmr.msra.gmra.mxu3 %vm97_vm1, %v12348_v37  ;;  %v9614_v52 = vor.u32 %v12369_v26, %v9613_v44 }
  0xf9   :  { %v686_v55 = vmax.f32 %v682_v53, %v683_v54  ;;  %1702 = vmatpush.bf16.msra.mxu1 %v1680_v14  ;;  %1849 = vmatpush.bf16.msra.mxu2 %v13421_v47  ;;  %v584_v60 = vadd.f32 %v578_v11, %v512_v36  ;;  %v12360_v11 = vld [vmem:[#allocation3 + $0x44] sm:$0xf] }
  0xfa   :  { %9513 = vmatmul.msk.bf16.vlgmr.msra.gmra.mxu0 %vm97_vm1, %v13479_v46  ;;  %1863 = vmatpush.bf16.msra.mxu3 %v1680_v14  ;;  %v9550_v51 = vor.u32 %v12360_v11, %v9547_v28  ;;  %v9615_v14 = vld [vmem:[#allocation3 + $0x18] sm:$0x70] }
  0xfb   :  { %v688_v62 = vmax.f32 %v585_v38, %v686_v55  ;;  %v13496_v1 = vpop.f32.mrf.mxu2  ;;  %v13498_v33 = vpop.f32.mrf.mxu3  ;;  %1877 = vmatpush.bf16.msra.mxu0 %v1737_v41  ;;  %v586_v61 = vmax.f32 %v583_v31, %v584_v60  ;;  %v9591_v41 = vld [vmem:[#allocation3 + $0x30] sm:$0xf]  ;;  %v9607_v60 = vld [vmem:[#allocation3 + $0x8] sm:$0xf0]  ;;  %v12377_v31 = vld [vmem:[#allocation3 + $0x44] sm:$0xf0] }
  0xfc   :  { %v640_v48 = vpop.f32.mrf.mxu1  ;;  %v9592_v18 = vor.u32 %v12374_v12, %v9591_v41  ;;  %v9593_v41 = vld [vmem:[#allocation3 + $0x38] sm:$0x70] }
  0xfd   :  { %v690_v47 = vadd.f32 %v13376_v8, %v688_v62  ;;  %v641_v3 = vadd.f32 %v640_v48, %v13437_v0  ;;  %1703 = vmatpush.bf16.msra.mxu1 %v9504_v42  ;;  %1850 = vmatpush.bf16.msra.mxu2 %v13427_v56  ;;  %v9558_v0 = vor.u32 %v12362_v7, %v9555_v43  ;;  %v9605_v62 = vld [vmem:[#allocation3] sm:$0xf]  ;;  %v12367_v48 = vld [vmem:[#allocation3 + $0x4] sm:$0xf0] }
  0xfe   :  { %1864 = vmatpush.bf16.msra.mxu3 %v9504_v42  ;;  %v13531_v29 = vsel %vm101_vm0, %v9592_v18, 0  ;;  %v9638_v42 = vor.u32 %v12379_v59, %v9637_v15 }
  0xff   :  { %v13504_v45 = vpop.f32.mrf.mxu0  ;;  %v692_v35 = vpack.c.bf16 %v690_v47, %v690_v47  ;;  %v685_v5 = vadd.f32 %v679_v34, %v641_v3  ;;  %1878 = vmatpush.bf16.msra.mxu0 %v9522_v58  ;;  %v13521_v58 = vld [vmem:[%s16932_s0 + $0x60] sm:$0xff]  ;;  %v1807_v22 = vsel %vm101_vm0, %v9558_v0, 0  ;;  %v9629_v3 = vld [vmem:[#allocation3 + $0x40] sm:$0xf]  ;;  %v810_v0 = vadd.f32 %v13496_v1, %v13439_v63 }
 0x100   :  { %v13562_v47 = vsel %vm101_vm0, %v9638_v42, 0  ;;  %v13571_v43 = vor.u32 %v12377_v31, %v9629_v3  ;;  %v9639_v42 = vld [vmem:[#allocation3 + $0x58] sm:$0x70] }
 0x101   :  { %694 = vst [vmem:[#allocation2 + $0x4] sm:$0xf] %v692_v35  ;;  %v687_v6 = vmax.f32 %v684_v32, %v685_v5  ;;  %v9606_v32 = vor.u32 %v12367_v48, %v9605_v62  ;;  %v13568_v35 = vor.u32 %v12366_v49, %v9607_v60  ;;  %v895_v21 = vadd.f32 %v13481_v24, %v810_v0  ;;  %v12390_v62 = vld [vmem:[#allocation3 + $0x34] sm:$0x70]  ;;  %v9667_v0 = vld [vmem:[#allocation3 + $0x20] sm:$0xf] }
 0x103   :  { %v689_v16 = vmax.f32 %v586_v61, %v687_v6  ;;  %v13508_v13 = vpop.f32.mrf.mxu2  ;;  %v13510_v17 = vpop.f32.mrf.mxu3 }
 0x104   :  { %v13512_v56 = vpop.f32.mrf.mxu1  ;;  %v812_v24 = vadd.f32 %v13508_v13, %v13464_v20 }
 0x105   :  { %v691_v57 = vadd.f32 %v13376_v8, %v689_v16  ;;  %v824_v16 = vadd.f32 %v13498_v33, %v13512_v56  ;;  %v12371_v33 = vld [vmem:[#allocation3 + $0x24] sm:$0xf]  ;;  %v9585_v56 = vld [vmem:[#allocation3 + $0x28] sm:$0xf0] }
 0x106   :  { %v897_v13 = vadd.f32 %v13504_v45, %v812_v24  ;;  %v12365_v45 = vld [vmem:[%s16932_s0 + $0x60] sm:$0xff] }
 0x107   :  { %v13523_v19 = vpop.f32.mrf.mxu0  ;;  %v693_v25 = vpack.c.bf16 %v691_v57, %v691_v57  ;;  %9480 = vmatmul.msk.bf16.vlgmr.msrb.gmra.mxu1 %vm97_vm1, %v13363_v2 }
 0x108   :  { %9535 = vmatmul.msk.bf16.vlgmr.msrb.gmra.mxu2 %vm97_vm1, %v12349_v50  ;;  %9536 = vmatmul.msk.bf16.vlgmr.msrb.gmra.mxu3 %vm97_vm1, %v12349_v50 }
 0x109   :  { %695 = vst [vmem:[#allocation2 + $0x3c] sm:$0xf] %v693_v25  ;;  %1829 = vmatpush.bf16.msrb.mxu1 %v1807_v22  ;;  %1916 = vmatpush.bf16.msrb.mxu2 %v13452_v4  ;;  %v12368_v4 = vld [vmem:[#allocation3 + $0x14] sm:$0xf]  ;;  %v13589_v25 = vld [vmem:[%s16932_s0 + $0x68] sm:$0xff] }
 0x10a   :  { %9559 = vmatmul.msk.bf16.vlgmr.msrb.gmra.mxu0 %vm97_vm1, %v13521_v58  ;;  %1930 = vmatpush.bf16.msrb.mxu3 %v1807_v22  ;;  %v9618_v53 = vor.u32 %v12368_v4, %v9615_v14 }
 0x10b   :  { %v910_v34 = vpop.f32.mrf.mxu2  ;;  %v924_v2 = vpop.f32.mrf.mxu3  ;;  %2002 = vmatpush.bf16.msrb.mxu0 %v13531_v29 }
 0x10c   :  { %v13539_v37 = vpop.f32.mrf.mxu1  ;;  %v13553_v36 = vsel %vm101_vm0, %v9618_v53, 0  ;;  %v939_v22 = vadd.f32 %v13523_v19, %v910_v34 }
 0x10d   :  { %1830 = vmatpush.bf16.msrb.mxu1 %v9550_v51  ;;  %1917 = vmatpush.bf16.msrb.mxu2 %v13461_v23  ;;  %v2051_v23 = vsel %vm101_vm0, %v9614_v52, 0 }
 0x10e   :  { %1931 = vmatpush.bf16.msrb.mxu3 %v9550_v51 }
 0x10f   :  { %v13541_v39 = vpop.f32.mrf.mxu0  ;;  %2003 = vmatpush.bf16.msrb.mxu0 %v13537_v27 }
 0x113   :  { %v13545_v54 = vpop.f32.mrf.mxu2  ;;  %v13547_v38 = vpop.f32.mrf.mxu3 }
 0x114   :  { %v890_v55 = vpop.f32.mrf.mxu1  ;;  %v941_v15 = vadd.f32 %v13541_v39, %v13545_v54 }
 0x115   :  { %v896_v11 = vadd.f32 %v890_v55, %v824_v16  ;;  %v12378_v55 = vld [vmem:[#allocation3 + $0x54] sm:$0xf]  ;;  %v12388_v16 = vld [vmem:[#allocation3 + $0x24] sm:$0xf0] }
 0x117   :  { %v13549_v40 = vpop.f32.mrf.mxu0  ;;  %9514 = vmatmul.msk.bf16.vlgmr.msra.gmra.mxu1 %vm97_vm1, %v13479_v46  ;;  %v899_v19 = vmax.f32 %v895_v21, %v896_v11  ;;  %v9697_v11 = vld [vmem:[#allocation3 + $0x10] sm:$0xf] }
 0x118   :  { %9561 = vmatmul.msk.bf16.vlgmr.msra.gmra.mxu2 %vm97_vm1, %v13521_v58  ;;  %9562 = vmatmul.msk.bf16.vlgmr.msra.gmra.mxu3 %vm97_vm1, %v13521_v58 }
 0x119   :  { %1891 = vmatpush.bf16.msra.mxu1 %v13443_v9  ;;  %2062 = vmatpush.bf16.msra.mxu2 %v2051_v23  ;;  %v12373_v9 = vld [vmem:[#allocation3 + $0x34] sm:$0xf] }
 0x11a   :  { %9563 = vmatmul.msk.bf16.vlgmr.msra.gmra.mxu0 %vm97_vm1, %v13479_v46  ;;  %2076 = vmatpush.bf16.msra.mxu3 %v13553_v36  ;;  %v9596_v12 = vor.u32 %v12373_v9, %v9593_v41  ;;  %v9631_v9 = vld [vmem:[#allocation3 + $0x48] sm:$0xf0] }
 0x11b   :  { %v977_v5 = vpop.f32.mrf.mxu2  ;;  %v991_v7 = vpop.f32.mrf.mxu3  ;;  %2129 = vmatpush.bf16.msra.mxu0 %v13562_v47 }
 0x11c   :  { %v892_v61 = vpop.f32.mrf.mxu1  ;;  %v1994_v1 = vsel %vm101_vm0, %v9596_v12, 0  ;;  %v996_v30 = vadd.f32 %v977_v5, %v939_v22 }
 0x11d   :  { %1892 = vmatpush.bf16.msra.mxu1 %v13458_v10  ;;  %2063 = vmatpush.bf16.msra.mxu2 %v9606_v32  ;;  %v12364_v10 = vld [vmem:[%s16932_s0 + $0x68] sm:$0xff] }
 0x11e   :  { %2077 = vmatpush.bf16.msra.mxu3 %v13568_v35 }
 0x11f   :  { %v13574_v6 = vpop.f32.mrf.mxu0  ;;  %2130 = vmatpush.bf16.msra.mxu0 %v13571_v43 }
 0x123   :  { %v979_v50 = vpop.f32.mrf.mxu2  ;;  %v993_v18 = vpop.f32.mrf.mxu3 }
 0x124   :  { %v952_v57 = vpop.f32.mrf.mxu1 }
 0x125   :  { %v953_v28 = vadd.f32 %v952_v57, %v924_v2  ;;  %v9588_v2 = vor.u32 %v12371_v33, %v9585_v56  ;;  %v13647_v57 = vor.u32 %v12388_v16, %v9667_v0  ;;  %v9721_v33 = vld [vmem:[#allocation3 + $0x50] sm:$0xf]  ;;  %v12395_v56 = vld [vmem:[#allocation3 + $0x54] sm:$0x70] }
 0x127   :  { %v13591_v63 = vpop.f32.mrf.mxu0  ;;  %v997_v51 = vadd.f32 %v991_v7, %v953_v28  ;;  %9560 = vmatmul.msk.bf16.vlgmr.msrb.gmra.mxu1 %vm97_vm1, %v13521_v58  ;;  %v826_v58 = vadd.f32 %v13510_v17, %v13539_v37  ;;  %v998_v17 = vadd.f32 %v979_v50, %v941_v15  ;;  %v12385_v28 = vld [vmem:[#allocation3 + $0x14] sm:$0x70]  ;;  %v12382_v15 = vld [vmem:[#allocation3 + $0x4] sm:$0xf] }
 0x128   :  { %9571 = vmatmul.msk.bf16.vlgmr.msrb.gmra.mxu2 %vm97_vm1, %v12364_v10  ;;  %9572 = vmatmul.msk.bf16.vlgmr.msrb.gmra.mxu3 %vm97_vm1, %v12364_v10  ;;  %v9698_v21 = vor.u32 %v12385_v28, %v9697_v11 }
 0x129   :  { %v1000_v34 = vmax.f32 %v996_v30, %v997_v51  ;;  %2016 = vmatpush.bf16.msrb.mxu1 %v1994_v1  ;;  %2163 = vmatpush.bf16.msrb.mxu2 %v13531_v29  ;;  %v898_v59 = vadd.f32 %v892_v61, %v826_v58  ;;  %v12376_v61 = vld [vmem:[#allocation3 + $0x44] sm:$0xf] }
 0x12a   :  { %9597 = vmatmul.msk.bf16.vlgmr.msrb.gmra.mxu0 %vm97_vm1, %v13589_v25  ;;  %2177 = vmatpush.bf16.msrb.mxu3 %v1994_v1  ;;  %v9634_v50 = vor.u32 %v12376_v61, %v9631_v9  ;;  %v9699_v1 = vld [vmem:[#allocation3 + $0x18] sm:$0x70] }
 0x12b   :  { %v1002_v44 = vmax.f32 %v899_v19, %v1000_v34  ;;  %v13606_v26 = vpop.f32.mrf.mxu2  ;;  %v13608_v4 = vpop.f32.mrf.mxu3  ;;  %2191 = vmatpush.bf16.msrb.mxu0 %v2051_v23  ;;  %v900_v39 = vmax.f32 %v897_v13, %v898_v59  ;;  %v9675_v23 = vld [vmem:[#allocation3 + $0x30] sm:$0xf]  ;;  %v9691_v59 = vld [vmem:[#allocation3 + $0x8] sm:$0xf0]  ;;  %v12393_v13 = vld [vmem:[#allocation3 + $0x44] sm:$0xf0] }
 0x12c   :  { %v954_v14 = vpop.f32.mrf.mxu1  ;;  %v9676_v3 = vor.u32 %v12390_v62, %v9675_v23  ;;  %v9677_v23 = vld [vmem:[#allocation3 + $0x38] sm:$0x70] }
 0x12d   :  { %v1004_v29 = vadd.f32 %v13376_v8, %v1002_v44  ;;  %v955_v52 = vadd.f32 %v954_v14, %v13547_v38  ;;  %2017 = vmatpush.bf16.msrb.mxu1 %v9588_v2  ;;  %2164 = vmatpush.bf16.msrb.mxu2 %v13537_v27  ;;  %v9642_v38 = vor.u32 %v12378_v55, %v9639_v42  ;;  %v9689_v44 = vld [vmem:[#allocation3] sm:$0xf]  ;;  %v12383_v14 = vld [vmem:[#allocation3 + $0x4] sm:$0xf0] }
 0x12e   :  { %2178 = vmatpush.bf16.msrb.mxu3 %v9588_v2  ;;  %v13641_v12 = vsel %vm101_vm0, %v9676_v3, 0  ;;  %v9722_v2 = vor.u32 %v12395_v56, %v9721_v33 }
 0x12f   :  { %v13614_v20 = vpop.f32.mrf.mxu0  ;;  %v1006_v37 = vpack.c.bf16 %v1004_v29, %v1004_v29  ;;  %v999_v53 = vadd.f32 %v993_v18, %v955_v52  ;;  %2192 = vmatpush.bf16.msrb.mxu0 %v9606_v32  ;;  %v13631_v32 = vld [vmem:[%s16932_s0 + $0x70] sm:$0xff]  ;;  %v2121_v7 = vsel %vm101_vm0, %v9642_v38, 0  ;;  %v1124_v38 = vadd.f32 %v13606_v26, %v13549_v40 }
 0x130   :  { %v13672_v29 = vsel %vm101_vm0, %v9722_v2, 0  ;;  %v9713_v52 = vld [vmem:[#allocation3 + $0x40] sm:$0xf]  ;;  %v9723_v2 = vld [vmem:[#allocation3 + $0x58] sm:$0x70] }
 0x131   :  { %1008 = vst [vmem:[#allocation2 + $0x8] sm:$0xf] %v1006_v37  ;;  %v1001_v54 = vmax.f32 %v998_v17, %v999_v53  ;;  %v9690_v17 = vor.u32 %v12383_v14, %v9689_v44  ;;  %v13678_v37 = vor.u32 %v12382_v15, %v9691_v59  ;;  %v13681_v42 = vor.u32 %v12393_v13, %v9713_v52  ;;  %v12406_v44 = vld [vmem:[#allocation3 + $0x34] sm:$0x70] }
 0x132   :  { %v1209_v0 = vadd.f32 %v13591_v63, %v1124_v38  ;;  %v12404_v38 = vld [vmem:[#allocation3 + $0x24] sm:$0xf0] }
 0x133   :  { %v1003_v48 = vmax.f32 %v900_v39, %v1001_v54  ;;  %v13618_v49 = vpop.f32.mrf.mxu2  ;;  %v13620_v60 = vpop.f32.mrf.mxu3 }
 0x134   :  { %v13622_v27 = vpop.f32.mrf.mxu1  ;;  %v1126_v63 = vadd.f32 %v13618_v49, %v13574_v6 }
 0x135   :  { %v1005_v31 = vadd.f32 %v13376_v8, %v1003_v48  ;;  %v1138_v48 = vadd.f32 %v13608_v4, %v13622_v27  ;;  %v12387_v4 = vld [vmem:[#allocation3 + $0x24] sm:$0xf]  ;;  %v9669_v27 = vld [vmem:[#allocation3 + $0x28] sm:$0xf0] }
 0x136   :  { %v1211_v49 = vadd.f32 %v13614_v20, %v1126_v63  ;;  %v12381_v20 = vld [vmem:[%s16932_s0 + $0x70] sm:$0xff] }
 0x137   :  { %v13633_v5 = vpop.f32.mrf.mxu0  ;;  %v1007_v41 = vpack.c.bf16 %v1005_v31, %v1005_v31  ;;  %9564 = vmatmul.msk.bf16.vlgmr.msra.gmra.mxu1 %vm97_vm1, %v13479_v46 }
 0x138   :  { %9619 = vmatmul.msk.bf16.vlgmr.msra.gmra.mxu2 %vm97_vm1, %v12365_v45  ;;  %9620 = vmatmul.msk.bf16.vlgmr.msra.gmra.mxu3 %vm97_vm1, %v12365_v45 }
 0x139   :  { %1009 = vst [vmem:[#allocation2 + $0x40] sm:$0xf] %v1007_v41  ;;  %2143 = vmatpush.bf16.msra.mxu1 %v2121_v7  ;;  %2230 = vmatpush.bf16.msra.mxu2 %v13562_v47  ;;  %v12384_v47 = vld [vmem:[#allocation3 + $0x14] sm:$0xf]  ;;  %v13699_v41 = vld [vmem:[%s16932_s0 + $0x78] sm:$0xff] }
 0x13a   :  { %9643 = vmatmul.msk.bf16.vlgmr.msra.gmra.mxu0 %vm97_vm1, %v13631_v32  ;;  %2244 = vmatpush.bf16.msra.mxu3 %v2121_v7  ;;  %v9702_v30 = vor.u32 %v12384_v47, %v9699_v1 }
 0x13b   :  { %v1224_v18 = vpop.f32.mrf.mxu2  ;;  %v1238_v46 = vpop.f32.mrf.mxu3  ;;  %2316 = vmatpush.bf16.msra.mxu0 %v13641_v12 }
 0x13c   :  { %v13649_v10 = vpop.f32.mrf.mxu1  ;;  %v13663_v58 = vsel %vm101_vm0, %v9702_v30, 0  ;;  %v1253_v7 = vadd.f32 %v13633_v5, %v1224_v18 }
 0x13d   :  { %2144 = vmatpush.bf16.msra.mxu1 %v9634_v50  ;;  %2231 = vmatpush.bf16.msra.mxu2 %v13571_v43  ;;  %v2365_v43 = vsel %vm101_vm0, %v9698_v21, 0 }
 0x13e   :  { %2245 = vmatpush.bf16.msra.mxu3 %v9634_v50 }
 0x13f   :  { %v13651_v22 = vpop.f32.mrf.mxu0  ;;  %2317 = vmatpush.bf16.msra.mxu0 %v13647_v57 }
 0x143   :  { %v13655_v51 = vpop.f32.mrf.mxu2  ;;  %v13657_v19 = vpop.f32.mrf.mxu3 }
 0x144   :  { %v1204_v34 = vpop.f32.mrf.mxu1  ;;  %v1255_v33 = vadd.f32 %v13651_v22, %v13655_v51 }
 0x145   :  { %v1210_v61 = vadd.f32 %v1204_v34, %v1138_v48  ;;  %v12394_v34 = vld [vmem:[#allocation3 + $0x54] sm:$0xf] }
 0x147   :  { %v13659_v24 = vpop.f32.mrf.mxu0  ;;  %9598 = vmatmul.msk.bf16.vlgmr.msrb.gmra.mxu1 %vm97_vm1, %v13589_v25  ;;  %v1213_v5 = vmax.f32 %v1209_v0, %v1210_v61  ;;  %v12401_v61 = vld [vmem:[#allocation3 + $0x14] sm:$0x70] }
 0x148   :  { %9645 = vmatmul.msk.bf16.vlgmr.msrb.gmra.mxu2 %vm97_vm1, %v13631_v32  ;;  %9646 = vmatmul.msk.bf16.vlgmr.msrb.gmra.mxu3 %vm97_vm1, %v13631_v32 }
 0x149   :  { %2205 = vmatpush.bf16.msrb.mxu1 %v13553_v36  ;;  %2376 = vmatpush.bf16.msrb.mxu2 %v2365_v43  ;;  %v12389_v36 = vld [vmem:[#allocation3 + $0x34] sm:$0xf] }
 0x14a   :  { %9647 = vmatmul.msk.bf16.vlgmr.msrb.gmra.mxu0 %vm97_vm1, %v13589_v25  ;;  %2390 = vmatpush.bf16.msrb.mxu3 %v13663_v58  ;;  %v9680_v62 = vor.u32 %v12389_v36, %v9677_v23  ;;  %v9715_v36 = vld [vmem:[#allocation3 + $0x48] sm:$0xf0] }
 0x14b   :  { %v1291_v53 = vpop.f32.mrf.mxu2  ;;  %v1305_v55 = vpop.f32.mrf.mxu3  ;;  %2443 = vmatpush.bf16.msrb.mxu0 %v13672_v29 }
 0x14c   :  { %v1206_v39 = vpop.f32.mrf.mxu1  ;;  %v2308_v26 = vsel %vm101_vm0, %v9680_v62, 0  ;;  %v1310_v16 = vadd.f32 %v1291_v53, %v1253_v7  ;;  %v9751_v62 = vld [vmem:[#allocation3 + $0x20] sm:$0xf]  ;;  %v9781_v7 = vld [vmem:[#allocation3 + $0x10] sm:$0xf] }
 0x14d   :  { %2206 = vmatpush.bf16.msrb.mxu1 %v13568_v35  ;;  %2377 = vmatpush.bf16.msrb.mxu2 %v9690_v17  ;;  %v12380_v35 = vld [vmem:[%s16932_s0 + $0x78] sm:$0xff] }
 0x14e   :  { %2391 = vmatpush.bf16.msrb.mxu3 %v13678_v37 }
 0x14f   :  { %v13684_v54 = vpop.f32.mrf.mxu0  ;;  %2444 = vmatpush.bf16.msrb.mxu0 %v13681_v42 }
 0x153   :  { %v1293_v45 = vpop.f32.mrf.mxu2  ;;  %v1307_v3 = vpop.f32.mrf.mxu3 }
 0x154   :  { %v1266_v31 = vpop.f32.mrf.mxu1 }
 0x155   :  { %v1267_v9 = vadd.f32 %v1266_v31, %v1238_v46  ;;  %v9672_v46 = vor.u32 %v12387_v4, %v9669_v27  ;;  %v12411_v4 = vld [vmem:[#allocation3 + $0x54] sm:$0x70]  ;;  %v9782_v27 = vor.u32 %v12401_v61, %v9781_v7 }
 0x157   :  { %v13701_v40 = vpop.f32.mrf.mxu0  ;;  %v1311_v50 = vadd.f32 %v1305_v55, %v1267_v9  ;;  %9644 = vmatmul.msk.bf16.vlgmr.msra.gmra.mxu1 %vm97_vm1, %v13631_v32  ;;  %v1140_v32 = vadd.f32 %v13620_v60, %v13649_v10  ;;  %v1312_v60 = vadd.f32 %v1293_v45, %v1255_v33  ;;  %v9783_v9 = vld [vmem:[#allocation3 + $0x18] sm:$0x70]  ;;  %v9775_v33 = vld [vmem:[#allocation3 + $0x8] sm:$0xf0] }
 0x158   :  { %9655 = vmatmul.msk.bf16.vlgmr.msra.gmra.mxu2 %vm97_vm1, %v12380_v35  ;;  %9656 = vmatmul.msk.bf16.vlgmr.msra.gmra.mxu3 %vm97_vm1, %v12380_v35 }
 0x159   :  { %v1314_v18 = vmax.f32 %v1310_v16, %v1311_v50  ;;  %2330 = vmatpush.bf16.msra.mxu1 %v2308_v26  ;;  %2477 = vmatpush.bf16.msra.mxu2 %v13641_v12  ;;  %v1212_v56 = vadd.f32 %v1206_v39, %v1140_v32  ;;  %v12392_v39 = vld [vmem:[#allocation3 + $0x44] sm:$0xf]  ;;  %v9773_v32 = vld [vmem:[#allocation3] sm:$0xf] }
 0x15a   :  { %9681 = vmatmul.msk.bf16.vlgmr.msra.gmra.mxu0 %vm97_vm1, %v13699_v41  ;;  %2491 = vmatpush.bf16.msra.mxu3 %v2308_v26  ;;  %v9718_v48 = vor.u32 %v12392_v39, %v9715_v36  ;;  %v9805_v26 = vld [vmem:[#allocation3 + $0x50] sm:$0xf]  ;;  %v13809_v36 = vld [vmem:[%s16932_s0 + $0x88] sm:$0xff] }
 0x15b   :  { %v1316_v11 = vmax.f32 %v1213_v5, %v1314_v18  ;;  %v13716_v28 = vpop.f32.mrf.mxu2  ;;  %v13718_v47 = vpop.f32.mrf.mxu3  ;;  %2505 = vmatpush.bf16.msra.mxu0 %v2365_v43  ;;  %v1214_v22 = vmax.f32 %v1211_v49, %v1212_v56  ;;  %v9759_v43 = vld [vmem:[#allocation3 + $0x30] sm:$0xf]  ;;  %v9806_v18 = vor.u32 %v12411_v4, %v9805_v26 }
 0x15c   :  { %v1268_v1 = vpop.f32.mrf.mxu1  ;;  %v9760_v52 = vor.u32 %v12406_v44, %v9759_v43  ;;  %v1438_v44 = vadd.f32 %v13716_v28, %v13659_v24 }
 0x15d   :  { %v1318_v12 = vadd.f32 %v13376_v8, %v1316_v11  ;;  %v1269_v21 = vadd.f32 %v1268_v1, %v13657_v19  ;;  %2331 = vmatpush.bf16.msra.mxu1 %v9672_v46  ;;  %2478 = vmatpush.bf16.msra.mxu2 %v13647_v57  ;;  %v9726_v19 = vor.u32 %v12394_v34, %v9723_v2  ;;  %v12399_v11 = vld [vmem:[#allocation3 + $0x4] sm:$0xf0]  ;;  %v12398_v1 = vld [vmem:[#allocation3 + $0x4] sm:$0xf]  ;;  %v13782_v56 = vsel %vm101_vm0, %v9806_v18, 0 }
 0x15e   :  { %2492 = vmatpush.bf16.msra.mxu3 %v9672_v46  ;;  %v9774_v49 = vor.u32 %v12399_v11, %v9773_v32  ;;  %v12422_v32 = vld [vmem:[#allocation3 + $0x34] sm:$0x70] }
 0x15f   :  { %v13724_v6 = vpop.f32.mrf.mxu0  ;;  %v1320_v10 = vpack.c.bf16 %v1318_v12, %v1318_v12  ;;  %v1313_v30 = vadd.f32 %v1307_v3, %v1269_v21  ;;  %2506 = vmatpush.bf16.msra.mxu0 %v9690_v17  ;;  %v13741_v17 = vld [vmem:[%s16932_s0 + $0x80] sm:$0xff]  ;;  %v2435_v55 = vsel %vm101_vm0, %v9726_v19, 0  ;;  %v13757_v3 = vor.u32 %v12404_v38, %v9751_v62  ;;  %v9797_v12 = vld [vmem:[#allocation3 + $0x40] sm:$0xf]  ;;  %v12409_v21 = vld [vmem:[#allocation3 + $0x44] sm:$0xf0] }
 0x160   :  { %v13791_v34 = vor.u32 %v12409_v21, %v9797_v12 }
 0x161   :  { %1322 = vst [vmem:[#allocation2 + $0xc] sm:$0xf] %v1320_v10  ;;  %v1315_v51 = vmax.f32 %v1312_v60, %v1313_v30  ;;  %v13788_v60 = vor.u32 %v12398_v1, %v9775_v33 }
 0x163   :  { %v1317_v14 = vmax.f32 %v1214_v22, %v1315_v51  ;;  %v13728_v15 = vpop.f32.mrf.mxu2  ;;  %v13730_v59 = vpop.f32.mrf.mxu3  ;;  %v9761_v51 = vld [vmem:[#allocation3 + $0x38] sm:$0x70] }
 0x164   :  { %v13732_v57 = vpop.f32.mrf.mxu1 }
 0x165   :  { %v1319_v13 = vadd.f32 %v13376_v8, %v1317_v14  ;;  %v13751_v8 = vsel %vm101_vm0, %v9760_v52, 0  ;;  %v1452_v19 = vadd.f32 %v13718_v47, %v13732_v57  ;;  %v12403_v47 = vld [vmem:[#allocation3 + $0x24] sm:$0xf]  ;;  %v9753_v57 = vld [vmem:[#allocation3 + $0x28] sm:$0xf0] }
 0x167   :  { %v13743_v53 = vpop.f32.mrf.mxu0  ;;  %v1321_v23 = vpack.c.bf16 %v1319_v13, %v1319_v13  ;;  %9648 = vmatmul.msk.bf16.vlgmr.msrb.gmra.mxu1 %vm97_vm1, %v13589_v25 }
 0x168   :  { %9703 = vmatmul.msk.bf16.vlgmr.msrb.gmra.mxu2 %vm97_vm1, %v12381_v20  ;;  %9704 = vmatmul.msk.bf16.vlgmr.msrb.gmra.mxu3 %vm97_vm1, %v12381_v20 }
 0x169   :  { %1323 = vst [vmem:[#allocation2 + $0x44] sm:$0xf] %v1321_v23  ;;  %2457 = vmatpush.bf16.msrb.mxu1 %v2435_v55  ;;  %2544 = vmatpush.bf16.msrb.mxu2 %v13672_v29  ;;  %v12400_v29 = vld [vmem:[#allocation3 + $0x14] sm:$0xf]  ;;  %v1523_v23 = vadd.f32 %v13701_v40, %v1438_v44  ;;  %v1440_v40 = vadd.f32 %v13728_v15, %v13684_v54  ;;  %v9835_v44 = vld [vmem:[#allocation3 + $0x20] sm:$0xf] }
 0x16a   :  { %9727 = vmatmul.msk.bf16.vlgmr.msrb.gmra.mxu0 %vm97_vm1, %v13741_v17  ;;  %2558 = vmatpush.bf16.msrb.mxu3 %v2435_v55  ;;  %v9786_v0 = vor.u32 %v12400_v29, %v9783_v9 }
 0x16b   :  { %v1538_v45 = vpop.f32.mrf.mxu2  ;;  %v1552_v25 = vpop.f32.mrf.mxu3  ;;  %2630 = vmatpush.bf16.msrb.mxu0 %v13751_v8 }
 0x16c   :  { %v13759_v31 = vpop.f32.mrf.mxu1  ;;  %v13773_v63 = vsel %vm101_vm0, %v9786_v0, 0  ;;  %v1567_v13 = vadd.f32 %v13743_v53, %v1538_v45  ;;  %v9756_v45 = vor.u32 %v12403_v47, %v9753_v57  ;;  %v12410_v0 = vld [vmem:[#allocation3 + $0x54] sm:$0xf]  ;;  %v9889_v47 = vld [vmem:[#allocation3 + $0x50] sm:$0xf] }
 0x16d   :  { %2458 = vmatpush.bf16.msrb.mxu1 %v9718_v48  ;;  %2545 = vmatpush.bf16.msrb.mxu2 %v13681_v42  ;;  %v2679_v42 = vsel %vm101_vm0, %v9782_v27, 0  ;;  %v12427_v57 = vld [vmem:[#allocation3 + $0x54] sm:$0x70] }
 0x16e   :  { %2559 = vmatpush.bf16.msrb.mxu3 %v9718_v48 }
 0x16f   :  { %v13761_v35 = vpop.f32.mrf.mxu0  ;;  %2631 = vmatpush.bf16.msrb.mxu0 %v13757_v3 }
 0x173   :  { %v13765_v16 = vpop.f32.mrf.mxu2  ;;  %v13767_v50 = vpop.f32.mrf.mxu3 }
 0x174   :  { %v1518_v5 = vpop.f32.mrf.mxu1  ;;  %v1569_v9 = vadd.f32 %v13761_v35, %v13765_v16  ;;  %v9807_v16 = vld [vmem:[#allocation3 + $0x58] sm:$0x70] }
 0x175   :  { %v1524_v55 = vadd.f32 %v1518_v5, %v1452_v19  ;;  %v12420_v19 = vld [vmem:[#allocation3 + $0x24] sm:$0xf0] }
 0x177   :  { %v13769_v46 = vpop.f32.mrf.mxu0  ;;  %9682 = vmatmul.msk.bf16.vlgmr.msra.gmra.mxu1 %vm97_vm1, %v13699_v41  ;;  %v1527_v53 = vmax.f32 %v1523_v23, %v1524_v55  ;;  %v9865_v55 = vld [vmem:[#allocation3 + $0x10] sm:$0xf] }
 0x178   :  { %9729 = vmatmul.msk.bf16.vlgmr.msra.gmra.mxu2 %vm97_vm1, %v13741_v17  ;;  %9730 = vmatmul.msk.bf16.vlgmr.msra.gmra.mxu3 %vm97_vm1, %v13741_v17 }
 0x179   :  { %2519 = vmatpush.bf16.msra.mxu1 %v13663_v58  ;;  %2690 = vmatpush.bf16.msra.mxu2 %v2679_v42  ;;  %v12405_v58 = vld [vmem:[#allocation3 + $0x34] sm:$0xf] }
 0x17a   :  { %9731 = vmatmul.msk.bf16.vlgmr.msra.gmra.mxu0 %vm97_vm1, %v13699_v41  ;;  %2704 = vmatpush.bf16.msra.mxu3 %v13773_v63  ;;  %v9764_v43 = vor.u32 %v12405_v58, %v9761_v51  ;;  %v9799_v58 = vld [vmem:[#allocation3 + $0x48] sm:$0xf0] }
 0x17b   :  { %v1605_v10 = vpop.f32.mrf.mxu2  ;;  %v1619_v30 = vpop.f32.mrf.mxu3  ;;  %2757 = vmatpush.bf16.msra.mxu0 %v13782_v56 }
 0x17c   :  { %v1520_v2 = vpop.f32.mrf.mxu1  ;;  %v2622_v28 = vsel %vm101_vm0, %v9764_v43, 0  ;;  %v1624_v62 = vadd.f32 %v1605_v10, %v1567_v13 }
 0x17d   :  { %2520 = vmatpush.bf16.msra.mxu1 %v13678_v37  ;;  %2691 = vmatpush.bf16.msra.mxu2 %v9774_v49  ;;  %v12396_v37 = vld [vmem:[%s16932_s0 + $0x88] sm:$0xff] }
 0x17e   :  { %2705 = vmatpush.bf16.msra.mxu3 %v13788_v60 }
 0x17f   :  { %v13794_v22 = vpop.f32.mrf.mxu0  ;;  %2758 = vmatpush.bf16.msra.mxu0 %v13791_v34 }
 0x183   :  { %v1607_v14 = vpop.f32.mrf.mxu2  ;;  %v1621_v20 = vpop.f32.mrf.mxu3 }
 0x184   :  { %v1580_v52 = vpop.f32.mrf.mxu1  ;;  %v1626_v4 = vadd.f32 %v1607_v14, %v1569_v9  ;;  %v12414_v9 = vld [vmem:[#allocation3 + $0x4] sm:$0xf] }
 0x185   :  { %v1581_v39 = vadd.f32 %v1580_v52, %v1552_v25  ;;  %v13872_v52 = vor.u32 %v12420_v19, %v9835_v44 }
 0x187   :  { %v13811_v24 = vpop.f32.mrf.mxu0  ;;  %v1625_v38 = vadd.f32 %v1619_v30, %v1581_v39  ;;  %9728 = vmatmul.msk.bf16.vlgmr.msrb.gmra.mxu1 %vm97_vm1, %v13741_v17  ;;  %v1454_v17 = vadd.f32 %v13730_v59, %v13759_v31  ;;  %v1525_v31 = vadd.f32 %v13724_v6, %v1440_v40  ;;  %v12397_v6 = vld [vmem:[%s16932_s0 + $0x80] sm:$0xff]  ;;  %v12417_v39 = vld [vmem:[#allocation3 + $0x14] sm:$0x70] }
 0x188   :  { %9739 = vmatmul.msk.bf16.vlgmr.msrb.gmra.mxu2 %vm97_vm1, %v12396_v37  ;;  %9740 = vmatmul.msk.bf16.vlgmr.msrb.gmra.mxu3 %vm97_vm1, %v12396_v37  ;;  %v9866_v23 = vor.u32 %v12417_v39, %v9865_v55 }
 0x189   :  { %v1628_v48 = vmax.f32 %v1624_v62, %v1625_v38  ;;  %2644 = vmatpush.bf16.msrb.mxu1 %v2622_v28  ;;  %2791 = vmatpush.bf16.msrb.mxu2 %v13751_v8  ;;  %v1526_v26 = vadd.f32 %v1520_v2, %v1454_v17  ;;  %v13835_v8 = vld [vmem:[%s16934_s2] ss:$0 sm:$0xff]  ;;  %v12408_v2 = vld [vmem:[#allocation3 + $0x44] sm:$0xf] }
 0x18a   :  { %9765 = vmatmul.msk.bf16.vlgmr.msrb.gmra.mxu0 %vm97_vm1, %v13809_v36  ;;  %2805 = vmatpush.bf16.msrb.mxu3 %v2622_v28  ;;  %v9802_v14 = vor.u32 %v12408_v2, %v9799_v58  ;;  %v9867_v28 = vld [vmem:[#allocation3 + $0x18] sm:$0x70] }
 0x18b   :  { %v1630_v25 = vmax.f32 %v1527_v53, %v1628_v48  ;;  %v13826_v7 = vpop.f32.mrf.mxu2  ;;  %v13828_v61 = vpop.f32.mrf.mxu3  ;;  %2819 = vmatpush.bf16.msrb.mxu0 %v2679_v42  ;;  %v1528_v5 = vmax.f32 %v1525_v31, %v1526_v26  ;;  %v9843_v42 = vld [vmem:[#allocation3 + $0x30] sm:$0xf]  ;;  %v9859_v26 = vld [vmem:[#allocation3 + $0x8] sm:$0xf0]  ;;  %v12425_v31 = vld [vmem:[#allocation3 + $0x44] sm:$0xf0] }
 0x18c   :  { %v1582_v29 = vpop.f32.mrf.mxu1  ;;  %v9844_v12 = vor.u32 %v12422_v32, %v9843_v42  ;;  %v9845_v42 = vld [vmem:[#allocation3 + $0x38] sm:$0x70] }
 0x18d   :  { %v1632_v54 = vadd.f32 %v13835_v8, %v1630_v25  ;;  %v1583_v15 = vadd.f32 %v1582_v29, %v13767_v50  ;;  %2645 = vmatpush.bf16.msrb.mxu1 %v9756_v45  ;;  %2792 = vmatpush.bf16.msrb.mxu2 %v13757_v3  ;;  %v9810_v50 = vor.u32 %v12410_v0, %v9807_v16  ;;  %v9857_v25 = vld [vmem:[#allocation3] sm:$0xf]  ;;  %v12415_v29 = vld [vmem:[#allocation3 + $0x4] sm:$0xf0] }
 0x18e   :  { %2806 = vmatpush.bf16.msrb.mxu3 %v9756_v45  ;;  %v13866_v43 = vsel %vm101_vm0, %v9844_v12, 0  ;;  %v9890_v45 = vor.u32 %v12427_v57, %v9889_v47 }
 0x18f   :  { %v13839_v59 = vpop.f32.mrf.mxu0  ;;  %v1634_v35 = vpack.c.bf16 %v1632_v54, %v1632_v54  ;;  %v1627_v27 = vadd.f32 %v1621_v20, %v1583_v15  ;;  %2820 = vmatpush.bf16.msrb.mxu0 %v9774_v49  ;;  %v13856_v49 = vld [vmem:[%s16932_s0 + $0x90] sm:$0xff]  ;;  %v2749_v30 = vsel %vm101_vm0, %v9810_v50, 0  ;;  %v1752_v50 = vadd.f32 %v13826_v7, %v13769_v46 }
 0x190   :  { %v13897_v54 = vsel %vm101_vm0, %v9890_v45, 0  ;;  %v9881_v15 = vld [vmem:[#allocation3 + $0x40] sm:$0xf]  ;;  %v9891_v45 = vld [vmem:[#allocation3 + $0x58] sm:$0x70] }
 0x191   :  { %1636 = vst [vmem:[#allocation2 + $0x10] sm:$0xf] %v1634_v35  ;;  %v1629_v18 = vmax.f32 %v1626_v4, %v1627_v27  ;;  %v9858_v4 = vor.u32 %v12415_v29, %v9857_v25  ;;  %v13903_v35 = vor.u32 %v12414_v9, %v9859_v26  ;;  %v13906_v16 = vor.u32 %v12425_v31, %v9881_v15  ;;  %v12438_v25 = vld [vmem:[#allocation3 + $0x34] sm:$0x70] }
 0x192   :  { %v1837_v44 = vadd.f32 %v13811_v24, %v1752_v50  ;;  %v9919_v50 = vld [vmem:[#allocation3 + $0x20] sm:$0xf] }
 0x193   :  { %v1631_v11 = vmax.f32 %v1528_v5, %v1629_v18  ;;  %v13843_v1 = vpop.f32.mrf.mxu2  ;;  %v13845_v33 = vpop.f32.mrf.mxu3 }
 0x194   :  { %v13847_v3 = vpop.f32.mrf.mxu1  ;;  %v1754_v24 = vadd.f32 %v13843_v1, %v13794_v22 }
 0x195   :  { %v1633_v21 = vadd.f32 %v13835_v8, %v1631_v11  ;;  %v1766_v11 = vadd.f32 %v13828_v61, %v13847_v3  ;;  %v12419_v61 = vld [vmem:[#allocation3 + $0x24] sm:$0xf]  ;;  %v9837_v3 = vld [vmem:[#allocation3 + $0x28] sm:$0xf0] }
 0x196   :  { %v1839_v1 = vadd.f32 %v13839_v59, %v1754_v24  ;;  %v12413_v59 = vld [vmem:[%s16932_s0 + $0x90] sm:$0xff] }
 0x197   :  { %v13858_v10 = vpop.f32.mrf.mxu0  ;;  %v1635_v51 = vpack.c.bf16 %v1633_v21, %v1633_v21  ;;  %9732 = vmatmul.msk.bf16.vlgmr.msra.gmra.mxu1 %vm97_vm1, %v13699_v41 }
 0x198   :  { %9787 = vmatmul.msk.bf16.vlgmr.msra.gmra.mxu2 %vm97_vm1, %v12397_v6  ;;  %9788 = vmatmul.msk.bf16.vlgmr.msra.gmra.mxu3 %vm97_vm1, %v12397_v6 }
 0x199   :  { %1637 = vst [vmem:[#allocation2 + $0x48] sm:$0xf] %v1635_v51  ;;  %2771 = vmatpush.bf16.msra.mxu1 %v2749_v30  ;;  %2858 = vmatpush.bf16.msra.mxu2 %v13782_v56  ;;  %v12416_v56 = vld [vmem:[#allocation3 + $0x14] sm:$0xf]  ;;  %v13924_v51 = vld [vmem:[%s16932_s0 + $0x98] sm:$0xff] }
 0x19a   :  { %9811 = vmatmul.msk.bf16.vlgmr.msra.gmra.mxu0 %vm97_vm1, %v13856_v49  ;;  %2872 = vmatpush.bf16.msra.mxu3 %v2749_v30  ;;  %v9870_v62 = vor.u32 %v12416_v56, %v9867_v28 }
 0x19b   :  { %v1852_v20 = vpop.f32.mrf.mxu2  ;;  %v1866_v41 = vpop.f32.mrf.mxu3  ;;  %2944 = vmatpush.bf16.msra.mxu0 %v13866_v43 }
 0x19c   :  { %v13874_v37 = vpop.f32.mrf.mxu1  ;;  %v13888_v17 = vsel %vm101_vm0, %v9870_v62, 0  ;;  %v1881_v30 = vadd.f32 %v13858_v10, %v1852_v20 }
 0x19d   :  { %2772 = vmatpush.bf16.msra.mxu1 %v9802_v14  ;;  %2859 = vmatpush.bf16.msra.mxu2 %v13791_v34  ;;  %v2993_v34 = vsel %vm101_vm0, %v9866_v23, 0 }
 0x19e   :  { %2873 = vmatpush.bf16.msra.mxu3 %v9802_v14 }
 0x19f   :  { %v13876_v13 = vpop.f32.mrf.mxu0  ;;  %2945 = vmatpush.bf16.msra.mxu0 %v13872_v52 }
 0x1a3   :  { %v13880_v38 = vpop.f32.mrf.mxu2  ;;  %v13882_v53 = vpop.f32.mrf.mxu3 }
 0x1a4   :  { %v1832_v48 = vpop.f32.mrf.mxu1  ;;  %v1883_v47 = vadd.f32 %v13876_v13, %v13880_v38 }
 0x1a5   :  { %v1838_v2 = vadd.f32 %v1832_v48, %v1766_v11  ;;  %v12426_v48 = vld [vmem:[#allocation3 + $0x54] sm:$0xf]  ;;  %v12436_v11 = vld [vmem:[#allocation3 + $0x24] sm:$0xf0] }
 0x1a7   :  { %v13884_v40 = vpop.f32.mrf.mxu0  ;;  %9766 = vmatmul.msk.bf16.vlgmr.msrb.gmra.mxu1 %vm97_vm1, %v13809_v36  ;;  %v1841_v10 = vmax.f32 %v1837_v44, %v1838_v2  ;;  %v9949_v2 = vld [vmem:[#allocation3 + $0x10] sm:$0xf] }
 0x1a8   :  { %9813 = vmatmul.msk.bf16.vlgmr.msrb.gmra.mxu2 %vm97_vm1, %v13856_v49  ;;  %9814 = vmatmul.msk.bf16.vlgmr.msrb.gmra.mxu3 %vm97_vm1, %v13856_v49 }
 0x1a9   :  { %2833 = vmatpush.bf16.msrb.mxu1 %v13773_v63  ;;  %3004 = vmatpush.bf16.msrb.mxu2 %v2993_v34  ;;  %v12421_v63 = vld [vmem:[#allocation3 + $0x34] sm:$0xf] }
 0x1aa   :  { %9815 = vmatmul.msk.bf16.vlgmr.msrb.gmra.mxu0 %vm97_vm1, %v13809_v36  ;;  %3018 = vmatpush.bf16.msrb.mxu3 %v13888_v17  ;;  %v9848_v32 = vor.u32 %v12421_v63, %v9845_v42  ;;  %v9883_v63 = vld [vmem:[#allocation3 + $0x48] sm:$0xf0] }
 0x1ab   :  { %v1919_v27 = vpop.f32.mrf.mxu2  ;;  %v1933_v0 = vpop.f32.mrf.mxu3  ;;  %3071 = vmatpush.bf16.msrb.mxu0 %v13897_v54 }
 0x1ac   :  { %v1834_v5 = vpop.f32.mrf.mxu1  ;;  %v2936_v7 = vsel %vm101_vm0, %v9848_v32, 0  ;;  %v1938_v19 = vadd.f32 %v1919_v27, %v1881_v30 }
 0x1ad   :  { %2834 = vmatpush.bf16.msrb.mxu1 %v13788_v60  ;;  %3005 = vmatpush.bf16.msrb.mxu2 %v9858_v4  ;;  %v12412_v60 = vld [vmem:[%s16932_s0 + $0x98] sm:$0xff] }
 0x1ae   :  { %3019 = vmatpush.bf16.msrb.mxu3 %v13903_v35 }
 0x1af   :  { %v13909_v18 = vpop.f32.mrf.mxu0  ;;  %3072 = vmatpush.bf16.msrb.mxu0 %v13906_v16 }
 0x1b3   :  { %v1921_v6 = vpop.f32.mrf.mxu2  ;;  %v1935_v12 = vpop.f32.mrf.mxu3 }
 0x1b4   :  { %v1894_v21 = vpop.f32.mrf.mxu1 }
 0x1b5   :  { %v1895_v58 = vadd.f32 %v1894_v21, %v1866_v41  ;;  %v9840_v41 = vor.u32 %v12419_v61, %v9837_v3  ;;  %v13982_v21 = vor.u32 %v12436_v11, %v9919_v50  ;;  %v9973_v61 = vld [vmem:[#allocation3 + $0x50] sm:$0xf]  ;;  %v12443_v3 = vld [vmem:[#allocation3 + $0x54] sm:$0x70] }
 0x1b7   :  { %v13926_v46 = vpop.f32.mrf.mxu0  ;;  %v1939_v14 = vadd.f32 %v1933_v0, %v1895_v58  ;;  %9812 = vmatmul.msk.bf16.vlgmr.msra.gmra.mxu1 %vm97_vm1, %v13856_v49  ;;  %v1768_v49 = vadd.f32 %v13845_v33, %v13874_v37  ;;  %v1940_v33 = vadd.f32 %v1921_v6, %v1883_v47  ;;  %v12433_v58 = vld [vmem:[#allocation3 + $0x14] sm:$0x70]  ;;  %v12430_v47 = vld [vmem:[#allocation3 + $0x4] sm:$0xf] }
 0x1b8   :  { %9823 = vmatmul.msk.bf16.vlgmr.msra.gmra.mxu2 %vm97_vm1, %v12412_v60  ;;  %9824 = vmatmul.msk.bf16.vlgmr.msra.gmra.mxu3 %vm97_vm1, %v12412_v60  ;;  %v9950_v44 = vor.u32 %v12433_v58, %v9949_v2 }
 0x1b9   :  { %v1942_v20 = vmax.f32 %v1938_v19, %v1939_v14  ;;  %2958 = vmatpush.bf16.msra.mxu1 %v2936_v7  ;;  %3105 = vmatpush.bf16.msra.mxu2 %v13866_v43  ;;  %v1840_v57 = vadd.f32 %v1834_v5, %v1768_v49  ;;  %v12424_v5 = vld [vmem:[#allocation3 + $0x44] sm:$0xf] }
 0x1ba   :  { %9849 = vmatmul.msk.bf16.vlgmr.msra.gmra.mxu0 %vm97_vm1, %v13924_v51  ;;  %3119 = vmatpush.bf16.msra.mxu3 %v2936_v7  ;;  %v9886_v6 = vor.u32 %v12424_v5, %v9883_v63  ;;  %v9951_v7 = vld [vmem:[#allocation3 + $0x18] sm:$0x70] }
 0x1bb   :  { %v1944_v55 = vmax.f32 %v1841_v10, %v1942_v20  ;;  %v13941_v39 = vpop.f32.mrf.mxu2  ;;  %v13943_v56 = vpop.f32.mrf.mxu3  ;;  %3133 = vmatpush.bf16.msra.mxu0 %v2993_v34  ;;  %v1842_v13 = vmax.f32 %v1839_v1, %v1840_v57  ;;  %v9927_v34 = vld [vmem:[#allocation3 + $0x30] sm:$0xf]  ;;  %v9943_v57 = vld [vmem:[#allocation3 + $0x8] sm:$0xf0]  ;;  %v12441_v1 = vld [vmem:[#allocation3 + $0x44] sm:$0xf0] }
 0x1bc   :  { %v1896_v28 = vpop.f32.mrf.mxu1  ;;  %v9928_v15 = vor.u32 %v12438_v25, %v9927_v34  ;;  %v9929_v34 = vld [vmem:[#allocation3 + $0x38] sm:$0x70] }
 0x1bd   :  { %v1946_v43 = vadd.f32 %v13835_v8, %v1944_v55  ;;  %v1897_v23 = vadd.f32 %v1896_v28, %v13882_v53  ;;  %2959 = vmatpush.bf16.msra.mxu1 %v9840_v41  ;;  %3106 = vmatpush.bf16.msra.mxu2 %v13872_v52  ;;  %v9894_v53 = vor.u32 %v12426_v48, %v9891_v45  ;;  %v9941_v55 = vld [vmem:[#allocation3] sm:$0xf]  ;;  %v12431_v28 = vld [vmem:[#allocation3 + $0x4] sm:$0xf0] }
 0x1be   :  { %3120 = vmatpush.bf16.msra.mxu3 %v9840_v41  ;;  %v13976_v32 = vsel %vm101_vm0, %v9928_v15, 0  ;;  %v9974_v41 = vor.u32 %v12443_v3, %v9973_v61 }
 0x1bf   :  { %v13949_v22 = vpop.f32.mrf.mxu0  ;;  %v1948_v37 = vpack.c.bf16 %v1946_v43, %v1946_v43  ;;  %v1941_v62 = vadd.f32 %v1935_v12, %v1897_v23  ;;  %3134 = vmatpush.bf16.msra.mxu0 %v9858_v4  ;;  %v13966_v4 = vld [vmem:[%s16932_s0 + $0xa0] sm:$0xff]  ;;  %v3063_v0 = vsel %vm101_vm0, %v9894_v53, 0  ;;  %v9965_v23 = vld [vmem:[#allocation3 + $0x40] sm:$0xf]  ;;  %v2066_v53 = vadd.f32 %v13941_v39, %v13884_v40 }
 0x1c0   :  { %v14007_v43 = vsel %vm101_vm0, %v9974_v41, 0  ;;  %v14016_v45 = vor.u32 %v12441_v1, %v9965_v23  ;;  %v9975_v41 = vld [vmem:[#allocation3 + $0x58] sm:$0x70] }
 0x1c1   :  { %1950 = vst [vmem:[#allocation2 + $0x14] sm:$0xf] %v1948_v37  ;;  %v1943_v38 = vmax.f32 %v1940_v33, %v1941_v62  ;;  %v9942_v33 = vor.u32 %v12431_v28, %v9941_v55  ;;  %v14013_v37 = vor.u32 %v12430_v47, %v9943_v57  ;;  %v2151_v50 = vadd.f32 %v13926_v46, %v2066_v53  ;;  %v12454_v55 = vld [vmem:[#allocation3 + $0x34] sm:$0x70]  ;;  %v10003_v53 = vld [vmem:[#allocation3 + $0x20] sm:$0xf] }
 0x1c3   :  { %v1945_v29 = vmax.f32 %v1842_v13, %v1943_v38  ;;  %v13953_v9 = vpop.f32.mrf.mxu2  ;;  %v13955_v26 = vpop.f32.mrf.mxu3 }
 0x1c4   :  { %v13957_v52 = vpop.f32.mrf.mxu1  ;;  %v2068_v46 = vadd.f32 %v13953_v9, %v13909_v18 }
 0x1c5   :  { %v1947_v31 = vadd.f32 %v13835_v8, %v1945_v29  ;;  %v2080_v29 = vadd.f32 %v13943_v56, %v13957_v52  ;;  %v12435_v56 = vld [vmem:[#allocation3 + $0x24] sm:$0xf]  ;;  %v9921_v52 = vld [vmem:[#allocation3 + $0x28] sm:$0xf0] }
 0x1c6   :  { %v2153_v9 = vadd.f32 %v13949_v22, %v2068_v46  ;;  %v12429_v22 = vld [vmem:[%s16932_s0 + $0xa0] sm:$0xff] }
 0x1c7   :  { %v13968_v27 = vpop.f32.mrf.mxu0  ;;  %v1949_v42 = vpack.c.bf16 %v1947_v31, %v1947_v31  ;;  %9816 = vmatmul.msk.bf16.vlgmr.msrb.gmra.mxu1 %vm97_vm1, %v13809_v36 }
 0x1c8   :  { %9871 = vmatmul.msk.bf16.vlgmr.msrb.gmra.mxu2 %vm97_vm1, %v12413_v59  ;;  %9872 = vmatmul.msk.bf16.vlgmr.msrb.gmra.mxu3 %vm97_vm1, %v12413_v59 }
 0x1c9   :  { %1951 = vst [vmem:[#allocation2 + $0x4c] sm:$0xf] %v1949_v42  ;;  %3085 = vmatpush.bf16.msrb.mxu1 %v3063_v0  ;;  %3172 = vmatpush.bf16.msrb.mxu2 %v13897_v54  ;;  %v12432_v54 = vld [vmem:[#allocation3 + $0x14] sm:$0xf]  ;;  %v14034_v42 = vld [vmem:[%s16932_s0 + $0xa8] sm:$0xff] }
 0x1ca   :  { %9895 = vmatmul.msk.bf16.vlgmr.msrb.gmra.mxu0 %vm97_vm1, %v13966_v4  ;;  %3186 = vmatpush.bf16.msrb.mxu3 %v3063_v0  ;;  %v9954_v19 = vor.u32 %v12432_v54, %v9951_v7 }
 0x1cb   :  { %v2166_v12 = vpop.f32.mrf.mxu2  ;;  %v2180_v36 = vpop.f32.mrf.mxu3  ;;  %3258 = vmatpush.bf16.msrb.mxu0 %v13976_v32 }
 0x1cc   :  { %v13984_v60 = vpop.f32.mrf.mxu1  ;;  %v13998_v49 = vsel %vm101_vm0, %v9954_v19, 0  ;;  %v2195_v0 = vadd.f32 %v13968_v27, %v2166_v12 }
 0x1cd   :  { %3086 = vmatpush.bf16.msrb.mxu1 %v9886_v6  ;;  %3173 = vmatpush.bf16.msrb.mxu2 %v13906_v16  ;;  %v3307_v16 = vsel %vm101_vm0, %v9950_v44, 0 }
 0x1ce   :  { %3187 = vmatpush.bf16.msrb.mxu3 %v9886_v6 }
 0x1cf   :  { %v13986_v30 = vpop.f32.mrf.mxu0  ;;  %3259 = vmatpush.bf16.msrb.mxu0 %v13982_v21 }
 0x1d3   :  { %v13990_v14 = vpop.f32.mrf.mxu2  ;;  %v13992_v10 = vpop.f32.mrf.mxu3 }
 0x1d4   :  { %v2146_v20 = vpop.f32.mrf.mxu1  ;;  %v2197_v61 = vadd.f32 %v13986_v30, %v13990_v14 }
 0x1d5   :  { %v2152_v5 = vadd.f32 %v2146_v20, %v2080_v29  ;;  %v12442_v20 = vld [vmem:[#allocation3 + $0x54] sm:$0xf]  ;;  %v12452_v29 = vld [vmem:[#allocation3 + $0x24] sm:$0xf0] }
 0x1d7   :  { %v13994_v24 = vpop.f32.mrf.mxu0  ;;  %9850 = vmatmul.msk.bf16.vlgmr.msra.gmra.mxu1 %vm97_vm1, %v13924_v51  ;;  %v2155_v27 = vmax.f32 %v2151_v50, %v2152_v5  ;;  %v10033_v5 = vld [vmem:[#allocation3 + $0x10] sm:$0xf] }
 0x1d8   :  { %9897 = vmatmul.msk.bf16.vlgmr.msra.gmra.mxu2 %vm97_vm1, %v13966_v4  ;;  %9898 = vmatmul.msk.bf16.vlgmr.msra.gmra.mxu3 %vm97_vm1, %v13966_v4 }
 0x1d9   :  { %3147 = vmatpush.bf16.msra.mxu1 %v13888_v17  ;;  %3318 = vmatpush.bf16.msra.mxu2 %v3307_v16  ;;  %v12437_v17 = vld [vmem:[#allocation3 + $0x34] sm:$0xf] }
 0x1da   :  { %9899 = vmatmul.msk.bf16.vlgmr.msra.gmra.mxu0 %vm97_vm1, %v13924_v51  ;;  %3332 = vmatpush.bf16.msra.mxu3 %v13998_v49  ;;  %v9932_v25 = vor.u32 %v12437_v17, %v9929_v34  ;;  %v9967_v17 = vld [vmem:[#allocation3 + $0x48] sm:$0xf0] }
 0x1db   :  { %v2233_v62 = vpop.f32.mrf.mxu2  ;;  %v2247_v48 = vpop.f32.mrf.mxu3  ;;  %3385 = vmatpush.bf16.msra.mxu0 %v14007_v43 }
 0x1dc   :  { %v2148_v13 = vpop.f32.mrf.mxu1  ;;  %v3250_v39 = vsel %vm101_vm0, %v9932_v25, 0  ;;  %v2252_v11 = vadd.f32 %v2233_v62, %v2195_v0 }
 0x1dd   :  { %3148 = vmatpush.bf16.msra.mxu1 %v13903_v35  ;;  %3319 = vmatpush.bf16.msra.mxu2 %v9942_v33  ;;  %v12428_v35 = vld [vmem:[%s16932_s0 + $0xa8] sm:$0xff] }
 0x1de   :  { %3333 = vmatpush.bf16.msra.mxu3 %v14013_v37 }
 0x1df   :  { %v14019_v38 = vpop.f32.mrf.mxu0  ;;  %3386 = vmatpush.bf16.msra.mxu0 %v14016_v45 }
 0x1e3   :  { %v2235_v59 = vpop.f32.mrf.mxu2  ;;  %v2249_v15 = vpop.f32.mrf.mxu3 }
 0x1e4   :  { %v2208_v31 = vpop.f32.mrf.mxu1 }
 0x1e5   :  { %v2209_v63 = vadd.f32 %v2208_v31, %v2180_v36  ;;  %v9924_v36 = vor.u32 %v12435_v56, %v9921_v52  ;;  %v14092_v31 = vor.u32 %v12452_v29, %v10003_v53  ;;  %v10057_v56 = vld [vmem:[#allocation3 + $0x50] sm:$0xf]  ;;  %v12459_v52 = vld [vmem:[#allocation3 + $0x54] sm:$0x70] }
 0x1e7   :  { %v14036_v40 = vpop.f32.mrf.mxu0  ;;  %v2253_v6 = vadd.f32 %v2247_v48, %v2209_v63  ;;  %9896 = vmatmul.msk.bf16.vlgmr.msrb.gmra.mxu1 %vm97_vm1, %v13966_v4  ;;  %v2082_v4 = vadd.f32 %v13955_v26, %v13984_v60  ;;  %v2254_v26 = vadd.f32 %v2235_v59, %v2197_v61  ;;  %v12449_v63 = vld [vmem:[#allocation3 + $0x14] sm:$0x70]  ;;  %v12446_v61 = vld [vmem:[#allocation3 + $0x4] sm:$0xf] }
 0x1e8   :  { %9907 = vmatmul.msk.bf16.vlgmr.msrb.gmra.mxu2 %vm97_vm1, %v12428_v35  ;;  %9908 = vmatmul.msk.bf16.vlgmr.msrb.gmra.mxu3 %vm97_vm1, %v12428_v35  ;;  %v10034_v50 = vor.u32 %v12449_v63, %v10033_v5 }
 0x1e9   :  { %v2256_v12 = vmax.f32 %v2252_v11, %v2253_v6  ;;  %3272 = vmatpush.bf16.msrb.mxu1 %v3250_v39  ;;  %3419 = vmatpush.bf16.msrb.mxu2 %v13976_v32  ;;  %v2154_v3 = vadd.f32 %v2148_v13, %v2082_v4  ;;  %v12440_v13 = vld [vmem:[#allocation3 + $0x44] sm:$0xf] }
 0x1ea   :  { %9933 = vmatmul.msk.bf16.vlgmr.msrb.gmra.mxu0 %vm97_vm1, %v14034_v42  ;;  %3433 = vmatpush.bf16.msrb.mxu3 %v3250_v39  ;;  %v9970_v59 = vor.u32 %v12440_v13, %v9967_v17  ;;  %v10035_v39 = vld [vmem:[#allocation3 + $0x18] sm:$0x70] }
 0x1eb   :  { %v2258_v2 = vmax.f32 %v2155_v27, %v2256_v12  ;;  %v14051_v58 = vpop.f32.mrf.mxu2  ;;  %v14053_v54 = vpop.f32.mrf.mxu3  ;;  %3447 = vmatpush.bf16.msrb.mxu0 %v3307_v16  ;;  %v2156_v30 = vmax.f32 %v2153_v9, %v2154_v3  ;;  %v10011_v16 = vld [vmem:[#allocation3 + $0x30] sm:$0xf]  ;;  %v10027_v3 = vld [vmem:[#allocation3 + $0x8] sm:$0xf0]  ;;  %v12457_v9 = vld [vmem:[#allocation3 + $0x44] sm:$0xf0] }
 0x1ec   :  { %v2210_v7 = vpop.f32.mrf.mxu1  ;;  %v10012_v23 = vor.u32 %v12454_v55, %v10011_v16  ;;  %v10013_v16 = vld [vmem:[#allocation3 + $0x38] sm:$0x70] }
 0x1ed   :  { %v2260_v32 = vadd.f32 %v13835_v8, %v2258_v2  ;;  %v2211_v44 = vadd.f32 %v2210_v7, %v13992_v10  ;;  %3273 = vmatpush.bf16.msrb.mxu1 %v9924_v36  ;;  %3420 = vmatpush.bf16.msrb.mxu2 %v13982_v21  ;;  %v9978_v10 = vor.u32 %v12442_v20, %v9975_v41  ;;  %v10025_v2 = vld [vmem:[#allocation3] sm:$0xf]  ;;  %v12447_v7 = vld [vmem:[#allocation3 + $0x4] sm:$0xf0] }
 0x1ee   :  { %3434 = vmatpush.bf16.msrb.mxu3 %v9924_v36  ;;  %v14086_v25 = vsel %vm101_vm0, %v10012_v23, 0  ;;  %v10058_v36 = vor.u32 %v12459_v52, %v10057_v56 }
 0x1ef   :  { %v14059_v18 = vpop.f32.mrf.mxu0  ;;  %v2262_v60 = vpack.c.bf16 %v2260_v32, %v2260_v32  ;;  %v2255_v19 = vadd.f32 %v2249_v15, %v2211_v44  ;;  %3448 = vmatpush.bf16.msrb.mxu0 %v9942_v33  ;;  %v14076_v33 = vld [vmem:[%s16932_s0 + $0xb0] sm:$0xff]  ;;  %v3377_v48 = vsel %vm101_vm0, %v9978_v10, 0  ;;  %v2380_v10 = vadd.f32 %v14051_v58, %v13994_v24 }
 0x1f0   :  { %v14117_v32 = vsel %vm101_vm0, %v10058_v36, 0  ;;  %v10049_v44 = vld [vmem:[#allocation3 + $0x40] sm:$0xf]  ;;  %v10059_v36 = vld [vmem:[#allocation3 + $0x58] sm:$0x70] }
 0x1f1   :  { %2264 = vst [vmem:[#allocation2 + $0x18] sm:$0xf] %v2262_v60  ;;  %v2257_v14 = vmax.f32 %v2254_v26, %v2255_v19  ;;  %v10026_v26 = vor.u32 %v12447_v7, %v10025_v2  ;;  %v14123_v60 = vor.u32 %v12446_v61, %v10027_v3  ;;  %v14126_v41 = vor.u32 %v12457_v9, %v10049_v44  ;;  %v12470_v2 = vld [vmem:[#allocation3 + $0x34] sm:$0x70] }
 0x1f2   :  { %v2465_v53 = vadd.f32 %v14036_v40, %v2380_v10  ;;  %v12468_v10 = vld [vmem:[#allocation3 + $0x24] sm:$0xf0] }
 0x1f3   :  { %v2259_v28 = vmax.f32 %v2156_v30, %v2257_v14  ;;  %v14063_v47 = vpop.f32.mrf.mxu2  ;;  %v14065_v57 = vpop.f32.mrf.mxu3 }
 0x1f4   :  { %v14067_v21 = vpop.f32.mrf.mxu1  ;;  %v2382_v40 = vadd.f32 %v14063_v47, %v14019_v38 }
 0x1f5   :  { %v2261_v1 = vadd.f32 %v13835_v8, %v2259_v28  ;;  %v2394_v28 = vadd.f32 %v14053_v54, %v14067_v21  ;;  %v12451_v54 = vld [vmem:[#allocation3 + $0x24] sm:$0xf]  ;;  %v10005_v21 = vld [vmem:[#allocation3 + $0x28] sm:$0xf0] }
 0x1f6   :  { %v2467_v47 = vadd.f32 %v14059_v18, %v2382_v40  ;;  %v12445_v18 = vld [vmem:[%s16932_s0 + $0xb0] sm:$0xff] }
 0x1f7   :  { %v14078_v62 = vpop.f32.mrf.mxu0  ;;  %v2263_v34 = vpack.c.bf16 %v2261_v1, %v2261_v1  ;;  %9900 = vmatmul.msk.bf16.vlgmr.msra.gmra.mxu1 %vm97_vm1, %v13924_v51 }
 0x1f8   :  { %9955 = vmatmul.msk.bf16.vlgmr.msra.gmra.mxu2 %vm97_vm1, %v12429_v22  ;;  %9956 = vmatmul.msk.bf16.vlgmr.msra.gmra.mxu3 %vm97_vm1, %v12429_v22 }
 0x1f9   :  { %2265 = vst [vmem:[#allocation2 + $0x50] sm:$0xf] %v2263_v34  ;;  %3399 = vmatpush.bf16.msra.mxu1 %v3377_v48  ;;  %3486 = vmatpush.bf16.msra.mxu2 %v14007_v43  ;;  %v12448_v43 = vld [vmem:[#allocation3 + $0x14] sm:$0xf]  ;;  %v14144_v34 = vld [vmem:[%s16932_s0 + $0xb8] sm:$0xff] }
 0x1fa   :  { %9979 = vmatmul.msk.bf16.vlgmr.msra.gmra.mxu0 %vm97_vm1, %v14076_v33  ;;  %3500 = vmatpush.bf16.msra.mxu3 %v3377_v48  ;;  %v10038_v11 = vor.u32 %v12448_v43, %v10035_v39 }
 0x1fb   :  { %v2480_v15 = vpop.f32.mrf.mxu2  ;;  %v2494_v51 = vpop.f32.mrf.mxu3  ;;  %3572 = vmatpush.bf16.msra.mxu0 %v14086_v25 }
 0x1fc   :  { %v14094_v35 = vpop.f32.mrf.mxu1  ;;  %v14108_v4 = vsel %vm101_vm0, %v10038_v11, 0  ;;  %v2509_v48 = vadd.f32 %v14078_v62, %v2480_v15 }
 0x1fd   :  { %3400 = vmatpush.bf16.msra.mxu1 %v9970_v59  ;;  %3487 = vmatpush.bf16.msra.mxu2 %v14016_v45  ;;  %v3621_v45 = vsel %vm101_vm0, %v10034_v50, 0 }
 0x1fe   :  { %3501 = vmatpush.bf16.msra.mxu3 %v9970_v59 }
 0x1ff   :  { %v14096_v0 = vpop.f32.mrf.mxu0  ;;  %3573 = vmatpush.bf16.msra.mxu0 %v14092_v31 }
 0x203   :  { %v14100_v6 = vpop.f32.mrf.mxu2  ;;  %v14102_v27 = vpop.f32.mrf.mxu3 }
 0x204   :  { %v2460_v12 = vpop.f32.mrf.mxu1  ;;  %v2511_v56 = vadd.f32 %v14096_v0, %v14100_v6 }
 0x205   :  { %v2466_v13 = vadd.f32 %v2460_v12, %v2394_v28  ;;  %v12458_v12 = vld [vmem:[#allocation3 + $0x54] sm:$0xf] }
 0x207   :  { %v14104_v46 = vpop.f32.mrf.mxu0  ;;  %9934 = vmatmul.msk.bf16.vlgmr.msrb.gmra.mxu1 %vm97_vm1, %v14034_v42  ;;  %v2469_v62 = vmax.f32 %v2465_v53, %v2466_v13  ;;  %v12465_v13 = vld [vmem:[#allocation3 + $0x14] sm:$0x70] }
 0x208   :  { %9981 = vmatmul.msk.bf16.vlgmr.msrb.gmra.mxu2 %vm97_vm1, %v14076_v33  ;;  %9982 = vmatmul.msk.bf16.vlgmr.msrb.gmra.mxu3 %vm97_vm1, %v14076_v33 }
 0x209   :  { %3461 = vmatpush.bf16.msrb.mxu1 %v13998_v49  ;;  %3632 = vmatpush.bf16.msrb.mxu2 %v3621_v45  ;;  %v12453_v49 = vld [vmem:[#allocation3 + $0x34] sm:$0xf] }
 0x20a   :  { %9983 = vmatmul.msk.bf16.vlgmr.msrb.gmra.mxu0 %vm97_vm1, %v14034_v42  ;;  %3646 = vmatpush.bf16.msrb.mxu3 %v14108_v4  ;;  %v10016_v55 = vor.u32 %v12453_v49, %v10013_v16  ;;  %v10051_v49 = vld [vmem:[#allocation3 + $0x48] sm:$0xf0] }
 0x20b   :  { %v2547_v19 = vpop.f32.mrf.mxu2  ;;  %v2561_v20 = vpop.f32.mrf.mxu3  ;;  %3699 = vmatpush.bf16.msrb.mxu0 %v14117_v32 }
 0x20c   :  { %v2462_v30 = vpop.f32.mrf.mxu1  ;;  %v3564_v58 = vsel %vm101_vm0, %v10016_v55, 0  ;;  %v2566_v29 = vadd.f32 %v2547_v19, %v2509_v48  ;;  %v10087_v55 = vld [vmem:[#allocation3 + $0x20] sm:$0xf]  ;;  %v10117_v48 = vld [vmem:[#allocation3 + $0x10] sm:$0xf] }
 0x20d   :  { %3462 = vmatpush.bf16.msrb.mxu1 %v14013_v37  ;;  %3633 = vmatpush.bf16.msrb.mxu2 %v10026_v26  ;;  %v12444_v37 = vld [vmem:[%s16932_s0 + $0xb8] sm:$0xff] }
 0x20e   :  { %3647 = vmatpush.bf16.msrb.mxu3 %v14123_v60 }
 0x20f   :  { %v14129_v14 = vpop.f32.mrf.mxu0  ;;  %3700 = vmatpush.bf16.msrb.mxu0 %v14126_v41 }
 0x213   :  { %v2549_v22 = vpop.f32.mrf.mxu2  ;;  %v2563_v23 = vpop.f32.mrf.mxu3 }
 0x214   :  { %v2522_v1 = vpop.f32.mrf.mxu1 }
 0x215   :  { %v2523_v17 = vadd.f32 %v2522_v1, %v2494_v51  ;;  %v10008_v51 = vor.u32 %v12451_v54, %v10005_v21  ;;  %v12475_v54 = vld [vmem:[#allocation3 + $0x54] sm:$0x70]  ;;  %v10118_v21 = vor.u32 %v12465_v13, %v10117_v48 }
 0x217   :  { %v14146_v24 = vpop.f32.mrf.mxu0  ;;  %v2567_v59 = vadd.f32 %v2561_v20, %v2523_v17  ;;  %9980 = vmatmul.msk.bf16.vlgmr.msra.gmra.mxu1 %vm97_vm1, %v14076_v33  ;;  %v2396_v33 = vadd.f32 %v14065_v57, %v14094_v35  ;;  %v2568_v57 = vadd.f32 %v2549_v22, %v2511_v56  ;;  %v10119_v17 = vld [vmem:[#allocation3 + $0x18] sm:$0x70]  ;;  %v10111_v56 = vld [vmem:[#allocation3 + $0x8] sm:$0xf0] }
 0x218   :  { %9991 = vmatmul.msk.bf16.vlgmr.msra.gmra.mxu2 %vm97_vm1, %v12444_v37  ;;  %9992 = vmatmul.msk.bf16.vlgmr.msra.gmra.mxu3 %vm97_vm1, %v12444_v37 }
 0x219   :  { %v2570_v15 = vmax.f32 %v2566_v29, %v2567_v59  ;;  %3586 = vmatpush.bf16.msra.mxu1 %v3564_v58  ;;  %3733 = vmatpush.bf16.msra.mxu2 %v14086_v25  ;;  %v2468_v52 = vadd.f32 %v2462_v30, %v2396_v33  ;;  %v12456_v30 = vld [vmem:[#allocation3 + $0x44] sm:$0xf]  ;;  %v10109_v33 = vld [vmem:[#allocation3] sm:$0xf] }
 0x21a   :  { %10017 = vmatmul.msk.bf16.vlgmr.msra.gmra.mxu0 %vm97_vm1, %v14144_v34  ;;  %3747 = vmatpush.bf16.msra.mxu3 %v3564_v58  ;;  %v10054_v28 = vor.u32 %v12456_v30, %v10051_v49  ;;  %v10141_v58 = vld [vmem:[#allocation3 + $0x50] sm:$0xf]  ;;  %v14254_v49 = vld [vmem:[%s16932_s0 + $0xc8] sm:$0xff] }
 0x21b   :  { %v2572_v5 = vmax.f32 %v2469_v62, %v2570_v15  ;;  %v14161_v63 = vpop.f32.mrf.mxu2  ;;  %v14163_v43 = vpop.f32.mrf.mxu3  ;;  %3761 = vmatpush.bf16.msra.mxu0 %v3621_v45  ;;  %v2470_v0 = vmax.f32 %v2467_v47, %v2468_v52  ;;  %v10095_v45 = vld [vmem:[#allocation3 + $0x30] sm:$0xf]  ;;  %v10142_v15 = vor.u32 %v12475_v54, %v10141_v58 }
 0x21c   :  { %v2524_v39 = vpop.f32.mrf.mxu1  ;;  %v10096_v44 = vor.u32 %v12470_v2, %v10095_v45  ;;  %v2694_v2 = vadd.f32 %v14161_v63, %v14104_v46 }
 0x21d   :  { %v2574_v25 = vadd.f32 %v13835_v8, %v2572_v5  ;;  %v2525_v50 = vadd.f32 %v2524_v39, %v14102_v27  ;;  %3587 = vmatpush.bf16.msra.mxu1 %v10008_v51  ;;  %3734 = vmatpush.bf16.msra.mxu2 %v14092_v31  ;;  %v10062_v27 = vor.u32 %v12458_v12, %v10059_v36  ;;  %v12463_v5 = vld [vmem:[#allocation3 + $0x4] sm:$0xf0]  ;;  %v12462_v39 = vld [vmem:[#allocation3 + $0x4] sm:$0xf]  ;;  %v14227_v52 = vsel %vm101_vm0, %v10142_v15, 0 }
 0x21e   :  { %3748 = vmatpush.bf16.msra.mxu3 %v10008_v51  ;;  %v10110_v47 = vor.u32 %v12463_v5, %v10109_v33  ;;  %v12486_v33 = vld [vmem:[#allocation3 + $0x34] sm:$0x70] }
 0x21f   :  { %v14169_v38 = vpop.f32.mrf.mxu0  ;;  %v2576_v35 = vpack.c.bf16 %v2574_v25, %v2574_v25  ;;  %v2569_v11 = vadd.f32 %v2563_v23, %v2525_v50  ;;  %3762 = vmatpush.bf16.msra.mxu0 %v10026_v26  ;;  %v14186_v26 = vld [vmem:[%s16932_s0 + $0xc0] sm:$0xff]  ;;  %v3691_v20 = vsel %vm101_vm0, %v10062_v27, 0  ;;  %v14202_v23 = vor.u32 %v12468_v10, %v10087_v55  ;;  %v10133_v25 = vld [vmem:[#allocation3 + $0x40] sm:$0xf]  ;;  %v12473_v50 = vld [vmem:[#allocation3 + $0x44] sm:$0xf0] }
 0x220   :  { %v14236_v12 = vor.u32 %v12473_v50, %v10133_v25 }
 0x221   :  { %2578 = vst [vmem:[#allocation2 + $0x1c] sm:$0xf] %v2576_v35  ;;  %v2571_v6 = vmax.f32 %v2568_v57, %v2569_v11  ;;  %v14233_v57 = vor.u32 %v12462_v39, %v10111_v56 }
 0x223   :  { %v2573_v7 = vmax.f32 %v2470_v0, %v2571_v6  ;;  %v14173_v61 = vpop.f32.mrf.mxu2  ;;  %v14175_v3 = vpop.f32.mrf.mxu3  ;;  %v10097_v6 = vld [vmem:[#allocation3 + $0x38] sm:$0x70] }
 0x224   :  { %v14177_v31 = vpop.f32.mrf.mxu1 }
 0x225   :  { %v2575_v9 = vadd.f32 %v13835_v8, %v2573_v7  ;;  %v14196_v8 = vsel %vm101_vm0, %v10096_v44, 0  ;;  %v2708_v27 = vadd.f32 %v14163_v43, %v14177_v31  ;;  %v12467_v43 = vld [vmem:[#allocation3 + $0x24] sm:$0xf]  ;;  %v10089_v31 = vld [vmem:[#allocation3 + $0x28] sm:$0xf0] }
 0x227   :  { %v14188_v19 = vpop.f32.mrf.mxu0  ;;  %v2577_v16 = vpack.c.bf16 %v2575_v9, %v2575_v9  ;;  %9984 = vmatmul.msk.bf16.vlgmr.msrb.gmra.mxu1 %vm97_vm1, %v14034_v42 }
 0x228   :  { %10039 = vmatmul.msk.bf16.vlgmr.msrb.gmra.mxu2 %vm97_vm1, %v12445_v18  ;;  %10040 = vmatmul.msk.bf16.vlgmr.msrb.gmra.mxu3 %vm97_vm1, %v12445_v18 }
 0x229   :  { %2579 = vst [vmem:[#allocation2 + $0x54] sm:$0xf] %v2577_v16  ;;  %3713 = vmatpush.bf16.msrb.mxu1 %v3691_v20  ;;  %3800 = vmatpush.bf16.msrb.mxu2 %v14117_v32  ;;  %v12464_v32 = vld [vmem:[#allocation3 + $0x14] sm:$0xf]  ;;  %v2779_v16 = vadd.f32 %v14146_v24, %v2694_v2  ;;  %v2696_v24 = vadd.f32 %v14173_v61, %v14129_v14  ;;  %v10171_v2 = vld [vmem:[#allocation3 + $0x20] sm:$0xf] }
 0x22a   :  { %10063 = vmatmul.msk.bf16.vlgmr.msrb.gmra.mxu0 %vm97_vm1, %v14186_v26  ;;  %3814 = vmatpush.bf16.msrb.mxu3 %v3691_v20  ;;  %v10122_v53 = vor.u32 %v12464_v32, %v10119_v17 }
 0x22b   :  { %v2794_v22 = vpop.f32.mrf.mxu2  ;;  %v2808_v42 = vpop.f32.mrf.mxu3  ;;  %3886 = vmatpush.bf16.msrb.mxu0 %v14196_v8 }
 0x22c   :  { %v14204_v1 = vpop.f32.mrf.mxu1  ;;  %v14218_v40 = vsel %vm101_vm0, %v10122_v53, 0  ;;  %v2823_v9 = vadd.f32 %v14188_v19, %v2794_v22  ;;  %v10092_v22 = vor.u32 %v12467_v43, %v10089_v31  ;;  %v12474_v53 = vld [vmem:[#allocation3 + $0x54] sm:$0xf]  ;;  %v10203_v31 = vld [vmem:[#allocation3 + $0x18] sm:$0x70] }
 0x22d   :  { %3714 = vmatpush.bf16.msrb.mxu1 %v10054_v28  ;;  %3801 = vmatpush.bf16.msrb.mxu2 %v14126_v41  ;;  %v3935_v41 = vsel %vm101_vm0, %v10118_v21, 0  ;;  %v12480_v43 = vld [vmem:[#allocation3 + $0x14] sm:$0xf] }
 0x22e   :  { %3815 = vmatpush.bf16.msrb.mxu3 %v10054_v28 }
 0x22f   :  { %v14206_v37 = vpop.f32.mrf.mxu0  ;;  %3887 = vmatpush.bf16.msrb.mxu0 %v14202_v23 }
 0x233   :  { %v14210_v29 = vpop.f32.mrf.mxu2  ;;  %v14212_v59 = vpop.f32.mrf.mxu3 }
 0x234   :  { %v2774_v62 = vpop.f32.mrf.mxu1  ;;  %v2825_v17 = vadd.f32 %v14206_v37, %v14210_v29  ;;  %v10143_v29 = vld [vmem:[#allocation3 + $0x58] sm:$0x70] }
 0x235   :  { %v2780_v20 = vadd.f32 %v2774_v62, %v2708_v27  ;;  %v12484_v27 = vld [vmem:[#allocation3 + $0x24] sm:$0xf0] }
 0x237   :  { %v14214_v51 = vpop.f32.mrf.mxu0  ;;  %10018 = vmatmul.msk.bf16.vlgmr.msra.gmra.mxu1 %vm97_vm1, %v14144_v34  ;;  %v2783_v19 = vmax.f32 %v2779_v16, %v2780_v20  ;;  %v10225_v20 = vld [vmem:[#allocation3 + $0x50] sm:$0xf] }
 0x238   :  { %10065 = vmatmul.msk.bf16.vlgmr.msra.gmra.mxu2 %vm97_vm1, %v14186_v26  ;;  %10066 = vmatmul.msk.bf16.vlgmr.msra.gmra.mxu3 %vm97_vm1, %v14186_v26 }
 0x239   :  { %3775 = vmatpush.bf16.msra.mxu1 %v14108_v4  ;;  %3946 = vmatpush.bf16.msra.mxu2 %v3935_v41  ;;  %v12469_v4 = vld [vmem:[#allocation3 + $0x34] sm:$0xf] }
 0x23a   :  { %10067 = vmatmul.msk.bf16.vlgmr.msra.gmra.mxu0 %vm97_vm1, %v14144_v34  ;;  %3960 = vmatpush.bf16.msra.mxu3 %v14218_v40  ;;  %v10100_v45 = vor.u32 %v12469_v4, %v10097_v6  ;;  %v10135_v4 = vld [vmem:[#allocation3 + $0x48] sm:$0xf0] }
 0x23b   :  { %v2861_v35 = vpop.f32.mrf.mxu2  ;;  %v2875_v11 = vpop.f32.mrf.mxu3  ;;  %4013 = vmatpush.bf16.msra.mxu0 %v14227_v52 }
 0x23c   :  { %v2776_v36 = vpop.f32.mrf.mxu1  ;;  %v3878_v63 = vsel %vm101_vm0, %v10100_v45, 0  ;;  %v2880_v55 = vadd.f32 %v2861_v35, %v2823_v9 }
 0x23d   :  { %3776 = vmatpush.bf16.msra.mxu1 %v14123_v60  ;;  %3947 = vmatpush.bf16.msra.mxu2 %v10110_v47  ;;  %v12460_v60 = vld [vmem:[%s16932_s0 + $0xc8] sm:$0xff] }
 0x23e   :  { %3961 = vmatpush.bf16.msra.mxu3 %v14233_v57 }
 0x23f   :  { %v14239_v0 = vpop.f32.mrf.mxu0  ;;  %4014 = vmatpush.bf16.msra.mxu0 %v14236_v12 }
 0x243   :  { %v2863_v7 = vpop.f32.mrf.mxu2  ;;  %v2877_v18 = vpop.f32.mrf.mxu3 }
 0x244   :  { %v2836_v44 = vpop.f32.mrf.mxu1  ;;  %v2882_v54 = vadd.f32 %v2863_v7, %v2825_v17  ;;  %v10193_v17 = vld [vmem:[#allocation3] sm:$0xf] }
 0x245   :  { %v2837_v30 = vadd.f32 %v2836_v44, %v2808_v42  ;;  %v14317_v44 = vor.u32 %v12484_v27, %v10171_v2  ;;  %v12483_v27 = vld [vmem:[#allocation3 + $0x24] sm:$0xf] }
 0x247   :  { %v14256_v46 = vpop.f32.mrf.mxu0  ;;  %v2881_v10 = vadd.f32 %v2875_v11, %v2837_v30  ;;  %10064 = vmatmul.msk.bf16.vlgmr.msrb.gmra.mxu1 %vm97_vm1, %v14186_v26  ;;  %v2710_v26 = vadd.f32 %v14175_v3, %v14204_v1  ;;  %v2781_v1 = vadd.f32 %v14169_v38, %v2696_v24  ;;  %v12461_v38 = vld [vmem:[%s16932_s0 + $0xc0] sm:$0xff]  ;;  %v12491_v30 = vld [vmem:[#allocation3 + $0x54] sm:$0x70] }
 0x248   :  { %10075 = vmatmul.msk.bf16.vlgmr.msrb.gmra.mxu2 %vm97_vm1, %v12460_v60  ;;  %10076 = vmatmul.msk.bf16.vlgmr.msrb.gmra.mxu3 %vm97_vm1, %v12460_v60 }
 0x249   :  { %v2884_v28 = vmax.f32 %v2880_v55, %v2881_v10  ;;  %3900 = vmatpush.bf16.msrb.mxu1 %v3878_v63  ;;  %4047 = vmatpush.bf16.msrb.mxu2 %v14196_v8  ;;  %v2782_v58 = vadd.f32 %v2776_v36, %v2710_v26  ;;  %v14280_v8 = vld [vmem:[%s16934_s2] ss:$0 sm:$0xff]  ;;  %v12472_v36 = vld [vmem:[#allocation3 + $0x44] sm:$0xf]  ;;  %v10226_v10 = vor.u32 %v12491_v30, %v10225_v20  ;;  %v12489_v26 = vld [vmem:[#allocation3 + $0x44] sm:$0xf0] }
 0x24a   :  { %10101 = vmatmul.msk.bf16.vlgmr.msrb.gmra.mxu0 %vm97_vm1, %v14254_v49  ;;  %4061 = vmatpush.bf16.msrb.mxu3 %v3878_v63  ;;  %v10138_v7 = vor.u32 %v12472_v36, %v10135_v4  ;;  %v12481_v63 = vld [vmem:[#allocation3 + $0x14] sm:$0x70] }
 0x24b   :  { %v2886_v42 = vmax.f32 %v2783_v19, %v2884_v28  ;;  %v14271_v48 = vpop.f32.mrf.mxu2  ;;  %v14273_v13 = vpop.f32.mrf.mxu3  ;;  %4075 = vmatpush.bf16.msrb.mxu0 %v3935_v41  ;;  %v2784_v62 = vmax.f32 %v2781_v1, %v2782_v58  ;;  %v10179_v41 = vld [vmem:[#allocation3 + $0x30] sm:$0xf]  ;;  %v12479_v58 = vld [vmem:[#allocation3 + $0x4] sm:$0xf0]  ;;  %v10195_v1 = vld [vmem:[#allocation3 + $0x8] sm:$0xf0] }
 0x24c   :  { %v2838_v32 = vpop.f32.mrf.mxu1  ;;  %v10180_v25 = vor.u32 %v12486_v33, %v10179_v41  ;;  %v10181_v41 = vld [vmem:[#allocation3 + $0x38] sm:$0x70]  ;;  %v3008_v33 = vadd.f32 %v14271_v48, %v14214_v51 }
 0x24d   :  { %v2888_v14 = vadd.f32 %v14280_v8, %v2886_v42  ;;  %v2839_v61 = vadd.f32 %v2838_v32, %v14212_v59  ;;  %3901 = vmatpush.bf16.msrb.mxu1 %v10092_v22  ;;  %4048 = vmatpush.bf16.msrb.mxu2 %v14202_v23  ;;  %v10146_v59 = vor.u32 %v12474_v53, %v10143_v29  ;;  %v14334_v42 = vsel %vm101_vm0, %v10226_v10, 0 }
 0x24e   :  { %4062 = vmatpush.bf16.msrb.mxu3 %v10092_v22  ;;  %v14311_v45 = vsel %vm101_vm0, %v10180_v25, 0  ;;  %v10206_v22 = vor.u32 %v12480_v43, %v10203_v31  ;;  %v3093_v48 = vadd.f32 %v14256_v46, %v3008_v33  ;;  %v12488_v33 = vld [vmem:[#allocation3 + $0x44] sm:$0xf] }
 0x24f   :  { %v14284_v3 = vpop.f32.mrf.mxu0  ;;  %v2890_v37 = vpack.c.bf16 %v2888_v14, %v2888_v14  ;;  %v2883_v21 = vadd.f32 %v2877_v18, %v2839_v61  ;;  %4076 = vmatpush.bf16.msrb.mxu0 %v10110_v47  ;;  %v14301_v47 = vld [vmem:[%s16932_s0 + $0xd0] sm:$0xff]  ;;  %v4005_v11 = vsel %vm101_vm0, %v10146_v59, 0 }
 0x250   :  { %v14342_v14 = vsel %vm101_vm0, %v10206_v22, 0  ;;  %v12478_v61 = vld [vmem:[#allocation3 + $0x4] sm:$0xf]  ;;  %v10227_v22 = vld [vmem:[#allocation3 + $0x58] sm:$0x70] }
 0x251   :  { %2892 = vst [vmem:[#allocation2 + $0x20] sm:$0xf] %v2890_v37  ;;  %v2885_v15 = vmax.f32 %v2882_v54, %v2883_v21  ;;  %v10194_v37 = vor.u32 %v12479_v58, %v10193_v17  ;;  %v14351_v29 = vor.u32 %v12478_v61, %v10195_v1  ;;  %v14411_v1 = vld [vmem:[%s16932_s0 + $0xe0] sm:$0xff] }
 0x253   :  { %v2887_v5 = vmax.f32 %v2784_v62, %v2885_v15  ;;  %v14288_v39 = vpop.f32.mrf.mxu2  ;;  %v14290_v56 = vpop.f32.mrf.mxu3 }
 0x254   :  { %v14292_v23 = vpop.f32.mrf.mxu1 }
 0x255   :  { %v2889_v50 = vadd.f32 %v14280_v8, %v2887_v5  ;;  %v3022_v59 = vadd.f32 %v14273_v13, %v14292_v23 }
 0x257   :  { %v14303_v35 = vpop.f32.mrf.mxu0  ;;  %v2891_v6 = vpack.c.bf16 %v2889_v50, %v2889_v50  ;;  %10068 = vmatmul.msk.bf16.vlgmr.msra.gmra.mxu1 %vm97_vm1, %v14144_v34 }
 0x258   :  { %10123 = vmatmul.msk.bf16.vlgmr.msra.gmra.mxu2 %vm97_vm1, %v12461_v38  ;;  %10124 = vmatmul.msk.bf16.vlgmr.msra.gmra.mxu3 %vm97_vm1, %v12461_v38 }
 0x259   :  { %2893 = vst [vmem:[#allocation2 + $0x58] sm:$0xf] %v2891_v6  ;;  %4027 = vmatpush.bf16.msra.mxu1 %v4005_v11  ;;  %4114 = vmatpush.bf16.msra.mxu2 %v14227_v52  ;;  %v10201_v52 = vld [vmem:[#allocation3 + $0x10] sm:$0xf]  ;;  %v14369_v6 = vld [vmem:[%s16932_s0 + $0xd8] sm:$0xff] }
 0x25a   :  { %10147 = vmatmul.msk.bf16.vlgmr.msra.gmra.mxu0 %vm97_vm1, %v14301_v47  ;;  %4128 = vmatpush.bf16.msra.mxu3 %v4005_v11  ;;  %v10202_v19 = vor.u32 %v12481_v63, %v10201_v52 }
 0x25b   :  { %v3108_v18 = vpop.f32.mrf.mxu2  ;;  %v3122_v34 = vpop.f32.mrf.mxu3  ;;  %4200 = vmatpush.bf16.msra.mxu0 %v14311_v45 }
 0x25c   :  { %v14319_v60 = vpop.f32.mrf.mxu1  ;;  %v4249_v32 = vsel %vm101_vm0, %v10202_v19, 0  ;;  %v3137_v11 = vadd.f32 %v14303_v35, %v3108_v18  ;;  %v10173_v35 = vld [vmem:[#allocation3 + $0x28] sm:$0xf0] }
 0x25d   :  { %4028 = vmatpush.bf16.msra.mxu1 %v10138_v7  ;;  %4115 = vmatpush.bf16.msra.mxu2 %v14236_v12  ;;  %v10217_v12 = vld [vmem:[#allocation3 + $0x40] sm:$0xf]  ;;  %v10176_v46 = vor.u32 %v12483_v27, %v10173_v35  ;;  %v12545_v27 = vld [vmem:[#allocation5 + $0x174] sm:$0xf0] }
 0x25e   :  { %4129 = vmatpush.bf16.msra.mxu3 %v10138_v7  ;;  %v14348_v54 = vor.u32 %v12489_v26, %v10217_v12 }
 0x25f   :  { %v14321_v9 = vpop.f32.mrf.mxu0  ;;  %4201 = vmatpush.bf16.msra.mxu0 %v14317_v44 }
 0x263   :  { %v14325_v16 = vpop.f32.mrf.mxu2  ;;  %v14327_v55 = vpop.f32.mrf.mxu3 }
 0x264   :  { %v3088_v28 = vpop.f32.mrf.mxu1  ;;  %v3139_v43 = vadd.f32 %v14321_v9, %v14325_v16 }
 0x265   :  { %v3094_v36 = vadd.f32 %v3088_v28, %v3022_v59  ;;  %v12490_v28 = vld [vmem:[#allocation3 + $0x54] sm:$0xf]  ;;  %v10219_v59 = vld [vmem:[#allocation3 + $0x48] sm:$0xf0] }
 0x266   :  { %v10230_v17 = vor.u32 %v12490_v28, %v10227_v22 }
 0x267   :  { %v14329_v24 = vpop.f32.mrf.mxu0  ;;  %10102 = vmatmul.msk.bf16.vlgmr.msrb.gmra.mxu1 %vm97_vm1, %v14254_v49  ;;  %v3097_v7 = vmax.f32 %v3093_v48, %v3094_v36  ;;  %v12507_v48 = vld [vmem:[#allocation5 + $0x44] sm:$0xf0] }
 0x268   :  { %10149 = vmatmul.msk.bf16.vlgmr.msrb.gmra.mxu2 %vm97_vm1, %v14301_v47  ;;  %10150 = vmatmul.msk.bf16.vlgmr.msrb.gmra.mxu3 %vm97_vm1, %v14301_v47 }
 0x269   :  { %4089 = vmatpush.bf16.msrb.mxu1 %v14218_v40  ;;  %4260 = vmatpush.bf16.msrb.mxu2 %v4249_v32  ;;  %v12485_v40 = vld [vmem:[#allocation3 + $0x34] sm:$0xf] }
 0x26a   :  { %10151 = vmatmul.msk.bf16.vlgmr.msrb.gmra.mxu0 %vm97_vm1, %v14254_v49  ;;  %4274 = vmatpush.bf16.msrb.mxu3 %v14342_v14  ;;  %v10184_v25 = vor.u32 %v12485_v40, %v10181_v41  ;;  %v4319_v41 = vsel %vm101_vm0, %v10230_v17, 0  ;;  %v12501_v17 = vld [vmem:[#allocation5 + $0x14] sm:$0xf0] }
 0x26b   :  { %4327 = vmatpush.bf16.msrb.mxu0 %v14334_v42  ;;  %v3175_v21 = vpop.f32.mrf.mxu2  ;;  %v3189_v53 = vpop.f32.mrf.mxu3 }
 0x26c   :  { %v3090_v62 = vpop.f32.mrf.mxu1  ;;  %v3194_v13 = vadd.f32 %v3175_v21, %v3137_v11  ;;  %v4192_v2 = vsel %vm101_vm0, %v10184_v25, 0 }
 0x26d   :  { %4090 = vmatpush.bf16.msrb.mxu1 %v14233_v57  ;;  %4261 = vmatpush.bf16.msrb.mxu2 %v10194_v37  ;;  %v12476_v57 = vld [vmem:[%s16932_s0 + $0xd8] sm:$0xff] }
 0x26e   :  { %4275 = vmatpush.bf16.msrb.mxu3 %v14351_v29 }
 0x26f   :  { %v14354_v15 = vpop.f32.mrf.mxu0  ;;  %4328 = vmatpush.bf16.msrb.mxu0 %v14348_v54 }
 0x273   :  { %v3177_v5 = vpop.f32.mrf.mxu2  ;;  %v3191_v38 = vpop.f32.mrf.mxu3 }
 0x274   :  { %v3150_v50 = vpop.f32.mrf.mxu1 }
 0x275   :  { %v3151_v4 = vadd.f32 %v3150_v50, %v3122_v34  ;;  %v3024_v34 = vadd.f32 %v14290_v56, %v14319_v60  ;;  %v3196_v56 = vadd.f32 %v3177_v5, %v3139_v43  ;;  %v10307_v50 = vld [vmem:[#allocation5 + $0x50] sm:$0xf] }
 0x277   :  { %v14371_v51 = vpop.f32.mrf.mxu0  ;;  %v3195_v23 = vadd.f32 %v3189_v53, %v3151_v4  ;;  %10148 = vmatmul.msk.bf16.vlgmr.msra.gmra.mxu1 %vm97_vm1, %v14301_v47  ;;  %v3010_v47 = vadd.f32 %v14288_v39, %v14239_v0  ;;  %v10315_v53 = vld [vmem:[#allocation5 + $0x60] sm:$0xf] }
 0x278   :  { %10159 = vmatmul.msk.bf16.vlgmr.msra.gmra.mxu2 %vm97_vm1, %v12476_v57  ;;  %10160 = vmatmul.msk.bf16.vlgmr.msra.gmra.mxu3 %vm97_vm1, %v12476_v57  ;;  %v12509_v57 = vld [vmem:[#allocation5 + $0x54] sm:$0xf0]  ;;  %v10299_v4 = vld [vmem:[#allocation5 + $0x40] sm:$0xf] }
 0x279   :  { %v3198_v18 = vmax.f32 %v3194_v13, %v3195_v23  ;;  %4361 = vmatpush.bf16.msra.mxu2 %v14311_v45  ;;  %4375 = vmatpush.bf16.msra.mxu3 %v4192_v2  ;;  %v3096_v45 = vadd.f32 %v3090_v62, %v3024_v34  ;;  %v3095_v39 = vadd.f32 %v14284_v3, %v3010_v47  ;;  %v12477_v3 = vld [vmem:[%s16932_s0 + $0xd0] sm:$0xff]  ;;  %v12511_v62 = vld [vmem:[#allocation5 + $0x64] sm:$0xf0]  ;;  %v10291_v23 = vld [vmem:[#allocation5 + $0x30] sm:$0xf] }
 0x27a   :  { %10185 = vmatmul.msk.bf16.vlgmr.msra.gmra.mxu0 %vm97_vm1, %v14369_v6  ;;  %4214 = vmatpush.bf16.msra.mxu1 %v4192_v2  ;;  %v14426_v5 = vor.u32 %v12511_v62, %v10315_v53  ;;  %v14438_v36 = vor.u32 %v12509_v57, %v10307_v50  ;;  %v14441_v13 = vor.u32 %v12507_v48, %v10299_v4  ;;  %v10451_v2 = vld [vmem:[#allocation5 + $0x170] sm:$0xf]  ;;  %v12539_v50 = vld [vmem:[#allocation5 + $0x144] sm:$0xf0]  ;;  %v10491_v57 = vld [vmem:[#allocation5 + $0x1c0] sm:$0xf] }
 0x27b   :  { %4389 = vmatpush.bf16.msra.mxu0 %v4249_v32  ;;  %v3200_v20 = vmax.f32 %v3097_v7, %v3198_v18  ;;  %v14386_v30 = vpop.f32.mrf.mxu2  ;;  %v14388_v52 = vpop.f32.mrf.mxu3  ;;  %v3098_v9 = vmax.f32 %v3095_v39, %v3096_v45  ;;  %v12513_v32 = vld [vmem:[#allocation5 + $0x74] sm:$0xf0]  ;;  %v10515_v18 = vld [vmem:[#allocation5 + $0x1f0] sm:$0xf]  ;;  %v14449_v34 = vor.u32 %v12545_v27, %v10451_v2  ;;  %v10283_v45 = vld [vmem:[#allocation5 + $0x20] sm:$0xf] }
 0x27c   :  { %v3152_v63 = vpop.f32.mrf.mxu1  ;;  %v12505_v7 = vld [vmem:[#allocation5 + $0x34] sm:$0xf0]  ;;  %v12503_v39 = vld [vmem:[#allocation5 + $0x24] sm:$0xf0]  ;;  %v10579_v48 = vld [vmem:[#allocation5 + $0x270] sm:$0xf] }
 0x27d   :  { %v3202_v31 = vadd.f32 %v14280_v8, %v3200_v20  ;;  %v3153_v10 = vadd.f32 %v3152_v63, %v14327_v55  ;;  %4362 = vmatpush.bf16.msra.mxu2 %v14317_v44  ;;  %4376 = vmatpush.bf16.msra.mxu3 %v10176_v46  ;;  %v10323_v44 = vld [vmem:[#allocation5 + $0x70] sm:$0xf]  ;;  %v14454_v63 = vor.u32 %v12505_v7, %v10291_v23  ;;  %v12555_v4 = vld [vmem:[#allocation5 + $0x1c4] sm:$0xf0]  ;;  %v12577_v23 = vld [vmem:[#allocation5 + $0x274] sm:$0xf0] }
 0x27e   :  { %4215 = vmatpush.bf16.msra.mxu1 %v10176_v46  ;;  %v14415_v21 = vor.u32 %v12513_v32, %v10323_v44  ;;  %v12561_v46 = vld [vmem:[#allocation5 + $0x1f4] sm:$0xf0]  ;;  %v14471_v28 = vor.u32 %v12503_v39, %v10283_v45  ;;  %v10247_v27 = vld [vmem:[#allocation2] sm:$0xf]  ;;  %v12495_v7 = vld [vmem:[#allocation2 + $0x34] sm:$0xf0]  ;;  %v14499_v45 = vor.u32 %v12555_v4, %v10491_v57 }
 0x27f   :  { %v14395_v0 = vpop.f32.mrf.mxu0  ;;  %4390 = vmatpush.bf16.msra.mxu0 %v10194_v37  ;;  %v3204_v60 = vpack.c.bf16 %v3202_v31, %v3202_v31  ;;  %v3197_v19 = vadd.f32 %v3191_v38, %v3153_v10  ;;  %v14456_v43 = vor.u32 %v12561_v46, %v10515_v18  ;;  %v10443_v31 = vld [vmem:[#allocation5 + $0x160] sm:$0xf]  ;;  %v12543_v10 = vld [vmem:[#allocation5 + $0x164] sm:$0xf0]  ;;  %v3322_v18 = vadd.f32 %v14386_v30, %v14329_v24  ;;  %v12537_v24 = vld [vmem:[#allocation5 + $0x134] sm:$0xf0] }
 0x280   :  { %17128 = vst [vmem:[#allocation12_spill] sm:$0xff] %v14499_v45  ;;  %v10483_v30 = vld [vmem:[#allocation5 + $0x1b0] sm:$0xf] }
 0x281   :  { %3206 = vst [vmem:[#allocation2 + $0x24] sm:$0xf] %v3204_v60  ;;  %v3199_v16 = vmax.f32 %v3196_v56, %v3197_v19  ;;  %v10507_v56 = vld [vmem:[#allocation5 + $0x1e0] sm:$0xf]  ;;  %v12559_v60 = vld [vmem:[#allocation5 + $0x1e4] sm:$0xf0]  ;;  %v14467_v19 = vor.u32 %v12543_v10, %v10443_v31 }
 0x282   :  { %17125 = vst [vmem:[#allocation9_spill] sm:$0xff] %v14456_v43  ;;  %v14473_v22 = vor.u32 %v12559_v60, %v10507_v56  ;;  %v12529_v31 = vld [vmem:[#allocation5 + $0xf4] sm:$0xf0]  ;;  %v10419_v10 = vld [vmem:[#allocation5 + $0x130] sm:$0xf] }
 0x283   :  { %v3201_v12 = vmax.f32 %v3098_v9, %v3199_v16  ;;  %v14398_v26 = vpop.f32.mrf.mxu2  ;;  %v14400_v55 = vpop.f32.mrf.mxu3  ;;  %v10275_v9 = vld [vmem:[#allocation5 + $0x10] sm:$0xf]  ;;  %v14526_v4 = vor.u32 %v12537_v24, %v10419_v10 }
 0x284   :  { %v14402_v58 = vpop.f32.mrf.mxu1  ;;  %17126 = vst [vmem:[#allocation10_spill] sm:$0xff] %v14473_v22  ;;  %v10435_v16 = vld [vmem:[#allocation5 + $0x150] sm:$0xf]  ;;  %v3324_v24 = vadd.f32 %v14398_v26, %v14354_v15  ;;  %v12533_v26 = vld [vmem:[#allocation5 + $0x114] sm:$0xf0] }
 0x285   :  { %v3203_v61 = vadd.f32 %v14280_v8, %v3201_v12  ;;  %v12541_v12 = vld [vmem:[#allocation5 + $0x154] sm:$0xf0]  ;;  %v3336_v39 = vadd.f32 %v14388_v52, %v14402_v58  ;;  %17130 = vst [vmem:[#allocation14_spill] sm:$0xff] %v14526_v4 }
 0x286   :  { %v14479_v62 = vor.u32 %v12541_v12, %v10435_v16  ;;  %v12553_v16 = vld [vmem:[#allocation5 + $0x1b4] sm:$0xf0] }
 0x287   :  { %v14413_v37 = vpop.f32.mrf.mxu0  ;;  %v3205_v40 = vpack.c.bf16 %v3203_v61, %v3203_v61  ;;  %10152 = vmatmul.msk.bf16.vlgmr.msrb.gmra.mxu1 %vm97_vm1, %v14254_v49  ;;  %v10222_v49 = vor.u32 %v12488_v33, %v10219_v59  ;;  %v12557_v61 = vld [vmem:[#allocation5 + $0x1d4] sm:$0xf0]  ;;  %v10267_v59 = vld [vmem:[#allocation5] sm:$0xf] }
 0x288   :  { %10207 = vmatmul.msk.bf16.vlgmr.msrb.gmra.mxu2 %vm97_vm1, %v12477_v3  ;;  %10208 = vmatmul.msk.bf16.vlgmr.msrb.gmra.mxu3 %vm97_vm1, %v12477_v3  ;;  %v10499_v3 = vld [vmem:[#allocation5 + $0x1d0] sm:$0xf] }
 0x289   :  { %3207 = vst [vmem:[#allocation2 + $0x5c] sm:$0xf] %v3205_v40  ;;  %4428 = vmatpush.bf16.msrb.mxu2 %v14334_v42  ;;  %4442 = vmatpush.bf16.msrb.mxu3 %v4319_v41  ;;  %v14487_v33 = vor.u32 %v12557_v61, %v10499_v3  ;;  %v14512_v3 = vor.u32 %v12495_v7, %v10247_v27  ;;  %v10571_v61 = vld [vmem:[#allocation5 + $0x260] sm:$0xf] }
 0x28a   :  { %10231 = vmatmul.msk.bf16.vlgmr.msrb.gmra.mxu0 %vm97_vm1, %v14411_v1  ;;  %4341 = vmatpush.bf16.msrb.mxu1 %v4319_v41  ;;  %v14485_v41 = vor.u32 %v12501_v17, %v10275_v9  ;;  %v14507_v9 = vor.u32 %v12577_v23, %v10579_v48  ;;  %v12492_v17 = vld [vmem:[%s16932_s0 + $0xe8] sm:$0xff]  ;;  %v14528_v48 = vor.u32 %v12553_v16, %v10483_v30  ;;  %v10475_v7 = vld [vmem:[#allocation5 + $0x1a0] sm:$0xf] }
 0x28b   :  { %4985 = vmatpush.bf16.msrb.mxu0 %v14415_v21  ;;  %v14428_v38 = vpop.f32.mrf.mxu2  ;;  %v14430_v25 = vpop.f32.mrf.mxu3  ;;  %17127 = vst [vmem:[#allocation11_spill] sm:$0xff] %v14487_v33 }
 0x28c   :  { %v14432_v11 = vpop.f32.mrf.mxu1  ;;  %17129 = vst [vmem:[#allocation13_spill] sm:$0xff] %v14507_v9  ;;  %v3451_v52 = vadd.f32 %v14413_v37, %v14428_v38  ;;  %v10379_v37 = vld [vmem:[#allocation5 + $0xe0] sm:$0xf]  ;;  %v12527_v38 = vld [vmem:[#allocation5 + $0xe4] sm:$0xf0] }
 0x28d   :  { %4429 = vmatpush.bf16.msrb.mxu2 %v14348_v54  ;;  %4443 = vmatpush.bf16.msrb.mxu3 %v10222_v49  ;;  %17131 = vst [vmem:[#allocation15_spill] sm:$0xff] %v14528_v48 }
 0x28e   :  { %4342 = vmatpush.bf16.msrb.mxu1 %v10222_v49  ;;  %v10427_v49 = vld [vmem:[#allocation5 + $0x140] sm:$0xf] }
 0x28f   :  { %4986 = vmatpush.bf16.msrb.mxu0 %v14426_v5  ;;  %v14436_v42 = vpop.f32.mrf.mxu0  ;;  %v14491_v2 = vor.u32 %v12539_v50, %v10427_v49 }
 0x293   :  { %4987 = vmatpush.bf16.msrb.mxu0 %v14438_v36  ;;  %v14443_v35 = vpop.f32.mrf.mxu2  ;;  %v14445_v54 = vpop.f32.mrf.mxu3 }
 0x294   :  { %v14447_v47 = vpop.f32.mrf.mxu1 }
 0x295   :  { %v3408_v58 = vadd.f32 %v14447_v47, %v3336_v39  ;;  %v10411_v47 = vld [vmem:[#allocation5 + $0x120] sm:$0xf] }
 0x297   :  { %4988 = vmatpush.bf16.msrb.mxu0 %v14441_v13  ;;  %v14452_v20 = vpop.f32.mrf.mxu0  ;;  %10186 = vmatmul.msk.bf16.vlgmr.msra.gmra.mxu1 %vm97_vm1, %v14369_v6 }
 0x298   :  { %10233 = vmatmul.msk.bf16.vlgmr.msra.gmra.mxu2 %vm97_vm1, %v14411_v1  ;;  %10234 = vmatmul.msk.bf16.vlgmr.msra.gmra.mxu3 %vm97_vm1, %v14411_v1 }
 0x299   :  { %5013 = vmatpush.bf16.msra.mxu2 %v14449_v34  ;;  %5027 = vmatpush.bf16.msra.mxu3 %v14456_v43  ;;  %v10325_v43 = vld [vmem:[#allocation5 + $0x78] sm:$0xf0] }
 0x29a   :  { %10235 = vmatmul.msk.bf16.vlgmr.msra.gmra.mxu0 %vm97_vm1, %v14369_v6  ;;  %4403 = vmatpush.bf16.msra.mxu1 %v14342_v14  ;;  %v12499_v14 = vld [vmem:[#allocation5 + $0x4] sm:$0xf0] }
 0x29b   :  { %4989 = vmatpush.bf16.msrb.mxu0 %v14454_v63  ;;  %v3489_v44 = vpop.f32.mrf.mxu2  ;;  %v3503_v32 = vpop.f32.mrf.mxu3  ;;  %v14497_v46 = vor.u32 %v12499_v14, %v10267_v59  ;;  %v12575_v59 = vld [vmem:[#allocation5 + $0x264] sm:$0xf0]  ;;  %v3407_v14 = vadd.f32 %v14371_v51, %v3322_v18 }
 0x29c   :  { %v14476_v53 = vpop.f32.mrf.mxu1  ;;  %v3508_v23 = vadd.f32 %v3489_v44, %v3451_v52  ;;  %v14533_v51 = vor.u32 %v12575_v59, %v10571_v61  ;;  %v12551_v18 = vld [vmem:[#allocation5 + $0x1a4] sm:$0xf0]  ;;  %v14539_v44 = vor.u32 %v12527_v38, %v10379_v37  ;;  %v10555_v38 = vld [vmem:[#allocation5 + $0x240] sm:$0xf] }
 0x29d   :  { %5014 = vmatpush.bf16.msra.mxu2 %v14467_v19  ;;  %5028 = vmatpush.bf16.msra.mxu3 %v14473_v22  ;;  %v3411_v10 = vmax.f32 %v3407_v14, %v3408_v58  ;;  %v14547_v16 = vor.u32 %v12551_v18, %v10475_v7  ;;  %v10467_v58 = vld [vmem:[#allocation5 + $0x190] sm:$0xf]  ;;  %v3409_v7 = vadd.f32 %v14395_v0, %v3324_v24  ;;  %v10459_v0 = vld [vmem:[#allocation5 + $0x180] sm:$0xf] }
 0x29e   :  { %4404 = vmatpush.bf16.msra.mxu1 %v14351_v29  ;;  %v10387_v29 = vld [vmem:[#allocation5 + $0xf0] sm:$0xf]  ;;  %17132 = vst [vmem:[#allocation16_spill] sm:$0xff] %v14533_v51 }
 0x29f   :  { %4990 = vmatpush.bf16.msrb.mxu0 %v14471_v28  ;;  %v14483_v40 = vpop.f32.mrf.mxu0  ;;  %v14519_v50 = vor.u32 %v12529_v31, %v10387_v29  ;;  %v10563_v29 = vld [vmem:[#allocation5 + $0x250] sm:$0xf]  ;;  %v12573_v31 = vld [vmem:[#allocation5 + $0x254] sm:$0xf0]  ;;  %17134 = vst [vmem:[#allocation18_spill] sm:$0xff] %v14547_v16 }
 0x2a0   :  { %v14556_v15 = vor.u32 %v12573_v31, %v10563_v29 }
 0x2a1   :  { %5015 = vmatpush.bf16.msra.mxu2 %v14479_v62  ;;  %5029 = vmatpush.bf16.msra.mxu3 %v14487_v33  ;;  %v10365_v33 = vld [vmem:[#allocation5 + $0xc8] sm:$0xf0] }
 0x2a2   :  { %17135 = vst [vmem:[#allocation19_spill] sm:$0xff] %v14556_v15 }
 0x2a3   :  { %4991 = vmatpush.bf16.msrb.mxu0 %v14485_v41  ;;  %v14503_v56 = vpop.f32.mrf.mxu2  ;;  %v14505_v60 = vpop.f32.mrf.mxu3 }
 0x2a4   :  { %v3464_v12 = vpop.f32.mrf.mxu1 }
 0x2a5   :  { %5016 = vmatpush.bf16.msra.mxu2 %v14491_v2  ;;  %v3465_v49 = vadd.f32 %v3464_v12, %v14430_v25  ;;  %5030 = vmatpush.bf16.msra.mxu3 %v14499_v45  ;;  %v12535_v25 = vld [vmem:[#allocation5 + $0x124] sm:$0xf0]  ;;  %v10403_v12 = vld [vmem:[#allocation5 + $0x110] sm:$0xf]  ;;  %v12522_v45 = vld [vmem:[#allocation5 + $0xc4] sm:$0xf] }
 0x2a6   :  { %v14545_v30 = vor.u32 %v12535_v25, %v10411_v47  ;;  %v12571_v47 = vld [vmem:[#allocation5 + $0x244] sm:$0xf0]  ;;  %v10363_v25 = vld [vmem:[#allocation5 + $0xc0] sm:$0xf]  ;;  %v14569_v18 = vor.u32 %v12533_v26, %v10403_v12  ;;  %v12569_v12 = vld [vmem:[#allocation5 + $0x234] sm:$0xf0] }
 0x2a7   :  { %4992 = vmatpush.bf16.msrb.mxu0 %v14497_v46  ;;  %v14524_v57 = vpop.f32.mrf.mxu0  ;;  %v3509_v27 = vadd.f32 %v3503_v32, %v3465_v49  ;;  %10232 = vmatmul.msk.bf16.vlgmr.msrb.gmra.mxu1 %vm97_vm1, %v14411_v1  ;;  %v10371_v1 = vld [vmem:[#allocation5 + $0xd0] sm:$0xf]  ;;  %v12525_v32 = vld [vmem:[#allocation5 + $0xd4] sm:$0xf0] }
 0x2a8   :  { %10243 = vmatmul.msk.bf16.vlgmr.msrb.gmra.mxu2 %vm97_vm1, %v12492_v17  ;;  %10244 = vmatmul.msk.bf16.vlgmr.msrb.gmra.mxu3 %vm97_vm1, %v12492_v17  ;;  %17133 = vst [vmem:[#allocation17_spill] sm:$0xff] %v14545_v30  ;;  %v3338_v17 = vadd.f32 %v14400_v55, %v14432_v11  ;;  %v12549_v49 = vld [vmem:[#allocation5 + $0x194] sm:$0xf0]  ;;  %v14558_v37 = vor.u32 %v12525_v32, %v10371_v1  ;;  %v12547_v1 = vld [vmem:[#allocation5 + $0x184] sm:$0xf0] }
 0x2a9   :  { %v3512_v39 = vmax.f32 %v3508_v23, %v3509_v27  ;;  %4999 = vmatpush.bf16.msrb.mxu1 %v14519_v50  ;;  %5017 = vmatpush.bf16.msra.mxu2 %v14526_v4  ;;  %v3453_v55 = vadd.f32 %v14436_v42, %v14443_v35  ;;  %17136 = vst [vmem:[#allocation20_spill] sm:$0xff] %v14569_v18  ;;  %v12523_v42 = vld [vmem:[#allocation5 + $0xc4] sm:$0xf0]  ;;  %v10395_v35 = vld [vmem:[#allocation5 + $0x100] sm:$0xf] }
 0x2aa   :  { %4993 = vmatmul.bf16.vlgmr.msrb.gmra.mxu0 %v14512_v3  ;;  %5031 = vmatpush.bf16.msra.mxu3 %v14528_v48  ;;  %v3410_v11 = vadd.f32 %v14476_v53, %v3338_v17  ;;  %v14571_v29 = vor.u32 %v12549_v49, %v10467_v58  ;;  %v12531_v53 = vld [vmem:[#allocation5 + $0x104] sm:$0xf0]  ;;  %v10547_v32 = vld [vmem:[#allocation5 + $0x230] sm:$0xf]  ;;  %v12528_v17 = vld [vmem:[#allocation5 + $0xf4] sm:$0xf] }
 0x2ab   :  { %5041 = vmatpush.bf16.msra.mxu0 %v14507_v9  ;;  %v3514_v61 = vmax.f32 %v3411_v10, %v3512_v39  ;;  %v14552_v59 = vpop.f32.mrf.mxu2  ;;  %v14554_v52 = vpop.f32.mrf.mxu3  ;;  %v3510_v31 = vadd.f32 %v14503_v56, %v3453_v55  ;;  %v14581_v56 = vor.u32 %v12523_v42, %v10363_v25  ;;  %v10453_v49 = vld [vmem:[#allocation5 + $0x178] sm:$0xf0]  ;;  %v12521_v55 = vld [vmem:[#allocation5 + $0xb4] sm:$0xf0]  ;;  %v14594_v25 = vor.u32 %v12569_v12, %v10547_v32  ;;  %v10257_v32 = vld [vmem:[#allocation2 + $0x40] sm:$0xf0] }
 0x2ac   :  { %v3466_v14 = vpop.f32.mrf.mxu1  ;;  %17137 = vst [vmem:[#allocation21_spill] sm:$0xff] %v14571_v29  ;;  %v3412_v26 = vmax.f32 %v3409_v7, %v3410_v11  ;;  %v10255_v42 = vld [vmem:[#allocation2 + $0x8] sm:$0xf]  ;;  %v12542_v12 = vld [vmem:[#allocation5 + $0x164] sm:$0xf] }
 0x2ad   :  { %v3516_v23 = vadd.f32 %v14280_v8, %v3514_v61  ;;  %5000 = vmatpush.bf16.msrb.mxu1 %v14539_v44  ;;  %v3467_v27 = vadd.f32 %v3466_v14, %v14445_v54  ;;  %5018 = vmatpush.bf16.msra.mxu2 %v14545_v30  ;;  %v14576_v54 = vor.u32 %v12571_v47, %v10555_v38  ;;  %v10389_v61 = vld [vmem:[#allocation5 + $0xf8] sm:$0xf0]  ;;  %v10355_v47 = vld [vmem:[#allocation5 + $0xb0] sm:$0xf]  ;;  %v12552_v9 = vld [vmem:[#allocation5 + $0x1b4] sm:$0xf] }
 0x2ae   :  { %5032 = vmatpush.bf16.msra.mxu3 %v14547_v16  ;;  %v14585_v14 = vor.u32 %v12531_v53, %v10395_v35  ;;  %v14587_v38 = vor.u32 %v12547_v1, %v10459_v0  ;;  %17141 = vst [vmem:[#allocation25_spill] sm:$0xff] %v14594_v25  ;;  %v14596_v7 = vor.u32 %v12528_v17, %v10389_v61  ;;  %v12526_v0 = vld [vmem:[#allocation5 + $0xe4] sm:$0xf]  ;;  %v10381_v1 = vld [vmem:[#allocation5 + $0xe8] sm:$0xf0] }
 0x2af   :  { %5042 = vmatpush.bf16.msra.mxu0 %v14533_v51  ;;  %v3518_v10 = vpack.c.bf16 %v3516_v23, %v3516_v23  ;;  %v3511_v39 = vadd.f32 %v14505_v60, %v3467_v27  ;;  %17138 = vst [vmem:[#allocation22_spill] sm:$0xff] %v14576_v54  ;;  %v14578_v24 = vpop.f32.mrf.mxu0  ;;  %v12544_v60 = vld [vmem:[#allocation5 + $0x174] sm:$0xf]  ;;  %v10445_v17 = vld [vmem:[#allocation5 + $0x168] sm:$0xf0] }
 0x2b0   :  { %17139 = vst [vmem:[#allocation23_spill] sm:$0xff] %v14585_v14  ;;  %v14600_v53 = vor.u32 %v12544_v60, %v10453_v49  ;;  %v10347_v60 = vld [vmem:[#allocation5 + $0xa0] sm:$0xf]  ;;  %v12519_v49 = vld [vmem:[#allocation5 + $0xa4] sm:$0xf0] }
 0x2b1   :  { %3520 = vst [vmem:[#allocation2 + $0x28] sm:$0xf] %v3518_v10  ;;  %v3513_v58 = vmax.f32 %v3510_v31, %v3511_v39  ;;  %5001 = vmatpush.bf16.msrb.mxu1 %v14558_v37  ;;  %5019 = vmatpush.bf16.msra.mxu2 %v14569_v18  ;;  %v12496_v31 = vld [vmem:[#allocation2 + $0x3c] sm:$0xf0]  ;;  %v10539_v10 = vld [vmem:[#allocation5 + $0x220] sm:$0xf] }
 0x2b2   :  { %5033 = vmatpush.bf16.msra.mxu3 %v14571_v29  ;;  %17140 = vst [vmem:[#allocation24_spill] sm:$0xff] %v14587_v38  ;;  %v12567_v39 = vld [vmem:[#allocation5 + $0x224] sm:$0xf0]  ;;  %v14608_v61 = vor.u32 %v12496_v31, %v10255_v42  ;;  %v14621_v31 = vor.u32 %v12542_v12, %v10445_v17  ;;  %v10373_v16 = vld [vmem:[#allocation5 + $0xd8] sm:$0xf0] }
 0x2b3   :  { %5043 = vmatpush.bf16.msra.mxu0 %v14556_v15  ;;  %v3515_v23 = vmax.f32 %v3412_v26, %v3513_v58  ;;  %v14590_v11 = vpop.f32.mrf.mxu2  ;;  %v14592_v27 = vpop.f32.mrf.mxu3  ;;  %17142 = vst [vmem:[#allocation26_spill] sm:$0xff] %v14596_v7  ;;  %v14604_v58 = vor.u32 %v12521_v55, %v10355_v47  ;;  %v14614_v47 = vor.u32 %v12526_v0, %v10381_v1  ;;  %v10531_v55 = vld [vmem:[#allocation5 + $0x210] sm:$0xf]  ;;  %v10437_v0 = vld [vmem:[#allocation5 + $0x158] sm:$0xf0] }
 0x2b4   :  { %v14598_v35 = vpop.f32.mrf.mxu1  ;;  %17143 = vst [vmem:[#allocation27_spill] sm:$0xff] %v14600_v53  ;;  %v12518_v15 = vld [vmem:[#allocation5 + $0xa4] sm:$0xf]  ;;  %v10349_v18 = vld [vmem:[#allocation5 + $0xa8] sm:$0xf0] }
 0x2b5   :  { %v3517_v26 = vadd.f32 %v14280_v8, %v3515_v23  ;;  %5002 = vmatpush.bf16.msrb.mxu1 %v14581_v56  ;;  %5020 = vmatpush.bf16.msra.mxu2 %v14585_v14  ;;  %v12494_v8 = vld [vmem:[#allocation2 + $0xc] sm:$0xf]  ;;  %v14612_v23 = vor.u32 %v12567_v39, %v10539_v10  ;;  %17145 = vst [vmem:[#allocation29_spill] sm:$0xff] %v14614_v47  ;;  %v12540_v39 = vld [vmem:[#allocation5 + $0x154] sm:$0xf] }
 0x2b6   :  { %5034 = vmatpush.bf16.msra.mxu3 %v14587_v38  ;;  %v14619_v42 = vor.u32 %v12494_v8, %v10257_v32  ;;  %17146 = vst [vmem:[#allocation30_spill] sm:$0xff] %v14621_v31  ;;  %v12524_v38 = vld [vmem:[#allocation5 + $0xd4] sm:$0xf]  ;;  %v14625_v10 = vor.u32 %v12519_v49, %v10347_v60  ;;  %v12517_v32 = vld [vmem:[#allocation5 + $0x94] sm:$0xf0]  ;;  %v14643_v48 = vor.u32 %v12540_v39, %v10437_v0 }
 0x2b7   :  { %5044 = vmatpush.bf16.msra.mxu0 %v14576_v54  ;;  %v3519_v29 = vpack.c.bf16 %v3517_v26, %v3517_v26  ;;  %17144 = vst [vmem:[#allocation28_spill] sm:$0xff] %v14612_v23  ;;  %10236 = vmatmul.msk.bf16.vlgmr.msra.gmra.mxu1 %vm97_vm1, %v14369_v6  ;;  %v12565_v26 = vld [vmem:[#allocation5 + $0x214] sm:$0xf0]  ;;  %v14627_v1 = vpop.f32.mrf.mxu0  ;;  %v10339_v6 = vld [vmem:[#allocation5 + $0x90] sm:$0xf]  ;;  %v14638_v60 = vor.u32 %v12524_v38, %v10373_v16 }
 0x2b8   :  { %5021 = vmatmul.bf16.vlgmr.msra.gmra.mxu2 %v14608_v61  ;;  %v14636_v17 = vor.u32 %v12565_v26, %v10531_v55  ;;  %v10523_v49 = vld [vmem:[#allocation5 + $0x200] sm:$0xf]  ;;  %v12563_v8 = vld [vmem:[#allocation5 + $0x204] sm:$0xf0]  ;;  %17149 = vst [vmem:[#allocation33_spill] sm:$0xff] %v14643_v48  ;;  %v14646_v22 = vor.u32 %v12517_v32, %v10339_v6  ;;  %v14652_v39 = vor.u32 %v12522_v45, %v10365_v33 }
 0x2b9   :  { %5069 = vmatpush.bf16.msrb.mxu2 %v14596_v7  ;;  %3521 = vst [vmem:[#allocation2 + $0x60] sm:$0xf] %v3519_v29  ;;  %5003 = vmatpush.bf16.msrb.mxu1 %v14604_v58  ;;  %v12560_v55 = vld [vmem:[#allocation5 + $0x1f4] sm:$0xf]  ;;  %v10517_v26 = vld [vmem:[#allocation5 + $0x1f8] sm:$0xf0] }
 0x2ba   :  { %5083 = vmatpush.bf16.msrb.mxu3 %v14600_v53  ;;  %17147 = vst [vmem:[#allocation31_spill] sm:$0xff] %v14636_v17  ;;  %v10331_v16 = vld [vmem:[#allocation5 + $0x80] sm:$0xf]  ;;  %v12515_v38 = vld [vmem:[#allocation5 + $0x84] sm:$0xf0]  ;;  %v14657_v32 = vor.u32 %v12560_v55, %v10517_v26 }
 0x2bb   :  { %5045 = vmatpush.bf16.msra.mxu0 %v14594_v25  ;;  %5035 = vmatmul.bf16.vlgmr.msra.gmra.mxu3 %v14619_v42  ;;  %v14632_v12 = vpop.f32.mrf.mxu2  ;;  %v14634_v29 = vpop.f32.mrf.mxu3  ;;  %17148 = vst [vmem:[#allocation32_spill] sm:$0xff] %v14638_v60  ;;  %v12497_v0 = vld [vmem:[#allocation2 + $0x44] sm:$0xf0]  ;;  %v12512_v25 = vld [vmem:[#allocation5 + $0x74] sm:$0xf] }
 0x2bc   :  { %v14641_v53 = vpop.f32.mrf.mxu1  ;;  %17151 = vst [vmem:[#allocation35_spill] sm:$0xff] %v14652_v39  ;;  %v12520_v7 = vld [vmem:[#allocation5 + $0xb4] sm:$0xf]  ;;  %v10357_v54 = vld [vmem:[#allocation5 + $0xb8] sm:$0xf0]  ;;  %v14662_v45 = vor.u32 %v12512_v25, %v10325_v43 }
 0x2bd   :  { %5070 = vmatpush.bf16.msrb.mxu2 %v14614_v47  ;;  %5004 = vmatpush.bf16.msrb.mxu1 %v14625_v10  ;;  %v10429_v47 = vld [vmem:[#allocation5 + $0x148] sm:$0xf0]  ;;  %17153 = vst [vmem:[#allocation37_spill] sm:$0xff] %v14657_v32  ;;  %v12536_v14 = vld [vmem:[#allocation5 + $0x134] sm:$0xf]  ;;  %v14670_v26 = vor.u32 %v12520_v7, %v10357_v54 }
 0x2be   :  { %5084 = vmatpush.bf16.msrb.mxu3 %v14621_v31  ;;  %v14650_v31 = vor.u32 %v12563_v8, %v10523_v49  ;;  %v10421_v49 = vld [vmem:[#allocation5 + $0x138] sm:$0xf0]  ;;  %v12558_v8 = vld [vmem:[#allocation5 + $0x1e4] sm:$0xf]  ;;  %v10509_v33 = vld [vmem:[#allocation5 + $0x1e8] sm:$0xf0] }
 0x2bf   :  { %5046 = vmatpush.bf16.msra.mxu0 %v14612_v23  ;;  %v12538_v23 = vld [vmem:[#allocation5 + $0x144] sm:$0xf]  ;;  %17154 = vst [vmem:[#allocation38_spill] sm:$0xff] %v14662_v45  ;;  %v10263_v55 = vld [vmem:[#allocation2 + $0x10] sm:$0xf] }
 0x2c0   :  { %17150 = vst [vmem:[#allocation34_spill] sm:$0xff] %v14650_v31  ;;  %v14655_v6 = vor.u32 %v12538_v23, %v10429_v47  ;;  %v14676_v43 = vor.u32 %v12497_v0, %v10263_v55  ;;  %v12534_v54 = vld [vmem:[#allocation5 + $0x124] sm:$0xf]  ;;  %v10413_v7 = vld [vmem:[#allocation5 + $0x128] sm:$0xf0] }
 0x2c1   :  { %5071 = vmatpush.bf16.msrb.mxu2 %v14638_v60  ;;  %5005 = vmatpush.bf16.msrb.mxu1 %v14646_v22  ;;  %v10249_v60 = vld [vmem:[#allocation2 + $0x38] sm:$0xf0]  ;;  %17155 = vst [vmem:[#allocation39_spill] sm:$0xff] %v14670_v26  ;;  %v12556_v51 = vld [vmem:[#allocation5 + $0x1d4] sm:$0xf] }
 0x2c2   :  { %5085 = vmatpush.bf16.msrb.mxu3 %v14643_v48  ;;  %17152 = vst [vmem:[#allocation36_spill] sm:$0xff] %v14655_v6  ;;  %v12510_v48 = vld [vmem:[#allocation5 + $0x64] sm:$0xf]  ;;  %v10501_v30 = vld [vmem:[#allocation5 + $0x1d8] sm:$0xf0] }
 0x2c3   :  { %5047 = vmatpush.bf16.msra.mxu0 %v14636_v17  ;;  %v14660_v17 = vor.u32 %v12515_v38, %v10331_v16  ;;  %v14666_v23 = vpop.f32.mrf.mxu2  ;;  %v14668_v47 = vpop.f32.mrf.mxu3  ;;  %v10317_v16 = vld [vmem:[#allocation5 + $0x68] sm:$0xf0]  ;;  %17156 = vst [vmem:[#allocation40_spill] sm:$0xff] %v14676_v43  ;;  %v12493_v0 = vld [vmem:[#allocation2 + $0x4] sm:$0xf] }
 0x2c4   :  { %v14672_v38 = vpop.f32.mrf.mxu0  ;;  %v14678_v25 = vpop.f32.mrf.mxu1  ;;  %v14687_v55 = vor.u32 %v12510_v48, %v10317_v16  ;;  %v12532_v48 = vld [vmem:[#allocation5 + $0x114] sm:$0xf]  ;;  %v10405_v16 = vld [vmem:[#allocation5 + $0x118] sm:$0xf0] }
 0x2c5   :  { %5072 = vmatpush.bf16.msrb.mxu2 %v14652_v39  ;;  %v14682_v39 = vor.u32 %v12558_v8, %v10509_v33  ;;  %5006 = vmatpush.bf16.msrb.mxu1 %v14660_v17  ;;  %v12508_v8 = vld [vmem:[#allocation5 + $0x54] sm:$0xf]  ;;  %v10309_v33 = vld [vmem:[#allocation5 + $0x58] sm:$0xf0] }
 0x2c6   :  { %5086 = vmatpush.bf16.msrb.mxu3 %v14655_v6  ;;  %17159 = vst [vmem:[#allocation43_spill] sm:$0xff] %v14687_v55  ;;  %v14696_v6 = vor.u32 %v12534_v54, %v10413_v7  ;;  %v10485_v4 = vld [vmem:[#allocation5 + $0x1b8] sm:$0xf0] }
 0x2c7   :  { %5048 = vmatpush.bf16.msra.mxu0 %v14650_v31  ;;  %v14680_v31 = vor.u32 %v12536_v14, %v10421_v49  ;;  %17158 = vst [vmem:[#allocation42_spill] sm:$0xff] %v14682_v39  ;;  %v14690_v14 = vor.u32 %v12493_v0, %v10249_v60  ;;  %v14692_v49 = vor.u32 %v12518_v15, %v10349_v18  ;;  %v12554_v60 = vld [vmem:[#allocation5 + $0x1c4] sm:$0xf]  ;;  %v10493_v0 = vld [vmem:[#allocation5 + $0x1c8] sm:$0xf0] }
 0x2c8   :  { %17161 = vst [vmem:[#allocation45_spill] sm:$0xff] %v14696_v6  ;;  %v14702_v15 = vor.u32 %v12508_v8, %v10309_v33  ;;  %v12514_v8 = vld [vmem:[#allocation5 + $0x84] sm:$0xf]  ;;  %v10333_v33 = vld [vmem:[#allocation5 + $0x88] sm:$0xf0] }
 0x2c9   :  { %17157 = vst [vmem:[#allocation41_spill] sm:$0xff] %v14680_v31  ;;  %5055 = vmatpush.bf16.msra.mxu1 %v14662_v45  ;;  %5073 = vmatpush.bf16.msrb.mxu2 %v14670_v26  ;;  %v10341_v45 = vld [vmem:[#allocation5 + $0x98] sm:$0xf0]  ;;  %v14713_v26 = vor.u32 %v12554_v60, %v10493_v0  ;;  %v14727_v0 = vor.u32 %v12552_v9, %v10485_v4 }
 0x2ca   :  { %5049 = vmatmul.bf16.vlgmr.msra.gmra.mxu0 %v14676_v43  ;;  %17160 = vst [vmem:[#allocation44_spill] sm:$0xff] %v14692_v49  ;;  %5087 = vmatpush.bf16.msrb.mxu3 %v14680_v31  ;;  %v12516_v43 = vld [vmem:[#allocation5 + $0x94] sm:$0xf] }
 0x2cb   :  { %5097 = vmatpush.bf16.msrb.mxu0 %v14657_v32  ;;  %v14698_v32 = vor.u32 %v12556_v51, %v10501_v30  ;;  %5007 = vmatmul.bf16.vlgmr.msrb.gmra.mxu1 %v14690_v14  ;;  %v3803_v18 = vpop.f32.mrf.mxu2  ;;  %v3817_v31 = vpop.f32.mrf.mxu3  ;;  %v14705_v54 = vor.u32 %v12516_v43, %v10341_v45  ;;  %v12506_v51 = vld [vmem:[#allocation5 + $0x44] sm:$0xf]  ;;  %v10301_v30 = vld [vmem:[#allocation5 + $0x48] sm:$0xf0] }
 0x2cc   :  { %v14709_v7 = vpop.f32.mrf.mxu1  ;;  %v14715_v45 = vpop.f32.mrf.mxu0  ;;  %v14718_v43 = vor.u32 %v12506_v51, %v10301_v30  ;;  %v3636_v30 = vadd.f32 %v14552_v59, %v14452_v20 }
 0x2cd   :  { %17162 = vst [vmem:[#allocation46_spill] sm:$0xff] %v14698_v32  ;;  %5056 = vmatpush.bf16.msra.mxu1 %v14687_v55  ;;  %5074 = vmatpush.bf16.msrb.mxu2 %v14692_v49  ;;  %v12530_v55 = vld [vmem:[#allocation5 + $0x104] sm:$0xf]  ;;  %v10397_v49 = vld [vmem:[#allocation5 + $0x108] sm:$0xf0] }
 0x2ce   :  { %5088 = vmatpush.bf16.msrb.mxu3 %v14696_v6  ;;  %17164 = vst [vmem:[#allocation48_spill] sm:$0xff] %v14715_v45  ;;  %v14721_v6 = vor.u32 %v12514_v8, %v10333_v33  ;;  %v14725_v60 = vor.u32 %v12530_v55, %v10397_v49  ;;  %v10477_v45 = vld [vmem:[#allocation5 + $0x1a8] sm:$0xf0]  ;;  %v3650_v8 = vadd.f32 %v14554_v52, %v14598_v35  ;;  %v12502_v55 = vld [vmem:[#allocation5 + $0x24] sm:$0xf] }
 0x2cf   :  { %5098 = vmatpush.bf16.msrb.mxu0 %v14682_v39  ;;  %v14711_v39 = vor.u32 %v12532_v48, %v10405_v16  ;;  %v12504_v48 = vld [vmem:[#allocation5 + $0x34] sm:$0xf]  ;;  %v10293_v16 = vld [vmem:[#allocation5 + $0x38] sm:$0xf0]  ;;  %v10285_v49 = vld [vmem:[#allocation5 + $0x28] sm:$0xf0] }
 0x2d0   :  { %v14730_v51 = vor.u32 %v12504_v48, %v10293_v16  ;;  %v3765_v48 = vadd.f32 %v14627_v1, %v14632_v12  ;;  %v3722_v20 = vadd.f32 %v14678_v25, %v3650_v8  ;;  %v12548_v52 = vld [vmem:[#allocation5 + $0x194] sm:$0xf]  ;;  %v10469_v35 = vld [vmem:[#allocation5 + $0x198] sm:$0xf0]  ;;  %v14749_v16 = vor.u32 %v12502_v55, %v10285_v49  ;;  %v12546_v8 = vld [vmem:[#allocation5 + $0x184] sm:$0xf] }
 0x2d1   :  { %17163 = vst [vmem:[#allocation47_spill] sm:$0xff] %v14711_v39  ;;  %5057 = vmatpush.bf16.msra.mxu1 %v14702_v15  ;;  %5075 = vmatpush.bf16.msrb.mxu2 %v14705_v54  ;;  %v12500_v12 = vld [vmem:[#allocation5 + $0x14] sm:$0xf] }
 0x2d2   :  { %5089 = vmatpush.bf16.msrb.mxu3 %v14711_v39 }
 0x2d3   :  { %5099 = vmatpush.bf16.msrb.mxu0 %v14698_v32  ;;  %v12550_v32 = vld [vmem:[#allocation5 + $0x1a4] sm:$0xf]  ;;  %v3805_v33 = vpop.f32.mrf.mxu2  ;;  %v3819_v39 = vpop.f32.mrf.mxu3 }
 0x2d4   :  { %v3778_v9 = vpop.f32.mrf.mxu1  ;;  %v14739_v4 = vor.u32 %v12550_v32, %v10477_v45  ;;  %v3721_v32 = vadd.f32 %v14524_v57, %v3636_v30  ;;  %v3822_v45 = vadd.f32 %v3803_v18, %v3765_v48  ;;  %v14753_v25 = vpop.f32.mrf.mxu0  ;;  %v10461_v57 = vld [vmem:[#allocation5 + $0x188] sm:$0xf0]  ;;  %v3652_v18 = vadd.f32 %v14592_v27, %v14641_v53  ;;  %v12576_v48 = vld [vmem:[#allocation5 + $0x274] sm:$0xf]  ;;  %v14780_v27 = vld [vmem:[%s16934_s2] ss:$0 sm:$0xff] }
 0x2d5   :  { %5058 = vmatpush.bf16.msra.mxu1 %v14718_v43  ;;  %5076 = vmatpush.bf16.msrb.mxu2 %v14721_v6  ;;  %v3779_v59 = vadd.f32 %v3778_v9, %v14634_v29  ;;  %v10269_v9 = vld [vmem:[#allocation5 + $0x8] sm:$0xf0] }
 0x2d6   :  { %5090 = vmatpush.bf16.msrb.mxu3 %v14725_v60  ;;  %v3725_v29 = vmax.f32 %v3721_v32, %v3722_v20  ;;  %v10581_v20 = vld [vmem:[#allocation5 + $0x278] sm:$0xf0] }
 0x2d7   :  { %5100 = vmatpush.bf16.msrb.mxu0 %v14713_v26  ;;  %v3823_v1 = vadd.f32 %v3817_v31, %v3779_v59  ;;  %v3724_v59 = vadd.f32 %v14709_v7, %v3652_v18  ;;  %v12568_v18 = vld [vmem:[#allocation5 + $0x234] sm:$0xf] }
 0x2d8   :  { %5077 = vmatmul.bf16.vlgmr.msrb.gmra.mxu2 %v14690_v14 }
 0x2d9   :  { %5159 = vmatpush.bf16.msra.mxu2 %v14415_v21  ;;  %5059 = vmatpush.bf16.msra.mxu1 %v14730_v51  ;;  %v10277_v21 = vld [vmem:[#allocation5 + $0x18] sm:$0xf0]  ;;  %v3826_v14 = vmax.f32 %v3822_v45, %v3823_v1  ;;  %v14790_v45 = vor.u32 %v12576_v48, %v10581_v20  ;;  %v12574_v1 = vld [vmem:[#allocation5 + $0x264] sm:$0xf]  ;;  %v17165_v48 = vld [vmem:[#allocation14_spill] sm:$0xff] }
 0x2da   :  { %5173 = vmatpush.bf16.msra.mxu3 %v14519_v50  ;;  %v14756_v50 = vor.u32 %v12548_v52, %v10469_v35  ;;  %v14763_v31 = vor.u32 %v12500_v12, %v10277_v21  ;;  %v10573_v12 = vld [vmem:[#allocation5 + $0x268] sm:$0xf0] }
 0x2db   :  { %5101 = vmatpush.bf16.msrb.mxu0 %v14727_v0  ;;  %5091 = vmatmul.bf16.vlgmr.msrb.gmra.mxu3 %v14608_v61  ;;  %v3638_v61 = vadd.f32 %v14590_v11, %v14483_v40  ;;  %v3828_v30 = vmax.f32 %v3725_v29, %v3826_v14  ;;  %v14767_v55 = vpop.f32.mrf.mxu2  ;;  %v14769_v49 = vpop.f32.mrf.mxu3  ;;  %v14774_v11 = vor.u32 %v12546_v8, %v10461_v57  ;;  %v10565_v29 = vld [vmem:[#allocation5 + $0x258] sm:$0xf0]  ;;  %v12570_v8 = vld [vmem:[#allocation5 + $0x244] sm:$0xf]  ;;  %v10557_v57 = vld [vmem:[#allocation5 + $0x248] sm:$0xf0] }
 0x2dc   :  { %v3780_v40 = vpop.f32.mrf.mxu1  ;;  %v14805_v21 = vor.u32 %v12574_v1, %v10573_v12  ;;  %v17167_v20 = vld [vmem:[#allocation38_spill] sm:$0xff]  ;;  %v17170_v1 = vld [vmem:[#allocation43_spill] sm:$0xff] }
 0x2dd   :  { %5160 = vmatpush.bf16.msra.mxu2 %v14426_v5  ;;  %5060 = vmatpush.bf16.msra.mxu1 %v14749_v16  ;;  %v12498_v5 = vld [vmem:[#allocation5 + $0x4] sm:$0xf]  ;;  %v3830_v53 = vadd.f32 %v14780_v27, %v3828_v30  ;;  %v10549_v30 = vld [vmem:[#allocation5 + $0x238] sm:$0xf0] }
 0x2de   :  { %5174 = vmatpush.bf16.msra.mxu3 %v14539_v44  ;;  %v3767_v44 = vadd.f32 %v14672_v38, %v14666_v23  ;;  %v3781_v23 = vadd.f32 %v3780_v40, %v14668_v47  ;;  %v3723_v38 = vadd.f32 %v14578_v24, %v3638_v61  ;;  %v14788_v52 = vor.u32 %v12498_v5, %v10269_v9  ;;  %v14795_v24 = vpop.f32.mrf.mxu0  ;;  %v12566_v5 = vld [vmem:[#allocation5 + $0x224] sm:$0xf]  ;;  %v10541_v9 = vld [vmem:[#allocation5 + $0x228] sm:$0xf0]  ;;  %v12578_v40 = vld [vmem:[#allocation2 + $0x8] sm:$0xf] }
 0x2df   :  { %5102 = vmatpush.bf16.msrb.mxu0 %v14739_v4  ;;  %v3832_v35 = vpack.c.bf16 %v3830_v53, %v3830_v53 }
 0x2e0   :  { %v3824_v7 = vadd.f32 %v3805_v33, %v3767_v44  ;;  %v3825_v32 = vadd.f32 %v3819_v39, %v3781_v23  ;;  %v10587_v44 = vld [vmem:[#allocation2 + $0x4] sm:$0xf] }
 0x2e1   :  { %5161 = vmatpush.bf16.msra.mxu2 %v14438_v36  ;;  %5061 = vmatpush.bf16.msra.mxu1 %v14763_v31  ;;  %v3726_v36 = vmax.f32 %v3723_v38, %v3724_v59  ;;  %3834 = vst [vmem:[#allocation2 + $0x2c] sm:$0xf] %v3832_v35  ;;  %v12564_v23 = vld [vmem:[#allocation5 + $0x214] sm:$0xf]  ;;  %v10533_v38 = vld [vmem:[#allocation5 + $0x218] sm:$0xf0] }
 0x2e2   :  { %5175 = vmatpush.bf16.msra.mxu3 %v14558_v37  ;;  %v3827_v37 = vmax.f32 %v3824_v7, %v3825_v32  ;;  %v17168_v35 = vld [vmem:[#allocation17_spill] sm:$0xff]  ;;  %v17169_v32 = vld [vmem:[#allocation16_spill] sm:$0xff]  ;;  %v14859_v12 = vor.u32 %v12564_v23, %v10533_v38 }
 0x2e3   :  { %5103 = vmatpush.bf16.msrb.mxu0 %v14756_v50  ;;  %v14801_v47 = vpop.f32.mrf.mxu2  ;;  %v14803_v33 = vpop.f32.mrf.mxu3  ;;  %v17180_v38 = vld [vmem:[#allocation40_spill] sm:$0xff] }
 0x2e4   :  { %v3829_v39 = vmax.f32 %v3726_v36, %v3827_v37  ;;  %v12562_v36 = vld [vmem:[#allocation5 + $0x204] sm:$0xf]  ;;  %v10525_v37 = vld [vmem:[#allocation5 + $0x208] sm:$0xf0] }
 0x2e5   :  { %5162 = vmatpush.bf16.msra.mxu2 %v14441_v13  ;;  %5062 = vmatpush.bf16.msra.mxu1 %v14788_v52  ;;  %v14807_v13 = vpop.f32.mrf.mxu1 }
 0x2e6   :  { %5176 = vmatpush.bf16.msra.mxu3 %v14581_v56  ;;  %v12572_v56 = vld [vmem:[#allocation5 + $0x254] sm:$0xf]  ;;  %v3831_v14 = vadd.f32 %v14780_v27, %v3829_v39  ;;  %v17171_v39 = vld [vmem:[#allocation20_spill] sm:$0xff] }
 0x2e7   :  { %5104 = vmatpush.bf16.msrb.mxu0 %v14774_v11 }
 0x2e8   :  { %5063 = vmatmul.bf16.vlgmr.msra.gmra.mxu1 %v14512_v3  ;;  %v14825_v3 = vor.u32 %v12570_v8, %v10557_v57  ;;  %v14865_v8 = vor.u32 %v12562_v36, %v10525_v37  ;;  %v12581_v57 = vld [vmem:[#allocation2 + $0x40] sm:$0xf0]  ;;  %v17181_v36 = vld [vmem:[#allocation10_spill] sm:$0xff] }
 0x2e9   :  { %5111 = vmatpush.bf16.msrb.mxu1 %v14790_v45  ;;  %5163 = vmatpush.bf16.msra.mxu2 %v14454_v63 }
 0x2ea   :  { %5105 = vmatmul.bf16.vlgmr.msrb.gmra.mxu0 %v14619_v42  ;;  %5177 = vmatpush.bf16.msra.mxu3 %v14604_v58  ;;  %v14815_v42 = vor.u32 %v12572_v56, %v10565_v29  ;;  %v14827_v58 = vpop.f32.mrf.mxu0  ;;  %v17172_v56 = vld [vmem:[#allocation19_spill] sm:$0xff] }
 0x2eb   :  { %5187 = vmatpush.bf16.msra.mxu0 %v14449_v34  ;;  %v3833_v34 = vpack.c.bf16 %v3831_v14, %v3831_v14  ;;  %v14821_v63 = vpop.f32.mrf.mxu2 }
 0x2ed   :  { %5112 = vmatpush.bf16.msrb.mxu1 %v14805_v21  ;;  %3835 = vst [vmem:[#allocation2 + $0x64] sm:$0xf] %v3833_v34  ;;  %5164 = vmatpush.bf16.msra.mxu2 %v14471_v28  ;;  %v14829_v61 = vpop.f32.mrf.mxu1  ;;  %v12580_v28 = vld [vmem:[#allocation2 + $0x38] sm:$0xf0] }
 0x2ee   :  { %5178 = vmatpush.bf16.msra.mxu3 %v14625_v10  ;;  %v14835_v10 = vor.u32 %v12568_v18, %v10549_v30  ;;  %v17173_v18 = vld [vmem:[#allocation23_spill] sm:$0xff]  ;;  %v17174_v30 = vld [vmem:[#allocation22_spill] sm:$0xff] }
 0x2ef   :  { %5188 = vmatpush.bf16.msra.mxu0 %v14467_v19  ;;  %v14823_v19 = vpop.f32.mrf.mxu3 }
 0x2f1   :  { %5113 = vmatpush.bf16.msrb.mxu1 %v14815_v42  ;;  %5165 = vmatpush.bf16.msra.mxu2 %v14485_v41  ;;  %v17166_v41 = vld [vmem:[#allocation13_spill] sm:$0xff] }
 0x2f2   :  { %5179 = vmatpush.bf16.msra.mxu3 %v14646_v22  ;;  %v14841_v22 = vor.u32 %v12580_v28, %v10587_v44  ;;  %v4078_v7 = vpop.f32.mrf.mxu0  ;;  %v10595_v28 = vld [vmem:[#allocation2 + $0xc] sm:$0xf]  ;;  %v17177_v44 = vld [vmem:[#allocation25_spill] sm:$0xff] }
 0x2f3   :  { %5189 = vmatpush.bf16.msra.mxu0 %v14479_v62  ;;  %v10589_v62 = vld [vmem:[#allocation2 + $0x3c] sm:$0xf0]  ;;  %v14847_v59 = vpop.f32.mrf.mxu2 }
 0x2f5   :  { %5114 = vmatpush.bf16.msrb.mxu1 %v14825_v3  ;;  %5166 = vmatpush.bf16.msra.mxu2 %v14497_v46  ;;  %v14851_v46 = vor.u32 %v12566_v5, %v10541_v9  ;;  %v14871_v5 = vor.u32 %v12581_v57, %v10595_v28  ;;  %v17176_v9 = vld [vmem:[#allocation9_spill] sm:$0xff] }
 0x2f6   :  { %5180 = vmatpush.bf16.msra.mxu3 %v14660_v17  ;;  %v4030_v17 = vpop.f32.mrf.mxu1 }
 0x2f7   :  { %5190 = vmatpush.bf16.msra.mxu0 %v14491_v2  ;;  %v14843_v2 = vor.u32 %v12578_v40, %v10589_v62  ;;  %v14849_v53 = vpop.f32.mrf.mxu3  ;;  %v17175_v62 = vld [vmem:[#allocation26_spill] sm:$0xff]  ;;  %v17178_v40 = vld [vmem:[#allocation48_spill] sm:$0xff] }
 0x2f8   :  { %5167 = vmatmul.bf16.vlgmr.msra.gmra.mxu2 %v14841_v22 }
 0x2f9   :  { %5215 = vmatpush.bf16.msrb.mxu2 %v17166_v41  ;;  %5115 = vmatpush.bf16.msrb.mxu1 %v14835_v10  ;;  %v3964_v41 = vadd.f32 %v14769_v49, %v14807_v13 }
 0x2fa   :  { %5229 = vmatpush.bf16.msrb.mxu3 %v17167_v20 }
 0x2fb   :  { %5191 = vmatpush.bf16.msra.mxu0 %v17165_v48  ;;  %5181 = vmatmul.bf16.vlgmr.msra.gmra.mxu3 %v14843_v2  ;;  %v4117_v29 = vpop.f32.mrf.mxu2  ;;  %v3950_v48 = vadd.f32 %v14767_v55, %v17178_v40  ;;  %v17182_v55 = vld [vmem:[#allocation28_spill] sm:$0xff] }
 0x2fd   :  { %5216 = vmatpush.bf16.msrb.mxu2 %v17169_v32  ;;  %5116 = vmatpush.bf16.msrb.mxu1 %v14851_v46  ;;  %v4079_v32 = vadd.f32 %v4078_v7, %v14821_v63  ;;  %v4035_v49 = vadd.f32 %v14795_v24, %v3950_v48  ;;  %v3952_v63 = vadd.f32 %v14801_v47, %v14753_v25 }
 0x2fe   :  { %5230 = vmatpush.bf16.msrb.mxu3 %v17170_v1  ;;  %v4032_v34 = vpop.f32.mrf.mxu1  ;;  %v4036_v1 = vadd.f32 %v4030_v17, %v3964_v41  ;;  %v3966_v24 = vadd.f32 %v14803_v33, %v14829_v61  ;;  %v10603_v61 = vld [vmem:[#allocation2 + $0x14] sm:$0xf] }
 0x2ff   :  { %5192 = vmatpush.bf16.msra.mxu0 %v17168_v35  ;;  %v4131_v14 = vpop.f32.mrf.mxu3  ;;  %v4136_v13 = vadd.f32 %v4117_v29, %v4079_v32 }
 0x301   :  { %5217 = vmatpush.bf16.msrb.mxu2 %v17172_v56  ;;  %5117 = vmatpush.bf16.msrb.mxu1 %v14859_v12  ;;  %v4039_v56 = vmax.f32 %v4035_v49, %v4036_v1  ;;  %v17194_v1 = vld [vmem:[#allocation18_spill] sm:$0xff]  ;;  %v10597_v49 = vld [vmem:[#allocation2 + $0x44] sm:$0xf0] }
 0x302   :  { %5231 = vmatpush.bf16.msrb.mxu3 %v14702_v15  ;;  %v4080_v15 = vpop.f32.mrf.mxu0 }
 0x303   :  { %5193 = vmatpush.bf16.msra.mxu0 %v17171_v39  ;;  %v4119_v20 = vpop.f32.mrf.mxu2  ;;  %v4081_v28 = vadd.f32 %v4080_v15, %v14847_v59  ;;  %v17189_v59 = vld [vmem:[#allocation39_spill] sm:$0xff]  ;;  %v17190_v15 = vld [vmem:[#allocation37_spill] sm:$0xff] }
 0x305   :  { %5218 = vmatpush.bf16.msrb.mxu2 %v17174_v30  ;;  %5118 = vmatpush.bf16.msrb.mxu1 %v14865_v8  ;;  %v4138_v48 = vadd.f32 %v4119_v20, %v4081_v28 }
 0x306   :  { %5232 = vmatpush.bf16.msrb.mxu3 %v14718_v43  ;;  %v17179_v43 = vld [vmem:[#allocation29_spill] sm:$0xff]  ;;  %v4092_v35 = vpop.f32.mrf.mxu1 }
 0x307   :  { %5194 = vmatpush.bf16.msra.mxu0 %v17173_v18  ;;  %v4133_v23 = vpop.f32.mrf.mxu3  ;;  %v4093_v37 = vadd.f32 %v4092_v35, %v14823_v19  ;;  %v17184_v18 = vld [vmem:[#allocation11_spill] sm:$0xff]  ;;  %v17193_v35 = vld [vmem:[#allocation42_spill] sm:$0xff] }
 0x308   :  { %5119 = vmatmul.bf16.vlgmr.msrb.gmra.mxu1 %v17180_v38  ;;  %v17185_v19 = vld [vmem:[#allocation31_spill] sm:$0xff]  ;;  %v17192_v38 = vld [vmem:[#allocation44_spill] sm:$0xff] }
 0x309   :  { %5201 = vmatpush.bf16.msra.mxu1 %v17176_v9  ;;  %5219 = vmatpush.bf16.msrb.mxu2 %v17177_v44  ;;  %v4137_v39 = vadd.f32 %v4131_v14, %v4093_v37  ;;  %v12582_v14 = vld [vmem:[#allocation2 + $0x48] sm:$0xf0]  ;;  %v17188_v44 = vld [vmem:[#allocation34_spill] sm:$0xff] }
 0x30a   :  { %5195 = vmatmul.bf16.vlgmr.msra.gmra.mxu0 %v14871_v5  ;;  %5233 = vmatpush.bf16.msrb.mxu3 %v14730_v51  ;;  %v17183_v51 = vld [vmem:[#allocation32_spill] sm:$0xff]  ;;  %v14894_v17 = vpop.f32.mrf.mxu0  ;;  %v14911_v40 = vor.u32 %v12582_v14, %v10603_v61  ;;  %v10835_v14 = vld [vmem:[#allocation5 + $0x160] sm:$0xf]  ;;  %v10827_v61 = vld [vmem:[#allocation5 + $0x150] sm:$0xf] }
 0x30b   :  { %5243 = vmatpush.bf16.msrb.mxu0 %v17175_v62  ;;  %v4140_v57 = vmax.f32 %v4136_v13, %v4137_v39  ;;  %v14901_v29 = vpop.f32.mrf.mxu2  ;;  %v4038_v62 = vadd.f32 %v4032_v34, %v3966_v24  ;;  %v17187_v9 = vld [vmem:[#allocation12_spill] sm:$0xff] }
 0x30c   :  { %v17197_v13 = vld [vmem:[#allocation24_spill] sm:$0xff] }
 0x30d   :  { %5202 = vmatpush.bf16.msra.mxu1 %v17181_v36  ;;  %5220 = vmatpush.bf16.msrb.mxu2 %v17182_v55  ;;  %v4142_v7 = vmax.f32 %v4039_v56, %v4140_v57  ;;  %v17196_v55 = vld [vmem:[#allocation21_spill] sm:$0xff] }
 0x30e   :  { %5234 = vmatpush.bf16.msrb.mxu3 %v14749_v16  ;;  %v17186_v16 = vld [vmem:[#allocation35_spill] sm:$0xff]  ;;  %v4094_v30 = vpop.f32.mrf.mxu1  ;;  %v17200_v57 = vld [vmem:[#allocation33_spill] sm:$0xff] }
 0x30f   :  { %5244 = vmatpush.bf16.msrb.mxu0 %v17179_v43  ;;  %v4144_v25 = vadd.f32 %v14780_v27, %v4142_v7  ;;  %v14905_v47 = vpop.f32.mrf.mxu3  ;;  %v4095_v33 = vadd.f32 %v4094_v30, %v14849_v53  ;;  %v17201_v7 = vld [vmem:[#allocation36_spill] sm:$0xff]  ;;  %v12641_v30 = vld [vmem:[#allocation5 + $0x164] sm:$0xf0] }
 0x311   :  { %5203 = vmatpush.bf16.msra.mxu1 %v17184_v18  ;;  %5221 = vmatpush.bf16.msrb.mxu2 %v17185_v19  ;;  %v4146_v41 = vpack.c.bf16 %v4144_v25, %v4144_v25  ;;  %v4139_v34 = vadd.f32 %v4133_v23, %v4095_v33  ;;  %v12627_v18 = vld [vmem:[#allocation5 + $0xf4] sm:$0xf0]  ;;  %v10763_v25 = vld [vmem:[#allocation5 + $0xd0] sm:$0xf] }
 0x312   :  { %5235 = vmatpush.bf16.msrb.mxu3 %v14763_v31  ;;  %v4037_v31 = vadd.f32 %v14827_v58, %v3952_v63  ;;  %v17191_v58 = vld [vmem:[#allocation15_spill] sm:$0xff]  ;;  %v12643_v19 = vld [vmem:[#allocation5 + $0x174] sm:$0xf0] }
 0x313   :  { %5245 = vmatpush.bf16.msrb.mxu0 %v17183_v51  ;;  %4148 = vst [vmem:[#allocation2 + $0x30] sm:$0xf] %v4146_v41  ;;  %v4141_v53 = vmax.f32 %v4138_v48, %v4139_v34  ;;  %v14928_v32 = vpop.f32.mrf.mxu2  ;;  %v10843_v63 = vld [vmem:[#allocation5 + $0x170] sm:$0xf]  ;;  %v12623_v33 = vld [vmem:[#allocation5 + $0xd4] sm:$0xf0] }
 0x314   :  { %v4040_v43 = vmax.f32 %v4037_v31, %v4038_v62  ;;  %v14976_v62 = vor.u32 %v12641_v30, %v10835_v14  ;;  %v12639_v31 = vld [vmem:[#allocation5 + $0x154] sm:$0xf0]  ;;  %v17205_v41 = vld [vmem:[#allocation45_spill] sm:$0xff] }
 0x315   :  { %5204 = vmatpush.bf16.msra.mxu1 %v17187_v9  ;;  %5222 = vmatpush.bf16.msrb.mxu2 %v17188_v44  ;;  %v17203_v9 = vld [vmem:[#allocation41_spill] sm:$0xff] }
 0x316   :  { %5236 = vmatpush.bf16.msrb.mxu3 %v14788_v52  ;;  %v4143_v20 = vmax.f32 %v4040_v43, %v4141_v53  ;;  %v14921_v52 = vpop.f32.mrf.mxu0  ;;  %v14925_v23 = vpop.f32.mrf.mxu1  ;;  %v10755_v44 = vld [vmem:[#allocation5 + $0xc0] sm:$0xf]  ;;  %v4264_v53 = vadd.f32 %v14901_v29, %v14894_v17  ;;  %v17207_v17 = vld [vmem:[#allocation47_spill] sm:$0xff] }
 0x317   :  { %5246 = vmatpush.bf16.msrb.mxu0 %v17186_v16  ;;  %v14931_v37 = vpop.f32.mrf.mxu3  ;;  %v12625_v16 = vld [vmem:[#allocation5 + $0xe4] sm:$0xf0]  ;;  %v10819_v34 = vld [vmem:[#allocation5 + $0x140] sm:$0xf] }
 0x318   :  { %5223 = vmatmul.bf16.vlgmr.msrb.gmra.mxu2 %v14911_v40 }
 0x319   :  { %5271 = vmatpush.bf16.msra.mxu2 %v17190_v15  ;;  %5205 = vmatpush.bf16.msra.mxu1 %v17191_v58  ;;  %v12637_v15 = vld [vmem:[#allocation5 + $0x144] sm:$0xf0]  ;;  %v10715_v58 = vld [vmem:[#allocation5 + $0x70] sm:$0xf] }
 0x31a   :  { %5285 = vmatpush.bf16.msra.mxu3 %v14790_v45  ;;  %v4145_v45 = vadd.f32 %v14780_v27, %v4143_v20  ;;  %v12611_v20 = vld [vmem:[#allocation5 + $0x74] sm:$0xf0] }
 0x31b   :  { %5247 = vmatpush.bf16.msrb.mxu0 %v17189_v59  ;;  %5237 = vmatmul.bf16.vlgmr.msrb.gmra.mxu3 %v14841_v22  ;;  %v17195_v22 = vld [vmem:[#allocation46_spill] sm:$0xff]  ;;  %v14947_v39 = vpop.f32.mrf.mxu2 }
 0x31c   :  { %v4147_v36 = vpack.c.bf16 %v4145_v45, %v4145_v45  ;;  %v12621_v59 = vld [vmem:[#allocation5 + $0xc4] sm:$0xf0] }
 0x31d   :  { %5272 = vmatpush.bf16.msra.mxu2 %v17193_v35  ;;  %5206 = vmatpush.bf16.msra.mxu1 %v17194_v1  ;;  %v14993_v45 = vor.u32 %v12621_v59, %v10755_v44  ;;  %v14995_v1 = vor.u32 %v12637_v15, %v10819_v34  ;;  %v10731_v44 = vld [vmem:[#allocation5 + $0x90] sm:$0xf]  ;;  %v12631_v59 = vld [vmem:[#allocation5 + $0x114] sm:$0xf0] }
 0x31e   :  { %5286 = vmatpush.bf16.msra.mxu3 %v14805_v21  ;;  %4149 = vst [vmem:[#allocation2 + $0x68] sm:$0xf] %v4147_v36  ;;  %v14940_v21 = vpop.f32.mrf.mxu1  ;;  %v14943_v51 = vpop.f32.mrf.mxu0  ;;  %v10747_v36 = vld [vmem:[#allocation5 + $0xb0] sm:$0xf] }
 0x31f   :  { %5248 = vmatpush.bf16.msrb.mxu0 %v17192_v38  ;;  %17206 = vst [vmem:[#allocation38_spill] sm:$0xff] %v14993_v45 }
 0x321   :  { %5273 = vmatpush.bf16.msra.mxu2 %v17195_v22  ;;  %5207 = vmatpush.bf16.msra.mxu1 %v17196_v55 }
 0x322   :  { %5287 = vmatpush.bf16.msra.mxu3 %v14815_v42  ;;  %v12579_v42 = vld [vmem:[#allocation2 + $0x10] sm:$0xf] }
 0x323   :  { %5249 = vmatpush.bf16.msrb.mxu0 %v14705_v54  ;;  %v17198_v54 = vld [vmem:[#allocation27_spill] sm:$0xff]  ;;  %v10600_v56 = vor.u32 %v12579_v42, %v10597_v49  ;;  %v12635_v49 = vld [vmem:[#allocation5 + $0x134] sm:$0xf0] }
 0x325   :  { %5274 = vmatpush.bf16.msra.mxu2 %v14713_v26  ;;  %5208 = vmatpush.bf16.msra.mxu1 %v17197_v13  ;;  %v17199_v26 = vld [vmem:[#allocation30_spill] sm:$0xff]  ;;  %v14999_v13 = vor.u32 %v12611_v20, %v10715_v58  ;;  %v10723_v20 = vld [vmem:[#allocation5 + $0x80] sm:$0xf] }
 0x326   :  { %5288 = vmatpush.bf16.msra.mxu3 %v14825_v3  ;;  %v4344_v3 = vpop.f32.mrf.mxu1  ;;  %v14955_v24 = vpop.f32.mrf.mxu0  ;;  %v12605_v58 = vld [vmem:[#allocation5 + $0x44] sm:$0xf0] }
 0x327   :  { %5250 = vmatpush.bf16.msrb.mxu0 %v14721_v6  ;;  %v4378_v6 = vpop.f32.mrf.mxu3 }
 0x328   :  { %5209 = vmatmul.bf16.vlgmr.msra.gmra.mxu1 %v10600_v56 }
 0x329   :  { %5257 = vmatpush.bf16.msrb.mxu1 %v17198_v54  ;;  %5275 = vmatpush.bf16.msra.mxu2 %v14727_v0  ;;  %v14959_v0 = vpop.f32.mrf.mxu2  ;;  %v4349_v54 = vadd.f32 %v14943_v51, %v4264_v53  ;;  %v12633_v51 = vld [vmem:[#allocation5 + $0x124] sm:$0xf0] }
 0x32a   :  { %5251 = vmatmul.bf16.vlgmr.msrb.gmra.mxu0 %v14843_v2  ;;  %5289 = vmatpush.bf16.msra.mxu3 %v14835_v10  ;;  %v10779_v2 = vld [vmem:[#allocation5 + $0xf0] sm:$0xf] }
 0x32b   :  { %v14961_v10 = vor.u32 %v12627_v18, %v10779_v2  ;;  %v12609_v2 = vld [vmem:[#allocation5 + $0x64] sm:$0xf0] }
 0x32d   :  { %5258 = vmatpush.bf16.msrb.mxu1 %v17199_v26  ;;  %5276 = vmatpush.bf16.msra.mxu2 %v14739_v4  ;;  %v14963_v4 = vor.u32 %v12643_v19, %v10843_v63  ;;  %v10707_v26 = vld [vmem:[#allocation5 + $0x60] sm:$0xf]  ;;  %v12617_v63 = vld [vmem:[#allocation5 + $0xa4] sm:$0xf0] }
 0x32e   :  { %5290 = vmatpush.bf16.msra.mxu3 %v14851_v46  ;;  %v10771_v46 = vld [vmem:[#allocation5 + $0xe0] sm:$0xf]  ;;  %v4392_v48 = vpop.f32.mrf.mxu0 }
 0x32f   :  { %v14966_v28 = vpop.f32.mrf.mxu3  ;;  %v4393_v22 = vadd.f32 %v4392_v48, %v14947_v39  ;;  %v10803_v19 = vld [vmem:[#allocation5 + $0x120] sm:$0xf]  ;;  %v12615_v48 = vld [vmem:[#allocation5 + $0x94] sm:$0xf0] }
 0x331   :  { %5259 = vmatpush.bf16.msrb.mxu1 %v17200_v57  ;;  %5277 = vmatpush.bf16.msra.mxu2 %v14756_v50  ;;  %v14970_v50 = vpop.f32.mrf.mxu1  ;;  %v4431_v43 = vpop.f32.mrf.mxu2 }
 0x332   :  { %5291 = vmatpush.bf16.msra.mxu3 %v14859_v12  ;;  %v14974_v12 = vor.u32 %v12625_v16, %v10771_v46  ;;  %v4450_v42 = vadd.f32 %v4431_v43, %v4393_v22  ;;  %v15010_v46 = vor.u32 %v12609_v2, %v10707_v26  ;;  %v4280_v16 = vadd.f32 %v14931_v37, %v14940_v21 }
 0x334   :  { %17202 = vst [vmem:[#allocation14_spill] sm:$0xff] %v14974_v12 }
 0x335   :  { %5260 = vmatpush.bf16.msrb.mxu1 %v17201_v7  ;;  %5278 = vmatpush.bf16.msra.mxu2 %v14774_v11  ;;  %v14982_v11 = vor.u32 %v12623_v33, %v10763_v25  ;;  %v4266_v7 = vadd.f32 %v14928_v32, %v14921_v52  ;;  %v10699_v25 = vld [vmem:[#allocation5 + $0x50] sm:$0xf]  ;;  %v4352_v32 = vadd.f32 %v14970_v50, %v4280_v16  ;;  %v10691_v50 = vld [vmem:[#allocation5 + $0x40] sm:$0xf] }
 0x336   :  { %5292 = vmatpush.bf16.msra.mxu3 %v14865_v8  ;;  %v14984_v8 = vor.u32 %v12639_v31, %v10827_v61  ;;  %v4394_v14 = vpop.f32.mrf.mxu0  ;;  %v15020_v31 = vor.u32 %v12633_v51, %v10803_v19  ;;  %v10641_v19 = vld [vmem:[#allocation2 + $0x40] sm:$0xf0]  ;;  %v12594_v51 = vld [vmem:[#allocation2 + $0x44] sm:$0xf0] }
 0x337   :  { %17204 = vst [vmem:[#allocation13_spill] sm:$0xff] %v14982_v11  ;;  %v4445_v38 = vpop.f32.mrf.mxu3  ;;  %v4395_v52 = vadd.f32 %v4394_v14, %v14959_v0  ;;  %v4351_v43 = vadd.f32 %v14955_v24, %v4266_v7  ;;  %v12629_v24 = vld [vmem:[#allocation5 + $0x104] sm:$0xf0]  ;;  %v12608_v7 = vld [vmem:[#allocation5 + $0x64] sm:$0xf] }
 0x338   :  { %5279 = vmatmul.bf16.vlgmr.msra.gmra.mxu2 %v10600_v56 }
 0x339   :  { %5919 = vmatpush.bf16.msrb.mxu2 %v14961_v10  ;;  %5261 = vmatpush.bf16.msrb.mxu1 %v17203_v9  ;;  %v4406_v35 = vpop.f32.mrf.mxu1  ;;  %v12607_v9 = vld [vmem:[#allocation5 + $0x54] sm:$0xf0]  ;;  %v4433_v33 = vpop.f32.mrf.mxu2 }
 0x33a   :  { %5933 = vmatpush.bf16.msrb.mxu3 %v14963_v4  ;;  %v4407_v29 = vadd.f32 %v4406_v35, %v4378_v6  ;;  %v10739_v6 = vld [vmem:[#allocation5 + $0xa0] sm:$0xf]  ;;  %v15028_v15 = vor.u32 %v12607_v9, %v10699_v25  ;;  %v4452_v53 = vadd.f32 %v4433_v33, %v4395_v52  ;;  %v12624_v25 = vld [vmem:[#allocation5 + $0xe4] sm:$0xf]  ;;  %v10773_v9 = vld [vmem:[#allocation5 + $0xe8] sm:$0xf0] }
 0x33b   :  { %5293 = vmatmul.bf16.vlgmr.msra.gmra.mxu3 %v14911_v40  ;;  %v4278_v40 = vadd.f32 %v14905_v47, %v14925_v23  ;;  %v12619_v47 = vld [vmem:[#allocation5 + $0xb4] sm:$0xf0]  ;;  %v10811_v23 = vld [vmem:[#allocation5 + $0x130] sm:$0xf]  ;;  %v15018_v61 = vor.u32 %v12617_v63, %v10739_v6  ;;  %v10787_v35 = vld [vmem:[#allocation5 + $0x100] sm:$0xf] }
 0x33c   :  { %v4451_v56 = vadd.f32 %v4445_v38, %v4407_v29  ;;  %v15004_v39 = vor.u32 %v12619_v47, %v10747_v36  ;;  %v12613_v38 = vld [vmem:[#allocation5 + $0x84] sm:$0xf0]  ;;  %v4354_v36 = vmax.f32 %v4351_v43, %v4352_v32  ;;  %v10717_v29 = vld [vmem:[#allocation5 + $0x78] sm:$0xf0]  ;;  %v12626_v47 = vld [vmem:[#allocation5 + $0xf4] sm:$0xf]  ;;  %v15044_v26 = vor.u32 %v12629_v24, %v10787_v35 }
 0x33d   :  { %5920 = vmatpush.bf16.msrb.mxu2 %v14974_v12  ;;  %5262 = vmatpush.bf16.msrb.mxu1 %v17205_v41  ;;  %v4350_v55 = vadd.f32 %v4344_v3, %v4278_v40  ;;  %v15006_v3 = vor.u32 %v12635_v49, %v10811_v23  ;;  %17209 = vst [vmem:[#allocation16_spill] sm:$0xff] %v15018_v61  ;;  %v10795_v41 = vld [vmem:[#allocation5 + $0x110] sm:$0xf]  ;;  %v10781_v23 = vld [vmem:[#allocation5 + $0xf8] sm:$0xf0] }
 0x33e   :  { %5934 = vmatpush.bf16.msrb.mxu3 %v14976_v62  ;;  %17208 = vst [vmem:[#allocation17_spill] sm:$0xff] %v15004_v39  ;;  %v4454_v18 = vmax.f32 %v4450_v42, %v4451_v56  ;;  %v12603_v42 = vld [vmem:[#allocation5 + $0x34] sm:$0xf0]  ;;  %v15042_v56 = vor.u32 %v12613_v38, %v10723_v20  ;;  %v4994_v2 = vpop.f32.mrf.mxu0  ;;  %v15049_v63 = vor.u32 %v12626_v47, %v10781_v23  ;;  %v12601_v52 = vld [vmem:[#allocation5 + $0x24] sm:$0xf0] }
 0x33f   :  { %v4353_v57 = vmax.f32 %v4349_v54, %v4350_v55  ;;  %v4447_v34 = vpop.f32.mrf.mxu3  ;;  %v12610_v55 = vld [vmem:[#allocation5 + $0x74] sm:$0xf]  ;;  %v10683_v54 = vld [vmem:[#allocation5 + $0x30] sm:$0xf]  ;;  %v12599_v38 = vld [vmem:[#allocation5 + $0x14] sm:$0xf0] }
 0x340   :  { %17211 = vst [vmem:[#allocation20_spill] sm:$0xff] %v15042_v56  ;;  %v15052_v14 = vor.u32 %v12603_v42, %v10683_v54  ;;  %v12606_v43 = vld [vmem:[#allocation5 + $0x54] sm:$0xf]  ;;  %v10667_v20 = vld [vmem:[#allocation5 + $0x10] sm:$0xf] }
 0x341   :  { %5921 = vmatpush.bf16.msrb.mxu2 %v14982_v11  ;;  %5263 = vmatpush.bf16.msrb.mxu1 %v17207_v17  ;;  %v4456_v30 = vmax.f32 %v4353_v57, %v4454_v18  ;;  %v15038_v17 = vor.u32 %v12605_v58, %v10691_v50  ;;  %v15047_v18 = vor.u32 %v12610_v55, %v10717_v29  ;;  %v5022_v33 = vpop.f32.mrf.mxu2  ;;  %v12622_v50 = vld [vmem:[#allocation5 + $0xd4] sm:$0xf]  ;;  %v10765_v58 = vld [vmem:[#allocation5 + $0xd8] sm:$0xf0]  ;;  %v10693_v55 = vld [vmem:[#allocation5 + $0x48] sm:$0xf0] }
 0x342   :  { %5935 = vmatpush.bf16.msrb.mxu3 %v14984_v8  ;;  %v15080_v24 = vor.u32 %v12599_v38, %v10667_v20  ;;  %v12620_v29 = vld [vmem:[#allocation5 + $0xc4] sm:$0xf]  ;;  %v10757_v47 = vld [vmem:[#allocation5 + $0xc8] sm:$0xf0]  ;;  %v10659_v23 = vld [vmem:[#allocation5] sm:$0xf] }
 0x343   :  { %v4458_v37 = vadd.f32 %v14780_v27, %v4456_v30  ;;  %17212 = vst [vmem:[#allocation19_spill] sm:$0xff] %v15047_v18  ;;  %v10709_v30 = vld [vmem:[#allocation5 + $0x68] sm:$0xf0]  ;;  %v10971_v54 = vld [vmem:[#allocation5 + $0x270] sm:$0xf] }
 0x344   :  { %v12675_v42 = vld [vmem:[#allocation5 + $0x274] sm:$0xf0] }
 0x345   :  { %5922 = vmatpush.bf16.msrb.mxu2 %v14993_v45  ;;  %5264 = vmatpush.bf16.msrb.mxu1 %v14725_v60  ;;  %v4408_v60 = vpop.f32.mrf.mxu1  ;;  %v4460_v0 = vpack.c.bf16 %v4458_v37, %v4458_v37  ;;  %v10995_v45 = vld [vmem:[#allocation2 + $0x1c] sm:$0xf] }
 0x346   :  { %5936 = vmatpush.bf16.msrb.mxu3 %v14995_v1  ;;  %v4409_v21 = vadd.f32 %v4408_v60, %v14966_v28  ;;  %v15035_v28 = vor.u32 %v12631_v59, %v10795_v41  ;;  %v15062_v59 = vor.u32 %v12608_v7, %v10709_v30  ;;  %v12618_v7 = vld [vmem:[#allocation5 + $0xb4] sm:$0xf]  ;;  %v15091_v30 = vor.u32 %v12675_v42, %v10971_v54  ;;  %v12669_v54 = vld [vmem:[#allocation5 + $0x244] sm:$0xf0] }
 0x347   :  { %4462 = vst [vmem:[#allocation2 + $0x34] sm:$0xf] %v4460_v0 }
 0x348   :  { %5265 = vmatmul.bf16.vlgmr.msrb.gmra.mxu1 %v14871_v5  ;;  %v4453_v40 = vadd.f32 %v4447_v34, %v4409_v21  ;;  %v15033_v5 = vor.u32 %v12615_v48, %v10731_v44  ;;  %v12591_v44 = vld [vmem:[#allocation2 + $0xc] sm:$0xf]  ;;  %v10647_v21 = vld [vmem:[#allocation2 + $0x10] sm:$0xf]  ;;  %v5036_v48 = vpop.f32.mrf.mxu3  ;;  %17213 = vst [vmem:[#allocation23_spill] sm:$0xff] %v15062_v59  ;;  %v15064_v34 = vor.u32 %v12624_v25, %v10773_v9 }
 0x349   :  { %5905 = vmatpush.bf16.msra.mxu1 %v14999_v13  ;;  %5923 = vmatpush.bf16.msrb.mxu2 %v15004_v39  ;;  %v15056_v37 = vor.u32 %v12591_v44, %v10641_v19  ;;  %v15060_v41 = vor.u32 %v12594_v51, %v10647_v21  ;;  %v10685_v51 = vld [vmem:[#allocation5 + $0x38] sm:$0xf0]  ;;  %v10963_v25 = vld [vmem:[#allocation5 + $0x260] sm:$0xf]  ;;  %v12673_v9 = vld [vmem:[#allocation5 + $0x264] sm:$0xf0] }
 0x34a   :  { %5937 = vmatpush.bf16.msrb.mxu3 %v15006_v3  ;;  %17210 = vst [vmem:[#allocation43_spill] sm:$0xff] %v15033_v5  ;;  %v4455_v22 = vmax.f32 %v4452_v53, %v4453_v40  ;;  %v10701_v40 = vld [vmem:[#allocation5 + $0x58] sm:$0xf0]  ;;  %v12593_v44 = vld [vmem:[#allocation2 + $0x3c] sm:$0xf0] }
 0x34b   :  { %v15075_v35 = vor.u32 %v12606_v43, %v10701_v40  ;;  %v10741_v21 = vld [vmem:[#allocation5 + $0xa8] sm:$0xf0]  ;;  %v15101_v43 = vor.u32 %v12673_v9, %v10963_v25 }
 0x34c   :  { %v4457_v49 = vmax.f32 %v4354_v36, %v4455_v22  ;;  %v15077_v36 = vor.u32 %v12622_v50, %v10765_v58  ;;  %v12604_v22 = vld [vmem:[#allocation5 + $0x44] sm:$0xf]  ;;  %v10955_v50 = vld [vmem:[#allocation5 + $0x250] sm:$0xf]  ;;  %v12671_v58 = vld [vmem:[#allocation5 + $0x254] sm:$0xf0] }
 0x34d   :  { %5906 = vmatpush.bf16.msra.mxu1 %v15010_v46  ;;  %5924 = vmatpush.bf16.msrb.mxu2 %v15018_v61  ;;  %v5008_v57 = vpop.f32.mrf.mxu1  ;;  %17214 = vst [vmem:[#allocation22_spill] sm:$0xff] %v15075_v35  ;;  %v10725_v25 = vld [vmem:[#allocation5 + $0x88] sm:$0xf0] }
 0x34e   :  { %5938 = vmatpush.bf16.msrb.mxu3 %v15020_v31  ;;  %v4459_v6 = vadd.f32 %v14780_v27, %v4457_v49  ;;  %v5009_v16 = vadd.f32 %v5008_v57, %v4994_v2  ;;  %v10675_v27 = vld [vmem:[#allocation5 + $0x20] sm:$0xf]  ;;  %v12597_v49 = vld [vmem:[#allocation5 + $0x4] sm:$0xf0]  ;;  %v15084_v2 = vor.u32 %v12604_v22, %v10693_v55  ;;  %v12602_v57 = vld [vmem:[#allocation5 + $0x34] sm:$0xf] }
 0x34f   :  { %v15069_v0 = vor.u32 %v12601_v52, %v10675_v27  ;;  %v15089_v19 = vor.u32 %v12597_v49, %v10659_v23  ;;  %v12600_v27 = vld [vmem:[#allocation5 + $0x24] sm:$0xf]  ;;  %v10677_v52 = vld [vmem:[#allocation5 + $0x28] sm:$0xf0]  ;;  %v12598_v22 = vld [vmem:[#allocation5 + $0x14] sm:$0xf]  ;;  %v15110_v23 = vor.u32 %v12671_v58, %v10955_v50 }
 0x350   :  { %v4461_v60 = vpack.c.bf16 %v4459_v6, %v4459_v6  ;;  %v5023_v32 = vadd.f32 %v5022_v33, %v5009_v16  ;;  %17215 = vst [vmem:[#allocation26_spill] sm:$0xff] %v15084_v2  ;;  %v15086_v6 = vor.u32 %v12620_v29, %v10757_v47  ;;  %v10749_v16 = vld [vmem:[#allocation5 + $0xb8] sm:$0xf0]  ;;  %v15095_v33 = vor.u32 %v12602_v57, %v10685_v51  ;;  %v12614_v29 = vld [vmem:[#allocation5 + $0x94] sm:$0xf] }
 0x351   :  { %5907 = vmatpush.bf16.msra.mxu1 %v15028_v15  ;;  %5925 = vmatpush.bf16.msrb.mxu2 %v15033_v5  ;;  %v15105_v20 = vor.u32 %v12600_v27, %v10677_v52  ;;  %v10669_v55 = vld [vmem:[#allocation5 + $0x18] sm:$0xf0]  ;;  %v10947_v49 = vld [vmem:[#allocation5 + $0x240] sm:$0xf]  ;;  %v12596_v51 = vld [vmem:[#allocation5 + $0x4] sm:$0xf] }
 0x352   :  { %5939 = vmatpush.bf16.msrb.mxu3 %v15035_v28  ;;  %4463 = vst [vmem:[#allocation2 + $0x6c] sm:$0xf] %v4461_v60  ;;  %v15066_v53 = vadd.f32 %v5036_v48, %v5023_v32  ;;  %v15097_v60 = vor.u32 %v12618_v7, %v10749_v16  ;;  %v12616_v32 = vld [vmem:[#allocation5 + $0xa4] sm:$0xf]  ;;  %v10639_v48 = vld [vmem:[#allocation2 + $0x8] sm:$0xf]  ;;  %v15114_v42 = vor.u32 %v12598_v22, %v10669_v55 }
 0x353   :  { %17216 = vst [vmem:[#allocation9_spill] sm:$0xff] %v15095_v33  ;;  %v10640_v40 = vor.u32 %v12593_v44, %v10639_v48  ;;  %v15107_v38 = vor.u32 %v12616_v32, %v10741_v21  ;;  %v10733_v47 = vld [vmem:[#allocation5 + $0x98] sm:$0xf0]  ;;  %v10661_v7 = vld [vmem:[#allocation5 + $0x8] sm:$0xf0]  ;;  %v15119_v9 = vor.u32 %v12669_v54, %v10947_v49 }
 0x354   :  { %17217 = vst [vmem:[#allocation25_spill] sm:$0xff] %v15105_v20  ;;  %v15116_v57 = vor.u32 %v12614_v29, %v10733_v47  ;;  %v12612_v16 = vld [vmem:[#allocation5 + $0x84] sm:$0xf]  ;;  %v12674_v44 = vld [vmem:[#allocation5 + $0x274] sm:$0xf]  ;;  %v15123_v21 = vor.u32 %v12596_v51, %v10661_v7 }
 0x355   :  { %5908 = vmatpush.bf16.msra.mxu1 %v15038_v17  ;;  %5926 = vmatpush.bf16.msrb.mxu2 %v15042_v56  ;;  %17218 = vst [vmem:[#allocation48_spill] sm:$0xff] %v15114_v42  ;;  %v10973_v27 = vld [vmem:[#allocation5 + $0x278] sm:$0xf0]  ;;  %v10939_v52 = vld [vmem:[#allocation5 + $0x230] sm:$0xf]  ;;  %v15125_v48 = vor.u32 %v12612_v16, %v10725_v25 }
 0x356   :  { %5940 = vmatpush.bf16.msrb.mxu3 %v15044_v26  ;;  %v12667_v32 = vld [vmem:[#allocation5 + $0x234] sm:$0xf0]  ;;  %17219 = vst [vmem:[#allocation29_spill] sm:$0xff] %v15123_v21  ;;  %v15127_v50 = vor.u32 %v12674_v44, %v10973_v27  ;;  %v12672_v22 = vld [vmem:[#allocation5 + $0x264] sm:$0xf]  ;;  %v12583_v56 = vld [vmem:[%s16937_s5] sm:$0xff] }
 0x357   :  { %v15130_v58 = vor.u32 %v12667_v32, %v10939_v52  ;;  %v10965_v55 = vld [vmem:[#allocation5 + $0x268] sm:$0xf0]  ;;  %v10931_v29 = vld [vmem:[#allocation5 + $0x220] sm:$0xf]  ;;  %v12665_v47 = vld [vmem:[#allocation5 + $0x224] sm:$0xf0] }
 0x358   :  { %5927 = vmatmul.bf16.vlgmr.msrb.gmra.mxu2 %v15056_v37  ;;  %17220 = vst [vmem:[#allocation40_spill] sm:$0xff] %v15127_v50  ;;  %v15136_v49 = vor.u32 %v12672_v22, %v10965_v55  ;;  %v15139_v54 = vor.u32 %v12665_v47, %v10931_v29  ;;  %v12670_v51 = vld [vmem:[#allocation5 + $0x254] sm:$0xf]  ;;  %v10957_v7 = vld [vmem:[#allocation5 + $0x258] sm:$0xf0] }
 0x359   :  { %5975 = vmatpush.bf16.msra.mxu2 %v15047_v18  ;;  %5909 = vmatpush.bf16.msra.mxu1 %v15052_v14  ;;  %v10923_v16 = vld [vmem:[#allocation5 + $0x210] sm:$0xf]  ;;  %v12663_v25 = vld [vmem:[#allocation5 + $0x214] sm:$0xf0]  ;;  %v15144_v44 = vor.u32 %v12670_v51, %v10957_v7  ;;  %v12668_v27 = vld [vmem:[#allocation5 + $0x244] sm:$0xf] }
 0x35a   :  { %5989 = vmatpush.bf16.msra.mxu3 %v15049_v63  ;;  %17221 = vst [vmem:[#allocation10_spill] sm:$0xff] %v15136_v49  ;;  %v10949_v52 = vld [vmem:[#allocation5 + $0x248] sm:$0xf0]  ;;  %v10915_v32 = vld [vmem:[#allocation5 + $0x200] sm:$0xf] }
 0x35b   :  { %5941 = vmatmul.bf16.vlgmr.msrb.gmra.mxu3 %v15060_v41  ;;  %17222 = vst [vmem:[#allocation28_spill] sm:$0xff] %v15144_v44  ;;  %v12661_v22 = vld [vmem:[#allocation5 + $0x204] sm:$0xf0]  ;;  %v12658_v55 = vld [vmem:[#allocation5 + $0x1f4] sm:$0xf] }
 0x35c   :  { %v12666_v29 = vld [vmem:[#allocation5 + $0x234] sm:$0xf]  ;;  %v10941_v47 = vld [vmem:[#allocation5 + $0x238] sm:$0xf0]  ;;  %v12656_v7 = vld [vmem:[#allocation5 + $0x1e4] sm:$0xf] }
 0x35d   :  { %5976 = vmatpush.bf16.msra.mxu2 %v15062_v59  ;;  %5910 = vmatpush.bf16.msra.mxu1 %v15069_v0  ;;  %v10837_v39 = vld [vmem:[#allocation5 + $0x168] sm:$0xf0] }
 0x35e   :  { %5990 = vmatpush.bf16.msra.mxu3 %v15064_v34 }
 0x361   :  { %5977 = vmatpush.bf16.msra.mxu2 %v15075_v35  ;;  %5911 = vmatpush.bf16.msra.mxu1 %v15080_v24  ;;  %v12585_v35 = vld [vmem:[%s16937_s5 + $0x10] sm:$0xff] }
 0x362   :  { %5991 = vmatpush.bf16.msra.mxu3 %v15077_v36 }
 0x365   :  { %5978 = vmatpush.bf16.msra.mxu2 %v15084_v2  ;;  %5912 = vmatpush.bf16.msra.mxu1 %v15089_v19  ;;  %v12648_v2 = vld [vmem:[#allocation5 + $0x1a4] sm:$0xf] }
 0x366   :  { %5992 = vmatpush.bf16.msra.mxu3 %v15086_v6 }
 0x368   :  { %5913 = vmatmul.bf16.vlgmr.msra.gmra.mxu1 %v10640_v40 }
 0x369   :  { %5961 = vmatpush.bf16.msrb.mxu1 %v15091_v30  ;;  %5979 = vmatpush.bf16.msra.mxu2 %v15095_v33  ;;  %v12657_v33 = vld [vmem:[#allocation5 + $0x1e4] sm:$0xf0] }
 0x36a   :  { %5993 = vmatpush.bf16.msra.mxu3 %v15097_v60 }
 0x36d   :  { %5962 = vmatpush.bf16.msrb.mxu1 %v15101_v43  ;;  %5980 = vmatpush.bf16.msra.mxu2 %v15105_v20  ;;  %v10899_v20 = vld [vmem:[#allocation5 + $0x1e0] sm:$0xf] }
 0x36e   :  { %5994 = vmatpush.bf16.msra.mxu3 %v15107_v38 }
 0x371   :  { %5963 = vmatpush.bf16.msrb.mxu1 %v15110_v23  ;;  %5981 = vmatpush.bf16.msra.mxu2 %v15114_v42 }
 0x372   :  { %5995 = vmatpush.bf16.msra.mxu3 %v15116_v57 }
 0x375   :  { %5964 = vmatpush.bf16.msrb.mxu1 %v15119_v9  ;;  %5982 = vmatpush.bf16.msra.mxu2 %v15123_v21 }
 0x376   :  { %5996 = vmatpush.bf16.msra.mxu3 %v15125_v48 }
 0x378   :  { %5983 = vmatmul.bf16.vlgmr.msra.gmra.mxu2 %v10640_v40  ;;  %v10909_v40 = vld [vmem:[#allocation5 + $0x1f8] sm:$0xf0] }
 0x379   :  { %6031 = vmatpush.bf16.msrb.mxu2 %v15127_v50  ;;  %5965 = vmatpush.bf16.msrb.mxu1 %v15130_v58  ;;  %v15156_v51 = vor.u32 %v12658_v55, %v10909_v40  ;;  %v12654_v40 = vld [vmem:[#allocation5 + $0x1d4] sm:$0xf]  ;;  %v15187_v50 = vpop.f32.mrf.mxu1 }
 0x37a   :  { %6079 = vmatpush.bf16.msrb.mxu3 %v14999_v13  ;;  %v15147_v13 = vor.u32 %v12663_v25, %v10923_v16  ;;  %v10901_v16 = vld [vmem:[#allocation5 + $0x1e8] sm:$0xf0]  ;;  %v15160_v25 = vor.u32 %v12666_v29, %v10941_v47  ;;  %v12662_v47 = vld [vmem:[#allocation5 + $0x214] sm:$0xf] }
 0x37b   :  { %5997 = vmatmul.bf16.vlgmr.msra.gmra.mxu3 %v15056_v37  ;;  %v15151_v37 = vor.u32 %v12668_v27, %v10949_v52  ;;  %v10933_v27 = vld [vmem:[#allocation5 + $0x228] sm:$0xf0]  ;;  %v10655_v52 = vld [vmem:[#allocation2 + $0x18] sm:$0xf] }
 0x37c   :  { %17224 = vst [vmem:[#allocation11_spill] sm:$0xff] %v15160_v25  ;;  %v12590_v29 = vld [vmem:[%s16937_s5 + $0x38] sm:$0xff] }
 0x37d   :  { %6032 = vmatpush.bf16.msrb.mxu2 %v15136_v49  ;;  %5966 = vmatpush.bf16.msrb.mxu1 %v15139_v54  ;;  %17223 = vst [vmem:[#allocation32_spill] sm:$0xff] %v15151_v37  ;;  %v10893_v49 = vld [vmem:[#allocation5 + $0x1d8] sm:$0xf0] }
 0x37e   :  { %6080 = vmatpush.bf16.msrb.mxu3 %v15010_v46  ;;  %v15154_v46 = vor.u32 %v12661_v22, %v10915_v32  ;;  %v15164_v32 = vor.u32 %v12656_v7, %v10901_v16  ;;  %v15166_v22 = vpop.f32.mrf.mxu0  ;;  %v15176_v7 = vor.u32 %v12654_v40, %v10893_v49  ;;  %5375 = vmatpush.bf16.msra.mxu0 %v12590_v29  ;;  %v10885_v16 = vld [vmem:[#allocation5 + $0x1c8] sm:$0xf0]  ;;  %v10907_v40 = vld [vmem:[#allocation5 + $0x1f0] sm:$0xf]  ;;  %v12659_v29 = vld [vmem:[#allocation5 + $0x1f4] sm:$0xf0] }
 0x381   :  { %6033 = vmatpush.bf16.msrb.mxu2 %v15144_v44  ;;  %5967 = vmatpush.bf16.msrb.mxu1 %v15147_v13  ;;  %v12595_v44 = vld [vmem:[#allocation2 + $0x4c] sm:$0xf0] }
 0x382   :  { %6081 = vmatpush.bf16.msrb.mxu3 %v15028_v15  ;;  %v12664_v15 = vld [vmem:[#allocation5 + $0x224] sm:$0xf]  ;;  %v10656_v55 = vor.u32 %v12595_v44, %v10655_v52  ;;  %v10917_v52 = vld [vmem:[#allocation5 + $0x208] sm:$0xf0] }
 0x383   :  { %v12652_v44 = vld [vmem:[#allocation5 + $0x1c4] sm:$0xf] }
 0x384   :  { %v15190_v49 = vor.u32 %v12652_v44, %v10885_v16  ;;  %v12588_v44 = vld [vmem:[%s16937_s5 + $0x28] sm:$0xff]  ;;  %v15203_v16 = vor.u32 %v12659_v29, %v10907_v40  ;;  %v15217_v40 = vor.u32 %v12657_v33, %v10899_v20  ;;  %v12586_v33 = vld [vmem:[%s16937_s5 + $0x18] sm:$0xff] }
 0x385   :  { %6034 = vmatpush.bf16.msrb.mxu2 %v15151_v37  ;;  %5968 = vmatpush.bf16.msrb.mxu1 %v15154_v46  ;;  %v10925_v37 = vld [vmem:[#allocation5 + $0x218] sm:$0xf0] }
 0x386   :  { %6082 = vmatpush.bf16.msrb.mxu3 %v15038_v17  ;;  %v15170_v17 = vor.u32 %v12664_v15, %v10933_v27  ;;  %v12589_v15 = vld [vmem:[%s16937_s5 + $0x30] sm:$0xff] }
 0x387   :  { %v12660_v27 = vld [vmem:[#allocation5 + $0x204] sm:$0xf]  ;;  %5376 = vmatpush.bf16.msra.mxu0 %v12589_v15  ;;  %v12678_v15 = vld [vmem:[#allocation2 + $0x40] sm:$0xf0] }
 0x388   :  { %17225 = vst [vmem:[#allocation31_spill] sm:$0xff] %v15170_v17  ;;  %5969 = vmatmul.bf16.vlgmr.msrb.gmra.mxu1 %v10656_v55  ;;  %v15198_v21 = vor.u32 %v12660_v27, %v10917_v52  ;;  %v12587_v27 = vld [vmem:[%s16937_s5 + $0x20] sm:$0xff] }
 0x389   :  { %6017 = vmatpush.bf16.msra.mxu1 %v15156_v51  ;;  %6035 = vmatpush.bf16.msrb.mxu2 %v15160_v25  ;;  %v15185_v25 = vpop.f32.mrf.mxu2 }
 0x38a   :  { %6083 = vmatpush.bf16.msrb.mxu3 %v15052_v14  ;;  %v15180_v14 = vor.u32 %v12662_v47, %v10925_v37  ;;  %v12650_v37 = vld [vmem:[#allocation5 + $0x1b4] sm:$0xf]  ;;  %v10877_v47 = vld [vmem:[#allocation5 + $0x1b8] sm:$0xf0]  ;;  %17227 = vst [vmem:[#allocation12_spill] sm:$0xff] %v15198_v21 }
 0x38b   :  { %v15206_v42 = vor.u32 %v12650_v37, %v10877_v47  ;;  %5377 = vmatpush.bf16.msra.mxu0 %v12588_v44  ;;  %v15221_v37 = vpop.f32.mrf.mxu1  ;;  %v10891_v47 = vld [vmem:[#allocation5 + $0x1d0] sm:$0xf]  ;;  %v12655_v44 = vld [vmem:[#allocation5 + $0x1d4] sm:$0xf0] }
 0x38c   :  { %17226 = vst [vmem:[#allocation35_spill] sm:$0xff] %v15180_v14 }
 0x38d   :  { %6018 = vmatpush.bf16.msra.mxu1 %v15164_v32  ;;  %6036 = vmatpush.bf16.msrb.mxu2 %v15170_v17  ;;  %v15194_v17 = vpop.f32.mrf.mxu3 }
 0x38e   :  { %6084 = vmatpush.bf16.msrb.mxu3 %v15069_v0  ;;  %v15192_v0 = vpop.f32.mrf.mxu0 }
 0x38f   :  { %5378 = vmatpush.bf16.msra.mxu0 %v12587_v27  ;;  %v12644_v27 = vld [vmem:[#allocation5 + $0x184] sm:$0xf] }
 0x391   :  { %6019 = vmatpush.bf16.msra.mxu1 %v15176_v7  ;;  %6037 = vmatpush.bf16.msrb.mxu2 %v15180_v14  ;;  %v10869_v14 = vld [vmem:[#allocation5 + $0x1a8] sm:$0xf0]  ;;  %v15219_v29 = vpop.f32.mrf.mxu2 }
 0x392   :  { %6085 = vmatpush.bf16.msrb.mxu3 %v15080_v24  ;;  %v10979_v24 = vld [vmem:[#allocation2 + $0xc] sm:$0xf] }
 0x393   :  { %v15215_v52 = vor.u32 %v12678_v15, %v10979_v24  ;;  %v12653_v24 = vld [vmem:[#allocation5 + $0x1c4] sm:$0xf0]  ;;  %5379 = vmatpush.bf16.msra.mxu0 %v12586_v33  ;;  %v15256_v59 = vpop.f32.mrf.mxu1 }
 0x395   :  { %6020 = vmatpush.bf16.msra.mxu1 %v15190_v49  ;;  %6038 = vmatpush.bf16.msrb.mxu2 %v15198_v21  ;;  %17228 = vst [vmem:[#allocation34_spill] sm:$0xff] %v15215_v52  ;;  %v12646_v21 = vld [vmem:[#allocation5 + $0x194] sm:$0xf]  ;;  %v15227_v15 = vpop.f32.mrf.mxu3 }
 0x396   :  { %6086 = vmatpush.bf16.msrb.mxu3 %v15089_v19  ;;  %v15224_v19 = vor.u32 %v12648_v2, %v10869_v14  ;;  %v15232_v20 = vpop.f32.mrf.mxu0  ;;  %v15236_v2 = vor.u32 %v12655_v44, %v10891_v47  ;;  %v10883_v14 = vld [vmem:[#allocation5 + $0x1c0] sm:$0xf]  ;;  %v12651_v44 = vld [vmem:[#allocation5 + $0x1b4] sm:$0xf0] }
 0x397   :  { %5380 = vmatpush.bf16.msra.mxu0 %v12585_v35  ;;  %v10867_v35 = vld [vmem:[#allocation5 + $0x1a0] sm:$0xf] }
 0x398   :  { %6039 = vmatmul.bf16.vlgmr.msrb.gmra.mxu2 %v10656_v55 }
 0x399   :  { %6121 = vmatpush.bf16.msra.mxu2 %v15203_v16  ;;  %6021 = vmatpush.bf16.msra.mxu1 %v15206_v42  ;;  %v15254_v33 = vpop.f32.mrf.mxu2 }
 0x39a   :  { %6135 = vmatpush.bf16.msra.mxu3 %v15091_v30  ;;  %v10861_v30 = vld [vmem:[#allocation5 + $0x198] sm:$0xf0] }
 0x39b   :  { %6087 = vmatmul.bf16.vlgmr.msrb.gmra.mxu3 %v15215_v52  ;;  %v15239_v55 = vor.u32 %v12646_v21, %v10861_v30  ;;  %v10853_v52 = vld [vmem:[#allocation5 + $0x188] sm:$0xf0]  ;;  %v10875_v21 = vld [vmem:[#allocation5 + $0x1b0] sm:$0xf]  ;;  %v12584_v30 = vld [vmem:[%s16937_s5 + $0x8] sm:$0xff] }
 0x39c   :  { %v15249_v47 = vor.u32 %v12644_v27, %v10853_v52  ;;  %v10649_v52 = vld [vmem:[#allocation2 + $0x48] sm:$0xf0]  ;;  %5381 = vmatpush.bf16.msra.mxu0 %v12584_v30  ;;  %v12592_v27 = vld [vmem:[#allocation2 + $0x14] sm:$0xf]  ;;  %v15282_v30 = vpop.f32.mrf.mxu1 }
 0x39d   :  { %6122 = vmatpush.bf16.msra.mxu2 %v15217_v40  ;;  %6022 = vmatpush.bf16.msra.mxu1 %v15224_v19  ;;  %v15271_v5 = vor.u32 %v12592_v27, %v10649_v52 }
 0x39e   :  { %6136 = vmatpush.bf16.msra.mxu3 %v15101_v43  ;;  %v15246_v43 = vor.u32 %v12653_v24, %v10883_v14  ;;  %v15258_v18 = vpop.f32.mrf.mxu0  ;;  %v15264_v14 = vpop.f32.mrf.mxu3  ;;  %v12649_v24 = vld [vmem:[#allocation5 + $0x1a4] sm:$0xf0] }
 0x3a0   :  { %5382 = vmatpush.bf16.msra.mxu0 %v12583_v56  ;;  %v10845_v56 = vld [vmem:[#allocation5 + $0x178] sm:$0xf0] }
 0x3a1   :  { %6123 = vmatpush.bf16.msra.mxu2 %v15236_v2  ;;  %6023 = vmatpush.bf16.msra.mxu1 %v15239_v55 }
 0x3a2   :  { %6137 = vmatpush.bf16.msra.mxu3 %v15110_v23  ;;  %v15262_v23 = vor.u32 %v12651_v44, %v10875_v21  ;;  %v10859_v21 = vld [vmem:[#allocation5 + $0x190] sm:$0xf]  ;;  %v12647_v44 = vld [vmem:[#allocation5 + $0x194] sm:$0xf0] }
 0x3a4   :  { %5947 = vmatpush.bf16.msrb.mxu0 %v15203_v16  ;;  %v15300_v11 = vpop.f32.mrf.mxu1 }
 0x3a5   :  { %6124 = vmatpush.bf16.msra.mxu2 %v15246_v43  ;;  %6024 = vmatpush.bf16.msra.mxu1 %v15249_v47 }
 0x3a6   :  { %6138 = vmatpush.bf16.msra.mxu3 %v15119_v9  ;;  %v15275_v9 = vor.u32 %v12649_v24, %v10867_v35  ;;  %v15286_v52 = vpop.f32.mrf.mxu3  ;;  %v10851_v35 = vld [vmem:[#allocation5 + $0x180] sm:$0xf]  ;;  %v12645_v24 = vld [vmem:[#allocation5 + $0x184] sm:$0xf0]  ;;  %v15288_v27 = vpop.f32.mrf.mxu0 }
 0x3a7   :  { %v10852_v16 = vor.u32 %v12645_v24, %v10851_v35  ;;  %v10829_v24 = vld [vmem:[#allocation5 + $0x158] sm:$0xf0] }
 0x3a8   :  { %6025 = vmatmul.bf16.vlgmr.msra.gmra.mxu1 %v15271_v5  ;;  %5948 = vmatpush.bf16.msrb.mxu0 %v15217_v40 }
 0x3a9   :  { %6107 = vmatpush.bf16.msrb.mxu1 %v14963_v4  ;;  %6125 = vmatpush.bf16.msra.mxu2 %v15262_v23  ;;  %v15280_v4 = vpop.f32.mrf.mxu2 }
 0x3aa   :  { %6139 = vmatpush.bf16.msra.mxu3 %v15130_v58  ;;  %v10860_v58 = vor.u32 %v12647_v44, %v10859_v21  ;;  %v12680_v21 = vld [vmem:[#allocation2 + $0x50] sm:$0xf0] }
 0x3ab   :  { %v12640_v44 = vld [vmem:[#allocation5 + $0x164] sm:$0xf] }
 0x3ac   :  { %5949 = vmatpush.bf16.msrb.mxu0 %v15236_v2  ;;  %v15308_v35 = vor.u32 %v12640_v44, %v10837_v39  ;;  %v12636_v39 = vld [vmem:[#allocation5 + $0x144] sm:$0xf]  ;;  %v12679_v44 = vld [vmem:[#allocation2 + $0x48] sm:$0xf0] }
 0x3ad   :  { %6108 = vmatpush.bf16.msrb.mxu1 %v14976_v62  ;;  %6126 = vmatpush.bf16.msra.mxu2 %v15275_v9  ;;  %v12642_v62 = vld [vmem:[#allocation5 + $0x174] sm:$0xf] }
 0x3ae   :  { %6140 = vmatpush.bf16.msra.mxu3 %v15139_v54  ;;  %v15293_v61 = vor.u32 %v12642_v62, %v10845_v56  ;;  %v10989_v54 = vld [vmem:[#allocation2 + $0x4c] sm:$0xf0]  ;;  %v15310_v2 = vpop.f32.mrf.mxu0  ;;  %v15314_v62 = vpop.f32.mrf.mxu3 }
 0x3b0   :  { %5950 = vmatpush.bf16.msrb.mxu0 %v15246_v43  ;;  %v15326_v43 = vpop.f32.mrf.mxu1 }
 0x3b1   :  { %6109 = vmatpush.bf16.msrb.mxu1 %v14984_v8  ;;  %6127 = vmatpush.bf16.msra.mxu2 %v10860_v58  ;;  %v12677_v8 = vld [vmem:[#allocation2 + $0x18] sm:$0xf]  ;;  %v15298_v40 = vpop.f32.mrf.mxu2 }
 0x3b2   :  { %6141 = vmatpush.bf16.msra.mxu3 %v15147_v13  ;;  %v15304_v13 = vor.u32 %v12677_v8, %v10989_v54  ;;  %v10813_v54 = vld [vmem:[#allocation5 + $0x138] sm:$0xf0]  ;;  %v10805_v8 = vld [vmem:[#allocation5 + $0x128] sm:$0xf0] }
 0x3b4   :  { %5951 = vmatpush.bf16.msrb.mxu0 %v15262_v23 }
 0x3b5   :  { %6110 = vmatpush.bf16.msrb.mxu1 %v14995_v1  ;;  %6128 = vmatpush.bf16.msra.mxu2 %v10852_v16  ;;  %v15306_v1 = vor.u32 %v12680_v21, %v10995_v45 }
 0x3b6   :  { %6142 = vmatpush.bf16.msra.mxu3 %v15154_v46  ;;  %v12638_v46 = vld [vmem:[#allocation5 + $0x154] sm:$0xf]  ;;  %v15334_v21 = vpop.f32.mrf.mxu0 }
 0x3b7   :  { %17229 = vst [vmem:[#allocation39_spill] sm:$0xff] %v15306_v1  ;;  %v15320_v45 = vor.u32 %v12638_v46, %v10829_v24  ;;  %v10797_v24 = vld [vmem:[#allocation5 + $0x118] sm:$0xf0] }
 0x3b8   :  { %6129 = vmatmul.bf16.vlgmr.msra.gmra.mxu2 %v15304_v13  ;;  %5952 = vmatpush.bf16.msrb.mxu0 %v15275_v9 }
 0x3b9   :  { %6177 = vmatpush.bf16.msrb.mxu2 %v15293_v61  ;;  %6111 = vmatpush.bf16.msrb.mxu1 %v15006_v3  ;;  %v10821_v3 = vld [vmem:[#allocation5 + $0x148] sm:$0xf0] }
 0x3ba   :  { %6191 = vmatpush.bf16.msrb.mxu3 %v15156_v51  ;;  %v15324_v51 = vpop.f32.mrf.mxu2  ;;  %v15330_v56 = vor.u32 %v12636_v39, %v10821_v3 }
 0x3bb   :  { %6143 = vmatmul.bf16.vlgmr.msra.gmra.mxu3 %v15306_v1  ;;  %v5081_v1 = vadd.f32 %v15254_v33, %v15256_v59 }
 0x3bc   :  { %5953 = vmatpush.bf16.msrb.mxu0 %v10860_v58 }
 0x3bd   :  { %6178 = vmatpush.bf16.msrb.mxu2 %v15308_v35  ;;  %6112 = vmatpush.bf16.msrb.mxu1 %v15020_v31  ;;  %v5238_v31 = vpop.f32.mrf.mxu3  ;;  %v5095_v33 = vadd.f32 %v15264_v14, %v5081_v1  ;;  %v12703_v1 = vld [vmem:[#allocation5 + $0x44] sm:$0xf0] }
 0x3be   :  { %6192 = vmatpush.bf16.msrb.mxu3 %v15164_v32  ;;  %v12634_v32 = vld [vmem:[#allocation5 + $0x134] sm:$0xf]  ;;  %v5252_v58 = vpop.f32.mrf.mxu0 }
 0x3bf   :  { %v15338_v23 = vor.u32 %v12634_v32, %v10813_v54  ;;  %v10789_v32 = vld [vmem:[#allocation5 + $0x108] sm:$0xf0]  ;;  %v11123_v54 = vld [vmem:[#allocation5 + $0x70] sm:$0xf] }
 0x3c0   :  { %5954 = vmatpush.bf16.msrb.mxu0 %v10852_v16  ;;  %v12709_v16 = vld [vmem:[#allocation5 + $0x74] sm:$0xf0] }
 0x3c1   :  { %6179 = vmatpush.bf16.msrb.mxu2 %v15320_v45  ;;  %6113 = vmatpush.bf16.msrb.mxu1 %v15035_v28  ;;  %v10987_v28 = vld [vmem:[#allocation2 + $0x14] sm:$0xf] }
 0x3c2   :  { %6193 = vmatpush.bf16.msrb.mxu3 %v15176_v7  ;;  %v12632_v7 = vld [vmem:[#allocation5 + $0x124] sm:$0xf]  ;;  %v10988_v46 = vor.u32 %v12679_v44, %v10987_v28  ;;  %v15346_v39 = vpop.f32.mrf.mxu2  ;;  %v11187_v44 = vld [vmem:[#allocation5 + $0xf0] sm:$0xf]  ;;  %v15362_v28 = vor.u32 %v12709_v16, %v11123_v54 }
 0x3c3   :  { %v15344_v9 = vor.u32 %v12632_v7, %v10805_v8  ;;  %v12725_v7 = vld [vmem:[#allocation5 + $0xf4] sm:$0xf0]  ;;  %v5079_v8 = vadd.f32 %v15219_v29, %v15221_v37  ;;  %v5183_v29 = vadd.f32 %v15286_v52, %v15280_v4  ;;  %v5185_v4 = vadd.f32 %v15314_v62, %v15298_v40  ;;  %v11171_v52 = vld [vmem:[#allocation5 + $0xd0] sm:$0xf]  ;;  %v11099_v40 = vld [vmem:[#allocation5 + $0x40] sm:$0xf] }
 0x3c5   :  { %6180 = vmatpush.bf16.msrb.mxu2 %v15330_v56  ;;  %6114 = vmatpush.bf16.msrb.mxu1 %v15044_v26  ;;  %v15348_v26 = vpop.f32.mrf.mxu1  ;;  %v5197_v54 = vadd.f32 %v15310_v2, %v5183_v29  ;;  %v12721_v2 = vld [vmem:[#allocation5 + $0xd4] sm:$0xf0]  ;;  %v5051_v29 = vadd.f32 %v15192_v0, %v15066_v53  ;;  %v11155_v53 = vld [vmem:[#allocation5 + $0xb0] sm:$0xf] }
 0x3c6   :  { %6194 = vmatpush.bf16.msrb.mxu3 %v15190_v49  ;;  %v12630_v49 = vld [vmem:[#allocation5 + $0x114] sm:$0xf]  ;;  %v5254_v59 = vpop.f32.mrf.mxu0 }
 0x3c7   :  { %v15353_v3 = vor.u32 %v12630_v49, %v10797_v24  ;;  %v15364_v49 = vor.u32 %v12725_v7, %v11187_v44  ;;  %v11115_v24 = vld [vmem:[#allocation5 + $0x60] sm:$0xf]  ;;  %v5211_v44 = vadd.f32 %v15326_v43, %v5197_v54 }
 0x3c8   :  { %6115 = vmatmul.bf16.vlgmr.msrb.gmra.mxu1 %v10988_v46 }
 0x3c9   :  { %6163 = vmatpush.bf16.msra.mxu1 %v15049_v63  ;;  %6181 = vmatpush.bf16.msrb.mxu2 %v15338_v23  ;;  %v5240_v63 = vpop.f32.mrf.mxu3  ;;  %17230 = vst [vmem:[#allocation37_spill] sm:$0xff] %v15364_v49 }
 0x3ca   :  { %6195 = vmatpush.bf16.msrb.mxu3 %v15206_v42  ;;  %v12628_v42 = vld [vmem:[#allocation5 + $0x104] sm:$0xf]  ;;  %v5280_v37 = vpop.f32.mrf.mxu2 }
 0x3cd   :  { %6164 = vmatpush.bf16.msra.mxu1 %v15064_v34  ;;  %6182 = vmatpush.bf16.msrb.mxu2 %v15344_v9  ;;  %v15360_v34 = vor.u32 %v12628_v42, %v10789_v32  ;;  %v5266_v12 = vpop.f32.mrf.mxu1  ;;  %v5093_v32 = vadd.f32 %v15227_v15, %v5079_v8  ;;  %v5199_v8 = vadd.f32 %v15334_v21, %v5185_v4  ;;  %v12719_v21 = vld [vmem:[#allocation5 + $0xc4] sm:$0xf0] }
 0x3ce   :  { %6196 = vmatpush.bf16.msrb.mxu3 %v15224_v19  ;;  %v5253_v19 = vadd.f32 %v5252_v58, %v5238_v31  ;;  %v11179_v31 = vld [vmem:[#allocation5 + $0xe0] sm:$0xf]  ;;  %v12723_v58 = vld [vmem:[#allocation5 + $0xe4] sm:$0xf0] }
 0x3cf   :  { %v5107_v7 = vadd.f32 %v15258_v18, %v5093_v32  ;;  %v11163_v18 = vld [vmem:[#allocation5 + $0xc0] sm:$0xf]  ;;  %v12715_v4 = vld [vmem:[#allocation5 + $0xa4] sm:$0xf0] }
 0x3d0   :  { %v5267_v42 = vadd.f32 %v5266_v12, %v5253_v19  ;;  %v11107_v12 = vld [vmem:[#allocation5 + $0x50] sm:$0xf] }
 0x3d1   :  { %6165 = vmatpush.bf16.msra.mxu1 %v15077_v36  ;;  %6183 = vmatpush.bf16.msrb.mxu2 %v15353_v3  ;;  %v5011_v36 = vadd.f32 %v15187_v50, %v15166_v22  ;;  %v5294_v16 = vpop.f32.mrf.mxu3  ;;  %v15381_v22 = vor.u32 %v12723_v58, %v11179_v31 }
 0x3d2   :  { %6197 = vmatpush.bf16.msrb.mxu3 %v15239_v55  ;;  %v12707_v55 = vld [vmem:[#allocation5 + $0x64] sm:$0xf0]  ;;  %v5281_v50 = vadd.f32 %v5280_v37, %v5267_v42 }
 0x3d3   :  { %17231 = vst [vmem:[#allocation15_spill] sm:$0xff] %v15381_v22  ;;  %v5025_v15 = vadd.f32 %v15185_v25, %v5011_v36  ;;  %v5255_v25 = vadd.f32 %v5254_v59, %v5240_v63  ;;  %v5225_v63 = vadd.f32 %v15324_v51, %v5211_v44  ;;  %v12701_v51 = vld [vmem:[#allocation5 + $0x34] sm:$0xf0] }
 0x3d4   :  { %v5295_v19 = vadd.f32 %v5294_v16, %v5281_v50  ;;  %v10981_v59 = vld [vmem:[#allocation2 + $0x44] sm:$0xf0] }
 0x3d5   :  { %6166 = vmatpush.bf16.msra.mxu1 %v15086_v6  ;;  %6184 = vmatpush.bf16.msrb.mxu2 %v15360_v34  ;;  %v15379_v6 = vor.u32 %v12707_v55, %v11115_v24  ;;  %v5039_v62 = vadd.f32 %v15194_v17, %v5025_v15  ;;  %v5268_v43 = vpop.f32.mrf.mxu1  ;;  %v5213_v24 = vadd.f32 %v15348_v26, %v5199_v8  ;;  %v5282_v17 = vpop.f32.mrf.mxu2 }
 0x3d6   :  { %6198 = vmatpush.bf16.msrb.mxu3 %v15249_v47  ;;  %v12705_v47 = vld [vmem:[#allocation5 + $0x54] sm:$0xf0]  ;;  %v5269_v36 = vadd.f32 %v5268_v43, %v5255_v25  ;;  %v15407_v55 = vor.u32 %v12703_v1, %v11099_v40  ;;  %v11139_v40 = vld [vmem:[#allocation5 + $0x90] sm:$0xf] }
 0x3d7   :  { %v15394_v14 = vor.u32 %v12705_v47, %v11107_v12  ;;  %v5053_v26 = vadd.f32 %v15232_v20, %v5039_v62  ;;  %v5227_v42 = vadd.f32 %v15346_v39, %v5213_v24  ;;  %v12988_v12 = vld [vmem:[%s16936_s4] ss:$0 sm:$0xff]  ;;  %v11083_v20 = vld [vmem:[#allocation5 + $0x20] sm:$0xf]  ;;  %v12713_v1 = vld [vmem:[#allocation5 + $0x94] sm:$0xf0] }
 0x3d8   :  { %6185 = vmatmul.bf16.vlgmr.msrb.gmra.mxu2 %v10988_v46  ;;  %v5121_v46 = vadd.f32 %v15282_v30, %v5107_v7  ;;  %v5283_v31 = vadd.f32 %v5282_v17, %v5269_v36  ;;  %v11091_v30 = vld [vmem:[#allocation5 + $0x30] sm:$0xf]  ;;  %v11147_v39 = vld [vmem:[#allocation5 + $0xa0] sm:$0xf]  ;;  %v15439_v43 = vor.u32 %v12713_v1, %v11139_v40  ;;  %v12773_v36 = vld [vmem:[#allocation5 + $0x274] sm:$0xf0] }
 0x3d9   :  { %6823 = vmatpush.bf16.msra.mxu2 %v15362_v28  ;;  %6167 = vmatpush.bf16.msra.mxu1 %v15097_v60  ;;  %v15396_v60 = vor.u32 %v12721_v2, %v11171_v52  ;;  %v5296_v58 = vpop.f32.mrf.mxu3  ;;  %v15416_v16 = vor.u32 %v12701_v51, %v11091_v30  ;;  %v12676_v52 = vld [vmem:[#allocation2 + $0x10] sm:$0xf]  ;;  %v15432_v25 = vor.u32 %v12715_v4, %v11147_v39  ;;  %v11379_v24 = vld [vmem:[#allocation5 + $0x270] sm:$0xf]  ;;  %v12691_v51 = vld [vmem:[#allocation2 + $0x44] sm:$0xf0] }
 0x3da   :  { %6837 = vmatpush.bf16.msra.mxu3 %v15364_v49  ;;  %v5125_v0 = vmax.f32 %v5051_v29, %v5121_v46  ;;  %v5297_v32 = vadd.f32 %v5296_v58, %v5283_v31  ;;  %v15426_v2 = vor.u32 %v12676_v52, %v10981_v59  ;;  %17236 = vst [vmem:[#allocation21_spill] sm:$0xff] %v15439_v43  ;;  %v11131_v46 = vld [vmem:[#allocation5 + $0x80] sm:$0xf]  ;;  %v12708_v29 = vld [vmem:[#allocation5 + $0x74] sm:$0xf] }
 0x3db   :  { %6199 = vmatmul.bf16.vlgmr.msrb.gmra.mxu3 %v15304_v13  ;;  %17232 = vst [vmem:[#allocation44_spill] sm:$0xff] %v15396_v60  ;;  %v5109_v13 = vadd.f32 %v15288_v27, %v5095_v33  ;;  %v5299_v27 = vmax.f32 %v5225_v63, %v5295_v19  ;;  %v12699_v33 = vld [vmem:[#allocation5 + $0x24] sm:$0xf0]  ;;  %v11075_v19 = vld [vmem:[#allocation5 + $0x10] sm:$0xf]  ;;  %v15448_v31 = vor.u32 %v12773_v36, %v11379_v24 }
 0x3dc   :  { %v5300_v15 = vmax.f32 %v5227_v42, %v5297_v32  ;;  %v15428_v44 = vor.u32 %v12699_v33, %v11083_v20  ;;  %17235 = vst [vmem:[#allocation46_spill] sm:$0xff] %v15432_v25  ;;  %v12711_v63 = vld [vmem:[#allocation5 + $0x84] sm:$0xf0]  ;;  %v11371_v58 = vld [vmem:[#allocation5 + $0x260] sm:$0xf] }
 0x3dd   :  { %6824 = vmatpush.bf16.msra.mxu2 %v15379_v6  ;;  %6168 = vmatpush.bf16.msra.mxu1 %v15107_v38  ;;  %v5123_v37 = vadd.f32 %v15300_v11, %v5109_v13  ;;  %v15411_v38 = vor.u32 %v12719_v21, %v11163_v18  ;;  %v12717_v11 = vld [vmem:[#allocation5 + $0xb4] sm:$0xf0]  ;;  %v5301_v50 = vmax.f32 %v5125_v0, %v5299_v27  ;;  %v11067_v18 = vld [vmem:[#allocation5] sm:$0xf]  ;;  %v12695_v21 = vld [vmem:[#allocation5 + $0x4] sm:$0xf0] }
 0x3de   :  { %6838 = vmatpush.bf16.msra.mxu3 %v15381_v22  ;;  %v15444_v17 = vor.u32 %v12695_v21, %v11067_v18  ;;  %v15446_v27 = vor.u32 %v12711_v63, %v11131_v46  ;;  %v12706_v0 = vld [vmem:[#allocation5 + $0x64] sm:$0xf]  ;;  %v11117_v42 = vld [vmem:[#allocation5 + $0x68] sm:$0xf0]  ;;  %v11363_v39 = vld [vmem:[#allocation5 + $0x250] sm:$0xf] }
 0x3df   :  { %17233 = vst [vmem:[#allocation42_spill] sm:$0xff] %v15411_v38  ;;  %v5126_v54 = vmax.f32 %v5053_v26, %v5123_v37  ;;  %v5306_v7 = vadd.f32 %v12988_v12, %v5301_v50  ;;  %v11125_v37 = vld [vmem:[#allocation5 + $0x78] sm:$0xf0]  ;;  %v12689_v59 = vld [vmem:[#allocation2 + $0x14] sm:$0xf]  ;;  %v15463_v20 = vor.u32 %v12706_v0, %v11117_v42  ;;  %v17281_v22 = vld [vmem:[#allocation10_spill] sm:$0xff] }
 0x3e0   :  { %17237 = vst [vmem:[#allocation24_spill] sm:$0xff] %v15446_v27  ;;  %v15450_v30 = vor.u32 %v12708_v29, %v11125_v37  ;;  %v11049_v26 = vld [vmem:[#allocation2 + $0x48] sm:$0xf0]  ;;  %v12769_v4 = vld [vmem:[#allocation5 + $0x254] sm:$0xf0] }
 0x3e1   :  { %6825 = vmatpush.bf16.msra.mxu2 %v15394_v14  ;;  %6169 = vmatpush.bf16.msra.mxu1 %v15116_v57  ;;  %v15423_v57 = vor.u32 %v12717_v11, %v11155_v53  ;;  %v5302_v47 = vmax.f32 %v5126_v54, %v5300_v15  ;;  %v5928_v53 = vpop.f32.mrf.mxu2  ;;  %v12771_v11 = vld [vmem:[#allocation5 + $0x264] sm:$0xf0]  ;;  %v11047_v54 = vld [vmem:[#allocation2 + $0x10] sm:$0xf]  ;;  %v5942_v50 = vpop.f32.mrf.mxu3  ;;  %v15457_v15 = vor.u32 %v12689_v59, %v11049_v26  ;;  %v11109_v52 = vld [vmem:[#allocation5 + $0x58] sm:$0xf0] }
 0x3e2   :  { %6839 = vmatpush.bf16.msra.mxu3 %v15396_v60  ;;  %17238 = vst [vmem:[#allocation27_spill] sm:$0xff] %v15450_v30  ;;  %v11101_v40 = vld [vmem:[#allocation5 + $0x48] sm:$0xf0]  ;;  %v11347_v18 = vld [vmem:[#allocation5 + $0x230] sm:$0xf] }
 0x3e3   :  { %17234 = vst [vmem:[#allocation18_spill] sm:$0xff] %v15423_v57  ;;  %v5307_v8 = vadd.f32 %v12988_v12, %v5302_v47  ;;  %v15455_v12 = vor.u32 %v12691_v51, %v11047_v54  ;;  %v12704_v47 = vld [vmem:[#allocation5 + $0x54] sm:$0xf]  ;;  %v11093_v46 = vld [vmem:[#allocation5 + $0x38] sm:$0xf0]  ;;  %v17280_v60 = vld [vmem:[#allocation34_spill] sm:$0xff] }
 0x3e4   :  { %17239 = vst [vmem:[#allocation30_spill] sm:$0xff] %v15463_v20  ;;  %v12700_v21 = vld [vmem:[#allocation5 + $0x34] sm:$0xf]  ;;  %v11339_v24 = vld [vmem:[#allocation5 + $0x220] sm:$0xf] }
 0x3e5   :  { %6826 = vmatpush.bf16.msra.mxu2 %v15407_v55  ;;  %6170 = vmatpush.bf16.msra.mxu1 %v15125_v48  ;;  %v12697_v48 = vld [vmem:[#allocation5 + $0x14] sm:$0xf0]  ;;  %v5310_v62 = vpack.c.bf16 %v5307_v8, %v5306_v7  ;;  %v15472_v7 = vor.u32 %v12769_v4, %v11363_v39  ;;  %v15475_v8 = vor.u32 %v12704_v47, %v11109_v52  ;;  %v12698_v36 = vld [vmem:[#allocation5 + $0x24] sm:$0xf]  ;;  %v11085_v29 = vld [vmem:[#allocation5 + $0x28] sm:$0xf0] }
 0x3e6   :  { %6840 = vmatpush.bf16.msra.mxu3 %v15411_v38  ;;  %v15437_v13 = vor.u32 %v12697_v48, %v11075_v19  ;;  %v11355_v19 = vld [vmem:[#allocation5 + $0x240] sm:$0xf]  ;;  %v12702_v48 = vld [vmem:[#allocation5 + $0x44] sm:$0xf]  ;;  %v15497_v51 = vor.u32 %v12698_v36, %v11085_v29  ;;  %v11331_v26 = vld [vmem:[#allocation5 + $0x210] sm:$0xf] }
 0x3e7   :  { %5383 = vmatmul.bf16.vlgmr.msra.gmra.mxu0 %v5310_v62  ;;  %17240 = vst [vmem:[#allocation33_spill] sm:$0xff] %v15475_v8  ;;  %v15483_v62 = vor.u32 %v12702_v48, %v11101_v40  ;;  %v11323_v0 = vld [vmem:[#allocation5 + $0x200] sm:$0xf]  ;;  %v12694_v42 = vld [vmem:[#allocation5 + $0x4] sm:$0xf]  ;;  %v17246_v52 = vld [vmem:[#allocation14_spill] sm:$0xff] }
 0x3e8   :  { %6171 = vmatmul.bf16.vlgmr.msra.gmra.mxu1 %v15426_v2  ;;  %6003 = vmatpush.bf16.msra.mxu0 %v15293_v61  ;;  %v5914_v61 = vpop.f32.mrf.mxu1  ;;  %17243 = vst [vmem:[#allocation45_spill] sm:$0xff] %v15497_v51  ;;  %v12756_v54 = vld [vmem:[#allocation5 + $0x1f4] sm:$0xf]  ;;  %v11317_v59 = vld [vmem:[#allocation5 + $0x1f8] sm:$0xf0] }
 0x3e9   :  { %6827 = vmatpush.bf16.msra.mxu2 %v15416_v16  ;;  %v5929_v32 = vadd.f32 %v5928_v53, %v5914_v61  ;;  %17241 = vst [vmem:[#allocation36_spill] sm:$0xff] %v15483_v62  ;;  %v11077_v53 = vld [vmem:[#allocation5 + $0x18] sm:$0xf0]  ;;  %v15514_v47 = vor.u32 %v12756_v54, %v11317_v59  ;;  %v11309_v48 = vld [vmem:[#allocation5 + $0x1e8] sm:$0xf0]  ;;  %v17254_v59 = vld [vmem:[#allocation17_spill] sm:$0xff] }
 0x3ea   :  { %6841 = vmatpush.bf16.msra.mxu3 %v15423_v57  ;;  %v11381_v39 = vld [vmem:[#allocation5 + $0x278] sm:$0xf0]  ;;  %v12770_v40 = vld [vmem:[#allocation5 + $0x264] sm:$0xf]  ;;  %v12768_v29 = vld [vmem:[#allocation5 + $0x254] sm:$0xf] }
 0x3eb   :  { %v15465_v33 = vadd.f32 %v5942_v50, %v5929_v32  ;;  %v11069_v32 = vld [vmem:[#allocation5 + $0x8] sm:$0xf0]  ;;  %v12772_v50 = vld [vmem:[#allocation5 + $0x274] sm:$0xf]  ;;  %v11301_v36 = vld [vmem:[#allocation5 + $0x1d8] sm:$0xf0] }
 0x3ec   :  { %6004 = vmatpush.bf16.msra.mxu0 %v15308_v35  ;;  %v15461_v35 = vor.u32 %v12771_v11, %v11371_v58  ;;  %v12696_v58 = vld [vmem:[#allocation5 + $0x14] sm:$0xf]  ;;  %v11189_v57 = vld [vmem:[#allocation5 + $0xf8] sm:$0xf0] }
 0x3ed   :  { %6828 = vmatpush.bf16.msra.mxu2 %v15428_v44  ;;  %v15504_v11 = vor.u32 %v12696_v58, %v11077_v53  ;;  %v17251_v58 = vld [vmem:[#allocation38_spill] sm:$0xff]  ;;  %v12740_v38 = vld [vmem:[#allocation5 + $0x174] sm:$0xf] }
 0x3ee   :  { %6842 = vmatpush.bf16.msra.mxu3 %v15432_v25 }
 0x3ef   :  { %17244 = vst [vmem:[#allocation47_spill] sm:$0xff] %v15504_v11 }
 0x3f0   :  { %6005 = vmatpush.bf16.msra.mxu0 %v15320_v45  ;;  %v12767_v45 = vld [vmem:[#allocation5 + $0x244] sm:$0xf0] }
 0x3f1   :  { %6829 = vmatpush.bf16.msra.mxu2 %v15437_v13  ;;  %v15479_v1 = vor.u32 %v12767_v45, %v11355_v19  ;;  %v12693_v19 = vld [vmem:[#allocation2 + $0x54] sm:$0xf0]  ;;  %v12754_v45 = vld [vmem:[#allocation5 + $0x1e4] sm:$0xf] }
 0x3f2   :  { %6843 = vmatpush.bf16.msra.mxu3 %v15439_v43  ;;  %v12743_v43 = vld [vmem:[#allocation5 + $0x184] sm:$0xf0] }
 0x3f4   :  { %6006 = vmatpush.bf16.msra.mxu0 %v15330_v56  ;;  %v12765_v56 = vld [vmem:[#allocation5 + $0x234] sm:$0xf0] }
 0x3f5   :  { %6830 = vmatpush.bf16.msra.mxu2 %v15444_v17  ;;  %v15486_v63 = vor.u32 %v12765_v56, %v11347_v18  ;;  %v11373_v18 = vld [vmem:[#allocation5 + $0x268] sm:$0xf0] }
 0x3f6   :  { %6844 = vmatpush.bf16.msra.mxu3 %v15446_v27  ;;  %v11259_v27 = vld [vmem:[#allocation5 + $0x180] sm:$0xf] }
 0x3f7   :  { %5955 = vmatmul.bf16.vlgmr.msrb.gmra.mxu0 %v15271_v5  ;;  %v15490_v5 = vor.u32 %v12700_v21, %v11093_v46  ;;  %v15524_v21 = vor.u32 %v12754_v45, %v11309_v48  ;;  %v17248_v46 = vld [vmem:[#allocation13_spill] sm:$0xff]  ;;  %v17257_v48 = vld [vmem:[#allocation16_spill] sm:$0xff] }
 0x3f8   :  { %6831 = vmatmul.bf16.vlgmr.msra.gmra.mxu2 %v15455_v12  ;;  %6007 = vmatpush.bf16.msra.mxu0 %v15338_v23  ;;  %v12763_v23 = vld [vmem:[#allocation5 + $0x224] sm:$0xf0] }
 0x3f9   :  { %6879 = vmatpush.bf16.msrb.mxu2 %v15448_v31  ;;  %6845 = vmatmul.bf16.vlgmr.msra.gmra.mxu3 %v15457_v15  ;;  %17242 = vst [vmem:[#allocation41_spill] sm:$0xff] %v15490_v5  ;;  %v15493_v37 = vor.u32 %v12763_v23, %v11339_v24  ;;  %v15528_v24 = vor.u32 %v12770_v40, %v11373_v18  ;;  %v12752_v23 = vld [vmem:[#allocation5 + $0x1d4] sm:$0xf]  ;;  %v12746_v18 = vld [vmem:[#allocation5 + $0x1a4] sm:$0xf] }
 0x3fa   :  { %6893 = vmatpush.bf16.msrb.mxu3 %v15450_v30  ;;  %v11195_v30 = vld [vmem:[#allocation5 + $0x100] sm:$0xf] }
 0x3fb   :  { %17249 = vst [vmem:[#allocation13_spill] sm:$0xff] %v15528_v24 }
 0x3fc   :  { %6008 = vmatpush.bf16.msra.mxu0 %v15344_v9  ;;  %v12761_v9 = vld [vmem:[#allocation5 + $0x214] sm:$0xf0] }
 0x3fd   :  { %6880 = vmatpush.bf16.msrb.mxu2 %v15461_v35  ;;  %v15500_v61 = vor.u32 %v12761_v9, %v11331_v26  ;;  %v11365_v26 = vld [vmem:[#allocation5 + $0x258] sm:$0xf0]  ;;  %v15533_v9 = vor.u32 %v12752_v23, %v11301_v36  ;;  %v11341_v23 = vld [vmem:[#allocation5 + $0x228] sm:$0xf0] }
 0x3fe   :  { %6894 = vmatpush.bf16.msrb.mxu3 %v15463_v20  ;;  %v15537_v53 = vor.u32 %v12768_v29, %v11365_v26  ;;  %v17260_v29 = vld [vmem:[#allocation43_spill] sm:$0xff] }
 0x3ff   :  { %17250 = vst [vmem:[#allocation50_spill] sm:$0xff] %v15533_v9 }
 0x400   :  { %6009 = vmatpush.bf16.msra.mxu0 %v15353_v3  ;;  %v12759_v3 = vld [vmem:[#allocation5 + $0x204] sm:$0xf0]  ;;  %17252 = vst [vmem:[#allocation38_spill] sm:$0xff] %v15537_v53 }
 0x401   :  { %6881 = vmatpush.bf16.msrb.mxu2 %v15472_v7  ;;  %v15509_v4 = vor.u32 %v12759_v3, %v11323_v0  ;;  %v12750_v0 = vld [vmem:[#allocation5 + $0x1c4] sm:$0xf]  ;;  %v11293_v3 = vld [vmem:[#allocation5 + $0x1c8] sm:$0xf0] }
 0x402   :  { %6895 = vmatpush.bf16.msrb.mxu3 %v15475_v8  ;;  %v15540_v54 = vor.u32 %v12750_v0, %v11293_v3  ;;  %v11269_v0 = vld [vmem:[#allocation5 + $0x198] sm:$0xf0]  ;;  %v12760_v3 = vld [vmem:[#allocation5 + $0x214] sm:$0xf]  ;;  %v12729_v8 = vld [vmem:[#allocation5 + $0x114] sm:$0xf0] }
 0x404   :  { %6010 = vmatpush.bf16.msra.mxu0 %v15360_v34  ;;  %v15512_v34 = vor.u32 %v12694_v42, %v11069_v32  ;;  %v12766_v42 = vld [vmem:[#allocation5 + $0x244] sm:$0xf]  ;;  %v11357_v32 = vld [vmem:[#allocation5 + $0x248] sm:$0xf0]  ;;  %17253 = vst [vmem:[#allocation51_spill] sm:$0xff] %v15540_v54 }
 0x405   :  { %6882 = vmatpush.bf16.msrb.mxu2 %v15479_v1 }
 0x406   :  { %6896 = vmatpush.bf16.msrb.mxu3 %v15483_v62  ;;  %17245 = vst [vmem:[#allocation49_spill] sm:$0xff] %v15512_v34 }
 0x407   :  { %6011 = vmatmul.bf16.vlgmr.msra.gmra.mxu0 %v15060_v41  ;;  %v11063_v41 = vld [vmem:[#allocation2 + $0x20] sm:$0xf] }
 0x408   :  { %6093 = vmatpush.bf16.msrb.mxu0 %v14961_v10  ;;  %v15517_v10 = vor.u32 %v12772_v50, %v11381_v39  ;;  %v15522_v56 = vor.u32 %v12693_v19, %v11063_v41  ;;  %v12748_v50 = vld [vmem:[#allocation5 + $0x1b4] sm:$0xf]  ;;  %v11285_v39 = vld [vmem:[#allocation5 + $0x1b8] sm:$0xf0]  ;;  %v11277_v41 = vld [vmem:[#allocation5 + $0x1a8] sm:$0xf0] }
 0x409   :  { %6883 = vmatpush.bf16.msrb.mxu2 %v15486_v63  ;;  %v11349_v19 = vld [vmem:[#allocation5 + $0x238] sm:$0xf0]  ;;  %v15547_v45 = vor.u32 %v12748_v50, %v11285_v39  ;;  %v15554_v36 = vor.u32 %v12746_v18, %v11277_v41  ;;  %v12742_v39 = vld [vmem:[#allocation5 + $0x184] sm:$0xf]  ;;  %v11325_v18 = vld [vmem:[#allocation5 + $0x208] sm:$0xf0] }
 0x40a   :  { %6897 = vmatpush.bf16.msrb.mxu3 %v15490_v5  ;;  %17247 = vst [vmem:[#allocation14_spill] sm:$0xff] %v15517_v10  ;;  %v11251_v41 = vld [vmem:[#allocation5 + $0x170] sm:$0xf]  ;;  %v12747_v5 = vld [vmem:[#allocation5 + $0x1a4] sm:$0xf0] }
 0x40b   :  { %17256 = vst [vmem:[#allocation52_spill] sm:$0xff] %v15547_v45 }
 0x40c   :  { %6094 = vmatpush.bf16.msrb.mxu0 %v17246_v52  ;;  %v12764_v52 = vld [vmem:[#allocation5 + $0x234] sm:$0xf]  ;;  %17259 = vst [vmem:[#allocation53_spill] sm:$0xff] %v15554_v36 }
 0x40d   :  { %6884 = vmatpush.bf16.msrb.mxu2 %v15493_v37  ;;  %v15551_v40 = vor.u32 %v12764_v52, %v11349_v19  ;;  %v11261_v52 = vld [vmem:[#allocation5 + $0x188] sm:$0xf0]  ;;  %v12758_v19 = vld [vmem:[#allocation5 + $0x204] sm:$0xf] }
 0x40e   :  { %6898 = vmatpush.bf16.msrb.mxu3 %v15497_v51  ;;  %v17275_v51 = vld [vmem:[#allocation25_spill] sm:$0xff] }
 0x40f   :  { %17258 = vst [vmem:[#allocation16_spill] sm:$0xff] %v15551_v40 }
 0x410   :  { %6095 = vmatpush.bf16.msrb.mxu0 %v17248_v46  ;;  %v12762_v46 = vld [vmem:[#allocation5 + $0x224] sm:$0xf] }
 0x411   :  { %6885 = vmatpush.bf16.msrb.mxu2 %v15500_v61  ;;  %v15558_v26 = vor.u32 %v12762_v46, %v11341_v23  ;;  %v12741_v46 = vld [vmem:[#allocation5 + $0x174] sm:$0xf0]  ;;  %v11315_v23 = vld [vmem:[#allocation5 + $0x1f0] sm:$0xf] }
 0x412   :  { %6899 = vmatpush.bf16.msrb.mxu3 %v15504_v11  ;;  %v12749_v11 = vld [vmem:[#allocation5 + $0x1b4] sm:$0xf0] }
 0x413   :  { %17261 = vst [vmem:[#allocation43_spill] sm:$0xff] %v15558_v26 }
 0x414   :  { %6096 = vmatpush.bf16.msrb.mxu0 %v17251_v58  ;;  %v12744_v58 = vld [vmem:[#allocation5 + $0x194] sm:$0xf] }
 0x415   :  { %6886 = vmatpush.bf16.msrb.mxu2 %v15509_v4 }
 0x416   :  { %6900 = vmatpush.bf16.msrb.mxu3 %v15512_v34  ;;  %v11283_v34 = vld [vmem:[#allocation5 + $0x1b0] sm:$0xf] }
 0x418   :  { %6887 = vmatmul.bf16.vlgmr.msrb.gmra.mxu2 %v15522_v56  ;;  %6097 = vmatpush.bf16.msrb.mxu0 %v17254_v59  ;;  %v17263_v59 = vld [vmem:[#allocation20_spill] sm:$0xff] }
 0x419   :  { %6935 = vmatpush.bf16.msra.mxu2 %v15514_v47  ;;  %6901 = vmatmul.bf16.vlgmr.msrb.gmra.mxu3 %v15455_v12  ;;  %v15544_v12 = vor.u32 %v12766_v42, %v11357_v32  ;;  %v11333_v42 = vld [vmem:[#allocation5 + $0x218] sm:$0xf0]  ;;  %v15561_v32 = vor.u32 %v12744_v58, %v11269_v0  ;;  %v15572_v58 = vor.u32 %v12742_v39, %v11261_v52  ;;  %v15574_v0 = vpop.f32.mrf.mxu3  ;;  %v12690_v39 = vld [vmem:[#allocation2 + $0x1c] sm:$0xf] }
 0x41a   :  { %6949 = vmatpush.bf16.msra.mxu3 %v15517_v10  ;;  %v15565_v50 = vor.u32 %v12760_v3, %v11333_v42  ;;  %17268 = vst [vmem:[#allocation56_spill] sm:$0xff] %v15574_v0  ;;  %v15577_v3 = vor.u32 %v12758_v19, %v11325_v18  ;;  %v15579_v42 = vor.u32 %v12741_v46, %v11251_v41  ;;  %v17272_v18 = vld [vmem:[#allocation22_spill] sm:$0xff]  ;;  %v11235_v46 = vld [vmem:[#allocation5 + $0x150] sm:$0xf] }
 0x41b   :  { %17255 = vst [vmem:[#allocation17_spill] sm:$0xff] %v15544_v12 }
 0x41c   :  { %6098 = vmatpush.bf16.msrb.mxu0 %v17257_v48  ;;  %17262 = vst [vmem:[#allocation54_spill] sm:$0xff] %v15561_v32  ;;  %v17265_v48 = vld [vmem:[#allocation19_spill] sm:$0xff] }
 0x41d   :  { %6936 = vmatpush.bf16.msra.mxu2 %v15524_v21  ;;  %17264 = vst [vmem:[#allocation20_spill] sm:$0xff] %v15565_v50 }
 0x41e   :  { %6950 = vmatpush.bf16.msra.mxu3 %v15528_v24  ;;  %17267 = vst [vmem:[#allocation55_spill] sm:$0xff] %v15572_v58  ;;  %v12755_v24 = vld [vmem:[#allocation5 + $0x1e4] sm:$0xf0] }
 0x41f   :  { %17269 = vst [vmem:[#allocation57_spill] sm:$0xff] %v15577_v3 }
 0x420   :  { %6099 = vmatpush.bf16.msrb.mxu0 %v17260_v29  ;;  %v12757_v29 = vld [vmem:[#allocation5 + $0x1f4] sm:$0xf0] }
 0x421   :  { %6937 = vmatpush.bf16.msra.mxu2 %v15533_v9  ;;  %v11531_v9 = vld [vmem:[#allocation5 + $0x70] sm:$0xf] }
 0x422   :  { %6951 = vmatpush.bf16.msra.mxu3 %v15537_v53  ;;  %v12739_v53 = vld [vmem:[#allocation5 + $0x164] sm:$0xf0] }
 0x424   :  { %6100 = vmatpush.bf16.msrb.mxu0 %v17263_v59  ;;  %v17270_v59 = vld [vmem:[#allocation23_spill] sm:$0xff] }
 0x425   :  { %6938 = vmatpush.bf16.msra.mxu2 %v15540_v54 }
 0x426   :  { %6952 = vmatpush.bf16.msra.mxu3 %v15544_v12  ;;  %v11243_v12 = vld [vmem:[#allocation5 + $0x160] sm:$0xf] }
 0x427   :  { %6101 = vmatmul.bf16.vlgmr.msrb.gmra.mxu0 %v15426_v2  ;;  %v11307_v2 = vld [vmem:[#allocation5 + $0x1e0] sm:$0xf]  ;;  %v15589_v19 = vor.u32 %v12739_v53, %v11243_v12  ;;  %v17273_v12 = vld [vmem:[#allocation26_spill] sm:$0xff] }
 0x428   :  { %6149 = vmatpush.bf16.msra.mxu0 %v17265_v48  ;;  %v15582_v48 = vor.u32 %v12757_v29, %v11315_v23  ;;  %v15593_v41 = vor.u32 %v12755_v24, %v11307_v2  ;;  %v12737_v23 = vld [vmem:[#allocation5 + $0x154] sm:$0xf0]  ;;  %v11299_v29 = vld [vmem:[#allocation5 + $0x1d0] sm:$0xf]  ;;  %v11227_v2 = vld [vmem:[#allocation5 + $0x140] sm:$0xf] }
 0x429   :  { %6939 = vmatpush.bf16.msra.mxu2 %v15547_v45  ;;  %v15602_v53 = vor.u32 %v12737_v23, %v11235_v46  ;;  %v11219_v23 = vld [vmem:[#allocation5 + $0x130] sm:$0xf] }
 0x42a   :  { %6953 = vmatpush.bf16.msra.mxu3 %v15551_v40  ;;  %v15568_v40 = vpop.f32.mrf.mxu2 }
 0x42b   :  { %17266 = vst [vmem:[#allocation19_spill] sm:$0xff] %v15568_v40 }
 0x42c   :  { %6150 = vmatpush.bf16.msra.mxu0 %v17270_v59  ;;  %v12753_v59 = vld [vmem:[#allocation5 + $0x1d4] sm:$0xf0] }
 0x42d   :  { %6940 = vmatpush.bf16.msra.mxu2 %v15554_v36  ;;  %v15606_v24 = vor.u32 %v12753_v59, %v11299_v29  ;;  %v11173_v36 = vld [vmem:[#allocation5 + $0xd8] sm:$0xf0] }
 0x42e   :  { %6954 = vmatpush.bf16.msra.mxu3 %v15558_v26  ;;  %v11057_v26 = vld [vmem:[#allocation2 + $0x50] sm:$0xf0] }
 0x42f   :  { %v15587_v52 = vor.u32 %v12690_v39, %v11057_v26  ;;  %v15599_v26 = vpop.f32.mrf.mxu3  ;;  %v12735_v39 = vld [vmem:[#allocation5 + $0x144] sm:$0xf0] }
 0x430   :  { %6151 = vmatpush.bf16.msra.mxu0 %v17272_v18  ;;  %v11291_v18 = vld [vmem:[#allocation5 + $0x1c0] sm:$0xf]  ;;  %v15609_v10 = vor.u32 %v12735_v39, %v11227_v2  ;;  %v15622_v2 = vor.u32 %v12749_v11, %v11283_v34  ;;  %v11267_v11 = vld [vmem:[#allocation5 + $0x190] sm:$0xf]  ;;  %v12745_v34 = vld [vmem:[#allocation5 + $0x194] sm:$0xf0] }
 0x431   :  { %6941 = vmatpush.bf16.msra.mxu2 %v15561_v32  ;;  %17271 = vst [vmem:[#allocation23_spill] sm:$0xff] %v15587_v52  ;;  %v11211_v39 = vld [vmem:[#allocation5 + $0x120] sm:$0xf]  ;;  %v11245_v32 = vld [vmem:[#allocation5 + $0x168] sm:$0xf0] }
 0x432   :  { %6955 = vmatpush.bf16.msra.mxu3 %v15565_v50  ;;  %v15596_v50 = vpop.f32.mrf.mxu2 }
 0x434   :  { %6152 = vmatpush.bf16.msra.mxu0 %v17273_v12  ;;  %v12733_v12 = vld [vmem:[#allocation5 + $0x134] sm:$0xf0] }
 0x435   :  { %6942 = vmatpush.bf16.msra.mxu2 %v15572_v58  ;;  %v15616_v29 = vor.u32 %v12733_v12, %v11219_v23  ;;  %v17276_v23 = vld [vmem:[#allocation48_spill] sm:$0xff]  ;;  %v11181_v58 = vld [vmem:[#allocation5 + $0xe8] sm:$0xf0] }
 0x436   :  { %6956 = vmatpush.bf16.msra.mxu3 %v15577_v3  ;;  %v12751_v3 = vld [vmem:[#allocation5 + $0x1c4] sm:$0xf0] }
 0x437   :  { %v15613_v46 = vor.u32 %v12751_v3, %v11291_v18  ;;  %v15624_v3 = vpop.f32.mrf.mxu3  ;;  %v11275_v18 = vld [vmem:[#allocation5 + $0x1a0] sm:$0xf] }
 0x438   :  { %6943 = vmatmul.bf16.vlgmr.msra.gmra.mxu2 %v15587_v52  ;;  %v15631_v12 = vor.u32 %v12747_v5, %v11275_v18  ;;  %v15643_v5 = vor.u32 %v12745_v34, %v11267_v11  ;;  %v12727_v18 = vld [vmem:[#allocation5 + $0x104] sm:$0xf0]  ;;  %v15657_v34 = vor.u32 %v12743_v43, %v11259_v27  ;;  %v12722_v52 = vld [vmem:[#allocation5 + $0xe4] sm:$0xf]  ;;  %v11395_v43 = vld [vmem:[#allocation2 + $0x1c] sm:$0xf] }
 0x439   :  { %7025 = vmatpush.bf16.msrb.mxu2 %v15579_v42  ;;  %6957 = vmatmul.bf16.vlgmr.msra.gmra.mxu3 %v15522_v56  ;;  %v17274_v56 = vld [vmem:[#allocation9_spill] sm:$0xff]  ;;  %v15654_v11 = vor.u32 %v12727_v18, %v11195_v30  ;;  %v11397_v30 = vld [vmem:[#allocation2 + $0x54] sm:$0xf0]  ;;  %v12775_v27 = vld [vmem:[#allocation2 + $0x20] sm:$0xf] }
 0x43a   :  { %7039 = vmatpush.bf16.msrb.mxu3 %v15582_v48  ;;  %6153 = vmatpush.bf16.msra.mxu0 %v17274_v56  ;;  %v15618_v59 = vpop.f32.mrf.mxu2  ;;  %v12731_v56 = vld [vmem:[#allocation5 + $0x124] sm:$0xf0]  ;;  %v12738_v18 = vld [vmem:[#allocation5 + $0x164] sm:$0xf] }
 0x43b   :  { %v15627_v62 = vor.u32 %v12731_v56, %v11211_v39  ;;  %v12989_v39 = vld [vmem:[%s16938_s6] ss:$0 sm:$0xff] }
 0x43c   :  { %4471 = vst.msk [vmem:[%s16939_s7] sm:$0xff] %vm4470_vm2, %v12989_v39 }
 0x43d   :  { %7026 = vmatpush.bf16.msrb.mxu2 %v15589_v19  ;;  %4472 = vst.msk [vmem:[%s16939_s7 + $0x8] sm:$0xff] %vm4470_vm2, %v12989_v39  ;;  %v15673_v39 = vor.u32 %v12722_v52, %v11181_v58  ;;  %v17288_v52 = vld [vmem:[#allocation32_spill] sm:$0xff] }
 0x43e   :  { %7040 = vmatpush.bf16.msrb.mxu3 %v15593_v41  ;;  %6154 = vmatpush.bf16.msra.mxu0 %v17275_v51  ;;  %v11203_v51 = vld [vmem:[#allocation5 + $0x110] sm:$0xf] }
 0x43f   :  { %v15634_v20 = vor.u32 %v12729_v8, %v11203_v51  ;;  %v15645_v25 = vpop.f32.mrf.mxu3  ;;  %v17279_v8 = vld [vmem:[#allocation40_spill] sm:$0xff]  ;;  %v12724_v51 = vld [vmem:[#allocation5 + $0xf4] sm:$0xf] }
 0x441   :  { %7027 = vmatpush.bf16.msrb.mxu2 %v15602_v53 }
 0x442   :  { %7041 = vmatpush.bf16.msrb.mxu3 %v15606_v24  ;;  %6155 = vmatpush.bf16.msra.mxu0 %v17276_v23  ;;  %v15639_v56 = vpop.f32.mrf.mxu2  ;;  %v17278_v23 = vld [vmem:[#allocation29_spill] sm:$0xff] }
 0x443   :  { %17277 = vst [vmem:[#allocation22_spill] sm:$0xff] %v15639_v56  ;;  %v12736_v56 = vld [vmem:[#allocation5 + $0x154] sm:$0xf] }
 0x445   :  { %7028 = vmatpush.bf16.msrb.mxu2 %v15609_v10 }
 0x446   :  { %7042 = vmatpush.bf16.msrb.mxu3 %v15613_v46  ;;  %6156 = vmatpush.bf16.msra.mxu0 %v17278_v23  ;;  %v11253_v23 = vld [vmem:[#allocation5 + $0x178] sm:$0xf0] }
 0x447   :  { %v15666_v49 = vor.u32 %v12740_v38, %v11253_v23  ;;  %v15677_v38 = vor.u32 %v12775_v27, %v11397_v30  ;;  %v12720_v23 = vld [vmem:[#allocation5 + $0xd4] sm:$0xf]  ;;  %v12718_v30 = vld [vmem:[#allocation5 + $0xc4] sm:$0xf] }
 0x448   :  { %v15688_v58 = vor.u32 %v12720_v23, %v11173_v36  ;;  %v12734_v27 = vld [vmem:[#allocation5 + $0x144] sm:$0xf]  ;;  %v12716_v23 = vld [vmem:[#allocation5 + $0xb4] sm:$0xf] }
 0x449   :  { %7029 = vmatpush.bf16.msrb.mxu2 %v15616_v29  ;;  %6157 = vmatmul.bf16.vlgmr.msra.gmra.mxu0 %v17280_v60  ;;  %17282 = vst [vmem:[#allocation26_spill] sm:$0xff] %v15666_v49  ;;  %v12777_v60 = vld [vmem:[#allocation2 + $0x50] sm:$0xf0] }
 0x44a   :  { %7043 = vmatpush.bf16.msrb.mxu3 %v15622_v2  ;;  %6205 = vmatpush.bf16.msrb.mxu0 %v17279_v8  ;;  %v15659_v8 = vor.u32 %v12724_v51, %v11189_v57  ;;  %v15671_v57 = vor.u32 %v12777_v60, %v11395_v43  ;;  %17284 = vst [vmem:[#allocation9_spill] sm:$0xff] %v15677_v38  ;;  %v15681_v45 = vpop.f32.mrf.mxu2  ;;  %v11237_v60 = vld [vmem:[#allocation5 + $0x158] sm:$0xf0]  ;;  %v15684_v43 = vpop.f32.mrf.mxu3 }
 0x44b   :  { %v15679_v51 = vor.u32 %v12738_v18, %v11245_v32  ;;  %17286 = vst [vmem:[#allocation48_spill] sm:$0xff] %v15681_v45  ;;  %v15692_v32 = vor.u32 %v12736_v56, %v11237_v60  ;;  %v11165_v18 = vld [vmem:[#allocation5 + $0xc8] sm:$0xf0]  ;;  %v17290_v45 = vld [vmem:[#allocation11_spill] sm:$0xff]  ;;  %v11221_v60 = vld [vmem:[#allocation5 + $0x138] sm:$0xf0] }
 0x44c   :  { %17287 = vst [vmem:[#allocation29_spill] sm:$0xff] %v15684_v43  ;;  %v12732_v56 = vld [vmem:[#allocation5 + $0x134] sm:$0xf] }
 0x44d   :  { %7030 = vmatpush.bf16.msrb.mxu2 %v15627_v62  ;;  %17285 = vst [vmem:[#allocation25_spill] sm:$0xff] %v15679_v51  ;;  %v17301_v43 = vld [vmem:[#allocation39_spill] sm:$0xff] }
 0x44e   :  { %7044 = vmatpush.bf16.msrb.mxu3 %v15631_v12  ;;  %6206 = vmatpush.bf16.msrb.mxu0 %v17281_v22  ;;  %v17283_v22 = vld [vmem:[#allocation28_spill] sm:$0xff]  ;;  %17289 = vst [vmem:[#allocation40_spill] sm:$0xff] %v15692_v32 }
 0x451   :  { %7031 = vmatpush.bf16.msrb.mxu2 %v15634_v20 }
 0x452   :  { %7045 = vmatpush.bf16.msrb.mxu3 %v15643_v5  ;;  %6207 = vmatpush.bf16.msrb.mxu0 %v17283_v22  ;;  %v11229_v22 = vld [vmem:[#allocation5 + $0x148] sm:$0xf0] }
 0x453   :  { %v15699_v36 = vor.u32 %v12734_v27, %v11229_v22  ;;  %v11149_v27 = vld [vmem:[#allocation5 + $0xa8] sm:$0xf0]  ;;  %v12730_v22 = vld [vmem:[#allocation5 + $0x124] sm:$0xf] }
 0x455   :  { %7032 = vmatpush.bf16.msrb.mxu2 %v15654_v11  ;;  %17291 = vst [vmem:[#allocation34_spill] sm:$0xff] %v15699_v36 }
 0x456   :  { %7046 = vmatpush.bf16.msrb.mxu3 %v15657_v34  ;;  %6208 = vmatpush.bf16.msrb.mxu0 %v17288_v52  ;;  %v11157_v52 = vld [vmem:[#allocation5 + $0xb8] sm:$0xf0] }
 0x457   :  { %v15706_v0 = vor.u32 %v12716_v23, %v11157_v52  ;;  %v12712_v52 = vld [vmem:[#allocation5 + $0x94] sm:$0xf] }
 0x458   :  { %7033 = vmatmul.bf16.vlgmr.msrb.gmra.mxu2 %v15671_v57 }
 0x459   :  { %7081 = vmatpush.bf16.msra.mxu2 %v15659_v8  ;;  %7047 = vmatmul.bf16.vlgmr.msrb.gmra.mxu3 %v15677_v38  ;;  %v15701_v38 = vpop.f32.mrf.mxu2 }
 0x45a   :  { %7095 = vmatpush.bf16.msra.mxu3 %v15666_v49  ;;  %v15695_v49 = vor.u32 %v12718_v30, %v11165_v18  ;;  %6209 = vmatpush.bf16.msrb.mxu0 %v17290_v45  ;;  %17292 = vst [vmem:[#allocation10_spill] sm:$0xff] %v15701_v38  ;;  %v17294_v30 = vld [vmem:[#allocation31_spill] sm:$0xff]  ;;  %v15710_v45 = vor.u32 %v12732_v56, %v11221_v60  ;;  %v12714_v18 = vld [vmem:[#allocation5 + $0xa4] sm:$0xf] }
 0x45b   :  { %v15713_v54 = vor.u32 %v12714_v18, %v11149_v27  ;;  %v17296_v38 = vld [vmem:[#allocation35_spill] sm:$0xff]  ;;  %v17299_v18 = vld [vmem:[#allocation12_spill] sm:$0xff]  ;;  %v11133_v27 = vld [vmem:[#allocation5 + $0x88] sm:$0xf0] }
 0x45c   :  { %17295 = vst [vmem:[#allocation32_spill] sm:$0xff] %v15710_v45 }
 0x45d   :  { %7082 = vmatpush.bf16.msra.mxu2 %v15673_v39 }
 0x45e   :  { %7096 = vmatpush.bf16.msra.mxu3 %v15679_v51  ;;  %v15703_v51 = vpop.f32.mrf.mxu3  ;;  %6210 = vmatpush.bf16.msrb.mxu0 %v17294_v30  ;;  %v11141_v30 = vld [vmem:[#allocation5 + $0x98] sm:$0xf0] }
 0x45f   :  { %17293 = vst [vmem:[#allocation28_spill] sm:$0xff] %v15703_v51  ;;  %v12728_v51 = vld [vmem:[#allocation5 + $0x114] sm:$0xf]  ;;  %v15722_v60 = vor.u32 %v12712_v52, %v11141_v30 }
 0x461   :  { %7083 = vmatpush.bf16.msra.mxu2 %v15688_v58  ;;  %v15719_v56 = vpop.f32.mrf.mxu2 }
 0x462   :  { %7097 = vmatpush.bf16.msra.mxu3 %v15692_v32  ;;  %v11213_v32 = vld [vmem:[#allocation5 + $0x128] sm:$0xf0]  ;;  %6211 = vmatpush.bf16.msrb.mxu0 %v17296_v38  ;;  %17298 = vst [vmem:[#allocation31_spill] sm:$0xff] %v15719_v56  ;;  %v12807_v56 = vld [vmem:[#allocation5 + $0x74] sm:$0xf0] }
 0x463   :  { %v15717_v23 = vor.u32 %v12730_v22, %v11213_v32  ;;  %v12710_v32 = vld [vmem:[#allocation5 + $0x84] sm:$0xf] }
 0x464   :  { %v12726_v22 = vld [vmem:[#allocation5 + $0x104] sm:$0xf]  ;;  %v15733_v52 = vor.u32 %v12710_v32, %v11133_v27  ;;  %v12774_v32 = vld [vmem:[#allocation2 + $0x18] sm:$0xf] }
 0x465   :  { %7084 = vmatpush.bf16.msra.mxu2 %v15695_v49  ;;  %17297 = vst [vmem:[#allocation11_spill] sm:$0xff] %v15717_v23 }
 0x466   :  { %7098 = vmatpush.bf16.msra.mxu3 %v15699_v36  ;;  %v11205_v36 = vld [vmem:[#allocation5 + $0x118] sm:$0xf0]  ;;  %v15724_v40 = vpop.f32.mrf.mxu3  ;;  %6212 = vmatpush.bf16.msrb.mxu0 %v17299_v18  ;;  %v12805_v18 = vld [vmem:[#allocation5 + $0x64] sm:$0xf0] }
 0x467   :  { %v15728_v38 = vor.u32 %v12728_v51, %v11205_v36  ;;  %v15739_v51 = vor.u32 %v12807_v56, %v11531_v9  ;;  %v11389_v36 = vld [vmem:[#allocation2 + $0x4c] sm:$0xf0]  ;;  %v5384_v9 = vpop.f32.mrf.mxu0 }
 0x469   :  { %7085 = vmatpush.bf16.msra.mxu2 %v15706_v0  ;;  %17300 = vst [vmem:[#allocation35_spill] sm:$0xff] %v15728_v38  ;;  %6213 = vmatmul.bf16.vlgmr.msrb.gmra.mxu0 %v17301_v43  ;;  %v5308_v43 = vld [vmem:[%s16939_s7] sm:$0xff] }
 0x46a   :  { %7099 = vmatpush.bf16.msra.mxu3 %v15710_v45  ;;  %6851 = vmatpush.bf16.msra.mxu0 %v15579_v42  ;;  %v11197_v45 = vld [vmem:[#allocation5 + $0x108] sm:$0xf0]  ;;  %17302 = vst [vmem:[#allocation12_spill] sm:$0xff] %v15739_v51  ;;  %v11523_v42 = vld [vmem:[#allocation5 + $0x60] sm:$0xf]  ;;  %v5389_v56 = vadd.f32 %v5384_v9, %v5308_v43 }
 0x46b   :  { %v15736_v30 = vor.u32 %v12726_v22, %v11197_v45  ;;  %v15750_v45 = vor.u32 %v12774_v32, %v11389_v36  ;;  %v11515_v22 = vld [vmem:[#allocation5 + $0x50] sm:$0xf]  ;;  %v11507_v36 = vld [vmem:[#allocation5 + $0x40] sm:$0xf] }
 0x46c   :  { %5391 = vst.msk [vmem:[%s16939_s7] sm:$0xff] %vm4470_vm2, %v5389_v56  ;;  %v12799_v56 = vld [vmem:[#allocation5 + $0x34] sm:$0xf0] }
 0x46d   :  { %7086 = vmatpush.bf16.msra.mxu2 %v15713_v54 }
 0x46e   :  { %7100 = vmatpush.bf16.msra.mxu3 %v15717_v23  ;;  %6852 = vmatpush.bf16.msra.mxu0 %v15589_v19  ;;  %v15741_v23 = vpop.f32.mrf.mxu2  ;;  %v15747_v27 = vpop.f32.mrf.mxu3  ;;  %v15754_v19 = vor.u32 %v12805_v18, %v11523_v42  ;;  %v12801_v42 = vld [vmem:[#allocation5 + $0x44] sm:$0xf0]  ;;  %v5309_v18 = vld [vmem:[%s16939_s7 + $0x8] sm:$0xff] }
 0x46f   :  { %v15773_v32 = vor.u32 %v12801_v42, %v11507_v36 }
 0x470   :  { %17303 = vst [vmem:[#allocation39_spill] sm:$0xff] %v15754_v19 }
 0x471   :  { %7087 = vmatpush.bf16.msra.mxu2 %v15722_v60 }
 0x472   :  { %7101 = vmatpush.bf16.msra.mxu3 %v15728_v38  ;;  %6853 = vmatpush.bf16.msra.mxu0 %v15602_v53  ;;  %v12803_v38 = vld [vmem:[#allocation5 + $0x54] sm:$0xf0] }
 0x473   :  { %v15764_v53 = vor.u32 %v12803_v38, %v11515_v22  ;;  %v11499_v38 = vld [vmem:[#allocation5 + $0x30] sm:$0xf]  ;;  %v11491_v22 = vld [vmem:[#allocation5 + $0x20] sm:$0xf] }
 0x475   :  { %7088 = vmatpush.bf16.msra.mxu2 %v15733_v52  ;;  %17304 = vst [vmem:[#allocation58_spill] sm:$0xff] %v15764_v53 }
 0x476   :  { %7102 = vmatpush.bf16.msra.mxu3 %v15736_v30  ;;  %6854 = vmatpush.bf16.msra.mxu0 %v15609_v10  ;;  %v15769_v43 = vpop.f32.mrf.mxu2  ;;  %v15775_v10 = vpop.f32.mrf.mxu3 }
 0x478   :  { %7089 = vmatmul.bf16.vlgmr.msra.gmra.mxu2 %v15750_v45 }
 0x479   :  { %7103 = vmatmul.bf16.vlgmr.msra.gmra.mxu3 %v15671_v57  ;;  %v5386_v57 = vpop.f32.mrf.mxu0 }
 0x47a   :  { %7741 = vmatpush.bf16.msrb.mxu3 %v15739_v51  ;;  %6855 = vmatpush.bf16.msra.mxu0 %v15616_v29  ;;  %v5390_v9 = vadd.f32 %v5386_v57, %v5309_v18  ;;  %v15783_v29 = vor.u32 %v12799_v56, %v11499_v38  ;;  %v12692_v38 = vld [vmem:[#allocation2 + $0x4c] sm:$0xf0] }
 0x47c   :  { %5392 = vst.msk [vmem:[%s16939_s7 + $0x8] sm:$0xff] %vm4470_vm2, %v5390_v9 }
 0x47d   :  { %17305 = vst [vmem:[#allocation59_spill] sm:$0xff] %v15783_v29 }
 0x47e   :  { %7742 = vmatpush.bf16.msrb.mxu3 %v15754_v19  ;;  %6856 = vmatpush.bf16.msra.mxu0 %v15627_v62  ;;  %v6832_v42 = vpop.f32.mrf.mxu2  ;;  %v6846_v9 = vpop.f32.mrf.mxu3  ;;  %v11483_v19 = vld [vmem:[#allocation5 + $0x10] sm:$0xf]  ;;  %v12795_v62 = vld [vmem:[#allocation5 + $0x14] sm:$0xf0] }
 0x47f   :  { %v15792_v51 = vadd.f32 %v6846_v9, %v6832_v42  ;;  %v15796_v56 = vor.u32 %v12795_v62, %v11483_v19  ;;  %v12789_v19 = vld [vmem:[#allocation2 + $0x4c] sm:$0xf0]  ;;  %v12869_v62 = vld [vmem:[#allocation5 + $0x264] sm:$0xf0] }
 0x480   :  { %v11779_v9 = vld [vmem:[#allocation5 + $0x260] sm:$0xf] }
 0x481   :  { %v5956_v36 = vpop.f32.mrf.mxu0 }
 0x482   :  { %7743 = vmatpush.bf16.msrb.mxu3 %v15764_v53  ;;  %v12797_v53 = vld [vmem:[#allocation5 + $0x24] sm:$0xf0]  ;;  %6857 = vmatpush.bf16.msra.mxu0 %v15634_v20  ;;  %v15790_v57 = vadd.f32 %v5956_v36, %v15465_v33  ;;  %v11787_v36 = vld [vmem:[#allocation5 + $0x270] sm:$0xf] }
 0x483   :  { %v15787_v18 = vor.u32 %v12797_v53, %v11491_v22  ;;  %v11055_v20 = vld [vmem:[#allocation2 + $0x18] sm:$0xf]  ;;  %v11475_v22 = vld [vmem:[#allocation5] sm:$0xf] }
 0x484   :  { %v15799_v53 = vor.u32 %v12692_v38, %v11055_v20  ;;  %v12793_v33 = vld [vmem:[#allocation5 + $0x4] sm:$0xf0]  ;;  %v15813_v20 = vor.u32 %v12869_v62, %v11779_v9  ;;  %v12863_v9 = vld [vmem:[#allocation5 + $0x234] sm:$0xf0] }
 0x485   :  { %v15803_v42 = vor.u32 %v12793_v33, %v11475_v22  ;;  %v11771_v22 = vld [vmem:[#allocation5 + $0x250] sm:$0xf]  ;;  %v12867_v33 = vld [vmem:[#allocation5 + $0x254] sm:$0xf0] }
 0x486   :  { %7744 = vmatpush.bf16.msrb.mxu3 %v15773_v32  ;;  %6858 = vmatpush.bf16.msra.mxu0 %v15654_v11 }
 0x489   :  { %6859 = vmatmul.bf16.vlgmr.msra.gmra.mxu0 %v15799_v53 }
 0x48a   :  { %7745 = vmatpush.bf16.msrb.mxu3 %v15783_v29  ;;  %6907 = vmatpush.bf16.msrb.mxu0 %v15659_v8  ;;  %v12871_v29 = vld [vmem:[#allocation5 + $0x274] sm:$0xf0]  ;;  %v11455_v8 = vld [vmem:[#allocation2 + $0x18] sm:$0xf] }
 0x48b   :  { %v15806_v11 = vor.u32 %v12871_v29, %v11787_v36  ;;  %v15811_v38 = vor.u32 %v12789_v19, %v11455_v8  ;;  %v11763_v29 = vld [vmem:[#allocation5 + $0x240] sm:$0xf]  ;;  %v12865_v36 = vld [vmem:[#allocation5 + $0x244] sm:$0xf0]  ;;  %v11755_v19 = vld [vmem:[#allocation5 + $0x230] sm:$0xf] }
 0x48c   :  { %v15826_v62 = vor.u32 %v12863_v9, %v11755_v19  ;;  %v12861_v8 = vld [vmem:[#allocation5 + $0x224] sm:$0xf0]  ;;  %v12687_v9 = vld [vmem:[%s16937_s5 + $0x70] sm:$0xff] }
 0x48d   :  { %v12857_v19 = vld [vmem:[#allocation5 + $0x204] sm:$0xf0] }
 0x48e   :  { %7746 = vmatpush.bf16.msrb.mxu3 %v15787_v18  ;;  %6908 = vmatpush.bf16.msrb.mxu0 %v15673_v39  ;;  %v15818_v39 = vor.u32 %v12867_v33, %v11771_v22  ;;  %17306 = vst [vmem:[#allocation60_spill] sm:$0xff] %v15826_v62  ;;  %v15828_v22 = vpop.f32.mrf.mxu1  ;;  %v11739_v33 = vld [vmem:[#allocation5 + $0x210] sm:$0xf] }
 0x492   :  { %7747 = vmatpush.bf16.msrb.mxu3 %v15796_v56  ;;  %6909 = vmatpush.bf16.msrb.mxu0 %v15688_v58  ;;  %v15822_v58 = vor.u32 %v12865_v36, %v11763_v29  ;;  %v12859_v29 = vld [vmem:[#allocation5 + $0x214] sm:$0xf0] }
 0x493   :  { %v15839_v36 = vor.u32 %v12859_v29, %v11739_v33  ;;  %v12686_v33 = vld [vmem:[%s16937_s5 + $0x68] sm:$0xff]  ;;  %v15857_v29 = vpop.f32.mrf.mxu0 }
 0x495   :  { %17308 = vst [vmem:[#allocation62_spill] sm:$0xff] %v15839_v36 }
 0x496   :  { %7748 = vmatpush.bf16.msrb.mxu3 %v15803_v42  ;;  %6910 = vmatpush.bf16.msrb.mxu0 %v15695_v49  ;;  %v11747_v49 = vld [vmem:[#allocation5 + $0x220] sm:$0xf] }
 0x499   :  { %7749 = vmatmul.bf16.vlgmr.msrb.gmra.mxu3 %v15811_v38 }
 0x49a   :  { %7797 = vmatpush.bf16.msra.mxu3 %v15806_v11  ;;  %6911 = vmatpush.bf16.msrb.mxu0 %v15706_v0  ;;  %v15832_v0 = vor.u32 %v12861_v8, %v11747_v49  ;;  %v12854_v49 = vld [vmem:[#allocation5 + $0x1f4] sm:$0xf]  ;;  %v11725_v8 = vld [vmem:[#allocation5 + $0x1f8] sm:$0xf0] }
 0x49c   :  { %17307 = vst [vmem:[#allocation61_spill] sm:$0xff] %v15832_v0 }
 0x49e   :  { %7798 = vmatpush.bf16.msra.mxu3 %v15813_v20  ;;  %6912 = vmatpush.bf16.msrb.mxu0 %v15713_v54  ;;  %v12688_v54 = vld [vmem:[%s16937_s5 + $0x78] sm:$0xff] }
 0x49f   :  { %6293 = vmatpush.bf16.msrb.mxu1 %v12688_v54  ;;  %v15846_v54 = vpop.f32.mrf.mxu1 }
 0x4a2   :  { %7799 = vmatpush.bf16.msra.mxu3 %v15818_v39  ;;  %6913 = vmatpush.bf16.msrb.mxu0 %v15722_v60  ;;  %v11731_v60 = vld [vmem:[#allocation5 + $0x200] sm:$0xf] }
 0x4a3   :  { %6294 = vmatpush.bf16.msrb.mxu1 %v12687_v9  ;;  %v11471_v9 = vld [vmem:[#allocation2 + $0x28] sm:$0xf] }
 0x4a6   :  { %7800 = vmatpush.bf16.msra.mxu3 %v15822_v58  ;;  %6914 = vmatpush.bf16.msrb.mxu0 %v15733_v52  ;;  %v15849_v52 = vor.u32 %v12857_v19, %v11731_v60  ;;  %v12685_v19 = vld [vmem:[%s16937_s5 + $0x60] sm:$0xff] }
 0x4a7   :  { %6295 = vmatpush.bf16.msrb.mxu1 %v12686_v33  ;;  %v12848_v33 = vld [vmem:[#allocation5 + $0x1c4] sm:$0xf] }
 0x4a8   :  { %17309 = vst [vmem:[#allocation63_spill] sm:$0xff] %v15849_v52 }
 0x4a9   :  { %6915 = vmatmul.bf16.vlgmr.msrb.gmra.mxu0 %v15457_v15  ;;  %v11717_v15 = vld [vmem:[#allocation5 + $0x1e8] sm:$0xf0] }
 0x4aa   :  { %7801 = vmatpush.bf16.msra.mxu3 %v15826_v62  ;;  %6997 = vmatpush.bf16.msra.mxu0 %v15362_v28  ;;  %v15852_v28 = vor.u32 %v12854_v49, %v11725_v8  ;;  %v12852_v62 = vld [vmem:[#allocation5 + $0x1e4] sm:$0xf]  ;;  %v12850_v49 = vld [vmem:[#allocation5 + $0x1d4] sm:$0xf]  ;;  %v11709_v8 = vld [vmem:[#allocation5 + $0x1d8] sm:$0xf0] }
 0x4ab   :  { %v15864_v60 = vor.u32 %v12852_v62, %v11717_v15  ;;  %6296 = vmatpush.bf16.msrb.mxu1 %v12685_v19  ;;  %v12684_v62 = vld [vmem:[%s16937_s5 + $0x58] sm:$0xff]  ;;  %v12683_v19 = vld [vmem:[%s16937_s5 + $0x50] sm:$0xff] }
 0x4ac   :  { %17310 = vst [vmem:[#allocation64_spill] sm:$0xff] %v15852_v28  ;;  %v11701_v15 = vld [vmem:[#allocation5 + $0x1c8] sm:$0xf0] }
 0x4ad   :  { %17311 = vst [vmem:[#allocation65_spill] sm:$0xff] %v15864_v60 }
 0x4ae   :  { %7802 = vmatpush.bf16.msra.mxu3 %v15832_v0  ;;  %6998 = vmatpush.bf16.msra.mxu0 %v15379_v6  ;;  %v12791_v0 = vld [vmem:[#allocation2 + $0x5c] sm:$0xf0] }
 0x4af   :  { %v15862_v6 = vor.u32 %v12791_v0, %v11471_v9  ;;  %v15877_v0 = vpop.f32.mrf.mxu1  ;;  %6297 = vmatpush.bf16.msrb.mxu1 %v12684_v62  ;;  %v15879_v9 = vpop.f32.mrf.mxu0 }
 0x4b2   :  { %7803 = vmatpush.bf16.msra.mxu3 %v15839_v36  ;;  %6999 = vmatpush.bf16.msra.mxu0 %v15394_v14  ;;  %v15872_v14 = vor.u32 %v12850_v49, %v11709_v8  ;;  %v12846_v49 = vld [vmem:[#allocation5 + $0x1b4] sm:$0xf]  ;;  %v11693_v8 = vld [vmem:[#allocation5 + $0x1b8] sm:$0xf0] }
 0x4b3   :  { %6298 = vmatpush.bf16.msrb.mxu1 %v12683_v19  ;;  %v15890_v62 = vor.u32 %v12846_v49, %v11693_v8  ;;  %v12842_v8 = vld [vmem:[#allocation5 + $0x194] sm:$0xf] }
 0x4b4   :  { %17312 = vst [vmem:[#allocation66_spill] sm:$0xff] %v15872_v14 }
 0x4b5   :  { %17314 = vst [vmem:[#allocation68_spill] sm:$0xff] %v15890_v62 }
 0x4b6   :  { %7804 = vmatpush.bf16.msra.mxu3 %v15849_v52  ;;  %7000 = vmatpush.bf16.msra.mxu0 %v15407_v55  ;;  %v15883_v55 = vor.u32 %v12848_v33, %v11701_v15  ;;  %v12844_v33 = vld [vmem:[#allocation5 + $0x1a4] sm:$0xf]  ;;  %v11685_v15 = vld [vmem:[#allocation5 + $0x1a8] sm:$0xf0]  ;;  %v12839_v52 = vld [vmem:[#allocation5 + $0x174] sm:$0xf0] }
 0x4b7   :  { %v15899_v19 = vor.u32 %v12844_v33, %v11685_v15  ;;  %v15904_v49 = vpop.f32.mrf.mxu0  ;;  %v12840_v15 = vld [vmem:[#allocation5 + $0x184] sm:$0xf] }
 0x4b8   :  { %17313 = vst [vmem:[#allocation67_spill] sm:$0xff] %v15883_v55 }
 0x4b9   :  { %7805 = vmatmul.bf16.vlgmr.msra.gmra.mxu3 %v15862_v6  ;;  %17315 = vst [vmem:[#allocation69_spill] sm:$0xff] %v15899_v19 }
 0x4ba   :  { %7853 = vmatpush.bf16.msrb.mxu3 %v15852_v28  ;;  %7001 = vmatpush.bf16.msra.mxu0 %v15416_v16  ;;  %v12682_v16 = vld [vmem:[%s16937_s5 + $0x48] sm:$0xff]  ;;  %v11659_v28 = vld [vmem:[#allocation5 + $0x170] sm:$0xf] }
 0x4bb   :  { %6299 = vmatpush.bf16.msrb.mxu1 %v12682_v16 }
 0x4be   :  { %7854 = vmatpush.bf16.msrb.mxu3 %v15864_v60  ;;  %7002 = vmatpush.bf16.msra.mxu0 %v15428_v44  ;;  %v12681_v44 = vld [vmem:[%s16937_s5 + $0x40] sm:$0xff]  ;;  %v12776_v60 = vld [vmem:[#allocation2 + $0x48] sm:$0xf0] }
 0x4bf   :  { %6300 = vmatpush.bf16.msrb.mxu1 %v12681_v44  ;;  %v12837_v44 = vld [vmem:[#allocation5 + $0x164] sm:$0xf0] }
 0x4c2   :  { %7855 = vmatpush.bf16.msrb.mxu3 %v15872_v14  ;;  %v15895_v14 = vpop.f32.mrf.mxu1  ;;  %7003 = vmatpush.bf16.msra.mxu0 %v15437_v13  ;;  %v11387_v13 = vld [vmem:[#allocation2 + $0x14] sm:$0xf] }
 0x4c3   :  { %6865 = vmatpush.bf16.msra.mxu1 %v15582_v48  ;;  %v15912_v33 = vor.u32 %v12776_v60, %v11387_v13  ;;  %v6102_v48 = vpop.f32.mrf.mxu0  ;;  %v11465_v60 = vld [vmem:[#allocation2 + $0x58] sm:$0xf0]  ;;  %v11643_v13 = vld [vmem:[#allocation5 + $0x150] sm:$0xf] }
 0x4c6   :  { %7856 = vmatpush.bf16.msrb.mxu3 %v15883_v55  ;;  %v11677_v55 = vld [vmem:[#allocation5 + $0x198] sm:$0xf0]  ;;  %7004 = vmatpush.bf16.msra.mxu0 %v15444_v17 }
 0x4c7   :  { %v15909_v16 = vor.u32 %v12842_v8, %v11677_v55  ;;  %6866 = vmatpush.bf16.msra.mxu1 %v15593_v41  ;;  %v11651_v55 = vld [vmem:[#allocation5 + $0x160] sm:$0xf]  ;;  %v12788_v8 = vld [vmem:[#allocation2 + $0x24] sm:$0xf] }
 0x4c8   :  { %v15928_v41 = vor.u32 %v12788_v8, %v11465_v60  ;;  %v11619_v8 = vld [vmem:[#allocation5 + $0x120] sm:$0xf] }
 0x4c9   :  { %17316 = vst [vmem:[#allocation70_spill] sm:$0xff] %v15909_v16  ;;  %7005 = vmatmul.bf16.vlgmr.msra.gmra.mxu0 %v15912_v33 }
 0x4ca   :  { %7857 = vmatpush.bf16.msrb.mxu3 %v15890_v62  ;;  %7053 = vmatpush.bf16.msrb.mxu0 %v15448_v31  ;;  %v11669_v62 = vld [vmem:[#allocation5 + $0x188] sm:$0xf0]  ;;  %v15914_v36 = vpop.f32.mrf.mxu1  ;;  %v15922_v31 = vor.u32 %v12839_v52, %v11659_v28  ;;  %17318 = vst [vmem:[#allocation72_spill] sm:$0xff] %v15928_v41  ;;  %v12833_v28 = vld [vmem:[#allocation5 + $0x144] sm:$0xf0] }
 0x4cb   :  { %v15919_v17 = vor.u32 %v12840_v15, %v11669_v62  ;;  %6867 = vmatpush.bf16.msra.mxu1 %v15606_v24  ;;  %v15930_v62 = vor.u32 %v12837_v44, %v11651_v55  ;;  %v6104_v15 = vpop.f32.mrf.mxu0  ;;  %v11627_v55 = vld [vmem:[#allocation5 + $0x130] sm:$0xf]  ;;  %v12831_v44 = vld [vmem:[#allocation5 + $0x134] sm:$0xf0] }
 0x4cd   :  { %17317 = vst [vmem:[#allocation71_spill] sm:$0xff] %v15919_v17 }
 0x4ce   :  { %7858 = vmatpush.bf16.msrb.mxu3 %v15899_v19  ;;  %7054 = vmatpush.bf16.msrb.mxu0 %v15461_v35  ;;  %v12835_v35 = vld [vmem:[#allocation5 + $0x154] sm:$0xf0] }
 0x4cf   :  { %6868 = vmatpush.bf16.msra.mxu1 %v15613_v46  ;;  %v15936_v24 = vor.u32 %v12835_v35, %v11643_v13  ;;  %v15946_v46 = vor.u32 %v12831_v44, %v11627_v55  ;;  %v12829_v13 = vld [vmem:[#allocation5 + $0x124] sm:$0xf0]  ;;  %v11611_v35 = vld [vmem:[#allocation5 + $0x110] sm:$0xf] }
 0x4d0   :  { %v12825_v44 = vld [vmem:[#allocation5 + $0x104] sm:$0xf0] }
 0x4d2   :  { %7859 = vmatpush.bf16.msrb.mxu3 %v15909_v16  ;;  %7055 = vmatpush.bf16.msrb.mxu0 %v15472_v7  ;;  %v6116_v52 = vpop.f32.mrf.mxu1  ;;  %v11635_v7 = vld [vmem:[#allocation5 + $0x140] sm:$0xf]  ;;  %v11803_v16 = vld [vmem:[#allocation2 + $0x24] sm:$0xf] }
 0x4d3   :  { %6869 = vmatpush.bf16.msra.mxu1 %v15622_v2  ;;  %v15941_v60 = vor.u32 %v12833_v28, %v11635_v7  ;;  %v6158_v2 = vpop.f32.mrf.mxu0  ;;  %v12778_v7 = vld [vmem:[#allocation2 + $0x58] sm:$0xf0]  ;;  %v11403_v28 = vld [vmem:[#allocation2 + $0x24] sm:$0xf] }
 0x4d6   :  { %7860 = vmatpush.bf16.msrb.mxu3 %v15919_v17  ;;  %7056 = vmatpush.bf16.msrb.mxu0 %v15479_v1 }
 0x4d7   :  { %6870 = vmatpush.bf16.msra.mxu1 %v15631_v12  ;;  %v12827_v12 = vld [vmem:[#allocation5 + $0x114] sm:$0xf0] }
 0x4d8   :  { %v15956_v55 = vor.u32 %v12827_v12, %v11611_v35  ;;  %v5999_v12 = vadd.f32 %v15599_v26, %v15596_v50  ;;  %v17321_v26 = vld [vmem:[#allocation19_spill] sm:$0xff] }
 0x4d9   :  { %7861 = vmatmul.bf16.vlgmr.msrb.gmra.mxu3 %v15928_v41 }
 0x4da   :  { %7943 = vmatpush.bf16.msra.mxu3 %v15922_v31  ;;  %7057 = vmatpush.bf16.msrb.mxu0 %v15486_v63  ;;  %v6118_v1 = vpop.f32.mrf.mxu1  ;;  %v15951_v63 = vor.u32 %v12829_v13, %v11619_v8  ;;  %v12822_v8 = vld [vmem:[#allocation5 + $0xf4] sm:$0xf]  ;;  %v11597_v13 = vld [vmem:[#allocation5 + $0xf8] sm:$0xf0] }
 0x4db   :  { %6871 = vmatpush.bf16.msra.mxu1 %v15643_v5  ;;  %v11603_v5 = vld [vmem:[#allocation5 + $0x100] sm:$0xf]  ;;  %v6160_v41 = vpop.f32.mrf.mxu0  ;;  %v15967_v35 = vor.u32 %v12822_v8, %v11597_v13 }
 0x4de   :  { %7944 = vmatpush.bf16.msra.mxu3 %v15930_v62  ;;  %7058 = vmatpush.bf16.msrb.mxu0 %v15493_v37 }
 0x4df   :  { %6872 = vmatpush.bf16.msra.mxu1 %v15657_v34  ;;  %v6103_v34 = vadd.f32 %v6102_v48, %v15645_v25  ;;  %v6001_v25 = vadd.f32 %v15624_v3, %v15618_v59  ;;  %v6013_v48 = vadd.f32 %v15879_v9, %v5999_v12  ;;  %v5931_v59 = vadd.f32 %v17321_v26, %v15828_v22  ;;  %v12818_v9 = vld [vmem:[#allocation5 + $0xd4] sm:$0xf]  ;;  %v17328_v26 = vld [vmem:[#allocation52_spill] sm:$0xff] }
 0x4e0   :  { %v17323_v12 = vld [vmem:[#allocation51_spill] sm:$0xff] }
 0x4e1   :  { %v6117_v19 = vadd.f32 %v6116_v52, %v6103_v34  ;;  %v11581_v52 = vld [vmem:[#allocation5 + $0xd8] sm:$0xf0]  ;;  %v6015_v8 = vadd.f32 %v15904_v49, %v6001_v25  ;;  %v12816_v49 = vld [vmem:[#allocation5 + $0xc4] sm:$0xf] }
 0x4e2   :  { %7945 = vmatpush.bf16.msra.mxu3 %v15936_v24  ;;  %7059 = vmatpush.bf16.msrb.mxu0 %v15500_v61  ;;  %v6172_v37 = vpop.f32.mrf.mxu1  ;;  %v15959_v61 = vor.u32 %v12778_v7, %v11403_v28  ;;  %v12820_v7 = vld [vmem:[#allocation5 + $0xe4] sm:$0xf]  ;;  %v11589_v28 = vld [vmem:[#allocation5 + $0xe8] sm:$0xf0]  ;;  %v15992_v22 = vor.u32 %v12818_v9, %v11581_v52  ;;  %v17329_v9 = vld [vmem:[#allocation48_spill] sm:$0xff] }
 0x4e3   :  { %v6173_v17 = vadd.f32 %v6172_v37, %v6158_v2  ;;  %v15981_v50 = vor.u32 %v12820_v7, %v11589_v28  ;;  %v17324_v7 = vld [vmem:[#allocation56_spill] sm:$0xff]  ;;  %v6029_v25 = vadd.f32 %v15914_v36, %v6015_v8  ;;  %v5971_v36 = vadd.f32 %v15846_v54, %v15790_v57  ;;  %v12812_v57 = vld [vmem:[#allocation5 + $0xa4] sm:$0xf]  ;;  %v11557_v54 = vld [vmem:[#allocation5 + $0xa8] sm:$0xf0] }
 0x4e4   :  { %v5945_v28 = vadd.f32 %v17324_v7, %v5931_v59 }
 0x4e5   :  { %v6043_v52 = vadd.f32 %v17329_v9, %v6029_v25  ;;  %v11579_v9 = vld [vmem:[#allocation5 + $0xd0] sm:$0xf] }
 0x4e6   :  { %7946 = vmatpush.bf16.msra.mxu3 %v15941_v60  ;;  %7060 = vmatpush.bf16.msrb.mxu0 %v15509_v4  ;;  %v15964_v4 = vor.u32 %v12825_v44, %v11603_v5  ;;  %v6187_v5 = vadd.f32 %v15741_v23, %v6173_v17  ;;  %v17320_v44 = vld [vmem:[#allocation50_spill] sm:$0xff]  ;;  %v6214_v13 = vpop.f32.mrf.mxu0 }
 0x4e7   :  { %v17322_v23 = vld [vmem:[#allocation10_spill] sm:$0xff] }
 0x4e8   :  { %v6131_v17 = vadd.f32 %v17322_v23, %v6117_v19  ;;  %v5959_v19 = vadd.f32 %v15857_v29, %v5945_v28 }
 0x4e9   :  { %7061 = vmatmul.bf16.vlgmr.msrb.gmra.mxu0 %v15959_v61 }
 0x4ea   :  { %7947 = vmatpush.bf16.msra.mxu3 %v15946_v46  ;;  %7109 = vmatpush.bf16.msra.mxu0 %v15514_v47  ;;  %v12875_v47 = vld [vmem:[#allocation2 + $0x58] sm:$0xf0]  ;;  %v6174_v3 = vpop.f32.mrf.mxu1 }
 0x4eb   :  { %v15975_v2 = vor.u32 %v12875_v47, %v11803_v16  ;;  %v6175_v16 = vadd.f32 %v6174_v3, %v6160_v41  ;;  %v6201_v47 = vadd.f32 %v15747_v27, %v6187_v5  ;;  %v11573_v41 = vld [vmem:[#allocation5 + $0xc8] sm:$0xf0]  ;;  %v17326_v27 = vld [vmem:[#allocation31_spill] sm:$0xff]  ;;  %v17327_v5 = vld [vmem:[#allocation28_spill] sm:$0xff] }
 0x4ec   :  { %v16003_v59 = vor.u32 %v12816_v49, %v11573_v41  ;;  %v12814_v3 = vld [vmem:[#allocation5 + $0xb4] sm:$0xf]  ;;  %v11595_v49 = vld [vmem:[#allocation5 + $0xf0] sm:$0xf] }
 0x4ee   :  { %7948 = vmatpush.bf16.msra.mxu3 %v15951_v63  ;;  %7110 = vmatpush.bf16.msra.mxu0 %v15524_v21  ;;  %v17319_v21 = vld [vmem:[#allocation29_spill] sm:$0xff]  ;;  %v6216_v23 = vpop.f32.mrf.mxu0 }
 0x4ef   :  { %v6105_v37 = vadd.f32 %v6104_v15, %v17319_v21  ;;  %v6027_v15 = vadd.f32 %v15895_v14, %v6013_v48  ;;  %v6189_v14 = vadd.f32 %v15769_v43, %v6175_v16  ;;  %v6215_v48 = vadd.f32 %v6214_v13, %v6201_v47  ;;  %v11565_v43 = vld [vmem:[#allocation5 + $0xb8] sm:$0xf0] }
 0x4f0   :  { %v5973_v16 = vadd.f32 %v15877_v0, %v5959_v19  ;;  %v16013_v47 = vor.u32 %v12814_v3, %v11565_v43  ;;  %v17331_v0 = vld [vmem:[#allocation54_spill] sm:$0xff]  ;;  %v12993_v19 = vld [vmem:[%s16936_s4] ss:$0 sm:$0xff]  ;;  %v12808_v3 = vld [vmem:[#allocation5 + $0x84] sm:$0xf] }
 0x4f1   :  { %v6119_v34 = vadd.f32 %v6118_v1, %v6105_v37  ;;  %v17325_v1 = vld [vmem:[#allocation22_spill] sm:$0xff]  ;;  %v6203_v8 = vadd.f32 %v15775_v10, %v6189_v14  ;;  %v12823_v10 = vld [vmem:[#allocation5 + $0xf4] sm:$0xf0]  ;;  %v12810_v14 = vld [vmem:[#allocation5 + $0x94] sm:$0xf] }
 0x4f2   :  { %7949 = vmatpush.bf16.msra.mxu3 %v15956_v55  ;;  %7111 = vmatpush.bf16.msra.mxu0 %v17320_v44  ;;  %v6041_v21 = vadd.f32 %v17325_v1, %v6027_v15  ;;  %v6145_v44 = vadd.f32 %v17327_v5, %v6131_v17  ;;  %v6046_v7 = vmax.f32 %v5973_v16, %v6043_v52  ;;  %v11541_v43 = vld [vmem:[#allocation5 + $0x88] sm:$0xf0]  ;;  %v12819_v52 = vld [vmem:[#allocation5 + $0xd4] sm:$0xf0] }
 0x4f3   :  { %v6133_v37 = vadd.f32 %v17326_v27, %v6119_v34  ;;  %v6217_v13 = vadd.f32 %v6216_v23, %v6203_v8  ;;  %v17330_v34 = vld [vmem:[#allocation53_spill] sm:$0xff]  ;;  %v16019_v25 = vor.u32 %v12823_v10, %v11595_v49  ;;  %v16034_v16 = vor.u32 %v12808_v3, %v11541_v43  ;;  %v11797_v23 = vld [vmem:[#allocation2 + $0x54] sm:$0xf0]  ;;  %v17337_v49 = vld [vmem:[#allocation40_spill] sm:$0xff] }
 0x4f4   :  { %v6219_v29 = vmax.f32 %v6145_v44, %v6215_v48  ;;  %v6045_v15 = vmax.f32 %v5971_v36, %v6041_v21  ;;  %v11549_v48 = vld [vmem:[#allocation5 + $0x98] sm:$0xf0]  ;;  %v11587_v27 = vld [vmem:[#allocation5 + $0xe0] sm:$0xf]  ;;  %v17332_v44 = vld [vmem:[#allocation55_spill] sm:$0xff] }
 0x4f5   :  { %v6147_v17 = vadd.f32 %v15724_v40, %v6133_v37  ;;  %v16017_v40 = vor.u32 %v12812_v57, %v11557_v54  ;;  %v12821_v37 = vld [vmem:[#allocation5 + $0xe4] sm:$0xf0]  ;;  %v17334_v8 = vld [vmem:[#allocation9_spill] sm:$0xff]  ;;  %v12872_v57 = vld [vmem:[#allocation2 + $0x20] sm:$0xf] }
 0x4f6   :  { %7950 = vmatpush.bf16.msra.mxu3 %v15964_v4  ;;  %7112 = vmatpush.bf16.msra.mxu0 %v17323_v12  ;;  %v6221_v12 = vmax.f32 %v6045_v15, %v6219_v29  ;;  %v16029_v36 = vor.u32 %v12821_v37, %v11587_v27  ;;  %v17333_v29 = vld [vmem:[#allocation26_spill] sm:$0xff]  ;;  %v16037_v15 = vor.u32 %v12819_v52, %v11579_v9  ;;  %v11547_v27 = vld [vmem:[#allocation5 + $0x90] sm:$0xf]  ;;  %v12811_v37 = vld [vmem:[#allocation5 + $0x94] sm:$0xf0] }
 0x4f7   :  { %v6220_v28 = vmax.f32 %v6147_v17, %v6217_v13  ;;  %v11571_v17 = vld [vmem:[#allocation5 + $0xc0] sm:$0xf]  ;;  %v12817_v13 = vld [vmem:[#allocation5 + $0xc4] sm:$0xf0]  ;;  %v16042_v54 = vor.u32 %v12872_v57, %v11797_v23  ;;  %v17341_v43 = vld [vmem:[#allocation11_spill] sm:$0xff] }
 0x4f8   :  { %v6223_v1 = vadd.f32 %v12993_v19, %v6221_v12  ;;  %v16044_v12 = vor.u32 %v12817_v13, %v11571_v17  ;;  %v12809_v3 = vld [vmem:[#allocation5 + $0x84] sm:$0xf0]  ;;  %v12806_v9 = vld [vmem:[#allocation5 + $0x74] sm:$0xf]  ;;  %v11533_v52 = vld [vmem:[#allocation5 + $0x78] sm:$0xf0] }
 0x4f9   :  { %7951 = vmatmul.bf16.vlgmr.msra.gmra.mxu3 %v15975_v2  ;;  %v6222_v41 = vmax.f32 %v6046_v7, %v6220_v28  ;;  %17336 = vst [vmem:[#allocation29_spill] sm:$0xff] %v16042_v54  ;;  %v11563_v7 = vld [vmem:[#allocation5 + $0xb0] sm:$0xf]  ;;  %v12815_v28 = vld [vmem:[#allocation5 + $0xb4] sm:$0xf0] }
 0x4fa   :  { %7999 = vmatpush.bf16.msrb.mxu3 %v15967_v35  ;;  %7113 = vmatpush.bf16.msra.mxu0 %v17328_v26  ;;  %v16026_v26 = vor.u32 %v12810_v14, %v11549_v48  ;;  %v11555_v14 = vld [vmem:[#allocation5 + $0xa0] sm:$0xf]  ;;  %v12813_v48 = vld [vmem:[#allocation5 + $0xa4] sm:$0xf0]  ;;  %v17342_v23 = vld [vmem:[#allocation35_spill] sm:$0xff] }
 0x4fb   :  { %v6224_v21 = vadd.f32 %v12993_v19, %v6222_v41  ;;  %v17338_v19 = vld [vmem:[#allocation34_spill] sm:$0xff]  ;;  %v11457_v17 = vld [vmem:[#allocation2 + $0x50] sm:$0xf0] }
 0x4fc   :  { %v12804_v13 = vld [vmem:[#allocation5 + $0x64] sm:$0xf]  ;;  %v12787_v57 = vld [vmem:[#allocation2 + $0x1c] sm:$0xf] }
 0x4fd   :  { %v6227_v5 = vpack.c.bf16 %v6224_v21, %v6223_v1  ;;  %v16056_v1 = vor.u32 %v12813_v48, %v11555_v14  ;;  %v17339_v21 = vld [vmem:[#allocation23_spill] sm:$0xff]  ;;  %v17344_v14 = vld [vmem:[#allocation37_spill] sm:$0xff] }
 0x4fe   :  { %8000 = vmatpush.bf16.msrb.mxu3 %v15981_v50  ;;  %7114 = vmatpush.bf16.msra.mxu0 %v17330_v34  ;;  %v17335_v34 = vld [vmem:[#allocation25_spill] sm:$0xff] }
 0x4ff   :  { %6301 = vmatmul.bf16.vlgmr.msrb.gmra.mxu1 %v6227_v5  ;;  %v17340_v5 = vld [vmem:[#allocation32_spill] sm:$0xff] }
 0x500   :  { %6921 = vmatpush.bf16.msrb.mxu1 %v17333_v29 }
 0x502   :  { %8001 = vmatpush.bf16.msrb.mxu3 %v15992_v22  ;;  %7115 = vmatpush.bf16.msra.mxu0 %v17331_v0  ;;  %v16052_v0 = vor.u32 %v12815_v28, %v11563_v7  ;;  %v16072_v7 = vor.u32 %v12787_v57, %v11457_v17  ;;  %v11485_v17 = vld [vmem:[#allocation5 + $0x18] sm:$0xf0]  ;;  %v12792_v57 = vld [vmem:[#allocation5 + $0x4] sm:$0xf] }
 0x504   :  { %6922 = vmatpush.bf16.msrb.mxu1 %v17335_v34  ;;  %v11525_v34 = vld [vmem:[#allocation5 + $0x68] sm:$0xf0] }
 0x505   :  { %v16074_v28 = vor.u32 %v12804_v13, %v11525_v34  ;;  %v17352_v13 = vld [vmem:[#allocation18_spill] sm:$0xff] }
 0x506   :  { %8002 = vmatpush.bf16.msrb.mxu3 %v16003_v59  ;;  %7116 = vmatpush.bf16.msra.mxu0 %v17332_v44  ;;  %v6860_v10 = vpop.f32.mrf.mxu0  ;;  %v11539_v44 = vld [vmem:[#allocation5 + $0x80] sm:$0xf] }
 0x507   :  { %v16049_v41 = vadd.f32 %v6860_v10, %v15792_v51  ;;  %v16061_v51 = vor.u32 %v12811_v37, %v11547_v27  ;;  %v16065_v29 = vor.u32 %v12809_v3, %v11539_v44  ;;  %17343 = vst [vmem:[#allocation50_spill] sm:$0xff] %v16074_v28  ;;  %v11517_v10 = vld [vmem:[#allocation5 + $0x58] sm:$0xf0]  ;;  %v17346_v27 = vld [vmem:[#allocation15_spill] sm:$0xff] }
 0x508   :  { %6923 = vmatpush.bf16.msrb.mxu1 %v17337_v49  ;;  %v12802_v49 = vld [vmem:[#allocation5 + $0x54] sm:$0xf]  ;;  %v17348_v44 = vld [vmem:[#allocation44_spill] sm:$0xff] }
 0x509   :  { %7117 = vmatmul.bf16.vlgmr.msra.gmra.mxu0 %v17334_v8  ;;  %v16067_v8 = vor.u32 %v12806_v9, %v11533_v52  ;;  %v16081_v48 = vor.u32 %v12802_v49, %v11517_v10  ;;  %v17350_v9 = vld [vmem:[#allocation42_spill] sm:$0xff] }
 0x50a   :  { %8003 = vmatpush.bf16.msrb.mxu3 %v16013_v47  ;;  %7755 = vmatpush.bf16.msrb.mxu0 %v16019_v25  ;;  %v11477_v49 = vld [vmem:[#allocation5 + $0x8] sm:$0xf0] }
 0x50b   :  { %17345 = vst [vmem:[#allocation19_spill] sm:$0xff] %v16081_v48  ;;  %v17354_v10 = vld [vmem:[#allocation46_spill] sm:$0xff] }
 0x50c   :  { %6924 = vmatpush.bf16.msrb.mxu1 %v17338_v19  ;;  %v12800_v19 = vld [vmem:[#allocation5 + $0x44] sm:$0xf] }
 0x50e   :  { %8004 = vmatpush.bf16.msrb.mxu3 %v16017_v40  ;;  %7756 = vmatpush.bf16.msrb.mxu0 %v16029_v36 }
 0x50f   :  { %6873 = vmatmul.bf16.vlgmr.msra.gmra.mxu1 %v17339_v21  ;;  %v11509_v21 = vld [vmem:[#allocation5 + $0x48] sm:$0xf0] }
 0x510   :  { %6925 = vmatpush.bf16.msrb.mxu1 %v17340_v5  ;;  %v16085_v37 = vor.u32 %v12800_v19, %v11509_v21  ;;  %v11501_v5 = vld [vmem:[#allocation5 + $0x38] sm:$0xf0]  ;;  %v16101_v21 = vor.u32 %v12792_v57, %v11477_v49  ;;  %v12864_v57 = vld [vmem:[#allocation5 + $0x244] sm:$0xf]  ;;  %v11765_v49 = vld [vmem:[#allocation5 + $0x248] sm:$0xf0] }
 0x511   :  { %v11789_v19 = vld [vmem:[#allocation5 + $0x278] sm:$0xf0] }
 0x512   :  { %8005 = vmatpush.bf16.msrb.mxu3 %v16026_v26  ;;  %7757 = vmatpush.bf16.msrb.mxu0 %v16037_v15  ;;  %17347 = vst [vmem:[#allocation10_spill] sm:$0xff] %v16085_v37 }
 0x513   :  { %17355 = vst [vmem:[#allocation31_spill] sm:$0xff] %v16101_v21 }
 0x514   :  { %6926 = vmatpush.bf16.msrb.mxu1 %v17341_v43  ;;  %v11493_v43 = vld [vmem:[#allocation5 + $0x28] sm:$0xf0] }
 0x516   :  { %8006 = vmatpush.bf16.msrb.mxu3 %v16034_v16  ;;  %7758 = vmatpush.bf16.msrb.mxu0 %v16044_v12 }
 0x518   :  { %6927 = vmatpush.bf16.msrb.mxu1 %v17342_v23  ;;  %v12794_v23 = vld [vmem:[#allocation5 + $0x14] sm:$0xf] }
 0x519   :  { %8007 = vmatmul.bf16.vlgmr.msrb.gmra.mxu3 %v16042_v54  ;;  %v16097_v34 = vor.u32 %v12794_v23, %v11485_v17  ;;  %v11773_v23 = vld [vmem:[#allocation5 + $0x258] sm:$0xf0]  ;;  %v17360_v17 = vld [vmem:[#allocation27_spill] sm:$0xff] }
 0x51a   :  { %7759 = vmatpush.bf16.msrb.mxu0 %v16052_v0  ;;  %v17420_v54 = vld [vmem:[#allocation64_spill] sm:$0xff] }
 0x51b   :  { %17353 = vst [vmem:[#allocation22_spill] sm:$0xff] %v16097_v34 }
 0x51c   :  { %6928 = vmatpush.bf16.msrb.mxu1 %v15736_v30  ;;  %v12798_v30 = vld [vmem:[#allocation5 + $0x34] sm:$0xf] }
 0x51d   :  { %v16089_v3 = vor.u32 %v12798_v30, %v11501_v5  ;;  %v17357_v30 = vld [vmem:[#allocation21_spill] sm:$0xff] }
 0x51e   :  { %7760 = vmatpush.bf16.msrb.mxu0 %v16056_v1  ;;  %v12868_v5 = vld [vmem:[#allocation5 + $0x264] sm:$0xf] }
 0x51f   :  { %6929 = vmatmul.bf16.vlgmr.msrb.gmra.mxu1 %v15799_v53  ;;  %17349 = vst [vmem:[#allocation51_spill] sm:$0xff] %v16089_v3  ;;  %v12796_v53 = vld [vmem:[#allocation5 + $0x24] sm:$0xf] }
 0x520   :  { %7011 = vmatpush.bf16.msra.mxu1 %v17344_v14  ;;  %v16093_v52 = vor.u32 %v12796_v53, %v11493_v43  ;;  %v12870_v14 = vld [vmem:[#allocation5 + $0x274] sm:$0xf]  ;;  %v17359_v43 = vld [vmem:[#allocation24_spill] sm:$0xff] }
 0x522   :  { %7761 = vmatpush.bf16.msrb.mxu0 %v16061_v51  ;;  %17351 = vst [vmem:[#allocation56_spill] sm:$0xff] %v16093_v52 }
 0x524   :  { %7012 = vmatpush.bf16.msra.mxu1 %v17346_v27  ;;  %v16103_v27 = vor.u32 %v12870_v14, %v11789_v19  ;;  %v16119_v14 = vor.u32 %v12864_v57, %v11765_v49  ;;  %v12862_v19 = vld [vmem:[#allocation5 + $0x234] sm:$0xf]  ;;  %v17368_v57 = vld [vmem:[#allocation41_spill] sm:$0xff] }
 0x526   :  { %7762 = vmatpush.bf16.msrb.mxu0 %v16065_v29  ;;  %17356 = vst [vmem:[#allocation28_spill] sm:$0xff] %v16103_v27 }
 0x527   :  { %17363 = vst [vmem:[#allocation53_spill] sm:$0xff] %v16119_v14 }
 0x528   :  { %7013 = vmatpush.bf16.msra.mxu1 %v17348_v44  ;;  %v11781_v44 = vld [vmem:[#allocation5 + $0x268] sm:$0xf0] }
 0x529   :  { %7763 = vmatmul.bf16.vlgmr.msrb.gmra.mxu0 %v16072_v7  ;;  %v16108_v53 = vor.u32 %v12868_v5, %v11781_v44  ;;  %v17364_v5 = vld [vmem:[#allocation33_spill] sm:$0xff]  ;;  %v11749_v44 = vld [vmem:[#allocation5 + $0x228] sm:$0xf0] }
 0x52a   :  { %7811 = vmatpush.bf16.msra.mxu0 %v16067_v8 }
 0x52b   :  { %17358 = vst [vmem:[#allocation52_spill] sm:$0xff] %v16108_v53 }
 0x52c   :  { %7014 = vmatpush.bf16.msra.mxu1 %v17350_v9  ;;  %v12866_v9 = vld [vmem:[#allocation5 + $0x254] sm:$0xf] }
 0x52e   :  { %7812 = vmatpush.bf16.msra.mxu0 %v16074_v28  ;;  %v12933_v28 = vld [vmem:[#allocation5 + $0x154] sm:$0xf0] }
 0x530   :  { %7015 = vmatpush.bf16.msra.mxu1 %v17352_v13  ;;  %v16115_v13 = vor.u32 %v12866_v9, %v11773_v23  ;;  %v12858_v23 = vld [vmem:[#allocation5 + $0x214] sm:$0xf] }
 0x532   :  { %7813 = vmatpush.bf16.msra.mxu0 %v16081_v48  ;;  %17361 = vst [vmem:[#allocation48_spill] sm:$0xff] %v16115_v13 }
 0x534   :  { %7016 = vmatpush.bf16.msra.mxu1 %v17354_v10  ;;  %v17362_v10 = vld [vmem:[#allocation30_spill] sm:$0xff] }
 0x536   :  { %7814 = vmatpush.bf16.msra.mxu0 %v16085_v37 }
 0x538   :  { %7017 = vmatpush.bf16.msra.mxu1 %v17357_v30  ;;  %v11757_v30 = vld [vmem:[#allocation5 + $0x238] sm:$0xf0] }
 0x53a   :  { %7815 = vmatpush.bf16.msra.mxu0 %v16089_v3 }
 0x53c   :  { %7018 = vmatpush.bf16.msra.mxu1 %v17359_v43  ;;  %v17366_v43 = vld [vmem:[#allocation36_spill] sm:$0xff] }
 0x53e   :  { %7816 = vmatpush.bf16.msra.mxu0 %v16093_v52  ;;  %v12779_v52 = vld [vmem:[%s16937_s5 + $0x80] sm:$0xff] }
 0x53f   :  { %7019 = vmatmul.bf16.vlgmr.msra.gmra.mxu1 %v15750_v45  ;;  %v12860_v45 = vld [vmem:[#allocation5 + $0x224] sm:$0xf] }
 0x540   :  { %7067 = vmatpush.bf16.msrb.mxu1 %v17360_v17  ;;  %v16127_v9 = vor.u32 %v12860_v45, %v11749_v44  ;;  %v11741_v17 = vld [vmem:[#allocation5 + $0x218] sm:$0xf0]  ;;  %v17372_v44 = vld [vmem:[#allocation47_spill] sm:$0xff] }
 0x541   :  { %v16131_v49 = vor.u32 %v12858_v23, %v11741_v17  ;;  %v17373_v17 = vld [vmem:[#allocation49_spill] sm:$0xff] }
 0x542   :  { %7817 = vmatpush.bf16.msra.mxu0 %v16097_v34  ;;  %17367 = vst [vmem:[#allocation55_spill] sm:$0xff] %v16127_v9  ;;  %v17381_v34 = vld [vmem:[#allocation57_spill] sm:$0xff] }
 0x543   :  { %17369 = vst [vmem:[#allocation26_spill] sm:$0xff] %v16131_v49 }
 0x544   :  { %7068 = vmatpush.bf16.msrb.mxu1 %v17362_v10  ;;  %v12856_v10 = vld [vmem:[#allocation5 + $0x204] sm:$0xf] }
 0x546   :  { %7818 = vmatpush.bf16.msra.mxu0 %v16101_v21  ;;  %v11653_v21 = vld [vmem:[#allocation5 + $0x168] sm:$0xf0] }
 0x548   :  { %7069 = vmatpush.bf16.msrb.mxu1 %v17364_v5  ;;  %v11733_v5 = vld [vmem:[#allocation5 + $0x208] sm:$0xf0] }
 0x549   :  { %7819 = vmatmul.bf16.vlgmr.msra.gmra.mxu0 %v15811_v38  ;;  %v16123_v38 = vor.u32 %v12862_v19, %v11757_v30  ;;  %v17370_v19 = vld [vmem:[#allocation45_spill] sm:$0xff]  ;;  %v11723_v30 = vld [vmem:[#allocation5 + $0x1f0] sm:$0xf] }
 0x54a   :  { %7867 = vmatpush.bf16.msrb.mxu0 %v16103_v27  ;;  %v11805_v27 = vld [vmem:[#allocation2 + $0x5c] sm:$0xf0] }
 0x54b   :  { %17365 = vst [vmem:[#allocation54_spill] sm:$0xff] %v16123_v38 }
 0x54c   :  { %7070 = vmatpush.bf16.msrb.mxu1 %v17366_v43  ;;  %v16135_v43 = vor.u32 %v12856_v10, %v11733_v5  ;;  %v11699_v10 = vld [vmem:[#allocation5 + $0x1c0] sm:$0xf]  ;;  %v12849_v5 = vld [vmem:[#allocation5 + $0x1c4] sm:$0xf0] }
 0x54e   :  { %7868 = vmatpush.bf16.msrb.mxu0 %v16108_v53  ;;  %17371 = vst [vmem:[#allocation9_spill] sm:$0xff] %v16135_v43  ;;  %v11661_v53 = vld [vmem:[#allocation5 + $0x178] sm:$0xf0] }
 0x550   :  { %7071 = vmatpush.bf16.msrb.mxu1 %v17368_v57  ;;  %v12853_v57 = vld [vmem:[#allocation5 + $0x1e4] sm:$0xf0] }
 0x552   :  { %7869 = vmatpush.bf16.msrb.mxu0 %v16115_v13  ;;  %v17374_v13 = vld [vmem:[#allocation14_spill] sm:$0xff] }
 0x554   :  { %7072 = vmatpush.bf16.msrb.mxu1 %v17370_v19  ;;  %v11707_v19 = vld [vmem:[#allocation5 + $0x1d0] sm:$0xf] }
 0x556   :  { %7870 = vmatpush.bf16.msrb.mxu0 %v16119_v14  ;;  %v12855_v14 = vld [vmem:[#allocation5 + $0x1f4] sm:$0xf0] }
 0x557   :  { %v16137_v45 = vor.u32 %v12855_v14, %v11723_v30  ;;  %v17375_v30 = vld [vmem:[#allocation13_spill] sm:$0xff] }
 0x558   :  { %7073 = vmatpush.bf16.msrb.mxu1 %v17372_v44  ;;  %v11691_v44 = vld [vmem:[#allocation5 + $0x1b0] sm:$0xf] }
 0x55a   :  { %7871 = vmatpush.bf16.msrb.mxu0 %v16123_v38  ;;  %v11715_v38 = vld [vmem:[#allocation5 + $0x1e0] sm:$0xf] }
 0x55b   :  { %v16142_v23 = vor.u32 %v12853_v57, %v11715_v38  ;;  %v16153_v38 = vor.u32 %v12849_v5, %v11699_v10  ;;  %v12847_v57 = vld [vmem:[#allocation5 + $0x1b4] sm:$0xf0] }
 0x55c   :  { %7074 = vmatpush.bf16.msrb.mxu1 %v17373_v17  ;;  %v17376_v17 = vld [vmem:[#allocation38_spill] sm:$0xff]  ;;  %v17378_v10 = vld [vmem:[#allocation16_spill] sm:$0xff] }
 0x55e   :  { %7872 = vmatpush.bf16.msrb.mxu0 %v16127_v9  ;;  %v12851_v9 = vld [vmem:[#allocation5 + $0x1d4] sm:$0xf0] }
 0x55f   :  { %7075 = vmatmul.bf16.vlgmr.msrb.gmra.mxu1 %v15912_v33  ;;  %v16149_v14 = vor.u32 %v12851_v9, %v11707_v19  ;;  %v11683_v33 = vld [vmem:[#allocation5 + $0x1a0] sm:$0xf] }
 0x560   :  { %7123 = vmatpush.bf16.msra.mxu1 %v17374_v13  ;;  %v12845_v13 = vld [vmem:[#allocation5 + $0x1a4] sm:$0xf0]  ;;  %v17377_v9 = vld [vmem:[#allocation17_spill] sm:$0xff] }
 0x561   :  { %v16161_v19 = vor.u32 %v12845_v13, %v11683_v33  ;;  %v17380_v13 = vld [vmem:[#allocation20_spill] sm:$0xff] }
 0x562   :  { %7873 = vmatpush.bf16.msrb.mxu0 %v16131_v49  ;;  %v12841_v49 = vld [vmem:[#allocation5 + $0x184] sm:$0xf0] }
 0x564   :  { %7124 = vmatpush.bf16.msra.mxu1 %v17375_v30  ;;  %v11675_v30 = vld [vmem:[#allocation5 + $0x190] sm:$0xf] }
 0x566   :  { %7874 = vmatpush.bf16.msrb.mxu0 %v16135_v43  ;;  %v12843_v43 = vld [vmem:[#allocation5 + $0x194] sm:$0xf0] }
 0x567   :  { %v16165_v5 = vor.u32 %v12843_v43, %v11675_v30  ;;  %v12873_v43 = vld [vmem:[#allocation2 + $0x28] sm:$0xf] }
 0x568   :  { %7125 = vmatpush.bf16.msra.mxu1 %v17376_v17  ;;  %v11667_v17 = vld [vmem:[#allocation5 + $0x180] sm:$0xf]  ;;  %v16176_v30 = vor.u32 %v12873_v43, %v11805_v27  ;;  %v11629_v27 = vld [vmem:[#allocation5 + $0x138] sm:$0xf0] }
 0x569   :  { %7875 = vmatmul.bf16.vlgmr.msrb.gmra.mxu0 %v15862_v6  ;;  %v16157_v6 = vor.u32 %v12847_v57, %v11691_v44  ;;  %v17379_v44 = vld [vmem:[#allocation43_spill] sm:$0xff] }
 0x56a   :  { %7957 = vmatpush.bf16.msra.mxu0 %v16137_v45  ;;  %v12838_v57 = vld [vmem:[#allocation5 + $0x174] sm:$0xf] }
 0x56b   :  { %v16171_v33 = vor.u32 %v12838_v57, %v11661_v53  ;;  %v12832_v57 = vld [vmem:[#allocation5 + $0x144] sm:$0xf] }
 0x56c   :  { %7126 = vmatpush.bf16.msra.mxu1 %v17377_v9  ;;  %v16169_v9 = vor.u32 %v12841_v49, %v11667_v17  ;;  %v12834_v49 = vld [vmem:[#allocation5 + $0x154] sm:$0xf]  ;;  %v11645_v17 = vld [vmem:[#allocation5 + $0x158] sm:$0xf0] }
 0x56d   :  { %v16185_v53 = vor.u32 %v12834_v49, %v11645_v17  ;;  %v11621_v49 = vld [vmem:[#allocation5 + $0x128] sm:$0xf0]  ;;  %v12826_v17 = vld [vmem:[#allocation5 + $0x114] sm:$0xf] }
 0x56e   :  { %7958 = vmatpush.bf16.msra.mxu0 %v16142_v23 }
 0x570   :  { %7127 = vmatpush.bf16.msra.mxu1 %v17378_v10  ;;  %v12836_v10 = vld [vmem:[#allocation5 + $0x164] sm:$0xf] }
 0x572   :  { %7959 = vmatpush.bf16.msra.mxu0 %v16149_v14 }
 0x574   :  { %7128 = vmatpush.bf16.msra.mxu1 %v17379_v44  ;;  %v16178_v44 = vor.u32 %v12836_v10, %v11653_v21 }
 0x576   :  { %7960 = vmatpush.bf16.msra.mxu0 %v16153_v38 }
 0x578   :  { %7129 = vmatpush.bf16.msra.mxu1 %v17380_v13  ;;  %v11637_v13 = vld [vmem:[#allocation5 + $0x148] sm:$0xf0] }
 0x579   :  { %v16189_v21 = vor.u32 %v12832_v57, %v11637_v13  ;;  %v11613_v57 = vld [vmem:[#allocation5 + $0x118] sm:$0xf0] }
 0x57a   :  { %7961 = vmatpush.bf16.msra.mxu0 %v16157_v6  ;;  %v6226_v13 = vld [vmem:[%s16939_s7 + $0x8] sm:$0xff] }
 0x57c   :  { %7130 = vmatpush.bf16.msra.mxu1 %v17381_v34  ;;  %v12830_v34 = vld [vmem:[#allocation5 + $0x134] sm:$0xf] }
 0x57d   :  { %v16196_v43 = vor.u32 %v12830_v34, %v11629_v27 }
 0x57e   :  { %7962 = vmatpush.bf16.msra.mxu0 %v16161_v19 }
 0x57f   :  { %7131 = vmatmul.bf16.vlgmr.msra.gmra.mxu1 %v15959_v61  ;;  %v6302_v61 = vpop.f32.mrf.mxu1 }
 0x580   :  { %7769 = vmatpush.bf16.msrb.mxu1 %v15922_v31  ;;  %v6225_v31 = vld [vmem:[%s16939_s7] sm:$0xff] }
 0x581   :  { %v6307_v10 = vadd.f32 %v6302_v61, %v6225_v31  ;;  %v16211_v31 = vor.u32 %v12826_v17, %v11613_v57  ;;  %v11605_v61 = vld [vmem:[#allocation5 + $0x108] sm:$0xf0]  ;;  %v11931_v57 = vld [vmem:[#allocation5 + $0x60] sm:$0xf] }
 0x582   :  { %7963 = vmatpush.bf16.msra.mxu0 %v16165_v5 }
 0x583   :  { %6309 = vst.msk [vmem:[%s16939_s7] sm:$0xff] %vm4470_vm2, %v6307_v10  ;;  %v12905_v10 = vld [vmem:[#allocation5 + $0x74] sm:$0xf0] }
 0x584   :  { %7770 = vmatpush.bf16.msrb.mxu1 %v15930_v62  ;;  %v12828_v62 = vld [vmem:[#allocation5 + $0x124] sm:$0xf] }
 0x586   :  { %7964 = vmatpush.bf16.msra.mxu0 %v16169_v9 }
 0x587   :  { %v6304_v34 = vpop.f32.mrf.mxu1 }
 0x588   :  { %7771 = vmatpush.bf16.msrb.mxu1 %v15936_v24  ;;  %v16204_v24 = vor.u32 %v12828_v62, %v11621_v49  ;;  %v6308_v27 = vadd.f32 %v6304_v34, %v6226_v13  ;;  %v12903_v13 = vld [vmem:[#allocation5 + $0x64] sm:$0xf0] }
 0x589   :  { %7965 = vmatmul.bf16.vlgmr.msra.gmra.mxu0 %v16176_v30 }
 0x58a   :  { %8013 = vmatpush.bf16.msrb.mxu0 %v16171_v33  ;;  %6310 = vst.msk [vmem:[%s16939_s7 + $0x8] sm:$0xff] %vm4470_vm2, %v6308_v27  ;;  %v12790_v27 = vld [vmem:[#allocation2 + $0x54] sm:$0xf0] }
 0x58c   :  { %7772 = vmatpush.bf16.msrb.mxu1 %v15941_v60  ;;  %v12824_v60 = vld [vmem:[#allocation5 + $0x104] sm:$0xf] }
 0x58d   :  { %v16219_v62 = vor.u32 %v12824_v60, %v11605_v61  ;;  %v11463_v60 = vld [vmem:[#allocation2 + $0x20] sm:$0xf] }
 0x58e   :  { %8014 = vmatpush.bf16.msrb.mxu0 %v16178_v44  ;;  %v11923_v61 = vld [vmem:[#allocation5 + $0x50] sm:$0xf] }
 0x58f   :  { %v6874_v17 = vpop.f32.mrf.mxu1 }
 0x590   :  { %7773 = vmatpush.bf16.msrb.mxu1 %v15946_v46  ;;  %v11939_v46 = vld [vmem:[#allocation5 + $0x70] sm:$0xf]  ;;  %v16225_v34 = vadd.f32 %v6874_v17, %v16049_v41  ;;  %v12899_v17 = vld [vmem:[#allocation5 + $0x44] sm:$0xf0] }
 0x591   :  { %v16221_v49 = vor.u32 %v12905_v10, %v11939_v46  ;;  %v12901_v46 = vld [vmem:[#allocation5 + $0x54] sm:$0xf0]  ;;  %v11915_v10 = vld [vmem:[#allocation5 + $0x40] sm:$0xf] }
 0x592   :  { %8015 = vmatpush.bf16.msrb.mxu0 %v16185_v53  ;;  %v16238_v41 = vor.u32 %v12901_v46, %v11923_v61  ;;  %v12893_v61 = vld [vmem:[#allocation5 + $0x14] sm:$0xf0] }
 0x593   :  { %17382 = vst [vmem:[#allocation25_spill] sm:$0xff] %v16221_v49 }
 0x594   :  { %7774 = vmatpush.bf16.msrb.mxu1 %v15951_v63  ;;  %v16229_v63 = vor.u32 %v12903_v13, %v11931_v57  ;;  %17384 = vst [vmem:[#allocation34_spill] sm:$0xff] %v16238_v41  ;;  %v11907_v57 = vld [vmem:[#allocation5 + $0x30] sm:$0xf]  ;;  %v11899_v13 = vld [vmem:[#allocation5 + $0x20] sm:$0xf] }
 0x596   :  { %8016 = vmatpush.bf16.msrb.mxu0 %v16189_v21  ;;  %17383 = vst [vmem:[#allocation40_spill] sm:$0xff] %v16229_v63 }
 0x598   :  { %7775 = vmatpush.bf16.msrb.mxu1 %v15956_v55  ;;  %v16234_v55 = vor.u32 %v12790_v27, %v11463_v60  ;;  %v12895_v27 = vld [vmem:[#allocation5 + $0x24] sm:$0xf0] }
 0x599   :  { %v16250_v60 = vor.u32 %v12895_v27, %v11899_v13  ;;  %v16262_v13 = vpop.f32.mrf.mxu2  ;;  %v12187_v27 = vld [vmem:[#allocation5 + $0x260] sm:$0xf] }
 0x59a   :  { %8017 = vmatpush.bf16.msrb.mxu0 %v16196_v43 }
 0x59b   :  { %17387 = vst [vmem:[#allocation11_spill] sm:$0xff] %v16250_v60 }
 0x59c   :  { %7776 = vmatpush.bf16.msrb.mxu1 %v15964_v4  ;;  %v16242_v4 = vor.u32 %v12899_v17, %v11915_v10  ;;  %v12891_v10 = vld [vmem:[#allocation5 + $0x4] sm:$0xf0]  ;;  %v12195_v17 = vld [vmem:[#allocation5 + $0x270] sm:$0xf] }
 0x59e   :  { %8018 = vmatpush.bf16.msrb.mxu0 %v16204_v24  ;;  %17385 = vst [vmem:[#allocation23_spill] sm:$0xff] %v16242_v4 }
 0x59f   :  { %7777 = vmatmul.bf16.vlgmr.msrb.gmra.mxu1 %v16234_v55 }
 0x5a0   :  { %7825 = vmatpush.bf16.msra.mxu1 %v15967_v35  ;;  %v12897_v35 = vld [vmem:[#allocation5 + $0x34] sm:$0xf0] }
 0x5a2   :  { %8019 = vmatpush.bf16.msrb.mxu0 %v16211_v31 }
 0x5a4   :  { %7826 = vmatpush.bf16.msra.mxu1 %v15981_v50  ;;  %v11891_v50 = vld [vmem:[#allocation5 + $0x10] sm:$0xf] }
 0x5a5   :  { %v16254_v46 = vor.u32 %v12893_v61, %v11891_v50  ;;  %v12967_v50 = vld [vmem:[#allocation5 + $0x264] sm:$0xf0] }
 0x5a6   :  { %8020 = vmatpush.bf16.msrb.mxu0 %v16219_v62  ;;  %v12786_v61 = vld [vmem:[%s16937_s5 + $0xb8] sm:$0xff] }
 0x5a7   :  { %17388 = vst [vmem:[#allocation35_spill] sm:$0xff] %v16254_v46  ;;  %7211 = vmatpush.bf16.msrb.mxu2 %v12786_v61  ;;  %v12963_v61 = vld [vmem:[#allocation5 + $0x244] sm:$0xf0] }
 0x5a8   :  { %7827 = vmatpush.bf16.msra.mxu1 %v15992_v22  ;;  %v11883_v22 = vld [vmem:[#allocation5] sm:$0xf] }
 0x5a9   :  { %8021 = vmatmul.bf16.vlgmr.msrb.gmra.mxu0 %v15975_v2  ;;  %v16246_v2 = vor.u32 %v12897_v35, %v11907_v57  ;;  %v12969_v57 = vld [vmem:[#allocation5 + $0x274] sm:$0xf0] }
 0x5aa   :  { %8659 = vmatpush.bf16.msra.mxu0 %v16221_v49  ;;  %v16260_v35 = vor.u32 %v12969_v57, %v12195_v17  ;;  %v16274_v17 = vpop.f32.mrf.mxu3  ;;  %v12965_v57 = vld [vmem:[#allocation5 + $0x254] sm:$0xf0] }
 0x5ab   :  { %17386 = vst [vmem:[#allocation32_spill] sm:$0xff] %v16246_v2 }
 0x5ac   :  { %7828 = vmatpush.bf16.msra.mxu1 %v16003_v59  ;;  %v16258_v59 = vor.u32 %v12891_v10, %v11883_v22  ;;  %17390 = vst [vmem:[#allocation15_spill] sm:$0xff] %v16260_v35  ;;  %v16272_v10 = vor.u32 %v12967_v50, %v12187_v27  ;;  %v16286_v27 = vpop.f32.mrf.mxu2  ;;  %v16288_v50 = vpop.f32.mrf.mxu0 }
 0x5ae   :  { %8660 = vmatpush.bf16.msra.mxu0 %v16229_v63  ;;  %17389 = vst [vmem:[#allocation37_spill] sm:$0xff] %v16258_v59  ;;  %v12133_v63 = vld [vmem:[#allocation5 + $0x1f8] sm:$0xf0] }
 0x5af   :  { %17392 = vst [vmem:[#allocation42_spill] sm:$0xff] %v16272_v10 }
 0x5b0   :  { %7829 = vmatpush.bf16.msra.mxu1 %v16013_v47  ;;  %v12887_v47 = vld [vmem:[#allocation2 + $0x54] sm:$0xf0] }
 0x5b2   :  { %8661 = vmatpush.bf16.msra.mxu0 %v16238_v41 }
 0x5b4   :  { %7830 = vmatpush.bf16.msra.mxu1 %v16017_v40  ;;  %v11863_v40 = vld [vmem:[#allocation2 + $0x20] sm:$0xf] }
 0x5b5   :  { %v16270_v22 = vor.u32 %v12887_v47, %v11863_v40  ;;  %v12784_v40 = vld [vmem:[%s16937_s5 + $0xa8] sm:$0xff] }
 0x5b6   :  { %8662 = vmatpush.bf16.msra.mxu0 %v16242_v4  ;;  %v17400_v4 = vld [vmem:[#allocation59_spill] sm:$0xff] }
 0x5b7   :  { %17391 = vst [vmem:[#allocation44_spill] sm:$0xff] %v16270_v22 }
 0x5b8   :  { %7831 = vmatpush.bf16.msra.mxu1 %v16026_v26  ;;  %v12179_v26 = vld [vmem:[#allocation5 + $0x250] sm:$0xf] }
 0x5b9   :  { %v16284_v47 = vor.u32 %v12965_v57, %v12179_v26  ;;  %v16299_v26 = vpop.f32.mrf.mxu3  ;;  %v12163_v57 = vld [vmem:[#allocation5 + $0x230] sm:$0xf] }
 0x5ba   :  { %8663 = vmatpush.bf16.msra.mxu0 %v16246_v2  ;;  %v16308_v2 = vpop.f32.mrf.mxu0 }
 0x5bb   :  { %17394 = vst [vmem:[#allocation18_spill] sm:$0xff] %v16284_v47 }
 0x5bc   :  { %7832 = vmatpush.bf16.msra.mxu1 %v16034_v16  ;;  %v12171_v16 = vld [vmem:[#allocation5 + $0x240] sm:$0xf] }
 0x5be   :  { %8664 = vmatpush.bf16.msra.mxu0 %v16250_v60  ;;  %v17397_v60 = vld [vmem:[#allocation58_spill] sm:$0xff] }
 0x5bf   :  { %7833 = vmatmul.bf16.vlgmr.msra.gmra.mxu1 %v16072_v7  ;;  %v16297_v7 = vor.u32 %v12963_v61, %v12171_v16  ;;  %v12959_v16 = vld [vmem:[#allocation5 + $0x224] sm:$0xf0] }
 0x5c0   :  { %v12782_v61 = vld [vmem:[%s16937_s5 + $0x98] sm:$0xff] }
 0x5c1   :  { %17396 = vst [vmem:[#allocation46_spill] sm:$0xff] %v16297_v7 }
 0x5c2   :  { %8665 = vmatpush.bf16.msra.mxu0 %v16254_v46  ;;  %v17393_v46 = vld [vmem:[#allocation12_spill] sm:$0xff]  ;;  %v16336_v49 = vpop.f32.mrf.mxu0 }
 0x5c3   :  { %7915 = vmatpush.bf16.msrb.mxu1 %v17393_v46  ;;  %v17395_v46 = vld [vmem:[#allocation39_spill] sm:$0xff] }
 0x5c6   :  { %8666 = vmatpush.bf16.msra.mxu0 %v16258_v59  ;;  %v12785_v59 = vld [vmem:[%s16937_s5 + $0xb0] sm:$0xff] }
 0x5c7   :  { %7212 = vmatpush.bf16.msrb.mxu2 %v12785_v59  ;;  %7916 = vmatpush.bf16.msrb.mxu1 %v17395_v46  ;;  %v12783_v59 = vld [vmem:[%s16937_s5 + $0xa0] sm:$0xff] }
 0x5c9   :  { %8667 = vmatmul.bf16.vlgmr.msra.gmra.mxu0 %v16270_v22  ;;  %v17421_v22 = vld [vmem:[#allocation65_spill] sm:$0xff] }
 0x5ca   :  { %8715 = vmatpush.bf16.msrb.mxu0 %v16260_v35  ;;  %v16294_v35 = vpop.f32.mrf.mxu1  ;;  %v16359_v48 = vpop.f32.mrf.mxu0 }
 0x5cb   :  { %7213 = vmatpush.bf16.msrb.mxu2 %v12784_v40  ;;  %7917 = vmatpush.bf16.msrb.mxu1 %v17397_v60  ;;  %v16314_v60 = vpop.f32.mrf.mxu2 }
 0x5ce   :  { %8716 = vmatpush.bf16.msrb.mxu0 %v16272_v10  ;;  %v12961_v10 = vld [vmem:[#allocation5 + $0x234] sm:$0xf0] }
 0x5cf   :  { %v16306_v46 = vor.u32 %v12961_v10, %v12163_v57  ;;  %7214 = vmatpush.bf16.msrb.mxu2 %v12783_v59  ;;  %7918 = vmatpush.bf16.msrb.mxu1 %v15773_v32  ;;  %v12147_v10 = vld [vmem:[#allocation5 + $0x210] sm:$0xf]  ;;  %v12957_v57 = vld [vmem:[#allocation5 + $0x214] sm:$0xf0]  ;;  %v12781_v32 = vld [vmem:[%s16937_s5 + $0x90] sm:$0xff]  ;;  %v16325_v59 = vpop.f32.mrf.mxu3 }
 0x5d0   :  { %v16328_v41 = vor.u32 %v12957_v57, %v12147_v10  ;;  %v12889_v57 = vld [vmem:[#allocation2 + $0x64] sm:$0xf0] }
 0x5d1   :  { %17398 = vst [vmem:[#allocation21_spill] sm:$0xff] %v16306_v46 }
 0x5d2   :  { %8717 = vmatpush.bf16.msrb.mxu0 %v16284_v47  ;;  %v12155_v47 = vld [vmem:[#allocation5 + $0x220] sm:$0xf]  ;;  %17401 = vst [vmem:[#allocation27_spill] sm:$0xff] %v16328_v41 }
 0x5d3   :  { %v16317_v40 = vor.u32 %v12959_v16, %v12155_v47  ;;  %7215 = vmatpush.bf16.msrb.mxu2 %v12782_v61  ;;  %7919 = vmatpush.bf16.msrb.mxu1 %v17400_v4  ;;  %v12955_v47 = vld [vmem:[#allocation5 + $0x204] sm:$0xf0]  ;;  %v12952_v16 = vld [vmem:[#allocation5 + $0x1f4] sm:$0xf]  ;;  %v12780_v4 = vld [vmem:[%s16937_s5 + $0x88] sm:$0xff]  ;;  %v16334_v61 = vpop.f32.mrf.mxu2 }
 0x5d4   :  { %v16341_v10 = vor.u32 %v12952_v16, %v12133_v63 }
 0x5d5   :  { %17399 = vst [vmem:[#allocation24_spill] sm:$0xff] %v16317_v40 }
 0x5d6   :  { %8718 = vmatpush.bf16.msrb.mxu0 %v16297_v7  ;;  %v16319_v7 = vpop.f32.mrf.mxu1  ;;  %17403 = vst [vmem:[#allocation33_spill] sm:$0xff] %v16341_v10 }
 0x5d7   :  { %7216 = vmatpush.bf16.msrb.mxu2 %v12781_v32  ;;  %7920 = vmatpush.bf16.msrb.mxu1 %v15787_v18  ;;  %v12950_v18 = vld [vmem:[#allocation5 + $0x1e4] sm:$0xf]  ;;  %v12125_v32 = vld [vmem:[#allocation5 + $0x1e8] sm:$0xf0]  ;;  %v16347_v3 = vpop.f32.mrf.mxu3 }
 0x5d8   :  { %v16355_v16 = vor.u32 %v12950_v18, %v12125_v32  ;;  %v12109_v18 = vld [vmem:[#allocation5 + $0x1c8] sm:$0xf0] }
 0x5da   :  { %8719 = vmatpush.bf16.msrb.mxu0 %v16306_v46  ;;  %v12139_v46 = vld [vmem:[#allocation5 + $0x200] sm:$0xf]  ;;  %17405 = vst [vmem:[#allocation41_spill] sm:$0xff] %v16355_v16 }
 0x5db   :  { %7217 = vmatpush.bf16.msrb.mxu2 %v12780_v4  ;;  %7921 = vmatpush.bf16.msrb.mxu1 %v15796_v56  ;;  %v11795_v56 = vld [vmem:[#allocation2 + $0x1c] sm:$0xf]  ;;  %v12948_v4 = vld [vmem:[#allocation5 + $0x1d4] sm:$0xf] }
 0x5de   :  { %8720 = vmatpush.bf16.msrb.mxu0 %v16317_v40  ;;  %v16339_v40 = vor.u32 %v12955_v47, %v12139_v46  ;;  %v16349_v37 = vpop.f32.mrf.mxu1  ;;  %v11879_v46 = vld [vmem:[#allocation2 + $0x30] sm:$0xf]  ;;  %v12874_v47 = vld [vmem:[#allocation2 + $0x50] sm:$0xf0] }
 0x5df   :  { %v16353_v63 = vor.u32 %v12889_v57, %v11879_v46  ;;  %7218 = vmatpush.bf16.msrb.mxu2 %v12779_v52  ;;  %7922 = vmatpush.bf16.msrb.mxu1 %v15803_v42  ;;  %v16365_v57 = vpop.f32.mrf.mxu2  ;;  %v12946_v52 = vld [vmem:[#allocation5 + $0x1c4] sm:$0xf]  ;;  %v12944_v46 = vld [vmem:[#allocation5 + $0x1b4] sm:$0xf] }
 0x5e0   :  { %17402 = vst [vmem:[#allocation30_spill] sm:$0xff] %v16339_v40  ;;  %v16378_v32 = vor.u32 %v12946_v52, %v12109_v18 }
 0x5e1   :  { %17404 = vst [vmem:[#allocation36_spill] sm:$0xff] %v16353_v63 }
 0x5e2   :  { %8721 = vmatpush.bf16.msrb.mxu0 %v16328_v41  ;;  %v12117_v41 = vld [vmem:[#allocation5 + $0x1d8] sm:$0xf0]  ;;  %17408 = vst [vmem:[#allocation49_spill] sm:$0xff] %v16378_v32 }
 0x5e3   :  { %7783 = vmatpush.bf16.msra.mxu2 %v16137_v45  ;;  %7971 = vmatpush.bf16.msra.mxu1 %v15806_v11  ;;  %v16369_v42 = vor.u32 %v12948_v4, %v12117_v41  ;;  %v16375_v11 = vpop.f32.mrf.mxu3  ;;  %v12093_v4 = vld [vmem:[#allocation5 + $0x1a8] sm:$0xf0] }
 0x5e5   :  { %17407 = vst [vmem:[#allocation47_spill] sm:$0xff] %v16369_v42 }
 0x5e6   :  { %8722 = vmatpush.bf16.msrb.mxu0 %v16339_v40  ;;  %v16363_v40 = vor.u32 %v12874_v47, %v11795_v56  ;;  %v16372_v45 = vpop.f32.mrf.mxu1  ;;  %v12101_v47 = vld [vmem:[#allocation5 + $0x1b8] sm:$0xf0]  ;;  %v16384_v56 = vpop.f32.mrf.mxu0 }
 0x5e7   :  { %7784 = vmatpush.bf16.msra.mxu2 %v16142_v23  ;;  %7972 = vmatpush.bf16.msra.mxu1 %v15813_v20  ;;  %v16382_v41 = vpop.f32.mrf.mxu2  ;;  %v16387_v23 = vor.u32 %v12944_v46, %v12101_v47  ;;  %v12942_v20 = vld [vmem:[#allocation5 + $0x1a4] sm:$0xf]  ;;  %v12077_v47 = vld [vmem:[#allocation5 + $0x188] sm:$0xf0] }
 0x5e8   :  { %17406 = vst [vmem:[#allocation45_spill] sm:$0xff] %v16363_v40  ;;  %7923 = vmatmul.bf16.vlgmr.msrb.gmra.mxu1 %v16363_v40  ;;  %v12935_v40 = vld [vmem:[#allocation5 + $0x164] sm:$0xf0] }
 0x5e9   :  { %8723 = vmatmul.bf16.vlgmr.msrb.gmra.mxu0 %v16353_v63  ;;  %17409 = vst [vmem:[#allocation14_spill] sm:$0xff] %v16387_v23  ;;  %v12876_v63 = vld [vmem:[#allocation2 + $0x60] sm:$0xf0] }
 0x5ea   :  { %8771 = vmatpush.bf16.msra.mxu0 %v16341_v10 }
 0x5eb   :  { %7785 = vmatpush.bf16.msra.mxu2 %v16149_v14  ;;  %7973 = vmatpush.bf16.msra.mxu1 %v15818_v39  ;;  %v16391_v52 = vpop.f32.mrf.mxu3  ;;  %v16394_v39 = vor.u32 %v12942_v20, %v12093_v4  ;;  %v12940_v14 = vld [vmem:[#allocation5 + $0x194] sm:$0xf]  ;;  %v17413_v20 = vld [vmem:[#allocation61_spill] sm:$0xff]  ;;  %v12067_v4 = vld [vmem:[#allocation5 + $0x170] sm:$0xf] }
 0x5ed   :  { %17410 = vst [vmem:[#allocation13_spill] sm:$0xff] %v16394_v39 }
 0x5ee   :  { %8772 = vmatpush.bf16.msra.mxu0 %v16355_v16  ;;  %v7022_v18 = vpop.f32.mrf.mxu1  ;;  %v16398_v46 = vpop.f32.mrf.mxu0 }
 0x5ef   :  { %7786 = vmatpush.bf16.msra.mxu2 %v16153_v38  ;;  %7974 = vmatpush.bf16.msra.mxu1 %v15822_v58  ;;  %v12938_v58 = vld [vmem:[#allocation5 + $0x184] sm:$0xf]  ;;  %v16404_v16 = vpop.f32.mrf.mxu2 }
 0x5f2   :  { %8773 = vmatpush.bf16.msra.mxu0 %v16369_v42  ;;  %v12085_v42 = vld [vmem:[#allocation5 + $0x198] sm:$0xf0] }
 0x5f3   :  { %7787 = vmatpush.bf16.msra.mxu2 %v16157_v6  ;;  %v16401_v38 = vor.u32 %v12940_v14, %v12085_v42  ;;  %v16408_v6 = vor.u32 %v12938_v58, %v12077_v47  ;;  %v16413_v42 = vpop.f32.mrf.mxu3  ;;  %v17416_v14 = vld [vmem:[#allocation62_spill] sm:$0xff]  ;;  %v17419_v47 = vld [vmem:[#allocation63_spill] sm:$0xff] }
 0x5f5   :  { %17412 = vst [vmem:[#allocation38_spill] sm:$0xff] %v16401_v38 }
 0x5f6   :  { %8774 = vmatpush.bf16.msra.mxu0 %v16378_v32  ;;  %v17411_v32 = vld [vmem:[#allocation60_spill] sm:$0xff]  ;;  %v7076_v10 = vpop.f32.mrf.mxu1  ;;  %17414 = vst [vmem:[#allocation17_spill] sm:$0xff] %v16408_v6 }
 0x5f7   :  { %7975 = vmatpush.bf16.msra.mxu1 %v17411_v32  ;;  %7788 = vmatpush.bf16.msra.mxu2 %v16161_v19  ;;  %v11873_v19 = vld [vmem:[#allocation2 + $0x60] sm:$0xf0] }
 0x5fa   :  { %8775 = vmatpush.bf16.msra.mxu0 %v16387_v23  ;;  %v12937_v23 = vld [vmem:[#allocation5 + $0x174] sm:$0xf0] }
 0x5fb   :  { %7976 = vmatpush.bf16.msra.mxu1 %v17413_v20  ;;  %v16410_v32 = vor.u32 %v12937_v23, %v12067_v4  ;;  %7789 = vmatpush.bf16.msra.mxu2 %v16165_v5  ;;  %v12886_v20 = vld [vmem:[#allocation2 + $0x2c] sm:$0xf]  ;;  %v7090_v5 = vpop.f32.mrf.mxu2  ;;  %v16423_v23 = vpop.f32.mrf.mxu0 }
 0x5fc   :  { %v11811_v4 = vld [vmem:[#allocation2 + $0x2c] sm:$0xf] }
 0x5fd   :  { %17415 = vst [vmem:[#allocation16_spill] sm:$0xff] %v16410_v32 }
 0x5fe   :  { %8776 = vmatpush.bf16.msra.mxu0 %v16394_v39  ;;  %v12059_v39 = vld [vmem:[#allocation5 + $0x160] sm:$0xf] }
 0x5ff   :  { %7977 = vmatpush.bf16.msra.mxu1 %v17416_v14  ;;  %v16420_v58 = vor.u32 %v12935_v40, %v12059_v39  ;;  %7790 = vmatpush.bf16.msra.mxu2 %v16169_v9  ;;  %v12051_v14 = vld [vmem:[#allocation5 + $0x150] sm:$0xf]  ;;  %v7104_v9 = vpop.f32.mrf.mxu3  ;;  %v7078_v39 = vpop.f32.mrf.mxu1 }
 0x600   :  { %v16432_v40 = vor.u32 %v12933_v28, %v12051_v14  ;;  %v6919_v28 = vadd.f32 %v16336_v49, %v16325_v59  ;;  %v12035_v14 = vld [vmem:[#allocation5 + $0x130] sm:$0xf]  ;;  %v6849_v49 = vadd.f32 %v16274_v17, %v16262_v13 }
 0x601   :  { %17418 = vst [vmem:[#allocation20_spill] sm:$0xff] %v16420_v58  ;;  %v12019_v17 = vld [vmem:[#allocation5 + $0x110] sm:$0xf] }
 0x602   :  { %8777 = vmatpush.bf16.msra.mxu0 %v16401_v38  ;;  %v16418_v38 = vor.u32 %v12886_v20, %v11873_v19  ;;  %v12043_v19 = vld [vmem:[#allocation5 + $0x140] sm:$0xf]  ;;  %v12931_v20 = vld [vmem:[#allocation5 + $0x144] sm:$0xf0] }
 0x603   :  { %7978 = vmatpush.bf16.msra.mxu1 %v17419_v47  ;;  %v7021_v47 = vadd.f32 %v16372_v45, %v16359_v48  ;;  %v17422_v45 = vld [vmem:[#allocation66_spill] sm:$0xff] }
 0x604   :  { %17417 = vst [vmem:[#allocation43_spill] sm:$0xff] %v16418_v38 }
 0x605   :  { %v7035_v48 = vadd.f32 %v16382_v41, %v7021_v47 }
 0x606   :  { %8778 = vmatpush.bf16.msra.mxu0 %v16408_v6  ;;  %v16428_v6 = vor.u32 %v12876_v63, %v11811_v4  ;;  %v16440_v63 = vor.u32 %v12931_v20, %v12043_v19  ;;  %v7118_v4 = vpop.f32.mrf.mxu0  ;;  %v12927_v20 = vld [vmem:[#allocation5 + $0x124] sm:$0xf0] }
 0x607   :  { %8027 = vmatpush.bf16.msrb.mxu1 %v17420_v54  ;;  %v6917_v54 = vadd.f32 %v16308_v2, %v16299_v26  ;;  %v7092_v2 = vpop.f32.mrf.mxu2  ;;  %v6933_v26 = vadd.f32 %v16349_v37, %v6919_v28  ;;  %v7132_v59 = vpop.f32.mrf.mxu1 }
 0x608   :  { %7979 = vmatmul.bf16.vlgmr.msra.gmra.mxu1 %v16428_v6  ;;  %v7106_v37 = vpop.f32.mrf.mxu3 }
 0x609   :  { %8779 = vmatmul.bf16.vlgmr.msra.gmra.mxu0 %v16418_v38  ;;  %v12929_v38 = vld [vmem:[#allocation5 + $0x134] sm:$0xf0] }
 0x60a   :  { %8861 = vmatpush.bf16.msrb.mxu0 %v16410_v32  ;;  %v7091_v32 = vadd.f32 %v7090_v5, %v7076_v10  ;;  %v7023_v10 = vadd.f32 %v7022_v18, %v16384_v56  ;;  %v7093_v5 = vadd.f32 %v7092_v2, %v7078_v39  ;;  %v16450_v19 = vor.u32 %v12929_v38, %v12035_v14 }
 0x60b   :  { %8028 = vmatpush.bf16.msrb.mxu1 %v17421_v22  ;;  %v7049_v56 = vadd.f32 %v16391_v52, %v7035_v48  ;;  %v6863_v39 = vadd.f32 %v16288_v50, %v6849_v49  ;;  %v6947_v38 = vadd.f32 %v16365_v57, %v6933_v26  ;;  %v6889_v57 = vadd.f32 %v16286_v27, %v16225_v34  ;;  %v12920_v34 = vld [vmem:[#allocation5 + $0xf4] sm:$0xf]  ;;  %v12005_v27 = vld [vmem:[#allocation5 + $0xf8] sm:$0xf0] }
 0x60c   :  { %v7105_v22 = vadd.f32 %v7104_v9, %v7091_v32  ;;  %v7037_v18 = vadd.f32 %v16404_v16, %v7023_v10  ;;  %v17423_v9 = vld [vmem:[#allocation67_spill] sm:$0xff]  ;;  %v7107_v47 = vadd.f32 %v7106_v37, %v7093_v5  ;;  %v17425_v5 = vld [vmem:[#allocation69_spill] sm:$0xff]  ;;  %v11997_v37 = vld [vmem:[#allocation5 + $0xe8] sm:$0xf0] }
 0x60d   :  { %v6877_v52 = vadd.f32 %v16294_v35, %v6863_v39  ;;  %v7063_v28 = vadd.f32 %v16398_v46, %v7049_v56  ;;  %v6961_v14 = vadd.f32 %v16375_v11, %v6947_v38  ;;  %v16480_v56 = vor.u32 %v12920_v34, %v12005_v27  ;;  %v16488_v39 = vld [vmem:[%s16936_s4] ss:$0 sm:$0xff] }
 0x60e   :  { %8862 = vmatpush.bf16.msrb.mxu0 %v16420_v58  ;;  %v6931_v58 = vadd.f32 %v16319_v7, %v6917_v54  ;;  %v12027_v7 = vld [vmem:[#allocation5 + $0x120] sm:$0xf]  ;;  %v7119_v32 = vadd.f32 %v7118_v4, %v7105_v22  ;;  %v17424_v4 = vld [vmem:[#allocation68_spill] sm:$0xff]  ;;  %v7120_v50 = vpop.f32.mrf.mxu0  ;;  %v11971_v27 = vld [vmem:[#allocation5 + $0xb0] sm:$0xf] }
 0x60f   :  { %8029 = vmatpush.bf16.msrb.mxu1 %v17422_v45  ;;  %v16461_v13 = vor.u32 %v12927_v20, %v12027_v7  ;;  %v7121_v10 = vadd.f32 %v7120_v50, %v7107_v47  ;;  %v7134_v35 = vpop.f32.mrf.mxu1  ;;  %v12923_v45 = vld [vmem:[#allocation5 + $0x104] sm:$0xf0]  ;;  %v12003_v20 = vld [vmem:[#allocation5 + $0xf0] sm:$0xf]  ;;  %v12916_v50 = vld [vmem:[#allocation5 + $0xd4] sm:$0xf] }
 0x610   :  { %v6945_v41 = vadd.f32 %v16334_v61, %v6931_v58  ;;  %v7133_v54 = vadd.f32 %v7132_v59, %v7119_v32  ;;  %v12925_v61 = vld [vmem:[#allocation5 + $0x114] sm:$0xf0]  ;;  %v7051_v58 = vadd.f32 %v16413_v42, %v7037_v18  ;;  %v6891_v42 = vadd.f32 %v16314_v60, %v6877_v52  ;;  %v17426_v18 = vld [vmem:[#allocation70_spill] sm:$0xff]  ;;  %v7750_v34 = vpop.f32.mrf.mxu3 }
 0x611   :  { %v16472_v22 = vor.u32 %v12925_v61, %v12019_v17  ;;  %v7135_v26 = vadd.f32 %v7134_v35, %v7121_v10  ;;  %v11995_v17 = vld [vmem:[#allocation5 + $0xe0] sm:$0xf]  ;;  %v12919_v61 = vld [vmem:[#allocation5 + $0xe4] sm:$0xf0] }
 0x612   :  { %8863 = vmatpush.bf16.msrb.mxu0 %v16432_v40  ;;  %v6959_v16 = vadd.f32 %v16347_v3, %v6945_v41  ;;  %v7137_v48 = vmax.f32 %v7063_v28, %v7133_v54  ;;  %v12011_v3 = vld [vmem:[#allocation5 + $0x100] sm:$0xf]  ;;  %v7065_v2 = vadd.f32 %v16423_v23, %v7051_v58  ;;  %v6964_v49 = vmax.f32 %v6891_v42, %v6961_v14  ;;  %v12921_v41 = vld [vmem:[#allocation5 + $0xf4] sm:$0xf0]  ;;  %v12973_v23 = vld [vmem:[#allocation2 + $0x60] sm:$0xf0] }
 0x613   :  { %8030 = vmatpush.bf16.msrb.mxu1 %v17423_v9  ;;  %v16478_v7 = vor.u32 %v12923_v45, %v12011_v3  ;;  %v16483_v32 = vor.u32 %v12921_v41, %v12003_v20  ;;  %v12918_v9 = vld [vmem:[#allocation5 + $0xe4] sm:$0xf]  ;;  %v12211_v54 = vld [vmem:[#allocation2 + $0x2c] sm:$0xf]  ;;  %v17427_v58 = vld [vmem:[#allocation71_spill] sm:$0xff] }
 0x614   :  { %v6963_v46 = vmax.f32 %v6889_v57, %v6959_v16  ;;  %v7138_v59 = vmax.f32 %v7065_v2, %v7135_v26  ;;  %v16494_v52 = vor.u32 %v12973_v23, %v12211_v54  ;;  %v16497_v28 = vor.u32 %v12918_v9, %v11997_v37  ;;  %v11989_v57 = vld [vmem:[#allocation5 + $0xd8] sm:$0xf0]  ;;  %v11987_v14 = vld [vmem:[#allocation5 + $0xd0] sm:$0xf]  ;;  %v12914_v3 = vld [vmem:[#allocation5 + $0xc4] sm:$0xf] }
 0x615   :  { %v16506_v10 = vor.u32 %v12916_v50, %v11989_v57  ;;  %v11981_v45 = vld [vmem:[#allocation5 + $0xc8] sm:$0xf0]  ;;  %v11979_v42 = vld [vmem:[#allocation5 + $0xc0] sm:$0xf]  ;;  %v12912_v26 = vld [vmem:[#allocation5 + $0xb4] sm:$0xf] }
 0x616   :  { %8864 = vmatpush.bf16.msrb.mxu0 %v16440_v63  ;;  %v7139_v11 = vmax.f32 %v6963_v46, %v7137_v48  ;;  %v7140_v60 = vmax.f32 %v6964_v49, %v7138_v59  ;;  %v12917_v48 = vld [vmem:[#allocation5 + $0xd4] sm:$0xf0]  ;;  %v12915_v46 = vld [vmem:[#allocation5 + $0xc4] sm:$0xf0]  ;;  %v7764_v2 = vpop.f32.mrf.mxu0  ;;  %v11963_v23 = vld [vmem:[#allocation5 + $0xa0] sm:$0xf] }
 0x617   :  { %8031 = vmatpush.bf16.msrb.mxu1 %v17424_v4  ;;  %v16501_v4 = vor.u32 %v12919_v61, %v11995_v17  ;;  %v16509_v35 = vor.u32 %v12917_v48, %v11987_v14  ;;  %v7765_v49 = vadd.f32 %v7764_v2, %v7750_v34  ;;  %v12911_v9 = vld [vmem:[#allocation5 + $0xa4] sm:$0xf0]  ;;  %v17428_v54 = vld [vmem:[#allocation72_spill] sm:$0xff]  ;;  %v11955_v17 = vld [vmem:[#allocation5 + $0x90] sm:$0xf] }
 0x618   :  { %v7141_v38 = vadd.f32 %v16488_v39, %v7139_v11  ;;  %v7142_v47 = vadd.f32 %v16488_v39, %v7140_v60  ;;  %v12913_v11 = vld [vmem:[#allocation5 + $0xb4] sm:$0xf0]  ;;  %v12910_v60 = vld [vmem:[#allocation5 + $0xa4] sm:$0xf]  ;;  %v16532_v37 = vor.u32 %v12911_v9, %v11963_v23  ;;  %v11949_v50 = vld [vmem:[#allocation5 + $0x88] sm:$0xf0] }
 0x619   :  { %v16525_v41 = vor.u32 %v12913_v11, %v11971_v27  ;;  %v12909_v61 = vld [vmem:[#allocation5 + $0x94] sm:$0xf0]  ;;  %v11947_v57 = vld [vmem:[#allocation5 + $0x80] sm:$0xf]  ;;  %v12907_v14 = vld [vmem:[#allocation5 + $0x84] sm:$0xf0] }
 0x61a   :  { %8865 = vmatpush.bf16.msrb.mxu0 %v16450_v19  ;;  %v7145_v16 = vpack.c.bf16 %v7142_v47, %v7141_v38  ;;  %v12908_v38 = vld [vmem:[#allocation5 + $0x94] sm:$0xf]  ;;  %v11957_v47 = vld [vmem:[#allocation5 + $0x98] sm:$0xf0]  ;;  %v11865_v2 = vld [vmem:[#allocation2 + $0x58] sm:$0xf0] }
 0x61b   :  { %8032 = vmatpush.bf16.msrb.mxu1 %v17425_v5  ;;  %v11973_v5 = vld [vmem:[#allocation5 + $0xb8] sm:$0xf0]  ;;  %v12904_v48 = vld [vmem:[#allocation5 + $0x74] sm:$0xf]  ;;  %v11917_v23 = vld [vmem:[#allocation5 + $0x48] sm:$0xf0] }
 0x61c   :  { %7219 = vmatmul.bf16.vlgmr.msrb.gmra.mxu2 %v7145_v16  ;;  %v7778_v59 = vpop.f32.mrf.mxu1  ;;  %v16537_v16 = vor.u32 %v12908_v38, %v11957_v47  ;;  %v12885_v27 = vld [vmem:[#allocation2 + $0x24] sm:$0xf]  ;;  %v11909_v38 = vld [vmem:[#allocation5 + $0x38] sm:$0xf0]  ;;  %v11901_v47 = vld [vmem:[#allocation5 + $0x28] sm:$0xf0] }
 0x61d   :  { %7839 = vmatpush.bf16.msrb.mxu2 %v16171_v33  ;;  %v16513_v33 = vor.u32 %v12914_v3, %v11981_v45  ;;  %v16522_v20 = vadd.f32 %v7778_v59, %v7765_v49  ;;  %v11941_v3 = vld [vmem:[#allocation5 + $0x78] sm:$0xf0]  ;;  %v16557_v11 = vor.u32 %v12885_v27, %v11865_v2  ;;  %v12896_v9 = vld [vmem:[#allocation5 + $0x34] sm:$0xf]  ;;  %v17443_v27 = vld [vmem:[#allocation50_spill] sm:$0xff] }
 0x61e   :  { %8866 = vmatpush.bf16.msrb.mxu0 %v16461_v13  ;;  %v11925_v59 = vld [vmem:[#allocation5 + $0x58] sm:$0xf0] }
 0x61f   :  { %8033 = vmatpush.bf16.msrb.mxu1 %v17426_v18  ;;  %v11965_v18 = vld [vmem:[#allocation5 + $0xa8] sm:$0xf0]  ;;  %v17440_v2 = vld [vmem:[#allocation44_spill] sm:$0xff] }
 0x621   :  { %7840 = vmatpush.bf16.msrb.mxu2 %v16178_v44  ;;  %v16520_v44 = vor.u32 %v12912_v26, %v11973_v5  ;;  %v12902_v26 = vld [vmem:[#allocation5 + $0x64] sm:$0xf]  ;;  %v11933_v5 = vld [vmem:[#allocation5 + $0x68] sm:$0xf0] }
 0x622   :  { %8867 = vmatpush.bf16.msrb.mxu0 %v16472_v22  ;;  %v16559_v49 = vor.u32 %v12902_v26, %v11933_v5  ;;  %v17441_v26 = vld [vmem:[#allocation29_spill] sm:$0xff] }
 0x623   :  { %8034 = vmatpush.bf16.msrb.mxu1 %v17427_v58  ;;  %v12906_v58 = vld [vmem:[#allocation5 + $0x84] sm:$0xf] }
 0x624   :  { %v16544_v45 = vor.u32 %v12906_v58, %v11949_v50  ;;  %17431 = vst [vmem:[#allocation39_spill] sm:$0xff] %v16559_v49  ;;  %v11885_v58 = vld [vmem:[#allocation5 + $0x8] sm:$0xf0]  ;;  %v12968_v50 = vld [vmem:[#allocation5 + $0x274] sm:$0xf] }
 0x625   :  { %7841 = vmatpush.bf16.msrb.mxu2 %v16185_v53  ;;  %v16529_v53 = vor.u32 %v12910_v60, %v11965_v18  ;;  %v12898_v18 = vld [vmem:[#allocation5 + $0x44] sm:$0xf] }
 0x626   :  { %8868 = vmatpush.bf16.msrb.mxu0 %v16478_v7  ;;  %8035 = vmatmul.bf16.vlgmr.msrb.gmra.mxu1 %v16176_v30  ;;  %v16516_v30 = vor.u32 %v12915_v46, %v11979_v42  ;;  %v16549_v42 = vor.u32 %v12904_v48, %v11941_v3  ;;  %v12205_v46 = vld [vmem:[#allocation2 + $0x5c] sm:$0xf0]  ;;  %v12966_v48 = vld [vmem:[#allocation5 + $0x264] sm:$0xf] }
 0x627   :  { %8673 = vmatpush.bf16.msra.mxu1 %v16483_v32  ;;  %v12962_v5 = vld [vmem:[#allocation5 + $0x244] sm:$0xf] }
 0x628   :  { %17429 = vst [vmem:[#allocation57_spill] sm:$0xff] %v16549_v42 }
 0x629   :  { %8869 = vmatmul.bf16.vlgmr.msrb.gmra.mxu0 %v16494_v52  ;;  %7842 = vmatpush.bf16.msrb.mxu2 %v16189_v21  ;;  %v16540_v21 = vor.u32 %v12909_v61, %v11955_v17  ;;  %v11893_v17 = vld [vmem:[#allocation5 + $0x18] sm:$0xf0] }
 0x62a   :  { %8917 = vmatpush.bf16.msra.mxu0 %v16480_v56 }
 0x62b   :  { %8674 = vmatpush.bf16.msra.mxu1 %v16501_v4 }
 0x62c   :  { %7791 = vmatmul.bf16.vlgmr.msra.gmra.mxu2 %v17428_v54 }
 0x62d   :  { %7843 = vmatpush.bf16.msrb.mxu2 %v16196_v43  ;;  %v16547_v43 = vor.u32 %v12907_v14, %v11947_v57  ;;  %v12197_v57 = vld [vmem:[#allocation5 + $0x278] sm:$0xf0] }
 0x62e   :  { %8918 = vmatpush.bf16.msra.mxu0 %v16497_v28  ;;  %v16589_v14 = vor.u32 %v12968_v50, %v12197_v57  ;;  %v12141_v50 = vld [vmem:[#allocation5 + $0x208] sm:$0xf0]  ;;  %v17451_v57 = vld [vmem:[#allocation56_spill] sm:$0xff] }
 0x62f   :  { %8675 = vmatpush.bf16.msra.mxu1 %v16509_v35 }
 0x630   :  { %17438 = vst [vmem:[#allocation64_spill] sm:$0xff] %v16589_v14 }
 0x631   :  { %7844 = vmatpush.bf16.msrb.mxu2 %v16204_v24  ;;  %v12970_v24 = vld [vmem:[#allocation2 + $0x28] sm:$0xf] }
 0x632   :  { %8919 = vmatpush.bf16.msra.mxu0 %v16506_v10  ;;  %v16554_v34 = vor.u32 %v12970_v24, %v12205_v46  ;;  %v12181_v46 = vld [vmem:[#allocation5 + $0x258] sm:$0xf0]  ;;  %v12173_v24 = vld [vmem:[#allocation5 + $0x248] sm:$0xf0] }
 0x633   :  { %8676 = vmatpush.bf16.msra.mxu1 %v16516_v30 }
 0x634   :  { %17430 = vst [vmem:[#allocation12_spill] sm:$0xff] %v16554_v34 }
 0x635   :  { %7845 = vmatpush.bf16.msrb.mxu2 %v16211_v31  ;;  %v12900_v31 = vld [vmem:[#allocation5 + $0x54] sm:$0xf] }
 0x636   :  { %8920 = vmatpush.bf16.msra.mxu0 %v16513_v33  ;;  %v16567_v60 = vor.u32 %v12900_v31, %v11925_v59  ;;  %v16605_v31 = vor.u32 %v12962_v5, %v12173_v24  ;;  %v12165_v59 = vld [vmem:[#allocation5 + $0x238] sm:$0xf0]  ;;  %v12951_v5 = vld [vmem:[#allocation5 + $0x1e4] sm:$0xf0] }
 0x637   :  { %8677 = vmatpush.bf16.msra.mxu1 %v16525_v41 }
 0x638   :  { %17432 = vst [vmem:[#allocation58_spill] sm:$0xff] %v16567_v60 }
 0x639   :  { %7846 = vmatpush.bf16.msrb.mxu2 %v16219_v62  ;;  %v16571_v62 = vor.u32 %v12898_v18, %v11917_v23  ;;  %17444 = vst [vmem:[#allocation67_spill] sm:$0xff] %v16605_v31  ;;  %v17445_v18 = vld [vmem:[#allocation19_spill] sm:$0xff]  ;;  %v12958_v23 = vld [vmem:[#allocation5 + $0x224] sm:$0xf] }
 0x63a   :  { %8921 = vmatpush.bf16.msra.mxu0 %v16520_v44 }
 0x63b   :  { %8678 = vmatpush.bf16.msra.mxu1 %v16532_v37  ;;  %17433 = vst [vmem:[#allocation59_spill] sm:$0xff] %v16571_v62 }
 0x63c   :  { %7847 = vmatmul.bf16.vlgmr.msrb.gmra.mxu2 %v16234_v55  ;;  %v12894_v55 = vld [vmem:[#allocation5 + $0x24] sm:$0xf] }
 0x63d   :  { %7929 = vmatpush.bf16.msra.mxu2 %v16019_v25  ;;  %v16575_v25 = vor.u32 %v12896_v9, %v11909_v38  ;;  %v16579_v54 = vor.u32 %v12894_v55, %v11901_v47  ;;  %v12157_v9 = vld [vmem:[#allocation5 + $0x228] sm:$0xf0]  ;;  %v12956_v47 = vld [vmem:[#allocation5 + $0x214] sm:$0xf] }
 0x63e   :  { %8922 = vmatpush.bf16.msra.mxu0 %v16529_v53  ;;  %v17447_v38 = vld [vmem:[#allocation10_spill] sm:$0xff]  ;;  %v16613_v55 = vor.u32 %v12958_v23, %v12157_v9  ;;  %v17456_v23 = vld [vmem:[#allocation36_spill] sm:$0xff]  ;;  %v17457_v9 = vld [vmem:[#allocation45_spill] sm:$0xff] }
 0x63f   :  { %8679 = vmatpush.bf16.msra.mxu1 %v16540_v21  ;;  %17434 = vst [vmem:[#allocation60_spill] sm:$0xff] %v16575_v25 }
 0x640   :  { %17435 = vst [vmem:[#allocation61_spill] sm:$0xff] %v16579_v54 }
 0x641   :  { %7930 = vmatpush.bf16.msra.mxu2 %v16029_v36  ;;  %v12892_v36 = vld [vmem:[#allocation5 + $0x14] sm:$0xf]  ;;  %17448 = vst [vmem:[#allocation69_spill] sm:$0xff] %v16613_v55 }
 0x642   :  { %8923 = vmatpush.bf16.msra.mxu0 %v16537_v16  ;;  %v16583_v61 = vor.u32 %v12892_v36, %v11893_v17  ;;  %v12149_v36 = vld [vmem:[#allocation5 + $0x218] sm:$0xf0]  ;;  %v17449_v17 = vld [vmem:[#allocation51_spill] sm:$0xff] }
 0x643   :  { %8680 = vmatpush.bf16.msra.mxu1 %v16547_v43 }
 0x644   :  { %17436 = vst [vmem:[#allocation62_spill] sm:$0xff] %v16583_v61 }
 0x645   :  { %7931 = vmatpush.bf16.msra.mxu2 %v16037_v15  ;;  %v12890_v15 = vld [vmem:[#allocation5 + $0x4] sm:$0xf] }
 0x646   :  { %8924 = vmatpush.bf16.msra.mxu0 %v16544_v45  ;;  %8681 = vmatmul.bf16.vlgmr.msra.gmra.mxu1 %v16557_v11 }
 0x647   :  { %8729 = vmatpush.bf16.msrb.mxu1 %v16549_v42 }
 0x649   :  { %8925 = vmatmul.bf16.vlgmr.msra.gmra.mxu0 %v16554_v34  ;;  %7932 = vmatpush.bf16.msra.mxu2 %v16044_v12  ;;  %v16587_v12 = vor.u32 %v12890_v15, %v11885_v58  ;;  %v16617_v15 = vor.u32 %v12956_v47, %v12149_v36  ;;  %v12954_v58 = vld [vmem:[#allocation5 + $0x204] sm:$0xf]  ;;  %v12107_v47 = vld [vmem:[#allocation5 + $0x1c0] sm:$0xf]  ;;  %v12947_v36 = vld [vmem:[#allocation5 + $0x1c4] sm:$0xf0] }
 0x64b   :  { %8730 = vmatpush.bf16.msrb.mxu1 %v16559_v49  ;;  %17437 = vst [vmem:[#allocation63_spill] sm:$0xff] %v16587_v12 }
 0x64c   :  { %17450 = vst [vmem:[#allocation70_spill] sm:$0xff] %v16617_v15 }
 0x64d   :  { %7933 = vmatpush.bf16.msra.mxu2 %v16052_v0  ;;  %v12189_v0 = vld [vmem:[#allocation5 + $0x268] sm:$0xf0] }
 0x64e   :  { %v16594_v3 = vor.u32 %v12966_v48, %v12189_v0  ;;  %v12131_v48 = vld [vmem:[#allocation5 + $0x1f0] sm:$0xf]  ;;  %v12953_v0 = vld [vmem:[#allocation5 + $0x1f4] sm:$0xf0] }
 0x64f   :  { %8731 = vmatpush.bf16.msrb.mxu1 %v16567_v60 }
 0x650   :  { %17439 = vst [vmem:[#allocation65_spill] sm:$0xff] %v16594_v3 }
 0x651   :  { %7934 = vmatpush.bf16.msra.mxu2 %v16056_v1  ;;  %v12964_v1 = vld [vmem:[#allocation5 + $0x254] sm:$0xf] }
 0x653   :  { %8732 = vmatpush.bf16.msrb.mxu1 %v16571_v62 }
 0x655   :  { %7935 = vmatpush.bf16.msra.mxu2 %v16061_v51  ;;  %v16601_v51 = vor.u32 %v12964_v1, %v12181_v46  ;;  %v16621_v1 = vor.u32 %v12954_v58, %v12141_v50  ;;  %v16623_v46 = vor.u32 %v12953_v0, %v12131_v48  ;;  %v16639_v58 = vor.u32 %v12947_v36, %v12107_v47  ;;  %v12099_v50 = vld [vmem:[#allocation5 + $0x1b0] sm:$0xf]  ;;  %v17459_v48 = vld [vmem:[#allocation48_spill] sm:$0xff]  ;;  %v12939_v47 = vld [vmem:[#allocation5 + $0x184] sm:$0xf0] }
 0x656   :  { %v17462_v36 = vld [vmem:[#allocation55_spill] sm:$0xff] }
 0x657   :  { %8733 = vmatpush.bf16.msrb.mxu1 %v16575_v25  ;;  %17442 = vst [vmem:[#allocation66_spill] sm:$0xff] %v16601_v51 }
 0x658   :  { %17452 = vst [vmem:[#allocation71_spill] sm:$0xff] %v16621_v1 }
 0x659   :  { %7936 = vmatpush.bf16.msra.mxu2 %v16065_v29  ;;  %v12960_v29 = vld [vmem:[#allocation5 + $0x234] sm:$0xf] }
 0x65b   :  { %8734 = vmatpush.bf16.msrb.mxu1 %v16579_v54 }
 0x65c   :  { %7937 = vmatmul.bf16.vlgmr.msra.gmra.mxu2 %v17441_v26  ;;  %v12123_v26 = vld [vmem:[#allocation5 + $0x1e0] sm:$0xf] }
 0x65d   :  { %7985 = vmatpush.bf16.msrb.mxu2 %v16067_v8  ;;  %v16609_v8 = vor.u32 %v12960_v29, %v12165_v59  ;;  %v16628_v24 = vor.u32 %v12951_v5, %v12123_v26  ;;  %v12115_v29 = vld [vmem:[#allocation5 + $0x1d0] sm:$0xf]  ;;  %v12949_v59 = vld [vmem:[#allocation5 + $0x1d4] sm:$0xf0]  ;;  %v12943_v26 = vld [vmem:[#allocation5 + $0x1a4] sm:$0xf0] }
 0x65e   :  { %v17460_v5 = vld [vmem:[#allocation53_spill] sm:$0xff] }
 0x65f   :  { %8735 = vmatpush.bf16.msrb.mxu1 %v16583_v61  ;;  %17446 = vst [vmem:[#allocation68_spill] sm:$0xff] %v16609_v8  ;;  %v17487_v61 = vld [vmem:[#allocation47_spill] sm:$0xff] }
 0x661   :  { %7986 = vmatpush.bf16.msrb.mxu2 %v17443_v27  ;;  %v17454_v27 = vld [vmem:[#allocation31_spill] sm:$0xff] }
 0x663   :  { %8736 = vmatpush.bf16.msrb.mxu1 %v16587_v12  ;;  %v12219_v12 = vld [vmem:[#allocation2 + $0x34] sm:$0xf] }
 0x665   :  { %7987 = vmatpush.bf16.msrb.mxu2 %v17445_v18  ;;  %v17455_v18 = vld [vmem:[#allocation28_spill] sm:$0xff] }
 0x666   :  { %8737 = vmatmul.bf16.vlgmr.msrb.gmra.mxu1 %v17440_v2  ;;  %v17453_v2 = vld [vmem:[#allocation22_spill] sm:$0xff] }
 0x667   :  { %8785 = vmatpush.bf16.msra.mxu1 %v16589_v14  ;;  %v17483_v14 = vld [vmem:[#allocation30_spill] sm:$0xff] }
 0x669   :  { %7988 = vmatpush.bf16.msrb.mxu2 %v17447_v38  ;;  %v16635_v38 = vor.u32 %v12949_v59, %v12115_v29  ;;  %v12083_v29 = vld [vmem:[#allocation5 + $0x190] sm:$0xf]  ;;  %v12941_v59 = vld [vmem:[#allocation5 + $0x194] sm:$0xf0] }
 0x66b   :  { %8786 = vmatpush.bf16.msra.mxu1 %v16594_v3  ;;  %v17481_v3 = vld [vmem:[#allocation24_spill] sm:$0xff] }
 0x66d   :  { %7989 = vmatpush.bf16.msrb.mxu2 %v17449_v17  ;;  %v17458_v17 = vld [vmem:[#allocation52_spill] sm:$0xff] }
 0x66f   :  { %8787 = vmatpush.bf16.msra.mxu1 %v16601_v51 }
 0x671   :  { %7990 = vmatpush.bf16.msrb.mxu2 %v17451_v57  ;;  %v12945_v57 = vld [vmem:[#allocation5 + $0x1b4] sm:$0xf0] }
 0x672   :  { %v16643_v0 = vor.u32 %v12945_v57, %v12099_v50  ;;  %v12069_v50 = vld [vmem:[#allocation5 + $0x178] sm:$0xf0] }
 0x673   :  { %8788 = vmatpush.bf16.msra.mxu1 %v16605_v31 }
 0x675   :  { %7991 = vmatpush.bf16.msrb.mxu2 %v17453_v2  ;;  %v12091_v2 = vld [vmem:[#allocation5 + $0x1a0] sm:$0xf] }
 0x677   :  { %8789 = vmatpush.bf16.msra.mxu1 %v16609_v8  ;;  %v17478_v8 = vld [vmem:[#allocation18_spill] sm:$0xff] }
 0x679   :  { %7992 = vmatpush.bf16.msrb.mxu2 %v17454_v27  ;;  %v16647_v27 = vor.u32 %v12943_v26, %v12091_v2  ;;  %v17463_v2 = vld [vmem:[#allocation26_spill] sm:$0xff]  ;;  %v12213_v26 = vld [vmem:[#allocation2 + $0x64] sm:$0xf0] }
 0x67b   :  { %8790 = vmatpush.bf16.msra.mxu1 %v16613_v55  ;;  %v17477_v55 = vld [vmem:[#allocation42_spill] sm:$0xff] }
 0x67c   :  { %7993 = vmatmul.bf16.vlgmr.msrb.gmra.mxu2 %v17457_v9  ;;  %v12075_v9 = vld [vmem:[#allocation5 + $0x180] sm:$0xf] }
 0x67d   :  { %8041 = vmatpush.bf16.msra.mxu2 %v17455_v18  ;;  %v17461_v18 = vld [vmem:[#allocation54_spill] sm:$0xff]  ;;  %v16655_v57 = vor.u32 %v12939_v47, %v12075_v9  ;;  %v12932_v9 = vld [vmem:[#allocation5 + $0x154] sm:$0xf]  ;;  %v12053_v47 = vld [vmem:[#allocation5 + $0x158] sm:$0xf0] }
 0x67f   :  { %8791 = vmatpush.bf16.msra.mxu1 %v16617_v15  ;;  %v12045_v15 = vld [vmem:[#allocation5 + $0x148] sm:$0xf0] }
 0x681   :  { %8042 = vmatpush.bf16.msra.mxu2 %v17458_v17  ;;  %v12936_v17 = vld [vmem:[#allocation5 + $0x174] sm:$0xf] }
 0x683   :  { %8792 = vmatpush.bf16.msra.mxu1 %v16621_v1  ;;  %v17464_v1 = vld [vmem:[#allocation9_spill] sm:$0xff] }
 0x685   :  { %8043 = vmatpush.bf16.msra.mxu2 %v17459_v48  ;;  %v16657_v48 = vor.u32 %v12936_v17, %v12069_v50  ;;  %v17465_v17 = vld [vmem:[#allocation16_spill] sm:$0xff]  ;;  %v16671_v50 = vor.u32 %v12932_v9, %v12053_v47  ;;  %v7143_v9 = vld [vmem:[%s16939_s7] sm:$0xff] }
 0x686   :  { %8793 = vmatmul.bf16.vlgmr.msra.gmra.mxu1 %v17456_v23  ;;  %v16651_v23 = vor.u32 %v12941_v59, %v12083_v29  ;;  %v12971_v29 = vld [vmem:[#allocation2 + $0x30] sm:$0xf] }
 0x687   :  { %8875 = vmatpush.bf16.msrb.mxu1 %v16623_v46  ;;  %v16662_v59 = vor.u32 %v12971_v29, %v12213_v26  ;;  %v17466_v26 = vld [vmem:[#allocation20_spill] sm:$0xff] }
 0x689   :  { %8044 = vmatpush.bf16.msra.mxu2 %v17460_v5  ;;  %v12934_v5 = vld [vmem:[#allocation5 + $0x164] sm:$0xf] }
 0x68b   :  { %8876 = vmatpush.bf16.msrb.mxu1 %v16628_v24 }
 0x68d   :  { %8045 = vmatpush.bf16.msra.mxu2 %v17461_v18  ;;  %v12061_v18 = vld [vmem:[#allocation5 + $0x168] sm:$0xf0] }
 0x68f   :  { %8877 = vmatpush.bf16.msrb.mxu1 %v16635_v38 }
 0x691   :  { %8046 = vmatpush.bf16.msra.mxu2 %v17462_v36  ;;  %v16664_v36 = vor.u32 %v12934_v5, %v12061_v18  ;;  %v12037_v18 = vld [vmem:[#allocation5 + $0x138] sm:$0xf0] }
 0x693   :  { %8878 = vmatpush.bf16.msrb.mxu1 %v16639_v58 }
 0x695   :  { %8047 = vmatpush.bf16.msra.mxu2 %v17463_v2  ;;  %v12930_v2 = vld [vmem:[#allocation5 + $0x144] sm:$0xf] }
 0x696   :  { %v16675_v5 = vor.u32 %v12930_v2, %v12045_v15 }
 0x697   :  { %8879 = vmatpush.bf16.msrb.mxu1 %v16643_v0 }
 0x699   :  { %8048 = vmatpush.bf16.msra.mxu2 %v17464_v1  ;;  %v12928_v1 = vld [vmem:[#allocation5 + $0x134] sm:$0xf] }
 0x69a   :  { %v16679_v29 = vor.u32 %v12928_v1, %v12037_v18  ;;  %v12922_v1 = vld [vmem:[#allocation5 + $0x104] sm:$0xf]  ;;  %v12013_v18 = vld [vmem:[#allocation5 + $0x108] sm:$0xf0] }
 0x69b   :  { %8880 = vmatpush.bf16.msrb.mxu1 %v16647_v27 }
 0x69c   :  { %8049 = vmatmul.bf16.vlgmr.msra.gmra.mxu2 %v16428_v6  ;;  %v12926_v6 = vld [vmem:[#allocation5 + $0x124] sm:$0xf] }
 0x69d   :  { %8687 = vmatpush.bf16.msrb.mxu2 %v17465_v17  ;;  %v12029_v17 = vld [vmem:[#allocation5 + $0x128] sm:$0xf0] }
 0x69e   :  { %v16686_v15 = vor.u32 %v12926_v6, %v12029_v17  ;;  %v7144_v6 = vld [vmem:[%s16939_s7 + $0x8] sm:$0xff] }
 0x69f   :  { %8881 = vmatpush.bf16.msrb.mxu1 %v16651_v23  ;;  %v7220_v47 = vpop.f32.mrf.mxu2 }
 0x6a0   :  { %v7225_v2 = vadd.f32 %v7220_v47, %v7143_v9  ;;  %v11871_v47 = vld [vmem:[#allocation2 + $0x28] sm:$0xf] }
 0x6a1   :  { %8688 = vmatpush.bf16.msrb.mxu2 %v17466_v26  ;;  %v12924_v26 = vld [vmem:[#allocation5 + $0x114] sm:$0xf] }
 0x6a2   :  { %7227 = vst.msk [vmem:[%s16939_s7] sm:$0xff] %vm4470_vm2, %v7225_v2 }
 0x6a3   :  { %8882 = vmatpush.bf16.msrb.mxu1 %v16655_v57 }
 0x6a5   :  { %8689 = vmatpush.bf16.msrb.mxu2 %v16432_v40  ;;  %v12021_v40 = vld [vmem:[#allocation5 + $0x118] sm:$0xf0] }
 0x6a6   :  { %8883 = vmatmul.bf16.vlgmr.msrb.gmra.mxu1 %v16662_v59 }
 0x6a7   :  { %8931 = vmatpush.bf16.msra.mxu1 %v16657_v48  ;;  %v7222_v17 = vpop.f32.mrf.mxu2 }
 0x6a8   :  { %v7226_v9 = vadd.f32 %v7222_v17, %v7144_v6  ;;  %v12880_v17 = vld [vmem:[%s16937_s5 + $0xd8] sm:$0xff] }
 0x6a9   :  { %8690 = vmatpush.bf16.msrb.mxu2 %v16440_v63  ;;  %v16694_v63 = vor.u32 %v12924_v26, %v12021_v40 }
 0x6aa   :  { %7228 = vst.msk [vmem:[%s16939_s7 + $0x8] sm:$0xff] %vm4470_vm2, %v7226_v9 }
 0x6ab   :  { %8932 = vmatpush.bf16.msra.mxu1 %v16664_v36 }
 0x6ad   :  { %8691 = vmatpush.bf16.msrb.mxu2 %v16450_v19  ;;  %v16701_v19 = vor.u32 %v12922_v1, %v12013_v18  ;;  %v12881_v1 = vld [vmem:[%s16937_s5 + $0xe0] sm:$0xff]  ;;  %v17471_v18 = vld [vmem:[#allocation32_spill] sm:$0xff] }
 0x6af   :  { %8933 = vmatpush.bf16.msra.mxu1 %v16671_v50  ;;  %v7792_v26 = vpop.f32.mrf.mxu2 }
 0x6b1   :  { %8692 = vmatpush.bf16.msrb.mxu2 %v16461_v13  ;;  %v12888_v13 = vld [vmem:[#allocation2 + $0x5c] sm:$0xf0] }
 0x6b2   :  { %v16712_v2 = vor.u32 %v12888_v13, %v11871_v47  ;;  %v17472_v13 = vld [vmem:[#allocation11_spill] sm:$0xff] }
 0x6b3   :  { %8934 = vmatpush.bf16.msra.mxu1 %v16675_v5 }
 0x6b5   :  { %8693 = vmatpush.bf16.msrb.mxu2 %v16472_v22  ;;  %v16715_v22 = vadd.f32 %v7792_v26, %v16522_v20  ;;  %v12879_v26 = vld [vmem:[%s16937_s5 + $0xd0] sm:$0xff] }
 0x6b7   :  { %8935 = vmatpush.bf16.msra.mxu1 %v16679_v29 }
 0x6b9   :  { %8694 = vmatpush.bf16.msrb.mxu2 %v16478_v7  ;;  %v17467_v7 = vld [vmem:[#allocation25_spill] sm:$0xff] }
 0x6bb   :  { %8936 = vmatpush.bf16.msra.mxu1 %v16686_v15 }
 0x6bc   :  { %8695 = vmatmul.bf16.vlgmr.msrb.gmra.mxu2 %v16712_v2 }
 0x6bd   :  { %8743 = vmatpush.bf16.msra.mxu2 %v16480_v56  ;;  %v16726_v56 = vpop.f32.mrf.mxu3 }
 0x6bf   :  { %8937 = vmatpush.bf16.msra.mxu1 %v16694_v63 }
 0x6c1   :  { %8744 = vmatpush.bf16.msra.mxu2 %v16497_v28  ;;  %v17468_v28 = vld [vmem:[#allocation40_spill] sm:$0xff] }
 0x6c3   :  { %8938 = vmatpush.bf16.msra.mxu1 %v16701_v19 }
 0x6c5   :  { %8745 = vmatpush.bf16.msra.mxu2 %v16506_v10  ;;  %v16733_v10 = vpop.f32.mrf.mxu0  ;;  %v16739_v20 = vpop.f32.mrf.mxu3 }
 0x6c6   :  { %8939 = vmatmul.bf16.vlgmr.msra.gmra.mxu1 %v16494_v52  ;;  %v12884_v52 = vld [vmem:[%s16937_s5 + $0xf8] sm:$0xff] }
 0x6c7   :  { %8129 = vmatpush.bf16.msra.mxu3 %v12884_v52  ;;  %v17473_v52 = vld [vmem:[#allocation35_spill] sm:$0xff] }
 0x6c9   :  { %8746 = vmatpush.bf16.msra.mxu2 %v16513_v33  ;;  %v12883_v33 = vld [vmem:[%s16937_s5 + $0xf0] sm:$0xff] }
 0x6cb   :  { %8130 = vmatpush.bf16.msra.mxu3 %v12883_v33  ;;  %v12878_v33 = vld [vmem:[%s16937_s5 + $0xc8] sm:$0xff] }
 0x6cd   :  { %8747 = vmatpush.bf16.msra.mxu2 %v16520_v44  ;;  %v17469_v44 = vld [vmem:[#allocation34_spill] sm:$0xff]  ;;  %v16749_v40 = vpop.f32.mrf.mxu0  ;;  %v16760_v9 = vpop.f32.mrf.mxu3 }
 0x6d1   :  { %8748 = vmatpush.bf16.msra.mxu2 %v16529_v53  ;;  %v16741_v53 = vpop.f32.mrf.mxu1 }
 0x6d5   :  { %8749 = vmatpush.bf16.msra.mxu2 %v16537_v16  ;;  %v12882_v16 = vld [vmem:[%s16937_s5 + $0xe8] sm:$0xff] }
 0x6d6   :  { %8131 = vmatpush.bf16.msra.mxu3 %v12882_v16 }
 0x6d9   :  { %8750 = vmatpush.bf16.msra.mxu2 %v16544_v45  ;;  %v16746_v45 = vpop.f32.mrf.mxu2  ;;  %v16755_v6 = vpop.f32.mrf.mxu1 }
 0x6da   :  { %8132 = vmatpush.bf16.msra.mxu3 %v12881_v1  ;;  %v12203_v1 = vld [vmem:[#allocation2 + $0x24] sm:$0xf] }
 0x6dc   :  { %8751 = vmatmul.bf16.vlgmr.msra.gmra.mxu2 %v16557_v11  ;;  %v17470_v11 = vld [vmem:[#allocation23_spill] sm:$0xff] }
 0x6dd   :  { %8833 = vmatpush.bf16.msrb.mxu2 %v17467_v7  ;;  %v7822_v7 = vpop.f32.mrf.mxu0 }
 0x6de   :  { %8133 = vmatpush.bf16.msra.mxu3 %v12880_v17 }
 0x6e1   :  { %8834 = vmatpush.bf16.msrb.mxu2 %v17468_v28  ;;  %v16763_v47 = vpop.f32.mrf.mxu2  ;;  %v12972_v28 = vld [vmem:[#allocation2 + $0x58] sm:$0xf0]  ;;  %v7836_v16 = vpop.f32.mrf.mxu1 }
 0x6e2   :  { %8134 = vmatpush.bf16.msra.mxu3 %v12879_v26  ;;  %v16776_v17 = vor.u32 %v12972_v28, %v12203_v1 }
 0x6e4   :  { %17476 = vst [vmem:[#allocation72_spill] sm:$0xff] %v16776_v17 }
 0x6e5   :  { %8835 = vmatpush.bf16.msrb.mxu2 %v17469_v44  ;;  %v16772_v44 = vpop.f32.mrf.mxu3  ;;  %v16781_v26 = vpop.f32.mrf.mxu0 }
 0x6e6   :  { %8135 = vmatpush.bf16.msra.mxu3 %v12878_v33 }
 0x6e9   :  { %8836 = vmatpush.bf16.msrb.mxu2 %v17470_v11  ;;  %v17474_v11 = vld [vmem:[#allocation37_spill] sm:$0xff] }
 0x6ed   :  { %8837 = vmatpush.bf16.msrb.mxu2 %v17471_v18  ;;  %v17475_v18 = vld [vmem:[#allocation15_spill] sm:$0xff]  ;;  %v7864_v33 = vpop.f32.mrf.mxu3  ;;  %v16788_v1 = vpop.f32.mrf.mxu0 }
 0x6f1   :  { %8838 = vmatpush.bf16.msrb.mxu2 %v17472_v13  ;;  %v12877_v13 = vld [vmem:[%s16937_s5 + $0xc0] sm:$0xff] }
 0x6f2   :  { %8136 = vmatpush.bf16.msra.mxu3 %v12877_v13  ;;  %v17480_v13 = vld [vmem:[#allocation21_spill] sm:$0xff] }
 0x6f5   :  { %8839 = vmatpush.bf16.msrb.mxu2 %v17473_v52  ;;  %v7850_v52 = vpop.f32.mrf.mxu2  ;;  %v7952_v31 = vpop.f32.mrf.mxu3 }
 0x6f6   :  { %8701 = vmatpush.bf16.msrb.mxu3 %v16623_v46 }
 0x6f9   :  { %8840 = vmatpush.bf16.msrb.mxu2 %v17474_v11  ;;  %v7924_v11 = vpop.f32.mrf.mxu1 }
 0x6fa   :  { %8702 = vmatpush.bf16.msrb.mxu3 %v16628_v24  ;;  %v17482_v24 = vld [vmem:[#allocation27_spill] sm:$0xff] }
 0x6fc   :  { %8841 = vmatmul.bf16.vlgmr.msrb.gmra.mxu2 %v16776_v17  ;;  %v12974_v17 = vld [vmem:[#allocation2 + $0x68] sm:$0xf0] }
 0x6fd   :  { %8889 = vmatpush.bf16.msra.mxu2 %v17475_v18  ;;  %v7938_v28 = vpop.f32.mrf.mxu2  ;;  %v17479_v18 = vld [vmem:[#allocation46_spill] sm:$0xff] }
 0x6fe   :  { %8703 = vmatpush.bf16.msrb.mxu3 %v16635_v38  ;;  %v7939_v25 = vadd.f32 %v7938_v28, %v7924_v11  ;;  %v7767_v11 = vadd.f32 %v16733_v10, %v16726_v56 }
 0x701   :  { %8890 = vmatpush.bf16.msra.mxu2 %v17477_v55  ;;  %v7926_v51 = vpop.f32.mrf.mxu1  ;;  %v7966_v55 = vpop.f32.mrf.mxu0 }
 0x702   :  { %8704 = vmatpush.bf16.msrb.mxu3 %v16639_v58  ;;  %v17484_v58 = vld [vmem:[#allocation33_spill] sm:$0xff] }
 0x705   :  { %8891 = vmatpush.bf16.msra.mxu2 %v17478_v8  ;;  %v7940_v46 = vpop.f32.mrf.mxu2 }
 0x706   :  { %8705 = vmatpush.bf16.msrb.mxu3 %v16643_v0  ;;  %v17486_v0 = vld [vmem:[#allocation41_spill] sm:$0xff]  ;;  %v7941_v60 = vadd.f32 %v7940_v46, %v7926_v51  ;;  %v17491_v46 = vld [vmem:[#allocation38_spill] sm:$0xff] }
 0x709   :  { %8892 = vmatpush.bf16.msra.mxu2 %v17479_v18  ;;  %v7980_v8 = vpop.f32.mrf.mxu1  ;;  %v7954_v18 = vpop.f32.mrf.mxu3 }
 0x70a   :  { %8706 = vmatpush.bf16.msrb.mxu3 %v16647_v27 }
 0x70d   :  { %8893 = vmatpush.bf16.msra.mxu2 %v17480_v13  ;;  %v7994_v38 = vpop.f32.mrf.mxu2  ;;  %v16801_v13 = vor.u32 %v12974_v17, %v12219_v12  ;;  %v17488_v12 = vld [vmem:[#allocation49_spill] sm:$0xff]  ;;  %v7837_v17 = vadd.f32 %v7836_v16, %v7822_v7 }
 0x70e   :  { %8707 = vmatpush.bf16.msrb.mxu3 %v16651_v23  ;;  %v7835_v23 = vadd.f32 %v16755_v6, %v16749_v40 }
 0x70f   :  { %17485 = vst [vmem:[#allocation44_spill] sm:$0xff] %v16801_v13  ;;  %v7851_v34 = vadd.f32 %v7850_v52, %v7837_v17 }
 0x711   :  { %8894 = vmatpush.bf16.msra.mxu2 %v17481_v3  ;;  %v7968_v3 = vpop.f32.mrf.mxu0  ;;  %v8008_v27 = vpop.f32.mrf.mxu3 }
 0x712   :  { %8708 = vmatpush.bf16.msrb.mxu3 %v16655_v57  ;;  %v8009_v62 = vadd.f32 %v8008_v27, %v7994_v38  ;;  %v7953_v57 = vadd.f32 %v7952_v31, %v7939_v25  ;;  %v7955_v38 = vadd.f32 %v7954_v18, %v7941_v60  ;;  %v7865_v25 = vadd.f32 %v7864_v33, %v7851_v34 }
 0x714   :  { %v7967_v6 = vadd.f32 %v7966_v55, %v7953_v57  ;;  %v7969_v52 = vadd.f32 %v7968_v3, %v7955_v38  ;;  %v7879_v60 = vadd.f32 %v16788_v1, %v7865_v25 }
 0x715   :  { %8895 = vmatpush.bf16.msra.mxu2 %v17482_v24  ;;  %v7982_v24 = vpop.f32.mrf.mxu1 }
 0x716   :  { %v7981_v56 = vadd.f32 %v7980_v8, %v7967_v6  ;;  %v7983_v18 = vadd.f32 %v7982_v24, %v7969_v52  ;;  %v17492_v8 = vld [vmem:[#allocation17_spill] sm:$0xff]  ;;  %v17512_v17 = vld [vmem:[#allocation44_spill] sm:$0xff]  ;;  %v12982_v52 = vld [vmem:[%s16937_s5 + $0x138] sm:$0xff] }
 0x717   :  { %9047 = vmatpush.bf16.msrb.mxu0 %v12982_v52 }
 0x719   :  { %8896 = vmatpush.bf16.msra.mxu2 %v17483_v14  ;;  %v8022_v54 = vpop.f32.mrf.mxu0  ;;  %v7996_v14 = vpop.f32.mrf.mxu2 }
 0x71a   :  { %v8010_v49 = vpop.f32.mrf.mxu3 }
 0x71b   :  { %v8011_v42 = vadd.f32 %v8010_v49, %v7996_v14 }
 0x71c   :  { %8897 = vmatmul.bf16.vlgmr.msra.gmra.mxu2 %v16801_v13  ;;  %v7849_v13 = vadd.f32 %v16763_v47, %v7835_v23  ;;  %v7781_v47 = vadd.f32 %v16741_v53, %v7767_v11 }
 0x71d   :  { %8945 = vmatpush.bf16.msrb.mxu2 %v17484_v58  ;;  %v8036_v58 = vpop.f32.mrf.mxu1 }
 0x71e   :  { %v7863_v40 = vadd.f32 %v16772_v44, %v7849_v13  ;;  %v7795_v49 = vadd.f32 %v16746_v45, %v7781_v47  ;;  %v7807_v44 = vadd.f32 %v16739_v20, %v16715_v22 }
 0x720   :  { %v7877_v31 = vadd.f32 %v16781_v26, %v7863_v40  ;;  %v7809_v53 = vadd.f32 %v16760_v9, %v7795_v49 }
 0x721   :  { %8946 = vmatpush.bf16.msrb.mxu2 %v17486_v0  ;;  %v8023_v0 = vadd.f32 %v8022_v54, %v8009_v62  ;;  %v8050_v28 = vpop.f32.mrf.mxu2  ;;  %v8024_v16 = vpop.f32.mrf.mxu0  ;;  %v17490_v54 = vld [vmem:[#allocation13_spill] sm:$0xff] }
 0x722   :  { %v8025_v51 = vadd.f32 %v8024_v16, %v8011_v42  ;;  %v7881_v33 = vmax.f32 %v7807_v44, %v7877_v31  ;;  %v7882_v26 = vmax.f32 %v7809_v53, %v7879_v60  ;;  %v12981_v44 = vld [vmem:[%s16937_s5 + $0x130] sm:$0xff] }
 0x723   :  { %v8037_v7 = vadd.f32 %v8036_v58, %v8023_v0  ;;  %v8061_v58 = vld [vmem:[%s16939_s7] sm:$0xff]  ;;  %9048 = vmatpush.bf16.msrb.mxu0 %v12981_v44 }
 0x725   :  { %8947 = vmatpush.bf16.msrb.mxu2 %v17487_v61  ;;  %v17489_v61 = vld [vmem:[#allocation14_spill] sm:$0xff]  ;;  %v8051_v62 = vadd.f32 %v8050_v28, %v8037_v7  ;;  %v8038_v10 = vpop.f32.mrf.mxu1 }
 0x726   :  { %v8039_v34 = vadd.f32 %v8038_v10, %v8025_v51 }
 0x727   :  { %v8055_v55 = vmax.f32 %v7981_v56, %v8051_v62 }
 0x729   :  { %8948 = vmatpush.bf16.msrb.mxu2 %v17488_v12  ;;  %v8052_v42 = vpop.f32.mrf.mxu2  ;;  %v8057_v13 = vmax.f32 %v7881_v33, %v8055_v55  ;;  %v8668_v24 = vpop.f32.mrf.mxu0 }
 0x72a   :  { %v8053_v45 = vadd.f32 %v8052_v42, %v8039_v34 }
 0x72b   :  { %v8059_v22 = vadd.f32 %v16488_v39, %v8057_v13 }
 0x72c   :  { %v8056_v3 = vmax.f32 %v7983_v18, %v8053_v45  ;;  %v12979_v18 = vld [vmem:[%s16937_s5 + $0x120] sm:$0xff] }
 0x72d   :  { %8949 = vmatpush.bf16.msrb.mxu2 %v17489_v61  ;;  %v8682_v9 = vpop.f32.mrf.mxu1  ;;  %v8062_v61 = vld [vmem:[%s16939_s7 + $0x8] sm:$0xff] }
 0x72e   :  { %v8058_v27 = vmax.f32 %v7882_v26, %v8056_v3  ;;  %v8683_v14 = vadd.f32 %v8682_v9, %v8668_v24  ;;  %v12978_v26 = vld [vmem:[%s16937_s5 + $0x118] sm:$0xff]  ;;  %v12975_v24 = vld [vmem:[%s16937_s5 + $0x100] sm:$0xff] }
 0x730   :  { %v8060_v20 = vadd.f32 %v16488_v39, %v8058_v27  ;;  %v17494_v39 = vld [vmem:[#allocation57_spill] sm:$0xff] }
 0x731   :  { %8950 = vmatpush.bf16.msrb.mxu2 %v17490_v54  ;;  %v8670_v38 = vpop.f32.mrf.mxu0  ;;  %v12977_v27 = vld [vmem:[%s16937_s5 + $0x110] sm:$0xff] }
 0x732   :  { %v8063_v1 = vpack.c.bf16 %v8060_v20, %v8059_v22  ;;  %v12976_v20 = vld [vmem:[%s16937_s5 + $0x108] sm:$0xff] }
 0x734   :  { %8137 = vmatmul.bf16.vlgmr.msra.gmra.mxu3 %v8063_v1 }
 0x735   :  { %8951 = vmatpush.bf16.msrb.mxu2 %v17491_v46  ;;  %8757 = vmatpush.bf16.msra.mxu3 %v16657_v48  ;;  %v17495_v48 = vld [vmem:[#allocation12_spill] sm:$0xff]  ;;  %v8684_v7 = vpop.f32.mrf.mxu1 }
 0x736   :  { %v12980_v46 = vld [vmem:[%s16937_s5 + $0x128] sm:$0xff] }
 0x737   :  { %9049 = vmatpush.bf16.msrb.mxu0 %v12980_v46 }
 0x739   :  { %8952 = vmatpush.bf16.msrb.mxu2 %v17492_v8  ;;  %8758 = vmatpush.bf16.msra.mxu3 %v16664_v36  ;;  %v17497_v36 = vld [vmem:[#allocation58_spill] sm:$0xff]  ;;  %v16881_v16 = vpop.f32.mrf.mxu0 }
 0x73b   :  { %9050 = vmatpush.bf16.msrb.mxu0 %v12979_v18 }
 0x73c   :  { %8953 = vmatmul.bf16.vlgmr.msrb.gmra.mxu2 %v16662_v59  ;;  %v17493_v59 = vld [vmem:[#allocation43_spill] sm:$0xff] }
 0x73d   :  { %8759 = vmatpush.bf16.msra.mxu3 %v16671_v50  ;;  %v17505_v50 = vld [vmem:[#allocation65_spill] sm:$0xff]  ;;  %v8738_v51 = vpop.f32.mrf.mxu1 }
 0x73f   :  { %v8696_v23 = vpop.f32.mrf.mxu2  ;;  %9051 = vmatpush.bf16.msrb.mxu0 %v12978_v26 }
 0x740   :  { %v8697_v12 = vadd.f32 %v8696_v23, %v8683_v14 }
 0x741   :  { %8760 = vmatpush.bf16.msra.mxu3 %v16675_v5  ;;  %v17506_v5 = vld [vmem:[#allocation66_spill] sm:$0xff]  ;;  %v16885_v54 = vpop.f32.mrf.mxu0 }
 0x743   :  { %9052 = vmatpush.bf16.msrb.mxu0 %v12977_v27 }
 0x744   :  { %8709 = vmatmul.bf16.vlgmr.msrb.gmra.mxu3 %v17493_v59 }
 0x745   :  { %8761 = vmatpush.bf16.msra.mxu3 %v16679_v29  ;;  %v17507_v29 = vld [vmem:[#allocation67_spill] sm:$0xff]  ;;  %v8740_v31 = vpop.f32.mrf.mxu1 }
 0x747   :  { %v8698_v47 = vpop.f32.mrf.mxu2  ;;  %9053 = vmatpush.bf16.msrb.mxu0 %v12976_v20 }
 0x749   :  { %8762 = vmatpush.bf16.msra.mxu3 %v16686_v15  ;;  %v17508_v15 = vld [vmem:[#allocation68_spill] sm:$0xff]  ;;  %v8780_v56 = vpop.f32.mrf.mxu0 }
 0x74b   :  { %9054 = vmatpush.bf16.msrb.mxu0 %v12975_v24 }
 0x74d   :  { %8763 = vmatpush.bf16.msra.mxu3 %v16694_v63  ;;  %v17509_v63 = vld [vmem:[#allocation69_spill] sm:$0xff]  ;;  %v8794_v60 = vpop.f32.mrf.mxu1 }
 0x751   :  { %8764 = vmatpush.bf16.msra.mxu3 %v16701_v19  ;;  %v17510_v19 = vld [vmem:[#allocation70_spill] sm:$0xff]  ;;  %v8782_v42 = vpop.f32.mrf.mxu0 }
 0x754   :  { %8765 = vmatmul.bf16.vlgmr.msra.gmra.mxu3 %v16712_v2  ;;  %v17511_v2 = vld [vmem:[#allocation71_spill] sm:$0xff] }
 0x755   :  { %8847 = vmatpush.bf16.msrb.mxu3 %v16483_v32  ;;  %v17496_v32 = vld [vmem:[#allocation39_spill] sm:$0xff]  ;;  %v8796_v33 = vpop.f32.mrf.mxu1 }
 0x759   :  { %8848 = vmatpush.bf16.msrb.mxu3 %v16501_v4  ;;  %v17498_v4 = vld [vmem:[#allocation59_spill] sm:$0xff]  ;;  %v8870_v45 = vpop.f32.mrf.mxu0 }
 0x75d   :  { %8849 = vmatpush.bf16.msrb.mxu3 %v16509_v35  ;;  %v17499_v35 = vld [vmem:[#allocation60_spill] sm:$0xff]  ;;  %v8884_v3 = vpop.f32.mrf.mxu1 }
 0x75f   :  { %v8752_v62 = vpop.f32.mrf.mxu2 }
 0x761   :  { %8850 = vmatpush.bf16.msrb.mxu3 %v16516_v30  ;;  %v17500_v30 = vld [vmem:[#allocation61_spill] sm:$0xff]  ;;  %v8872_v1 = vpop.f32.mrf.mxu0 }
 0x765   :  { %8851 = vmatpush.bf16.msrb.mxu3 %v16525_v41  ;;  %v17501_v41 = vld [vmem:[#allocation62_spill] sm:$0xff]  ;;  %v8886_v14 = vpop.f32.mrf.mxu1 }
 0x767   :  { %v8754_v10 = vpop.f32.mrf.mxu2 }
 0x769   :  { %8852 = vmatpush.bf16.msrb.mxu3 %v16532_v37  ;;  %v17502_v37 = vld [vmem:[#allocation63_spill] sm:$0xff]  ;;  %v8926_v23 = vpop.f32.mrf.mxu0 }
 0x76d   :  { %8853 = vmatpush.bf16.msrb.mxu3 %v16540_v21  ;;  %v17503_v21 = vld [vmem:[#allocation64_spill] sm:$0xff]  ;;  %v8940_v59 = vpop.f32.mrf.mxu1 }
 0x771   :  { %8854 = vmatpush.bf16.msrb.mxu3 %v16547_v43  ;;  %v17504_v43 = vld [vmem:[#allocation72_spill] sm:$0xff] }
 0x774   :  { %8855 = vmatmul.bf16.vlgmr.msrb.gmra.mxu3 %v17495_v48 }
 0x775   :  { %8903 = vmatpush.bf16.msra.mxu3 %v17494_v39 }
 0x779   :  { %8904 = vmatpush.bf16.msra.mxu3 %v17496_v32 }
 0x77d   :  { %8905 = vmatpush.bf16.msra.mxu3 %v17497_v36  ;;  %v8753_v36 = vadd.f32 %v8752_v62, %v8738_v51 }
 0x77f   :  { %v8842_v34 = vpop.f32.mrf.mxu2 }
 0x781   :  { %8906 = vmatpush.bf16.msra.mxu3 %v17498_v4  ;;  %v8755_v4 = vadd.f32 %v8754_v10, %v8740_v31 }
 0x785   :  { %8907 = vmatpush.bf16.msra.mxu3 %v17499_v35 }
 0x787   :  { %v8844_v13 = vpop.f32.mrf.mxu2 }
 0x789   :  { %8908 = vmatpush.bf16.msra.mxu3 %v17500_v30 }
 0x78d   :  { %8909 = vmatpush.bf16.msra.mxu3 %v17501_v41 }
 0x791   :  { %8910 = vmatpush.bf16.msra.mxu3 %v17502_v37 }
 0x794   :  { %8911 = vmatmul.bf16.vlgmr.msra.gmra.mxu3 %v17504_v43  ;;  %v8928_v43 = vpop.f32.mrf.mxu0 }
 0x795   :  { %8959 = vmatpush.bf16.msrb.mxu3 %v17503_v21 }
 0x799   :  { %8960 = vmatpush.bf16.msrb.mxu3 %v17505_v50 }
 0x79d   :  { %8961 = vmatpush.bf16.msrb.mxu3 %v17506_v5 }
 0x79f   :  { %v8898_v22 = vpop.f32.mrf.mxu2 }
 0x7a1   :  { %8962 = vmatpush.bf16.msrb.mxu3 %v17507_v29  ;;  %v8685_v29 = vadd.f32 %v8684_v7, %v8670_v38 }
 0x7a5   :  { %8963 = vmatpush.bf16.msrb.mxu3 %v17508_v15 }
 0x7a9   :  { %8964 = vmatpush.bf16.msrb.mxu3 %v17509_v63 }
 0x7ad   :  { %8965 = vmatpush.bf16.msrb.mxu3 %v17510_v19 }
 0x7b1   :  { %8966 = vmatpush.bf16.msrb.mxu3 %v17511_v2 }
 0x7b4   :  { %8967 = vmatmul.bf16.vlgmr.msrb.gmra.mxu3 %v17512_v17 }
 0x7b7   :  { %v8138_v57 = vpop.f32.mrf.mxu3 }
 0x7b8   :  { %v8143_v0 = vadd.f32 %v8138_v57, %v8061_v58  ;;  %v8942_v58 = vpop.f32.mrf.mxu1  ;;  %v8699_v57 = vadd.f32 %v8698_v47, %v8685_v29 }
 0x7ba   :  { %8145 = vst.msk [vmem:[%s16939_s7] sm:$0xff] %vm4470_vm2, %v8143_v0 }
 0x7bf   :  { %v8140_v11 = vpop.f32.mrf.mxu3 }
 0x7c0   :  { %v8144_v28 = vadd.f32 %v8140_v11, %v8062_v61 }
 0x7c2   :  { %8146 = vst.msk [vmem:[%s16939_s7 + $0x8] sm:$0xff] %vm4470_vm2, %v8144_v28 }
 0x7c7   :  { %v8710_v40 = vpop.f32.mrf.mxu3 }
 0x7c8   :  { %v16879_v6 = vadd.f32 %v8710_v40, %v8697_v12  ;;  %v8900_v12 = vpop.f32.mrf.mxu2 }
 0x7ca   :  { %v8725_v31 = vadd.f32 %v16881_v16, %v16879_v6  ;;  %v8979_v16 = vld [vmem:[%s16939_s7] sm:$0xff] }
 0x7cf   :  { %v16883_v25 = vpop.f32.mrf.mxu3 }
 0x7d0   :  { %v8954_v35 = vpop.f32.mrf.mxu2  ;;  %v8713_v28 = vadd.f32 %v16883_v25, %v8699_v57 }
 0x7d2   :  { %v8727_v10 = vadd.f32 %v16885_v54, %v8713_v28 }
 0x7d7   :  { %v8766_v49 = vpop.f32.mrf.mxu3 }
 0x7d8   :  { %v8767_v30 = vadd.f32 %v8766_v49, %v8753_v36  ;;  %v8956_v49 = vpop.f32.mrf.mxu2 }
 0x7da   :  { %v8781_v63 = vadd.f32 %v8780_v56, %v8767_v30 }
 0x7dc   :  { %v8795_v40 = vadd.f32 %v8794_v60, %v8781_v63  ;;  %v12995_v60 = vld [vmem:[%s16936_s4] ss:$0 sm:$0xff] }
 0x7de   :  { %v8799_v44 = vmax.f32 %v8725_v31, %v8795_v40 }
 0x7df   :  { %v8768_v55 = vpop.f32.mrf.mxu3 }
 0x7e0   :  { %v8769_v50 = vadd.f32 %v8768_v55, %v8755_v4 }
 0x7e2   :  { %v8783_v0 = vadd.f32 %v8782_v42, %v8769_v50 }
 0x7e4   :  { %v8797_v38 = vadd.f32 %v8796_v33, %v8783_v0 }
 0x7f7   :  { %v8856_v53 = vpop.f32.mrf.mxu3 }
 0x7f8   :  { %v8857_v48 = vadd.f32 %v8856_v53, %v8842_v34  ;;  %v8800_v34 = vmax.f32 %v8727_v10, %v8797_v38 }
 0x7fa   :  { %v8871_v41 = vadd.f32 %v8870_v45, %v8857_v48  ;;  %v8980_v45 = vld [vmem:[%s16939_s7 + $0x8] sm:$0xff] }
 0x7fc   :  { %v8885_v19 = vadd.f32 %v8884_v3, %v8871_v41 }
 0x7fe   :  { %v8899_v62 = vadd.f32 %v8898_v22, %v8885_v19 }
 0x7ff   :  { %v8858_v8 = vpop.f32.mrf.mxu3 }
 0x800   :  { %v8859_v37 = vadd.f32 %v8858_v8, %v8844_v13 }
 0x802   :  { %v8873_v2 = vadd.f32 %v8872_v1, %v8859_v37 }
 0x804   :  { %v8887_v51 = vadd.f32 %v8886_v14, %v8873_v2 }
 0x806   :  { %v8901_v47 = vadd.f32 %v8900_v12, %v8887_v51 }
 0x817   :  { %v8912_v9 = vpop.f32.mrf.mxu3 }
 0x818   :  { %v8927_v32 = vadd.f32 %v8926_v23, %v8912_v9 }
 0x81a   :  { %v8941_v21 = vadd.f32 %v8940_v59, %v8927_v32 }
 0x81c   :  { %v8955_v17 = vadd.f32 %v8954_v35, %v8941_v21 }
 0x81f   :  { %v8914_v39 = vpop.f32.mrf.mxu3 }
 0x820   :  { %v8929_v5 = vadd.f32 %v8928_v43, %v8914_v39 }
 0x822   :  { %v8943_v61 = vadd.f32 %v8942_v58, %v8929_v5 }
 0x824   :  { %v8957_v52 = vadd.f32 %v8956_v49, %v8943_v61 }
 0x837   :  { %v8968_v15 = vpop.f32.mrf.mxu3 }
 0x838   :  { %v8969_v11 = vadd.f32 %v8968_v15, %v8955_v17 }
 0x83a   :  { %v8973_v7 = vmax.f32 %v8899_v62, %v8969_v11 }
 0x83c   :  { %v8975_v46 = vmax.f32 %v8799_v44, %v8973_v7 }
 0x83e   :  { %v8977_v53 = vadd.f32 %v12995_v60, %v8975_v46 }
 0x83f   :  { %v8970_v56 = vpop.f32.mrf.mxu3 }
 0x840   :  { %v8971_v55 = vadd.f32 %v8970_v56, %v8957_v52 }
 0x842   :  { %v8974_v42 = vmax.f32 %v8901_v47, %v8971_v55 }
 0x844   :  { %v8976_v25 = vmax.f32 %v8800_v34, %v8974_v42 }
 0x846   :  { %v8978_v18 = vadd.f32 %v12995_v60, %v8976_v25 }
 0x848   :  { %v8981_v6 = vpack.c.bf16 %v8978_v18, %v8977_v53 }
 0x84a   :  { %9055 = vmatmul.bf16.vlgmr.msrb.gmra.mxu0 %v8981_v6 }
 0x8c7   :  { %v9056_v54 = vpop.f32.mrf.mxu0 }
 0x8c8   :  { %v9061_v33 = vadd.f32 %v9056_v54, %v8979_v16 }
 0x8ca   :  { %9063 = vst.msk [vmem:[%s16939_s7] sm:$0xff] %vm4470_vm2, %v9061_v33 }
 0x8cf   :  { %v9058_v13 = vpop.f32.mrf.mxu0 }
 0x8d0   :  { %v9062_v26 = vadd.f32 %v9058_v13, %v8980_v45 }
 0x8d2   :  { %9064 = vst.msk [vmem:[%s16939_s7 + $0x8] sm:$0xff] %vm4470_vm2, %v9062_v26 }
 0x8d3   :  { %9069 = vsyncpa [#allocation4], 1 }
 0x8d4   :  { %9070 = vsyncpa [#allocation6], 1 }

</bundles_post_ra>
